<compile_context>
chip_gen: v5e
topology: v5e:2x2
jax: 0.10.0
libtpu: 0.0.40
codegen_flags: <defaults>
</compile_context>

<pallas_src>
import math
from functools import partial

import jax
import jax.numpy as jnp
from jax.experimental import pallas as pl
from jax.experimental.pallas import tpu as pltpu


def _smearing_kernel(angle_ref, out_ref, *, nk, nl, pack):
    # angle_ref: (tile, pack)   out_ref: (tile, pack * (nk + nl))
    nb = nk + nl
    a = angle_ref[...].astype(jnp.float32)                        # (tile, pack)

    j = jax.lax.broadcasted_iota(jnp.int32, (1, pack * nb), 1)    # lane index
    col = jnp.where(j < nb, j, j - nb) if pack == 2 else j        # basis index
    freq = jnp.where(col < nk, col + 1, col - nk + 1).astype(jnp.float32)
    phase = jnp.where(col < nk, jnp.float32(0.0), jnp.float32(0.5 * math.pi))

    if pack == 2:
        # lane j < nb reads angle column 0, lane j >= nb reads column 1
        a_b = jnp.where(j < nb, a[:, 0:1], a[:, 1:2])             # (tile, 2*nb)
    else:
        a_b = a                                                   # (tile, 1)

    # sin(a*f) for the first nk basis lanes, cos(a*f) (= sin(a*f + pi/2)) for the rest.
    out_ref[...] = jnp.sin(a_b * freq + phase).astype(out_ref.dtype)


def asymmetric_sine_cosine_smearing(
    angle: jax.Array, num_basis: int = 50, *, tile_rows: int = 8192
) -> jax.Array:
    """Pallas TPU implementation of AsymmetricSineCosineSmearing.forward."""
    nk = num_basis // 2
    nl = num_basis - nk

    flat = angle.reshape(-1)                   # angle.view(-1): metadata-only
    n = flat.shape[0]
    if n == 0:
        return jnp.zeros((0, num_basis), dtype=angle.dtype)

    # Pack two angles per output row when that improves lane density and divides N.
    pack = 2 if (2 * num_basis <= 128 and n % 2 == 0) else 1
    rows = n // pack
    width = pack * num_basis
    a2d = flat.reshape(rows, pack)             # metadata-only (row-major preserving)

    # Sublane-aligned row tile; last block may be ragged (Pallas drops OOB writes).
    tile = min(tile_rows, ((rows + 7) // 8) * 8)
    grid = (pl.cdiv(rows, tile),)

    out = pl.pallas_call(
        partial(_smearing_kernel, nk=nk, nl=nl, pack=pack),
        out_shape=jax.ShapeDtypeStruct((rows, width), angle.dtype),
        grid_spec=pltpu.PrefetchScalarGridSpec(
            num_scalar_prefetch=0,
            grid=grid,
            in_specs=[pl.BlockSpec((tile, pack), lambda i: (i, 0))],
            out_specs=pl.BlockSpec((tile, width), lambda i: (i, 0)),
        ),
        compiler_params=pltpu.CompilerParams(
            dimension_semantics=("parallel",),
        ),
    )(a2d)

    # (rows, pack*num_basis) -> (n, num_basis): same row-major linear order,
    # so this is a copy-free reshape.
    return out.reshape(n, num_basis)


if __name__ == "__main__":
    key = jax.random.PRNGKey(0)
    # 512 angles in [0, pi], as produced upstream of the smearing layer.
    angle = jax.random.uniform(
        key, (512,), dtype=jnp.float32, minval=0.0, maxval=math.pi
    )

    num_basis = 50
    out = asymmetric_sine_cosine_smearing(angle, num_basis)
    out = jax.block_until_ready(out)

    # Pure-JAX reference mirroring the PyTorch forward.
    nk = num_basis // 2
    nl = num_basis - nk
    freq_k = jnp.arange(1, nk + 1, dtype=jnp.float32)
    freq_l = jnp.arange(1, nl + 1, dtype=jnp.float32)
    a = angle.reshape(-1, 1)
    ref = jnp.concatenate([jnp.sin(a * freq_k), jnp.cos(a * freq_l)], axis=-1)

    assert out.shape == (angle.size, num_basis), out.shape
    assert out.dtype == angle.dtype, out.dtype
    # Phases up to ~25*pi in f32; cos-via-phase differs from direct cos by <~1e-5.
    assert jnp.max(jnp.abs(out - ref)) < 1e-4

    print("KERNEL_OK")
</pallas_src>

<mosaic_0001>
module attributes {stable_mosaic.version = 11 : i64} {
  func.func @_smearing_kernel(%arg0: i32, %arg1: memref<256x2xf32, #tpu.memory_space<vmem>>, %arg2: memref<256x100xf32, #tpu.memory_space<vmem>>) attributes {dimension_semantics = [#tpu.dimension_semantics<parallel>], iteration_bounds = array<i64: 1>, scalar_prefetch = 0 : i64, scratch_operands = 0 : i64, tpu.core_type = #tpu.core_type<tc>, window_params = [{transform_indices = @transform_0, window_bounds = array<i64: 256, 2>}, {transform_indices = @transform_1, window_bounds = array<i64: 256, 100>}]} {
    %c0 = arith.constant 0 : index
    %c0_0 = arith.constant 0 : index
    %0 = vector.load %arg1[%c0, %c0_0] : memref<256x2xf32, #tpu.memory_space<vmem>>, vector<256x2xf32>
    %1 = tpu.iota {dimensions = array<i32: 1>} : vector<1x100xi32>
    %c50_i32 = arith.constant 50 : i32
    %2 = vector.broadcast %c50_i32 : i32 to vector<1x100xi32>
    %3 = arith.cmpi slt, %1, %2 : vector<1x100xi32>
    %c50_i32_1 = arith.constant 50 : i32
    %4 = vector.broadcast %c50_i32_1 : i32 to vector<1x100xi32>
    %5 = arith.subi %1, %4 : vector<1x100xi32>
    %6 = arith.select %3, %1, %5 : vector<1x100xi1>, vector<1x100xi32>
    %c25_i32 = arith.constant 25 : i32
    %7 = vector.broadcast %c25_i32 : i32 to vector<1x100xi32>
    %8 = arith.cmpi slt, %6, %7 : vector<1x100xi32>
    %c1_i32 = arith.constant 1 : i32
    %9 = vector.broadcast %c1_i32 : i32 to vector<1x100xi32>
    %10 = arith.addi %6, %9 : vector<1x100xi32>
    %c25_i32_2 = arith.constant 25 : i32
    %11 = vector.broadcast %c25_i32_2 : i32 to vector<1x100xi32>
    %12 = arith.subi %6, %11 : vector<1x100xi32>
    %c1_i32_3 = arith.constant 1 : i32
    %13 = vector.broadcast %c1_i32_3 : i32 to vector<1x100xi32>
    %14 = arith.addi %12, %13 : vector<1x100xi32>
    %15 = arith.select %8, %10, %14 : vector<1x100xi1>, vector<1x100xi32>
    %16 = arith.sitofp %15 : vector<1x100xi32> to vector<1x100xf32>
    %c25_i32_4 = arith.constant 25 : i32
    %17 = vector.broadcast %c25_i32_4 : i32 to vector<1x100xi32>
    %18 = arith.cmpi slt, %6, %17 : vector<1x100xi32>
    %cst = arith.constant 0.000000e+00 : f32
    %cst_5 = arith.constant 1.57079637 : f32
    %19 = vector.broadcast %cst : f32 to vector<1x100xf32>
    %20 = vector.broadcast %cst_5 : f32 to vector<1x100xf32>
    %21 = arith.select %18, %19, %20 : vector<1x100xi1>, vector<1x100xf32>
    %c50_i32_6 = arith.constant 50 : i32
    %22 = vector.broadcast %c50_i32_6 : i32 to vector<1x100xi32>
    %23 = arith.cmpi slt, %1, %22 : vector<1x100xi32>
    %24 = vector.extract_strided_slice %0 {offsets = [0, 0], sizes = [256, 1], strides = [1, 1]} : vector<256x2xf32> to vector<256x1xf32>
    %25 = vector.extract_strided_slice %0 {offsets = [0, 1], sizes = [256, 1], strides = [1, 1]} : vector<256x2xf32> to vector<256x1xf32>
    %26 = vector.shape_cast %23 : vector<1x100xi1> to vector<1x100xi1>
    %27 = vector.broadcast %26 : vector<1x100xi1> to vector<256x100xi1>
    %28 = vector.shape_cast %24 : vector<256x1xf32> to vector<256x1xf32>
    %29 = vector.broadcast %28 : vector<256x1xf32> to vector<256x100xf32>
    %30 = vector.shape_cast %25 : vector<256x1xf32> to vector<256x1xf32>
    %31 = vector.broadcast %30 : vector<256x1xf32> to vector<256x100xf32>
    %32 = arith.select %27, %29, %31 : vector<256x100xi1>, vector<256x100xf32>
    %33 = vector.broadcast %16 : vector<1x100xf32> to vector<256x100xf32>
    %34 = arith.mulf %32, %33 : vector<256x100xf32>
    %35 = vector.broadcast %21 : vector<1x100xf32> to vector<256x100xf32>
    %36 = arith.addf %34, %35 : vector<256x100xf32>
    %37 = math.sin %36 : vector<256x100xf32>
    %c0_7 = arith.constant 0 : index
    %c0_8 = arith.constant 0 : index
    %38 = vector.load %arg2[%c0_7, %c0_8] : memref<256x100xf32, #tpu.memory_space<vmem>>, vector<256x100xf32>
    tpu.vector_store %arg2[%c0_7, %c0_8], %37 {strides = array<i32>} : memref<256x100xf32, #tpu.memory_space<vmem>>, vector<256x100xf32>,
    return
  }
  func.func @transform_0(%arg0: i32) -> (i32, i32) {
    %c0_i32 = arith.constant 0 : i32
    %c0_i32_0 = arith.constant 0 : i32
    return %arg0, %c0_i32 : i32, i32
  }
  func.func @transform_1(%arg0: i32) -> (i32, i32) {
    %c0_i32 = arith.constant 0 : i32
    %c0_i32_0 = arith.constant 0 : i32
    return %arg0, %c0_i32 : i32, i32
  }
}

</mosaic_0001>

<bundles_post_ra>
// kernel: tpu_custom_call.1
= control target key start
LH: loop header
LB: loop body
LE: loop exit
PB: predicated region body
PF: predicated region fallthrough
CT: control target
= control target key end

     0   :  { %v9471_v0 = vmov 0   ;;  %v5549_v33 = vmov 1   ;;  %v40_v41 = vlaneseq  ;;  %v5550_v56 = vmov 1.5707964   ;;  %s9456_s0 = inlined_call_operand.vmem [shape: f32[256,2], index: 0, kind: input, shape index: {}]   ;;  %s9457_s1 = inlined_call_operand.vmem [shape: f32[256,100], index: 1, kind: output, shape index: {}]  }
   0x1   :  { %5544 = vset.pattern.permute.xlu2 %v9471_v0  ;;  %5543 = vset.pattern.permute.xlu1 %v9471_v0  ;;  %v5572_v1 = vld [vmem:[%s9456_s0 + $0x20] sm:$0xff]  ;;  %v5577_v2 = vld [vmem:[%s9456_s0 + $0x10] sm:$0xff]  ;;  %v5591_v4 = vld [vmem:[%s9456_s0 + $0x28] sm:$0xff] }
   0x2   :  { %v5582_v3 = vld [vmem:[%s9456_s0] sm:$0xff]  ;;  %5542 = vset.pattern.permute.xlu0 %v9471_v0  ;;  %76 = vperm.xlu2 %5544, %v5572_v1   ;;  %v11_v5 = vld [vmem:[%s9456_s0 + $0x18] sm:$0xff]  ;;  %v5599_v6 = vld [vmem:[%s9456_s0 + $0x8] sm:$0xff]  ;;  %v5714_v43 = vand.u32 127, %v40_v41 }
   0x3   :  { %66 = vperm.xlu1 %5543, %v5577_v2   ;;  %56 = vperm.xlu0 %5542, %v5582_v3   ;;  %v5606_v7 = vld [vmem:[%s9456_s0 + $0x40] sm:$0xff]  ;;  %v5611_v8 = vld [vmem:[%s9456_s0 + $0x38] sm:$0xff]  ;;  %v14_v9 = vld [vmem:[%s9456_s0 + $0x30] sm:$0xff] }
   0x4   :  { %v5621_v10 = vld [vmem:[%s9456_s0 + $0x58] sm:$0xff]  ;;  %v18_v11 = vld [vmem:[%s9456_s0 + $0x50] sm:$0xff]  ;;  %v17_v12 = vld [vmem:[%s9456_s0 + $0x48] sm:$0xff]  ;;  %v5435_v44 = vadd.s32 4294967246, %v5714_v43  ;;  %vm42_vm0 = vcmp.lt.s32.totalorder %v5714_v43, 50 }
   0x5   :  { %v22_v13 = vld [vmem:[%s9456_s0 + $0x70] sm:$0xff]  ;;  %v21_v14 = vld [vmem:[%s9456_s0 + $0x68] sm:$0xff]  ;;  %v20_v15 = vld [vmem:[%s9456_s0 + $0x60] sm:$0xff] }
   0x6   :  { %v25_v16 = vld [vmem:[%s9456_s0 + $0x88] sm:$0xff]  ;;  %v24_v17 = vld [vmem:[%s9456_s0 + $0x80] sm:$0xff]  ;;  %v23_v18 = vld [vmem:[%s9456_s0 + $0x78] sm:$0xff]  ;;  %v44_v46 = vsel %vm42_vm0, %v5714_v43, %v5435_v44  ;;  %v9459_v44 = vmov 1326507024  }
   0x7   :  { %v28_v19 = vld [vmem:[%s9456_s0 + $0xa0] sm:$0xff]  ;;  %v27_v20 = vld [vmem:[%s9456_s0 + $0x98] sm:$0xff]  ;;  %v26_v21 = vld [vmem:[%s9456_s0 + $0x90] sm:$0xff]  ;;  %v5436_v47 = vadd.s32 4294967271, %v44_v46  ;;  %v46_v49 = vadd.s32 1, %v44_v46  ;;  %vm45_vm1 = vcmp.lt.s32.totalorder %v44_v46, 25 }
   0x8   :  { %v31_v22 = vld [vmem:[%s9456_s0 + $0xb8] sm:$0xff]  ;;  %v30_v23 = vld [vmem:[%s9456_s0 + $0xb0] sm:$0xff]  ;;  %v29_v24 = vld [vmem:[%s9456_s0 + $0xa8] sm:$0xff]  ;;  %v5729_v57 = vsel %vm45_vm1, 0.0, %v5550_v56 }
   0x9   :  { %v34_v25 = vld [vmem:[%s9456_s0 + $0xd0] sm:$0xff]  ;;  %v33_v26 = vld [vmem:[%s9456_s0 + $0xc8] sm:$0xff]  ;;  %v32_v27 = vld [vmem:[%s9456_s0 + $0xc0] sm:$0xff]  ;;  %v48_v50 = vadd.s32 1, %v5436_v47 }
   0xa   :  { %81 = vperm.xlu2 %5544, %v5591_v4   ;;  %v37_v28 = vld [vmem:[%s9456_s0 + $0xe8] sm:$0xff]  ;;  %v36_v29 = vld [vmem:[%s9456_s0 + $0xe0] sm:$0xff]  ;;  %v35_v30 = vld [vmem:[%s9456_s0 + $0xd8] sm:$0xff] }
   0xb   :  { %71 = vperm.xlu1 %5543, %v11_v5   ;;  %61 = vperm.xlu0 %5542, %v5599_v6   ;;  %v39_v31 = vld [vmem:[%s9456_s0 + $0xf8] sm:$0xff]  ;;  %v38_v32 = vld [vmem:[%s9456_s0 + $0xf0] sm:$0xff]  ;;  %v49_v51 = vsel %vm45_vm1, %v46_v49, %v48_v50 }
   0xc   :  { %v5727_v53 = vcvt.s32.f32 %v49_v51 }
  0x12   :  { %96 = vperm.xlu2 %5544, %v5606_v7  }
  0x13   :  { %91 = vperm.xlu1 %5543, %v5611_v8   ;;  %86 = vperm.xlu0 %5542, %v14_v9  }
  0x1a   :  { %111 = vperm.xlu2 %5544, %v5621_v10  }
  0x1b   :  { %106 = vperm.xlu1 %5543, %v18_v11   ;;  %101 = vperm.xlu0 %5542, %v17_v12  }
  0x22   :  { %126 = vperm.xlu2 %5544, %v22_v13  }
  0x23   :  { %121 = vperm.xlu1 %5543, %v21_v14   ;;  %116 = vperm.xlu0 %5542, %v20_v15  }
  0x2a   :  { %141 = vperm.xlu2 %5544, %v25_v16  }
  0x2b   :  { %136 = vperm.xlu1 %5543, %v24_v17   ;;  %131 = vperm.xlu0 %5542, %v23_v18  }
  0x32   :  { %156 = vperm.xlu2 %5544, %v28_v19  }
  0x33   :  { %151 = vperm.xlu1 %5543, %v27_v20   ;;  %146 = vperm.xlu0 %5542, %v26_v21  }
  0x3a   :  { %171 = vperm.xlu2 %5544, %v31_v22  }
  0x3b   :  { %166 = vperm.xlu1 %5543, %v30_v23   ;;  %161 = vperm.xlu0 %5542, %v29_v24  }
  0x42   :  { %186 = vperm.xlu2 %5544, %v34_v25  }
  0x43   :  { %181 = vperm.xlu1 %5543, %v33_v26   ;;  %176 = vperm.xlu0 %5542, %v32_v27  }
  0x4a   :  { %201 = vperm.xlu2 %5544, %v37_v28  }
  0x4b   :  { %196 = vperm.xlu1 %5543, %v36_v29   ;;  %191 = vperm.xlu0 %5542, %v35_v30  }
  0x52   :  { %5545 = vset.pattern.permute.xlu2 %v5549_v33 }
  0x53   :  { %211 = vperm.xlu1 %5543, %v39_v31   ;;  %206 = vperm.xlu0 %5542, %v38_v32  }
  0x54   :  { %215 = vperm.xlu2 %5545, %v5582_v3  }
  0x5b   :  { %5547 = vset.pattern.permute.xlu1 %v5549_v33  ;;  %5546 = vset.pattern.permute.xlu0 %v5549_v33 }
  0x5c   :  { %223 = vperm.xlu1 %5547, %v5577_v2   ;;  %227 = vperm.xlu2 %5545, %v11_v5   ;;  %v5692_v34 = vpop.permute.xlu2 %76 }
  0x5d   :  { %219 = vperm.xlu0 %5546, %v5599_v6  }
  0x64   :  { %231 = vperm.xlu1 %5547, %v5572_v1   ;;  %235 = vperm.xlu2 %5545, %v5591_v4   ;;  %v5697_v35 = vpop.permute.xlu2 %81 }
  0x65   :  { %239 = vperm.xlu0 %5546, %v14_v9  }
  0x6c   :  { %243 = vperm.xlu1 %5547, %v5611_v8   ;;  %247 = vperm.xlu2 %5545, %v5606_v7   ;;  %v5701_v36 = vpop.permute.xlu2 %96 }
  0x6d   :  { %251 = vperm.xlu0 %5546, %v17_v12  }
  0x74   :  { %255 = vperm.xlu1 %5547, %v18_v11   ;;  %259 = vperm.xlu2 %5545, %v5621_v10   ;;  %v5704_v37 = vpop.permute.xlu2 %111 }
  0x75   :  { %263 = vperm.xlu0 %5546, %v20_v15   ;;  %v5725_v52 = vpop.permute.xlu1 %66  ;;  %v57_v54 = vpop.permute.xlu0 %56 }
  0x7c   :  { %267 = vperm.xlu1 %5547, %v21_v14   ;;  %271 = vperm.xlu2 %5545, %v22_v13   ;;  %v5706_v38 = vpop.permute.xlu2 %126 }
  0x7d   :  { %275 = vperm.xlu0 %5546, %v23_v18   ;;  %v72_v63 = vpop.permute.xlu1 %71 }
  0x84   :  { %279 = vperm.xlu1 %5547, %v24_v17   ;;  %283 = vperm.xlu2 %5545, %v25_v16   ;;  %v5708_v39 = vpop.permute.xlu2 %141 }
  0x85   :  { %287 = vperm.xlu0 %5546, %v26_v21  }
  0x8c   :  { %291 = vperm.xlu1 %5547, %v27_v20   ;;  %295 = vperm.xlu2 %5545, %v28_v19   ;;  %v5710_v40 = vpop.permute.xlu2 %156  ;;  %v9469_v20 = vmov 683565275  }
  0x8d   :  { %299 = vperm.xlu0 %5546, %v29_v24  }
  0x94   :  { %303 = vperm.xlu1 %5547, %v30_v23   ;;  %307 = vperm.xlu2 %5545, %v31_v22   ;;  %v5712_v42 = vpop.permute.xlu2 %171  ;;  %v9467_v22 = vmov 2475754826  }
  0x95   :  { %311 = vperm.xlu0 %5546, %v32_v27  }
  0x9c   :  { %315 = vperm.xlu1 %5547, %v33_v26   ;;  %319 = vperm.xlu2 %5545, %v34_v25   ;;  %v5718_v45 = vpop.permute.xlu2 %186  ;;  %v9463_v26 = vmov 2131351028  }
  0x9d   :  { %9475 = vst [vmem:[#allocation2_spill] sm:$0xff] %v5718_v45  ;;  %323 = vperm.xlu0 %5546, %v35_v30  }
  0xa4   :  { %327 = vperm.xlu1 %5547, %v36_v29   ;;  %331 = vperm.xlu2 %5545, %v37_v28   ;;  %v5723_v48 = vpop.permute.xlu2 %201  ;;  %v9465_v29 = vmov 2102212464  }
  0xa5   :  { %9476 = vst [vmem:[#allocation3_spill] sm:$0xff] %v5723_v48  ;;  %335 = vperm.xlu0 %5546, %v38_v32   ;;  %v9461_v32 = vmov 920167782  }
  0xac   :  { %339 = vperm.xlu1 %5547, %v39_v31  }
  0xae   :  { %v216_v55 = vpop.permute.xlu2 %215 }
  0xaf   :  { %v342_v58 = vsel %vm42_vm0, %v57_v54, %v216_v55 }
  0xb0   :  { %v374_v59 = vmul.f32 %v342_v58, %v5727_v53 }
  0xb2   :  { %v5735_v60 = vadd.f32 %v374_v59, %v5729_v57 }
  0xb4   :  { %v438_v61 = vand.u32 2147483647, %v5735_v60  ;;  %v441_v62 = vand.u32 2139095040, %v5735_v60 }
  0xb6   :  { %v442_v1 = vshrl.u32 %v441_v62, 23  ;;  %v445_v2 = vand.u32 8388607, %v438_v61  ;;  %v228_v3 = vpop.permute.xlu2 %227 }
  0xb7   :  { %v345_v4 = vsel %vm42_vm0, %v72_v63, %v228_v3  ;;  %v5772_v3 = vpop.permute.xlu1 %91 }
  0xb8   :  { %v5437_v5 = vadd.s32 4294967169, %v442_v1  ;;  %v446_v6 = vor.u32 8388608, %v445_v2  ;;  %v377_v7 = vmul.f32 %v345_v4, %v5727_v53 }
  0xba   :  { %v448_v8 = vadd.s32 1, %v5437_v5  ;;  %v5745_v9 = vadd.f32 %v377_v7, %v5729_v57  ;;  %v5747_v10 = vshll.u32 %v446_v6, 8 }
  0xbc   :  { %vm449_vm2 = vcmp.gt.s32.totalorder %v448_v8, 0  ;;  %v903_v12 = vand.u32 2147483647, %v5745_v9  ;;  %v906_v13 = vand.u32 2139095040, %v5745_v9  ;;  %v5752_v16 = vand.u32 65535, %v5747_v10 }
  0xbd   :  { %v450_v11 = vsel %vm449_vm2, %v448_v8, 0  ;;  %v5755_v17 = vshrl.u32 %v5747_v10, 16 }
  0xbe   :  { %v452_v14 = vand.u32 31, %v450_v11  ;;  %v907_v18 = vshrl.u32 %v906_v13, 23  ;;  %v451_v19 = vshrl.u32 %v450_v11, 5  ;;  %v5761_v24 = vand.u32 8388607, %v903_v12  ;;  %v236_v7 = vpop.permute.xlu2 %235 }
  0xc0   :  { %v453_v15 = vsub.s32 32, %v452_v14  ;;  %v455_v21 = vshll.u32 %v9469_v20, %v452_v14  ;;  %v458_v23 = vshll.u32 %v9467_v22, %v452_v14  ;;  %v461_v28 = vshll.u32 %v9463_v26, %v452_v14 }
  0xc1   :  { %v464_v31 = vshll.u32 %v9465_v29, %v452_v14  ;;  %v467_v41 = vshll.u32 %v9461_v32, %v452_v14  ;;  %v5446_v51 = vadd.s32 4294967169, %v907_v18  ;;  %vm470_vm3 = vcmp.lt.s32.totalorder %v451_v19, 1 }
  0xc2   :  { %v456_v25 = vshrl.u32 %v9467_v22, %v453_v15  ;;  %v459_v27 = vshrl.u32 %v9463_v26, %v453_v15  ;;  %v462_v30 = vshrl.u32 %v9465_v29, %v453_v15  ;;  %v465_v33 = vshrl.u32 %v9461_v32, %v453_v15 }
  0xc3   :  { %v468_v46 = vshrl.u32 %v9459_v44, %v453_v15  ;;  %vm473_vm4 = vcmp.lt.s32.totalorder %v451_v19, 4  ;;  %v454_v56 = vshrl.u32 %v9469_v20, %v453_v15  ;;  %vm472_vm5 = vcmp.lt.s32.totalorder %v451_v19, 3 }
  0xc4   :  { %v457_v47 = vor.u32 %v456_v25, %v455_v21  ;;  %v460_v49 = vor.u32 %v459_v27, %v458_v23  ;;  %v463_v50 = vor.u32 %v462_v30, %v461_v28  ;;  %v466_v54 = vor.u32 %v465_v33, %v464_v31 }
  0xc5   :  { %v469_v55 = vor.u32 %v468_v46, %v467_v41  ;;  %v913_v2 = vadd.s32 1, %v5446_v51  ;;  %vm471_vm6 = vcmp.lt.s32.totalorder %v451_v19, 2  ;;  %v911_v23 = vor.u32 8388608, %v5761_v24 }
  0xc6   :  { %v475_v58 = vsel %vm473_vm4, %v463_v50, 2102212464  ;;  %v478_v59 = vsel %vm470_vm3, %v457_v47, %v460_v49  ;;  %v482_v62 = vsel %vm470_vm3, %v460_v49, %v463_v50  ;;  %v479_v63 = vsel %vm473_vm4, %v466_v54, 920167782 }
  0xc7   :  { %v483_v1 = vsel %vm473_vm4, %v469_v55, 1326507024  ;;  %v474_v4 = vsel %vm470_vm3, %v454_v56, %v457_v47  ;;  %v480_v5 = vsel %vm472_vm5, %v463_v50, %v479_v63  ;;  %v476_v8 = vsel %vm472_vm5, %v460_v49, %v475_v58 }
  0xc8   :  { %v484_v6 = vsel %vm472_vm5, %v466_v54, %v483_v1  ;;  %v481_v11 = vsel %vm471_vm6, %v478_v59, %v480_v5  ;;  %vm914_vm7 = vcmp.gt.s32.totalorder %v913_v2, 0  ;;  %v347_v25 = vsel %vm42_vm0, %v5697_v35, %v236_v7 }
  0xc9   :  { %v485_v13 = vsel %vm471_vm6, %v482_v62, %v484_v6  ;;  %v511_v18 = vand.u32 65535, %v481_v11  ;;  %v512_v21 = vshrl.u32 %v481_v11, 16  ;;  %v5778_v27 = vsel %vm471_vm6, %v474_v4, %v476_v8 }
  0xca   :  { %v489_v14 = vand.u32 65535, %v485_v13  ;;  %v490_v15 = vshrl.u32 %v485_v13, 16  ;;  %v915_v30 = vsel %vm914_vm7, %v913_v2, 0  ;;  %v5789_v2 = vpop.permute.xlu1 %106  ;;  %vm440_vm6 = vcmp.lt.s32.totalorder %v5735_v60, 0 }
  0xcb   :  { %v514_v41 = vmul.u32 %v512_v21, %v5752_v16  ;;  %v515_v46 = vmul.u32 %v511_v18, %v5755_v17  ;;  %v513_v49 = vmul.u32 %v511_v18, %v5752_v16  ;;  %v516_v35 = vmul.u32 %v512_v21, %v5755_v17 }
  0xcc   :  { %v492_v19 = vmul.u32 %v490_v15, %v5752_v16  ;;  %v493_v28 = vmul.u32 %v489_v14, %v5755_v17  ;;  %v491_v31 = vmul.u32 %v489_v14, %v5752_v16  ;;  %v494_v33 = vmul.u32 %v490_v15, %v5755_v17 }
  0xcd   :  { %v517_v54 = vshll.u32 %v514_v41, 16  ;;  %v518_v55 = vshrl.u32 %v514_v41, 16  ;;  %v519_v58 = vshll.u32 %v515_v46, 16  ;;  %v917_v59 = vand.u32 31, %v915_v30 }
  0xce   :  { %v495_v24 = vshll.u32 %v492_v19, 16  ;;  %v496_v47 = vshrl.u32 %v492_v19, 16  ;;  %v497_v50 = vshll.u32 %v493_v28, 16  ;;  %v498_v51 = vshrl.u32 %v493_v28, 16 }
  0xcf   :  { %v520_v63 = vshrl.u32 %v515_v46, 16  ;;  %vm521_vm9 = vc.u32 %v513_v49, %v517_v54  ;;  %v523_v1 = vadd.s32 %v517_v54, %v513_v49  ;;  %v5792_v17 = vsub.s32 32, %v917_v59 }
  0xd0   :  { %vm499_vm8 = vc.u32 %v491_v31, %v495_v24  ;;  %v501_v56 = vadd.s32 %v495_v24, %v491_v31  ;;  %v522_v16 = vsel %vm521_vm9, 1, %v9471_v0  ;;  %v5795_v7 = vshrl.u32 %v915_v30, 5 }
  0xd1   :  { %v500_v62 = vsel %vm499_vm8, 1, %v9471_v0  ;;  %v524_v6 = vadd.s32 %v522_v16, %v516_v35  ;;  %vm525_vm11 = vc.u32 %v523_v1, %v519_v58  ;;  %v5798_v13 = vadd.s32 %v523_v1, %v519_v58 }
  0xd2   :  { %v502_v4 = vadd.s32 %v500_v62, %v494_v33  ;;  %vm503_vm10 = vc.u32 %v501_v56, %v497_v50  ;;  %v526_v11 = vsel %vm525_vm11, 1, %v9471_v0  ;;  %v920_v14 = vshll.u32 %v9469_v20, %v917_v59 }
  0xd3   :  { %v504_v5 = vsel %vm503_vm10, 1, %v9471_v0  ;;  %v528_v15 = vadd.s32 %v526_v11, %v524_v6  ;;  %v921_v18 = vshrl.u32 %v9467_v22, %v5792_v17  ;;  %v923_v21 = vshll.u32 %v9467_v22, %v917_v59 }
  0xd4   :  { %v506_v8 = vadd.s32 %v504_v5, %v502_v4  ;;  %v924_v19 = vshrl.u32 %v9463_v26, %v5792_v17  ;;  %v926_v30 = vshll.u32 %v9463_v26, %v917_v59  ;;  %v927_v31 = vshrl.u32 %v9465_v29, %v5792_v17 }
  0xd5   :  { %v929_v33 = vshll.u32 %v9465_v29, %v917_v59  ;;  %v529_v41 = vadd.s32 %v528_v15, %v518_v55  ;;  %v5810_v46 = vor.u32 %v921_v18, %v920_v14  ;;  %v930_v49 = vshrl.u32 %v9461_v32, %v5792_v17 }
  0xd6   :  { %v507_v28 = vadd.s32 %v506_v8, %v496_v47  ;;  %v5812_v24 = vor.u32 %v924_v19, %v923_v21  ;;  %v928_v50 = vor.u32 %v927_v31, %v926_v30  ;;  %v932_v47 = vshll.u32 %v9461_v32, %v917_v59 }
  0xd7   :  { %v933_v54 = vshrl.u32 %v9459_v44, %v5792_v17  ;;  %v530_v56 = vadd.s32 %v529_v41, %v520_v63  ;;  %v931_v58 = vor.u32 %v930_v49, %v929_v33  ;;  %v379_v62 = vmul.f32 %v347_v25, %v5727_v53  ;;  %v5834_v25 = vpop.permute.xlu1 %121 }
  0xd8   :  { %v5816_v35 = vadd.s32 %v507_v28, %v498_v51  ;;  %vm935_vm13 = vcmp.lt.s32.totalorder %v5795_v7, 1  ;;  %v5825_v1 = vshll.u32 %v911_v23, 8  ;;  %v531_v51 = vmul.u32 %v5747_v10, %v5778_v27 }
  0xd9   :  { %v934_v55 = vor.u32 %v933_v54, %v932_v47  ;;  %v534_v4 = vadd.s32 1, %v530_v56  ;;  %vm938_vm14 = vcmp.lt.s32.totalorder %v5795_v7, 4  ;;  %v943_v59 = vsel %vm935_vm13, %v5810_v46, %v5812_v24 }
  0xda   :  { %vm533_vm12 = vc.u32 %v5816_v35, %v5798_v13  ;;  %vm937_vm15 = vcmp.lt.s32.totalorder %v5795_v7, 3  ;;  %v944_v63 = vsel %vm938_vm14, %v931_v58, 920167782  ;;  %v947_v23 = vsel %vm935_vm13, %v5812_v24, %v928_v50 }
  0xdb   :  { %v948_v10 = vsel %vm938_vm14, %v934_v55, 1326507024  ;;  %v535_v27 = vsel %vm533_vm12, %v534_v4, %v530_v56  ;;  %vm936_vm1 = vcmp.lt.s32.totalorder %v5795_v7, 2  ;;  %v945_v16 = vsel %vm937_vm15, %v928_v50, %v944_v63 }
  0xdc   :  { %v949_v5 = vsel %vm937_vm15, %v931_v58, %v948_v10  ;;  %v536_v6 = vadd.s32 %v535_v27, %v531_v51  ;;  %v946_v8 = vsel %vm936_vm1, %v943_v59, %v945_v16  ;;  %v952_v14 = vand.u32 65535, %v5825_v1 }
  0xdd   :  { %v950_v11 = vsel %vm936_vm1, %v947_v23, %v949_v5  ;;  %v953_v15 = vshrl.u32 %v5825_v1, 16  ;;  %v977_v19 = vshrl.u32 %v946_v8, 16  ;;  %v976_v30 = vand.u32 65535, %v946_v8 }
  0xde   :  { %v954_v18 = vand.u32 65535, %v950_v11  ;;  %v955_v21 = vshrl.u32 %v950_v11, 16  ;;  %v537_v28 = vadd.s32 536870912, %v536_v6  ;;  %v5856_v56 = vadd.f32 %v379_v62, %v5729_v57 }
  0xdf   :  { %v979_v49 = vmul.u32 %v977_v19, %v952_v14  ;;  %v980_v51 = vmul.u32 %v976_v30, %v953_v15  ;;  %v978_v23 = vmul.u32 %v976_v30, %v952_v14  ;;  %v5858_v10 = vpop.permute.xlu1 %136  ;;  %v940_v16 = vsel %vm938_vm14, %v928_v50, 2102212464 }
  0xe0   :  { %v957_v31 = vmul.u32 %v955_v21, %v952_v14  ;;  %v958_v33 = vmul.u32 %v954_v18, %v953_v15  ;;  %v538_v41 = vshrl.u32 %v537_v28, 30  ;;  %v956_v47 = vmul.u32 %v954_v18, %v952_v14  ;;  %9477 = vst [vmem:[#allocation4_spill] sm:$0xff] %v5858_v10 }
  0xe1   :  { %v959_v55 = vmul.u32 %v955_v21, %v953_v15  ;;  %v982_v4 = vshll.u32 %v979_v49, 16  ;;  %v981_v62 = vmul.u32 %v977_v19, %v953_v15  ;;  %v984_v28 = vshll.u32 %v980_v51, 16 }
  0xe2   :  { %v960_v54 = vshll.u32 %v957_v31, 16  ;;  %v539_v58 = vshll.u32 %v538_v41, 30  ;;  %v962_v59 = vshll.u32 %v958_v33, 16  ;;  %v961_v5 = vshrl.u32 %v957_v31, 16 }
  0xe3   :  { %vm986_vm4 = vc.u32 %v978_v23, %v982_v4  ;;  %v988_v30 = vadd.s32 %v982_v4, %v978_v23  ;;  %v562_v50 = vsub.s32 4, %v538_v41  ;;  %v919_v31 = vshrl.u32 %v9469_v20, %v5792_v17 }
  0xe4   :  { %vm964_vm2 = vc.u32 %v956_v47, %v960_v54  ;;  %v966_v63 = vadd.s32 %v960_v54, %v956_v47  ;;  %v540_v27 = vsub.s32 %v536_v6, %v539_v58  ;;  %v987_v14 = vsel %vm986_vm4, 1, %v9471_v0 }
  0xe5   :  { %v965_v8 = vsel %vm964_vm2, 1, %v9471_v0  ;;  %v1216_v6 = vand.u32 2139095040, %v5856_v56  ;;  %v989_v58 = vadd.s32 %v987_v14, %v981_v62  ;;  %vm990_vm7 = vc.u32 %v988_v30, %v984_v28 }
  0xe6   :  { %v967_v11 = vadd.s32 %v965_v8, %v959_v55  ;;  %vm968_vm3 = vc.u32 %v966_v63, %v962_v59  ;;  %vm541_vm5 = vcmp.lt.s32.totalorder %v540_v27, 0  ;;  %v542_v18 = vsub.s32 0, %v540_v27 }
  0xe7   :  { %v969_v21 = vsel %vm968_vm3, 1, %v9471_v0  ;;  %v939_v55 = vsel %vm935_vm13, %v919_v31, %v5810_v46  ;;  %v941_v4 = vsel %vm937_vm15, %v5812_v24, %v940_v16  ;;  %v963_v59 = vshrl.u32 %v958_v33, 16  ;;  %v5887_v16 = vpop.permute.xlu1 %151  ;;  %v248_v31 = vpop.permute.xlu2 %247 }
  0xe8   :  { %v971_v47 = vadd.s32 %v969_v21, %v967_v11  ;;  %v543_v54 = vsel %vm541_vm5, %v542_v18, %v540_v27  ;;  %v991_v63 = vsel %vm990_vm7, 1, %v9471_v0  ;;  %v983_v8 = vshrl.u32 %v979_v49, 16  ;;  %9480 = vst [vmem:[#allocation5_spill] sm:$0xff] %v5887_v16 }
  0xe9   :  { %v544_v15 = vclz %v543_v54  ;;  %v993_v17 = vadd.s32 %v991_v63, %v989_v58  ;;  %v1217_v11 = vshrl.u32 %v1216_v6, 23  ;;  %vm5878_vm8 = vcmp.le.f32.partialorder %v438_v61, 0.7853982 }
  0xea   :  { %v972_v19 = vadd.s32 %v971_v47, %v961_v5  ;;  %v563_v46 = vsel %vm440_vm6, %v562_v50, %v538_v41  ;;  %v9458_v18 = vand.u32 2147483647, %v5856_v56  ;;  %v532_v24 = vadd.s32 %v5798_v13, %v5816_v35 }
  0xeb   :  { %v5438_v23 = vadd.s32 4294967294, %v544_v15  ;;  %v985_v33 = vshrl.u32 %v980_v51, 16  ;;  %v994_v49 = vadd.s32 %v993_v17, %v983_v8  ;;  %v942_v61 = vsel %vm936_vm1, %v939_v55, %v941_v4 }
  0xec   :  { %v973_v62 = vadd.s32 %v972_v19, %v963_v59  ;;  %v992_v47 = vadd.s32 %v988_v30, %v984_v28  ;;  %v5452_v14 = vadd.s32 4294967169, %v1217_v11  ;;  %v565_v41 = vsel %vm5878_vm8, 0, %v563_v46 }
  0xed   :  { %vm5439_vm9 = vcmp.lt.s32.totalorder %v5438_v23, 0  ;;  %v995_v50 = vadd.s32 %v994_v49, %v985_v33  ;;  %v1220_v13 = vand.u32 8388607, %v9458_v18  ;;  %v582_v7 = vadd.s32 3, %v565_v41 }
  0xee   :  { %v547_v21 = vsel %vm5439_vm9, 0, %v5438_v23  ;;  %vm998_vm10 = vc.u32 %v973_v62, %v992_v47  ;;  %v1223_v35 = vadd.s32 1, %v5452_v14  ;;  %v996_v28 = vmul.u32 %v5825_v1, %v942_v61 }
  0xef   :  { %v548_v6 = vsub.s32 32, %v547_v21  ;;  %v552_v54 = vsub.s32 4294967266, %v547_v21  ;;  %v549_v51 = vshll.u32 %v540_v27, %v547_v21  ;;  %v999_v19 = vadd.s32 1, %v995_v50 }
  0xf0   :  { %vm1224_vm11 = vcmp.gt.s32.totalorder %v1223_v35, 0  ;;  %v350_v30 = vsel %vm42_vm0, %v5701_v36, %v248_v31  ;;  %v1221_v8 = vor.u32 8388608, %v1220_v13  ;;  %v5902_v49 = vand.u32 3, %v582_v7  ;;  %v5906_v36 = vpop.permute.xlu1 %166 }
  0xf1   :  { %v550_v58 = vshrl.u32 %v532_v24, %v548_v6  ;;  %v553_v15 = vadd.s32 127, %v552_v54  ;;  %v1000_v59 = vsel %vm998_vm10, %v999_v19, %v995_v50  ;;  %v1225_v63 = vsel %vm1224_vm11, %v1223_v35, 0  ;;  %9481 = vst [vmem:[#allocation6_spill] sm:$0xff] %v5906_v36 }
  0xf2   :  { %v1001_v23 = vadd.s32 %v1000_v59, %v996_v28  ;;  %v1227_v17 = vand.u32 31, %v1225_v63  ;;  %v382_v27 = vmul.f32 %v350_v30, %v5727_v53  ;;  %v5904_v21 = vadd.s32 %v992_v47, %v973_v62 }
  0xf3   :  { %v551_v55 = vor.u32 %v550_v58, %v549_v51  ;;  %v554_v4 = vshll.u32 %v553_v15, 23  ;;  %v5912_v54 = vshll.u32 %v1221_v8, 8  ;;  %v5924_v15 = vshrl.u32 %v1225_v63, 5 }
  0xf4   :  { %v1002_v46 = vadd.s32 536870912, %v1001_v23  ;;  %v5900_v24 = vsub.s32 32, %v1227_v17  ;;  %v1230_v50 = vshll.u32 %v9469_v20, %v1227_v17  ;;  %v5918_v62 = vadd.f32 %v382_v27, %v5729_v57 }
  0xf5   :  { %v555_v11 = vor.u32 4788187, %v554_v4  ;;  %v558_v1 = vcvt.s32.f32 %v551_v55  ;;  %v1233_v13 = vshll.u32 %v9467_v22, %v1227_v17  ;;  %v1239_v51 = vshll.u32 %v9465_v29, %v1227_v17 }
  0xf6   :  { %v1003_v61 = vshrl.u32 %v1002_v46, 30  ;;  %v1231_v14 = vshrl.u32 %v9467_v22, %v5900_v24  ;;  %v1234_v6 = vshrl.u32 %v9463_v26, %v5900_v24  ;;  %v1240_v31 = vshrl.u32 %v9461_v32, %v5900_v24 }
  0xf7   :  { %v556_v33 = vand.u32 2147483647, %v555_v11  ;;  %v1237_v35 = vshrl.u32 %v9465_v29, %v5900_v24  ;;  %v1236_v19 = vshll.u32 %v9463_v26, %v1227_v17  ;;  %v1243_v7 = vshrl.u32 %v9459_v44, %v5900_v24 }
  0xf8   :  { %v1004_v47 = vshll.u32 %v1003_v61, 30  ;;  %v5931_v30 = vor.u32 %v1231_v14, %v1230_v50  ;;  %v5933_v55 = vor.u32 %v1234_v6, %v1233_v13  ;;  %v1241_v4 = vor.u32 %v1240_v31, %v1239_v51 }
  0xf9   :  { %v559_v41 = vmul.f32 %v558_v1, %v556_v33  ;;  %vm905_vm12 = vcmp.lt.s32.totalorder %v5745_v9, 0  ;;  %v1242_v63 = vshll.u32 %v9461_v32, %v1227_v17  ;;  %v5940_v8 = vand.u32 65535, %v5912_v54 }
  0xfa   :  { %v5929_v28 = vsub.s32 %v1001_v23, %v1004_v47  ;;  %v5943_v11 = vshrl.u32 %v5912_v54, 16  ;;  %v1238_v46 = vor.u32 %v1237_v35, %v1236_v19  ;;  %vm1245_vm14 = vcmp.lt.s32.totalorder %v5924_v15, 1  ;;  %v5965_v47 = vpop.permute.xlu1 %181 }
  0xfb   :  { %v560_v58 = vxor.u32 2147483648, %v559_v41  ;;  %vm1248_vm15 = vcmp.lt.s32.totalorder %v5924_v15, 4  ;;  %v1681_v17 = vand.u32 2139095040, %v5918_v62  ;;  %v1244_v14 = vor.u32 %v1243_v7, %v1242_v63  ;;  %9482 = vst [vmem:[#allocation7_spill] sm:$0xff] %v5965_v47 }
  0xfc   :  { %vm1006_vm13 = vcmp.lt.s32.totalorder %v5929_v28, 0  ;;  %v1007_v27 = vsub.s32 0, %v5929_v28  ;;  %v1253_v5 = vsel %vm1245_vm14, %v5931_v30, %v5933_v55  ;;  %v1254_v6 = vsel %vm1248_vm15, %v1241_v4, 920167782 }
  0xfd   :  { %v561_v59 = vsel %vm440_vm6, %v560_v58, %v559_v41  ;;  %vm1247_vm1 = vcmp.lt.s32.totalorder %v5924_v15, 3  ;;  %v1027_v13 = vsub.s32 4, %v1003_v61  ;;  %vm1246_vm2 = vcmp.lt.s32.totalorder %v5924_v15, 2 }
  0xfe   :  { %v5948_v23 = vsel %vm5878_vm8, %v5735_v60, %v561_v59  ;;  %v1008_v1 = vsel %vm1006_vm13, %v1007_v27, %v5929_v28  ;;  %v1255_v35 = vsel %vm1247_vm1, %v1238_v46, %v1254_v6  ;;  %v1257_v63 = vsel %vm1245_vm14, %v5933_v55, %v1238_v46 }
  0xff   :  { %v566_v33 = vmul.f32 %v5948_v23, %v5948_v23  ;;  %v1009_v31 = vclz %v1008_v1  ;;  %v1256_v59 = vsel %vm1246_vm2, %v1253_v5, %v1255_v35  ;;  %v1258_v27 = vsel %vm1248_vm15, %v1244_v14, 1326507024 }
 0x100   :  { %v1287_v1 = vshrl.u32 %v1256_v59, 16  ;;  %v5978_v18 = vshrl.u32 %v1681_v17, 23  ;;  %v5984_v5 = vsel %vm905_vm12, %v1027_v13, %v1003_v61  ;;  %vm585_vm4 = vcmp.eq.s32.totalorder %v5902_v49, 0 }
 0x101   :  { %v567_v41 = vmul.f32 -0.001358992, %v566_v33  ;;  %v574_v50 = vmul.f32 -0.00019511016, %v566_v33  ;;  %v5447_v7 = vadd.s32 4294967294, %v1009_v31  ;;  %v5988_v31 = vshrl.u32 %v9469_v20, %v5900_v24 }
 0x102   :  { %vm588_vm5 = vcmp.eq.s32.totalorder %v5902_v49, 2  ;;  %v1250_v61 = vsel %vm1248_vm15, %v1238_v46, 2102212464  ;;  %vm5398_vm6 = vcmask 818176   ;;  %vm584_vm7 = vcmp.lt.s32.totalorder %v5902_v49, 2 }
 0x103   :  { %v568_v58 = vadd.f32 0.041655596, %v567_v41  ;;  %v575_v19 = vadd.f32 0.008332121, %v574_v50  ;;  %vm5448_vm3 = vcmp.lt.s32.totalorder %v5447_v7, 0  ;;  %v1259_v41 = vsel %vm1247_vm1, %v1241_v4, %v1258_v27 }
 0x104   :  { %v1012_v50 = vsel %vm5448_vm3, 0, %v5447_v7  ;;  %v1260_v14 = vsel %vm1246_vm2, %v1257_v63, %v1259_v41  ;;  %v5999_v63 = vmul.u32 %v1287_v1, %v5940_v8  ;;  %vm581_vm8 = vweird.f32 %v5735_v60 }
 0x105   :  { %v569_v44 = vmul.f32 %v568_v58, %v566_v33  ;;  %v576_v6 = vmul.f32 %v575_v19, %v566_v33  ;;  %v1013_v58 = vsub.s32 32, %v1012_v50  ;;  %v1286_v19 = vand.u32 65535, %v1256_v59 }
 0x106   :  { %v1017_v4 = vsub.s32 4294967266, %v1012_v50  ;;  %v1264_v13 = vand.u32 65535, %v1260_v14  ;;  %v1265_v7 = vshrl.u32 %v1260_v14, 16  ;;  %v1014_v59 = vshll.u32 %v5929_v28, %v1012_v50  ;;  %v6017_v28 = vpop.permute.xlu0 %61 }
 0x107   :  { %v570_v17 = vadd.f32 -0.4999988, %v569_v44  ;;  %v577_v35 = vadd.f32 -0.16666654, %v576_v6  ;;  %v1015_v44 = vshrl.u32 %v5904_v21, %v1013_v58  ;;  %vm6009_vm9 = vcmp.le.f32.partialorder %v903_v12, 0.7853982 }
 0x108   :  { %v1018_v6 = vadd.s32 127, %v1017_v4  ;;  %v1267_v41 = vmul.u32 %v1265_v7, %v5940_v8  ;;  %v6005_v46 = vmul.u32 %v1264_v13, %v5943_v11  ;;  %v1288_v21 = vmul.u32 %v1286_v19, %v5940_v8  ;;  %v6019_v4 = vpop.permute.xlu1 %196 }
 0x109   :  { %v571_v24 = vmul.f32 %v570_v17, %v566_v33  ;;  %v578_v27 = vmul.f32 %v577_v35, %v566_v33  ;;  %v6015_v35 = vmul.u32 %v1286_v19, %v5943_v11  ;;  %v1016_v50 = vor.u32 %v1015_v44, %v1014_v59  ;;  %9485 = vst [vmem:[#allocation8_spill] sm:$0xff] %v6019_v4 }
 0x10a   :  { %v1019_v58 = vshll.u32 %v1018_v6, 23  ;;  %v1269_v26 = vmul.u32 %v1265_v7, %v5943_v11  ;;  %v1272_v29 = vshll.u32 %v6005_v46, 16  ;;  %v1292_v20 = vshll.u32 %v5999_v63, 16 }
 0x10b   :  { %v572_v14 = vadd.f32 1.0, %v571_v24  ;;  %v579_v17 = vadd.f32 1.0, %v578_v27  ;;  %v1266_v24 = vmul.u32 %v1264_v13, %v5940_v8  ;;  %v1270_v27 = vshll.u32 %v1267_v41, 16 }
 0x10c   :  { %v1020_v22 = vor.u32 4788187, %v1019_v58  ;;  %v1271_v44 = vshrl.u32 %v1267_v41, 16  ;;  %v1291_v6 = vmul.u32 %v1287_v1, %v5943_v11  ;;  %v1023_v13 = vcvt.s32.f32 %v1016_v50 }
 0x10d   :  { %v580_v32 = vmul.f32 %v579_v17, %v5948_v23  ;;  %v589_v12 = vxor.u32 2147483648, %v572_v14  ;;  %vm1274_vm10 = vc.u32 %v1266_v24, %v1270_v27  ;;  %v1276_v19 = vadd.s32 %v1270_v27, %v1266_v24 }
 0x10e   :  { %v1275_v59 = vsel %vm1274_vm10, 1, %v9471_v0  ;;  %v1021_v8 = vand.u32 2147483647, %v1020_v22  ;;  %vm1296_vm13 = vc.u32 %v1288_v21, %v1292_v20  ;;  %v1030_v49 = vsel %vm6009_vm9, 0, %v5984_v5 }
 0x10f   :  { %v586_v51 = vxor.u32 2147483648, %v580_v32  ;;  %v1277_v4 = vadd.s32 %v1275_v59, %v1269_v26  ;;  %vm1278_vm11 = vc.u32 %v1276_v19, %v1272_v29  ;;  %v590_v7 = vsel %vm588_vm5, %v589_v12, %v580_v32 }
 0x110   :  { %v1279_v17 = vsel %vm1278_vm11, 1, %v9471_v0  ;;  %v1024_v58 = vmul.f32 %v1023_v13, %v1021_v8  ;;  %v1297_v11 = vsel %vm1296_vm13, 1, %v9471_v0  ;;  %v1294_v26 = vshll.u32 %v6015_v35, 16  ;;  %v6064_v12 = vpop.permute.xlu1 %211 }
 0x111   :  { %v587_v23 = vsel %vm585_vm4, %v572_v14, %v586_v51  ;;  %v1281_v24 = vadd.s32 %v1279_v17, %v1277_v4  ;;  %v1298_v29 = vadd.s32 %v1292_v20, %v1288_v21  ;;  %v1299_v51 = vadd.s32 %v1297_v11, %v1291_v6  ;;  %v6058_v4 = vpop.permute.xlu0 %86  ;;  %9487 = vst [vmem:[#allocation9_spill] sm:$0xff] %v6064_v12 }
 0x112   :  { %v591_v41 = vsel %vm584_vm7, %v587_v23, %v590_v7  ;;  %v1025_v32 = vxor.u32 2147483648, %v1024_v58  ;;  %v5461_v14 = vadd.s32 4294967169, %v5978_v18  ;;  %v1249_v60 = vsel %vm1245_vm14, %v5988_v31, %v5931_v30 }
 0x113   :  { %v592_v22 = vsel %vm581_vm8, nan, %v591_v41  ;;  %v1282_v1 = vadd.s32 %v1281_v24, %v1271_v44  ;;  %v1251_v20 = vsel %vm1247_vm1, %v5933_v55, %v1250_v61  ;;  %vm1300_vm15 = vc.u32 %v1298_v29, %v1294_v26 }
 0x114   :  { %5399 = vst.msk [vmem:[%s9457_s1] sm:$0xff] %vm5398_vm6, %v592_v22  ;;  %v9486_v21 = vand.u32 2147483647, %v5918_v62  ;;  %v1026_v5 = vsel %vm905_vm12, %v1025_v32, %v1024_v58  ;;  %v1273_v18 = vshrl.u32 %v6005_v46, 16  ;;  %v1301_v27 = vsel %vm1300_vm15, 1, %v9471_v0 }
 0x115   :  { %v1688_v30 = vadd.s32 1, %v5461_v14  ;;  %v6069_v55 = vsel %vm6009_vm9, %v5745_v9, %v1026_v5  ;;  %v1047_v31 = vadd.s32 3, %v1030_v49  ;;  %v1293_v61 = vshrl.u32 %v5999_v63, 16 }
 0x116   :  { %v6056_v50 = vand.u32 8388607, %v9486_v21  ;;  %v1303_v19 = vadd.s32 %v1301_v27, %v1299_v51  ;;  %v1031_v44 = vmul.f32 %v6069_v55, %v6069_v55  ;;  %v1252_v46 = vsel %vm1246_vm2, %v1249_v60, %v1251_v20 }
 0x117   :  { %v6076_v59 = vadd.s32 %v1282_v1, %v1273_v18  ;;  %vm1689_vm12 = vcmp.gt.s32.totalorder %v1688_v30, 0  ;;  %v1295_v6 = vshrl.u32 %v6015_v35, 16  ;;  %v6079_v7 = vadd.s32 %v1298_v29, %v1294_v26 }
 0x118   :  { %v1304_v8 = vadd.s32 %v1303_v19, %v1293_v61  ;;  %v1690_v13 = vsel %vm1689_vm12, %v1688_v30, 0  ;;  %v1032_v33 = vmul.f32 -0.001358992, %v1031_v44  ;;  %v1039_v23 = vmul.f32 -0.00019511016, %v1031_v44 }
 0x119   :  { %v1692_v17 = vand.u32 31, %v1690_v13  ;;  %v6081_v63 = vand.u32 3, %v1047_v31  ;;  %v1306_v58 = vmul.u32 %v5912_v54, %v1252_v46  ;;  %v1686_v15 = vor.u32 8388608, %v6056_v50  ;;  %v6102_v31 = vpop.permute.xlu0 %101 }
 0x11a   :  { %v1305_v41 = vadd.s32 %v1304_v8, %v1295_v6  ;;  %v1033_v24 = vadd.f32 0.041655596, %v1032_v33  ;;  %v1040_v11 = vadd.f32 0.008332121, %v1039_v23  ;;  %vm1308_vm14 = vc.u32 %v6076_v59, %v6079_v7  ;;  %v224_v8 = vpop.permute.xlu1 %223 }
 0x11b   :  { %v6087_v35 = vsub.s32 32, %v1692_v17  ;;  %v6089_v51 = vshrl.u32 %v1690_v13, 5  ;;  %v9488_v26 = vmov 683565275   ;;  %v9489_v32 = vmov 2475754826  }
 0x11c   :  { %v1309_v22 = vadd.s32 1, %v1305_v41  ;;  %v1695_v29 = vshll.u32 %v9488_v26, %v1692_v17  ;;  %v1698_v49 = vshll.u32 %v9489_v32, %v1692_v17  ;;  %v1034_v1 = vmul.f32 %v1033_v24, %v1031_v44 }
 0x11d   :  { %v1041_v14 = vmul.f32 %v1040_v11, %v1031_v44  ;;  %v1696_v54 = vshrl.u32 %v9489_v32, %v6087_v35  ;;  %v9490_v60 = vmov 2102212464   ;;  %v9491_v50 = vmov 2131351028  }
 0x11e   :  { %v1704_v20 = vshll.u32 %v9490_v60, %v1692_v17  ;;  %v1310_v21 = vsel %vm1308_vm14, %v1309_v22, %v1305_v41  ;;  %v1699_v5 = vshrl.u32 %v9491_v50, %v6087_v35  ;;  %v1702_v18 = vshrl.u32 %v9490_v60, %v6087_v35 }
 0x11f   :  { %v9492_v27 = vmov 920167782   ;;  %v1035_v61 = vadd.f32 -0.4999988, %v1034_v1  ;;  %v1042_v19 = vadd.f32 -0.16666654, %v1041_v14  ;;  %v1311_v46 = vadd.s32 %v1310_v21, %v1306_v58 }
 0x120   :  { %v1705_v30 = vshrl.u32 %v9492_v27, %v6087_v35  ;;  %v1701_v6 = vshll.u32 %v9491_v50, %v1692_v17  ;;  %v1697_v13 = vor.u32 %v1696_v54, %v1695_v29  ;;  %v1700_v33 = vor.u32 %v1699_v5, %v1698_v49 }
 0x121   :  { %v1707_v41 = vshll.u32 %v9492_v27, %v1692_v17  ;;  %v1036_v24 = vmul.f32 %v1035_v61, %v1031_v44  ;;  %v1043_v11 = vmul.f32 %v1042_v19, %v1031_v44  ;;  %vm1049_vm1 = vcmp.lt.s32.totalorder %v6081_v63, 2 }
 0x122   :  { %v1706_v23 = vor.u32 %v1705_v30, %v1704_v20  ;;  %v1312_v22 = vadd.s32 536870912, %v1311_v46  ;;  %v9493_v0 = vmov 1326507024   ;;  %vm1046_vm2 = vweird.f32 %v5745_v9 }
 0x123   :  { %v1708_v12 = vshrl.u32 %v9493_v0, %v6087_v35  ;;  %vm1050_vm3 = vcmp.eq.s32.totalorder %v6081_v63, 0  ;;  %v1703_v58 = vor.u32 %v1702_v18, %v1701_v6  ;;  %vm1713_vm4 = vcmp.lt.s32.totalorder %v6089_v51, 4 }
 0x124   :  { %v344_v29 = vsel %vm42_vm0, %v5725_v52, %v224_v8  ;;  %v1037_v17 = vadd.f32 1.0, %v1036_v24  ;;  %v1044_v49 = vadd.f32 1.0, %v1043_v11  ;;  %v6115_v44 = vshrl.u32 %v1312_v22, 30  ;;  %v6142_v24 = vpop.permute.xlu0 %116 }
 0x125   :  { %v1709_v1 = vor.u32 %v1708_v12, %v1707_v41  ;;  %vm1710_vm5 = vcmp.lt.s32.totalorder %v6089_v51, 1  ;;  %vm1712_vm7 = vcmp.lt.s32.totalorder %v6089_v51, 3  ;;  %v1719_v14 = vsel %vm1713_vm4, %v1706_v23, 920167782 }
 0x126   :  { %v6121_v54 = vshll.u32 %v1686_v15, 8  ;;  %v1045_v20 = vmul.f32 %v1044_v49, %v6069_v55  ;;  %v1054_v21 = vxor.u32 2147483648, %v1037_v17  ;;  %v1314_v5 = vshll.u32 %v6115_v44, 30 }
 0x127   :  { %v1718_v52 = vsel %vm1710_vm5, %v1697_v13, %v1700_v33  ;;  %vm1053_vm8 = vcmp.eq.s32.totalorder %v6081_v63, 2  ;;  %v1720_v12 = vsel %vm1712_vm7, %v1703_v58, %v1719_v14  ;;  %v1723_v18 = vsel %vm1713_vm4, %v1709_v1, 1326507024 }
 0x128   :  { %v376_v30 = vmul.f32 %v344_v29, %v5727_v53  ;;  %v1051_v15 = vxor.u32 2147483648, %v1045_v20  ;;  %v1315_v61 = vsub.s32 %v1311_v46, %v1314_v5  ;;  %vm1711_vm9 = vcmp.lt.s32.totalorder %v6089_v51, 2 }
 0x129   :  { %v1722_v55 = vsel %vm1710_vm5, %v1700_v33, %v1703_v58  ;;  %v1721_v19 = vsel %vm1711_vm9, %v1718_v52, %v1720_v12  ;;  %v1724_v6 = vsel %vm1712_vm7, %v1706_v23, %v1723_v18  ;;  %v1727_v8 = vand.u32 65535, %v6121_v54 }
 0x12a   :  { %v1728_v41 = vshrl.u32 %v6121_v54, 16  ;;  %v1052_v46 = vsel %vm1050_vm3, %v1037_v17, %v1051_v15  ;;  %v1055_v11 = vsel %vm1053_vm8, %v1054_v21, %v1045_v20  ;;  %vm1316_vm10 = vcmp.lt.s32.totalorder %v1315_v61, 0 }
 0x12b   :  { %v1317_v22 = vsub.s32 0, %v1315_v61  ;;  %v1056_v29 = vsel %vm1049_vm1, %v1052_v46, %v1055_v11  ;;  %v1694_v49 = vshrl.u32 %v9488_v26, %v6087_v35  ;;  %v1725_v23 = vsel %vm1711_vm9, %v1722_v55, %v1724_v6 }
 0x12c   :  { %v1752_v1 = vshrl.u32 %v1721_v19, 16  ;;  %v1057_v14 = vsel %vm1046_vm2, nan, %v1056_v29  ;;  %v1729_v52 = vand.u32 65535, %v1725_v23  ;;  %v1751_v12 = vand.u32 65535, %v1721_v19 }
 0x12d   :  { %v1318_v5 = vsel %vm1316_vm10, %v1317_v22, %v1315_v61  ;;  %5402 = vst.msk [vmem:[%s9457_s1 + $0x18] sm:$0xff] %vm5398_vm6, %v1057_v14  ;;  %v1715_v17 = vsel %vm1713_vm4, %v1703_v58, 2102212464  ;;  %v1730_v35 = vshrl.u32 %v1725_v23, 16  ;;  %v1307_v21 = vadd.s32 %v6079_v7, %v6076_v59 }
 0x12e   :  { %v1319_v63 = vclz %v1318_v5  ;;  %v1754_v20 = vmul.u32 %v1752_v1, %v1727_v8  ;;  %v6163_v9 = vadd.f32 %v376_v30, %v5729_v57  ;;  %v1714_v15 = vsel %vm1710_vm5, %v1694_v49, %v1697_v13  ;;  %v6169_v13 = vpop.permute.xlu0 %131 }
 0x12f   :  { %v1732_v55 = vmul.u32 %v1730_v35, %v1727_v8  ;;  %v1733_v19 = vmul.u32 %v1729_v52, %v1728_v41  ;;  %v1716_v6 = vsel %vm1712_vm7, %v1700_v33, %v1715_v17  ;;  %v1753_v46 = vmul.u32 %v1751_v12, %v1727_v8 }
 0x130   :  { %v5453_v18 = vadd.s32 4294967294, %v1319_v63  ;;  %v1755_v11 = vmul.u32 %v1751_v12, %v1728_v41  ;;  %v1757_v58 = vshll.u32 %v1754_v20, 16  ;;  %v1731_v22 = vmul.u32 %v1729_v52, %v1727_v8 }
 0x131   :  { %v1734_v29 = vmul.u32 %v1730_v35, %v1728_v41  ;;  %v1735_v23 = vshll.u32 %v1732_v55, 16  ;;  %v1737_v7 = vshll.u32 %v1733_v19, 16  ;;  %v1756_v30 = vmul.u32 %v1752_v1, %v1728_v41 }
 0x132   :  { %vm5454_vm11 = vcmp.lt.s32.totalorder %v5453_v18, 0  ;;  %v1759_v14 = vshll.u32 %v1755_v11, 16  ;;  %v9494_v49 = vmov 0   ;;  %vm1761_vm15 = vc.u32 %v1753_v46, %v1757_v58 }
 0x133   :  { %v1322_v59 = vsel %vm5454_vm11, 0, %v5453_v18  ;;  %vm1739_vm13 = vc.u32 %v1731_v22, %v1735_v23  ;;  %v1741_v33 = vadd.s32 %v1735_v23, %v1731_v22  ;;  %v1763_v12 = vadd.s32 %v1757_v58, %v1753_v46  ;;  %v260_v23 = vpop.permute.xlu2 %259 }
 0x134   :  { %v1323_v5 = vsub.s32 32, %v1322_v59  ;;  %v1324_v63 = vshll.u32 %v1315_v61, %v1322_v59  ;;  %v1327_v47 = vsub.s32 4294967266, %v1322_v59  ;;  %v1740_v36 = vsel %vm1739_vm13, 1, %v9494_v49 }
 0x135   :  { %v1742_v8 = vadd.s32 %v1740_v36, %v1734_v29  ;;  %v1762_v52 = vsel %vm1761_vm15, 1, %v9494_v49  ;;  %vm1743_vm12 = vc.u32 %v1741_v33, %v1737_v7  ;;  %v1758_v35 = vshrl.u32 %v1754_v20, 16 }
 0x136   :  { %v1325_v17 = vshrl.u32 %v1307_v21, %v1323_v5  ;;  %v1328_v48 = vadd.s32 127, %v1327_v47  ;;  %v1764_v41 = vadd.s32 %v1762_v52, %v1756_v30  ;;  %vm1765_vm14 = vc.u32 %v1763_v12, %v1759_v14 }
 0x137   :  { %v1744_v18 = vsel %vm1743_vm12, 1, %v9494_v49  ;;  %v1766_v59 = vsel %vm1765_vm14, 1, %v9494_v49  ;;  %v1736_v16 = vshrl.u32 %v1732_v55, 16  ;;  %v9473_v46 = vand.u32 2147483647, %v6163_v9 }
 0x138   :  { %v1326_v1 = vor.u32 %v1325_v17, %v1324_v63  ;;  %v1329_v61 = vshll.u32 %v1328_v48, 23  ;;  %v1746_v45 = vadd.s32 %v1744_v18, %v1742_v8  ;;  %v1768_v22 = vadd.s32 %v1766_v59, %v1764_v41 }
 0x139   :  { %vm1215_vm1 = vcmp.lt.s32.totalorder %v5856_v56, 0  ;;  %v1337_v47 = vsub.s32 4, %v6115_v44  ;;  %v751_v20 = vand.u32 2139095040, %v6163_v9  ;;  %v1738_v21 = vshrl.u32 %v1733_v19, 16 }
 0x13a   :  { %v1330_v36 = vor.u32 4788187, %v1329_v61  ;;  %v1747_v58 = vadd.s32 %v1746_v45, %v1736_v16  ;;  %v1760_v29 = vshrl.u32 %v1755_v11, 16  ;;  %v1769_v48 = vadd.s32 %v1768_v22, %v1758_v35  ;;  %v6189_v11 = vpop.permute.xlu0 %146 }
 0x13b   :  { %v1333_v30 = vcvt.s32.f32 %v1326_v1  ;;  %v1717_v55 = vsel %vm1711_vm9, %v1714_v15, %v1716_v6  ;;  %v752_v5 = vshrl.u32 %v751_v20, 23  ;;  %v1767_v33 = vadd.s32 %v1763_v12, %v1759_v14  ;;  %9495 = vst [vmem:[#allocation10_spill] sm:$0xff] %v6189_v11 }
 0x13c   :  { %v1331_v7 = vand.u32 2147483647, %v1330_v36  ;;  %v1748_v63 = vadd.s32 %v1747_v58, %v1738_v21  ;;  %v1770_v17 = vadd.s32 %v1769_v48, %v1760_v29  ;;  %v755_v8 = vand.u32 8388607, %v9473_v46 }
 0x13d   :  { %v1338_v45 = vsel %vm1215_vm1, %v1337_v47, %v6115_v44  ;;  %v5443_v16 = vadd.s32 4294967169, %v752_v5  ;;  %v353_v19 = vsel %vm42_vm0, %v5704_v37, %v260_v23  ;;  %v9496_v15 = vand.u32 2147483647, %v5856_v56 }
 0x13e   :  { %v1334_v52 = vmul.f32 %v1333_v30, %v1331_v7  ;;  %vm1773_vm2 = vc.u32 %v1748_v63, %v1767_v33  ;;  %v1774_v51 = vadd.s32 1, %v1770_v17  ;;  %v1771_v14 = vmul.u32 %v6121_v54, %v1717_v55 }
 0x13f   :  { %vm1214_vm3 = vcmp.le.f32.partialorder %v9496_v15, 0.7853982  ;;  %v758_v12 = vadd.s32 1, %v5443_v16  ;;  %v756_v1 = vor.u32 8388608, %v755_v8  ;;  %v385_v44 = vmul.f32 %v353_v19, %v5727_v53 }
 0x140   :  { %v1335_v6 = vxor.u32 2147483648, %v1334_v52  ;;  %v1340_v35 = vsel %vm1214_vm3, 0, %v1338_v45  ;;  %v1775_v41 = vsel %vm1773_vm2, %v1774_v51, %v1770_v17  ;;  %vm1680_vm5 = vcmp.lt.s32.totalorder %v5918_v62, 0 }
 0x141   :  { %v1776_v37 = vadd.s32 %v1775_v41, %v1771_v14  ;;  %vm759_vm4 = vcmp.gt.s32.totalorder %v758_v12, 0  ;;  %v1357_v36 = vadd.s32 3, %v1340_v35  ;;  %v6198_v21 = vshll.u32 %v756_v1, 8 }
 0x142   :  { %v1336_v61 = vsel %vm1215_vm1, %v1335_v6, %v1334_v52  ;;  %v760_v59 = vsel %vm759_vm4, %v758_v12, 0  ;;  %v6201_v54 = vadd.f32 %v385_v44, %v5729_v57  ;;  %v6208_v17 = vpop.permute.xlu0 %161  ;;  %v6210_v8 = vadd.s32 %v1767_v33, %v1748_v63 }
 0x143   :  { %v1339_v18 = vsel %vm1214_vm3, %v5856_v56, %v1336_v61  ;;  %v1777_v47 = vadd.s32 536870912, %v1776_v37  ;;  %v762_v20 = vand.u32 31, %v760_v59  ;;  %v6205_v55 = vand.u32 3, %v1357_v36  ;;  %9497 = vst [vmem:[#allocation11_spill] sm:$0xff] %v6208_v17 }
 0x144   :  { %v1341_v22 = vmul.f32 %v1339_v18, %v1339_v18  ;;  %v6213_v52 = vand.u32 65535, %v6198_v21  ;;  %v6216_v45 = vshrl.u32 %v6198_v21, 16  ;;  %v6221_v6 = vshrl.u32 %v760_v59, 5 }
 0x145   :  { %v1778_v48 = vshrl.u32 %v1777_v47, 30  ;;  %v6203_v23 = vsub.s32 32, %v762_v20  ;;  %v765_v14 = vshll.u32 %v9488_v26, %v762_v20  ;;  %v768_v33 = vshll.u32 %v9489_v32, %v762_v20 }
 0x146   :  { %v1342_v58 = vmul.f32 -0.001358992, %v1341_v22  ;;  %v1349_v29 = vmul.f32 -0.00019511016, %v1341_v22  ;;  %vm1363_vm7 = vcmp.eq.s32.totalorder %v6205_v55, 2  ;;  %vm1360_vm9 = vcmp.eq.s32.totalorder %v6205_v55, 0 }
 0x147   :  { %v1779_v5 = vshll.u32 %v1778_v48, 30  ;;  %v766_v63 = vshrl.u32 %v9489_v32, %v6203_v23  ;;  %v769_v12 = vshrl.u32 %v9491_v50, %v6203_v23  ;;  %v1802_v44 = vsub.s32 4, %v1778_v48 }
 0x148   :  { %v1343_v7 = vadd.f32 0.041655596, %v1342_v58  ;;  %v1350_v30 = vadd.f32 0.008332121, %v1349_v29  ;;  %v772_v61 = vshrl.u32 %v9490_v60, %v6203_v23  ;;  %v775_v59 = vshrl.u32 %v9492_v27, %v6203_v23 }
 0x149   :  { %v6219_v15 = vsub.s32 %v1776_v37, %v1779_v5  ;;  %v774_v37 = vshll.u32 %v9490_v60, %v762_v20  ;;  %vm1359_vm10 = vcmp.lt.s32.totalorder %v6205_v55, 2  ;;  %v778_v29 = vshrl.u32 %v9493_v0, %v6203_v23 }
 0x14a   :  { %v1344_v19 = vmul.f32 %v1343_v7, %v1341_v22  ;;  %v1351_v51 = vmul.f32 %v1350_v30, %v1341_v22  ;;  %vm1356_vm11 = vweird.f32 %v5856_v56  ;;  %v767_v30 = vor.u32 %v766_v63, %v765_v14 }
 0x14b   :  { %vm1781_vm8 = vcmp.lt.s32.totalorder %v6219_v15, 0  ;;  %v1782_v1 = vsub.s32 0, %v6219_v15  ;;  %v771_v5 = vshll.u32 %v9491_v50, %v762_v20  ;;  %v6244_v16 = vor.u32 %v769_v12, %v768_v33 }
 0x14c   :  { %v1345_v35 = vadd.f32 -0.4999988, %v1344_v19  ;;  %v1352_v41 = vadd.f32 -0.16666654, %v1351_v51  ;;  %v776_v19 = vor.u32 %v775_v59, %v774_v37  ;;  %v2146_v17 = vand.u32 2139095040, %v6201_v54 }
 0x14d   :  { %v1783_v58 = vsel %vm1781_vm8, %v1782_v1, %v6219_v15  ;;  %v773_v1 = vor.u32 %v772_v61, %v771_v5  ;;  %v9498_v14 = vand.u32 2147483647, %v5918_v62  ;;  %vm783_vm15 = vcmp.lt.s32.totalorder %v6221_v6, 4 }
 0x14e   :  { %v1346_v36 = vmul.f32 %v1345_v35, %v1341_v22  ;;  %v1353_v47 = vmul.f32 %v1352_v41, %v1341_v22  ;;  %v1784_v7 = vclz %v1783_v58  ;;  %v777_v22 = vshll.u32 %v9492_v27, %v762_v20  ;;  %v6259_v20 = vpop.permute.xlu0 %176 }
 0x14f   :  { %v6249_v41 = vsel %vm1680_vm5, %v1802_v44, %v1778_v48  ;;  %vm6254_vm13 = vcmp.le.f32.partialorder %v9498_v14, 0.7853982  ;;  %9501 = vst [vmem:[#allocation12_spill] sm:$0xff] %v6259_v20  ;;  %vm780_vm14 = vcmp.lt.s32.totalorder %v6221_v6, 1  ;;  %vm781_vm1 = vcmp.lt.s32.totalorder %v6221_v6, 2 }
 0x150   :  { %v1347_v51 = vadd.f32 1.0, %v1346_v36  ;;  %v1354_v46 = vadd.f32 1.0, %v1353_v47  ;;  %v5462_v35 = vadd.s32 4294967294, %v1784_v7  ;;  %v779_v33 = vor.u32 %v778_v29, %v777_v22 }
 0x151   :  { %vm782_vm2 = vcmp.lt.s32.totalorder %v6221_v6, 3  ;;  %v788_v12 = vsel %vm780_vm14, %v767_v30, %v6244_v16  ;;  %v792_v29 = vsel %vm780_vm14, %v6244_v16, %v773_v1 }
 0x152   :  { %v1355_v11 = vmul.f32 %v1354_v46, %v1339_v18  ;;  %v1364_v58 = vxor.u32 2147483648, %v1347_v51  ;;  %vm5463_vm12 = vcmp.lt.s32.totalorder %v5462_v35, 0  ;;  %v789_v46 = vsel %vm783_vm15, %v776_v19, 920167782 }
 0x153   :  { %v1787_v48 = vsel %vm5463_vm12, 0, %v5462_v35  ;;  %v790_v47 = vsel %vm782_vm2, %v773_v1, %v789_v46  ;;  %v793_v7 = vsel %vm783_vm15, %v779_v33, 1326507024 }
 0x154   :  { %v1361_v18 = vxor.u32 2147483648, %v1355_v11  ;;  %v1365_v44 = vsel %vm1363_vm7, %v1364_v58, %v1355_v11  ;;  %v1788_v61 = vsub.s32 32, %v1787_v48  ;;  %v1789_v37 = vshll.u32 %v6219_v15, %v1787_v48 }
 0x155   :  { %v1792_v59 = vsub.s32 4294967266, %v1787_v48  ;;  %v791_v22 = vsel %vm781_vm1, %v788_v12, %v790_v47  ;;  %v794_v35 = vsel %vm782_vm2, %v776_v19, %v793_v7  ;;  %v2147_v19 = vshrl.u32 %v2146_v17, 23 }
 0x156   :  { %v1362_v36 = vsel %vm1360_vm9, %v1347_v51, %v1361_v18  ;;  %v1790_v5 = vshrl.u32 %v6210_v8, %v1788_v61  ;;  %v821_v58 = vand.u32 65535, %v791_v22  ;;  %v822_v14 = vshrl.u32 %v791_v22, 16  ;;  %v6310_v17 = vpop.permute.xlu0 %191 }
 0x157   :  { %v1366_v11 = vsel %vm1359_vm10, %v1362_v36, %v1365_v44  ;;  %v1793_v15 = vadd.s32 127, %v1792_v59  ;;  %v764_v8 = vshrl.u32 %v9488_v26, %v6203_v23  ;;  %v795_v46 = vsel %vm781_vm1, %v792_v29, %v794_v35  ;;  %9502 = vst [vmem:[#allocation13_spill] sm:$0xff] %v6310_v17 }
 0x158   :  { %v1367_v51 = vsel %vm1356_vm11, nan, %v1366_v11  ;;  %v1791_v55 = vor.u32 %v1790_v5, %v1789_v37  ;;  %v799_v56 = vand.u32 65535, %v795_v46  ;;  %v800_v18 = vshrl.u32 %v795_v46, 16 }
 0x159   :  { %5404 = vst.msk [vmem:[%s9457_s1 + $0x28] sm:$0xff] %vm5398_vm6, %v1367_v51  ;;  %v1794_v33 = vshll.u32 %v1793_v15, 23  ;;  %v824_v48 = vmul.u32 %v822_v14, %v6213_v52  ;;  %v1805_v44 = vsel %vm6254_vm13, 0, %v6249_v41  ;;  %v784_v61 = vsel %vm780_vm14, %v764_v8, %v767_v30 }
 0x15a   :  { %v825_v37 = vmul.u32 %v821_v58, %v6216_v45  ;;  %v785_v23 = vsel %vm783_vm15, %v773_v1, 2102212464  ;;  %v802_v59 = vmul.u32 %v800_v18, %v6213_v52  ;;  %v803_v36 = vmul.u32 %v799_v56, %v6216_v45 }
 0x15b   :  { %v1795_v12 = vor.u32 4788187, %v1794_v33  ;;  %v823_v47 = vmul.u32 %v821_v58, %v6213_v52  ;;  %v1798_v7 = vcvt.s32.f32 %v1791_v55  ;;  %v826_v41 = vmul.u32 %v822_v14, %v6216_v45 }
 0x15c   :  { %v827_v11 = vshll.u32 %v824_v48, 16  ;;  %v801_v30 = vmul.u32 %v799_v56, %v6213_v52  ;;  %v804_v5 = vmul.u32 %v800_v18, %v6216_v45  ;;  %v805_v15 = vshll.u32 %v802_v59, 16 }
 0x15d   :  { %v1796_v29 = vand.u32 2147483647, %v1795_v12  ;;  %v829_v22 = vshll.u32 %v825_v37, 16  ;;  %v807_v51 = vshll.u32 %v803_v36, 16  ;;  %v5470_v8 = vadd.s32 4294967169, %v2147_v19 }
 0x15e   :  { %vm831_vm3 = vc.u32 %v823_v47, %v827_v11  ;;  %v833_v35 = vadd.s32 %v827_v11, %v823_v47  ;;  %vm809_vm4 = vc.u32 %v801_v30, %v805_v15  ;;  %v811_v33 = vadd.s32 %v805_v15, %v801_v30 }
 0x15f   :  { %v1799_v1 = vmul.f32 %v1798_v7, %v1796_v29  ;;  %v832_v58 = vsel %vm831_vm3, 1, %v9494_v49  ;;  %v810_v55 = vsel %vm809_vm4, 1, %v9494_v49  ;;  %v786_v52 = vsel %vm782_vm2, %v6244_v16, %v785_v23 }
 0x160   :  { %v834_v14 = vadd.s32 %v832_v58, %v826_v41  ;;  %vm835_vm7 = vc.u32 %v833_v35, %v829_v22  ;;  %v812_v45 = vadd.s32 %v810_v55, %v804_v5  ;;  %vm813_vm8 = vc.u32 %v811_v33, %v807_v51  ;;  %v6329_v33 = vpop.permute.xlu0 %206 }
 0x161   :  { %v1800_v46 = vxor.u32 2147483648, %v1799_v1  ;;  %v836_v56 = vsel %vm835_vm7, 1, %v9494_v49  ;;  %v814_v12 = vsel %vm813_vm8, 1, %v9494_v49  ;;  %v828_v47 = vshrl.u32 %v824_v48, 16  ;;  %9503 = vst [vmem:[#allocation14_spill] sm:$0xff] %v6329_v33 }
 0x162   :  { %v838_v19 = vadd.s32 %v836_v56, %v834_v14  ;;  %v806_v7 = vshrl.u32 %v802_v59, 16  ;;  %v816_v41 = vadd.s32 %v814_v12, %v812_v45  ;;  %v2153_v11 = vadd.s32 1, %v5470_v8 }
 0x163   :  { %v1801_v18 = vsel %vm1680_vm5, %v1800_v46, %v1799_v1  ;;  %v1822_v16 = vadd.s32 3, %v1805_v44  ;;  %v830_v23 = vshrl.u32 %v825_v37, 16  ;;  %v787_v15 = vsel %vm781_vm1, %v784_v61, %v786_v52 }
 0x164   :  { %v1804_v29 = vsel %vm6254_vm13, %v5918_v62, %v1801_v18  ;;  %v839_v5 = vadd.s32 %v838_v19, %v828_v47  ;;  %v808_v51 = vshrl.u32 %v803_v36, 16  ;;  %v817_v1 = vadd.s32 %v816_v41, %v806_v7 }
 0x165   :  { %v1806_v30 = vmul.f32 %v1804_v29, %v1804_v29  ;;  %vm2154_vm5 = vcmp.gt.s32.totalorder %v2153_v11, 0  ;;  %v6333_v59 = vadd.s32 %v833_v35, %v829_v22  ;;  %v9504_v44 = vand.u32 2147483647, %v6201_v54 }
 0x166   :  { %v840_v46 = vadd.s32 %v839_v5, %v830_v23  ;;  %v2155_v63 = vsel %vm2154_vm5, %v2153_v11, 0  ;;  %v6331_v55 = vadd.s32 %v817_v1, %v808_v51  ;;  %v1823_v36 = vand.u32 3, %v1822_v16 }
 0x167   :  { %v1807_v48 = vmul.f32 -0.001358992, %v1806_v30  ;;  %v1814_v58 = vmul.f32 -0.00019511016, %v1806_v30  ;;  %v2150_v37 = vand.u32 8388607, %v9504_v44  ;;  %v841_v52 = vmul.u32 %v6198_v21, %v787_v15 }
 0x168   :  { %v2157_v8 = vand.u32 31, %v2155_v63  ;;  %v844_v61 = vadd.s32 1, %v840_v46  ;;  %vm843_vm9 = vc.u32 %v6331_v55, %v6333_v59  ;;  %v6342_v7 = vshrl.u32 %v2155_v63, 5 }
 0x169   :  { %v1808_v14 = vadd.f32 0.041655596, %v1807_v48  ;;  %v1815_v6 = vadd.f32 0.008332121, %v1814_v58  ;;  %v2151_v19 = vor.u32 8388608, %v2150_v37  ;;  %vm1825_vm10 = vcmp.eq.s32.totalorder %v1823_v36, 0 }
 0x16a   :  { %v6340_v45 = vsub.s32 32, %v2157_v8  ;;  %v845_v12 = vsel %vm843_vm9, %v844_v61, %v840_v46  ;;  %vm1824_vm11 = vcmp.lt.s32.totalorder %v1823_v36, 2  ;;  %v2160_v15 = vshll.u32 %v9488_v26, %v2157_v8 }
 0x16b   :  { %v1809_v56 = vmul.f32 %v1808_v14, %v1806_v30  ;;  %v1816_v18 = vmul.f32 %v1815_v6, %v1806_v30  ;;  %v846_v22 = vadd.s32 %v845_v12, %v841_v52  ;;  %vm1821_vm13 = vweird.f32 %v5918_v62  ;;  %v220_v14 = vpop.permute.xlu0 %219 }
 0x16c   :  { %v2161_v11 = vshrl.u32 %v9489_v32, %v6340_v45  ;;  %v2164_v21 = vshrl.u32 %v9491_v50, %v6340_v45  ;;  %v2167_v16 = vshrl.u32 %v9490_v60, %v6340_v45  ;;  %v2170_v51 = vshrl.u32 %v9492_v27, %v6340_v45 }
 0x16d   :  { %v1810_v35 = vadd.f32 -0.4999988, %v1809_v56  ;;  %v1817_v47 = vadd.f32 -0.16666654, %v1816_v18  ;;  %v847_v41 = vadd.s32 536870912, %v846_v22  ;;  %v2163_v48 = vshll.u32 %v9489_v32, %v2157_v8 }
 0x16e   :  { %v2166_v58 = vshll.u32 %v9491_v50, %v2157_v8  ;;  %v2173_v46 = vshrl.u32 %v9493_v0, %v6340_v45  ;;  %v2172_v37 = vshll.u32 %v9492_v27, %v2157_v8  ;;  %v6363_v61 = vor.u32 %v2161_v11, %v2160_v15 }
 0x16f   :  { %v1811_v23 = vmul.f32 %v1810_v35, %v1806_v30  ;;  %v1818_v5 = vmul.f32 %v1817_v47, %v1806_v30  ;;  %v6354_v1 = vshrl.u32 %v847_v41, 30  ;;  %v2169_v30 = vshll.u32 %v9490_v60, %v2157_v8 }
 0x170   :  { %v6365_v52 = vor.u32 %v2164_v21, %v2163_v48  ;;  %v6367_v56 = vor.u32 %v2167_v16, %v2166_v58  ;;  %v2174_v47 = vor.u32 %v2173_v46, %v2172_v37  ;;  %vm1828_vm15 = vcmp.eq.s32.totalorder %v1823_v36, 2 }
 0x171   :  { %v1812_v63 = vadd.f32 1.0, %v1811_v23  ;;  %v1819_v44 = vadd.f32 1.0, %v1818_v5  ;;  %v849_v6 = vshll.u32 %v6354_v1, 30  ;;  %v2171_v35 = vor.u32 %v2170_v51, %v2169_v30 }
 0x172   :  { %v6369_v23 = vshll.u32 %v2151_v19, 8  ;;  %v343_v8 = vsel %vm42_vm0, %v6017_v28, %v220_v14  ;;  %vm2175_vm12 = vcmp.lt.s32.totalorder %v6342_v7, 1  ;;  %vm2177_vm14 = vcmp.lt.s32.totalorder %v6342_v7, 3 }
 0x173   :  { %v1820_v18 = vmul.f32 %v1819_v44, %v1804_v29  ;;  %v1829_v12 = vxor.u32 2147483648, %v1812_v63  ;;  %v850_v41 = vsub.s32 %v846_v22, %v849_v6  ;;  %vm2178_vm1 = vcmp.lt.s32.totalorder %v6342_v7, 4 }
 0x174   :  { %v2183_v22 = vsel %vm2175_vm12, %v6363_v61, %v6365_v52  ;;  %v2184_v28 = vsel %vm2178_vm1, %v2171_v35, 920167782  ;;  %v2187_v21 = vsel %vm2175_vm12, %v6365_v52, %v6367_v56  ;;  %v2188_v16 = vsel %vm2178_vm1, %v2174_v47, 1326507024 }
 0x175   :  { %v1826_v5 = vxor.u32 2147483648, %v1820_v18  ;;  %v1830_v11 = vsel %vm1828_vm15, %v1829_v12, %v1820_v18  ;;  %vm851_vm2 = vcmp.lt.s32.totalorder %v850_v41, 0  ;;  %v852_v29 = vsub.s32 0, %v850_v41 }
 0x176   :  { %vm2176_vm3 = vcmp.lt.s32.totalorder %v6342_v7, 2  ;;  %v2185_v48 = vsel %vm2177_vm14, %v6367_v56, %v2184_v28  ;;  %v2189_v44 = vsel %vm2177_vm14, %v2171_v35, %v2188_v16  ;;  %v2192_v30 = vand.u32 65535, %v6369_v23 }
 0x177   :  { %v1827_v19 = vsel %vm1825_vm10, %v1812_v63, %v1826_v5  ;;  %v853_v51 = vsel %vm851_vm2, %v852_v29, %v850_v41  ;;  %v2186_v63 = vsel %vm2176_vm3, %v2183_v22, %v2185_v48  ;;  %v2190_v36 = vsel %vm2176_vm3, %v2187_v21, %v2189_v44 }
 0x178   :  { %v1831_v15 = vsel %vm1824_vm11, %v1827_v19, %v1830_v11  ;;  %v854_v46 = vclz %v853_v51  ;;  %v2193_v62 = vshrl.u32 %v6369_v23, 16  ;;  %v2194_v14 = vand.u32 65535, %v2190_v36 }
 0x179   :  { %v1832_v58 = vsel %vm1821_vm13, nan, %v1831_v15  ;;  %v2195_v6 = vshrl.u32 %v2190_v36, 16  ;;  %v2217_v18 = vshrl.u32 %v2186_v63, 16  ;;  %v375_v12 = vmul.f32 %v343_v8, %v5727_v53 }
 0x17a   :  { %5407 = vst.msk [vmem:[%s9457_s1 + $0x40] sm:$0xff] %vm5398_vm6, %v1832_v58  ;;  %v5444_v37 = vadd.s32 4294967294, %v854_v46  ;;  %v2198_v47 = vmul.u32 %v2194_v14, %v2193_v62  ;;  %v842_v5 = vadd.s32 %v6333_v59, %v6331_v55  ;;  %v2216_v29 = vand.u32 65535, %v2186_v63 }
 0x17b   :  { %v2197_v35 = vmul.u32 %v2195_v6, %v2192_v30  ;;  %v2219_v22 = vmul.u32 %v2217_v18, %v2192_v30  ;;  %vm750_vm7 = vcmp.lt.s32.totalorder %v6163_v9, 0  ;;  %v2196_v21 = vmul.u32 %v2194_v14, %v2192_v30 }
 0x17c   :  { %vm5445_vm4 = vcmp.lt.s32.totalorder %v5444_v37, 0  ;;  %v2199_v51 = vmul.u32 %v2195_v6, %v2193_v62  ;;  %v2202_v48 = vshll.u32 %v2198_v47, 16  ;;  %v6414_v8 = vadd.f32 %v375_v12, %v5729_v57 }
 0x17d   :  { %v857_v11 = vsel %vm5445_vm4, 0, %v5444_v37  ;;  %v2200_v16 = vshll.u32 %v2197_v35, 16  ;;  %v9505_v55 = vand.u32 2147483647, %v6163_v9  ;;  %v2218_v36 = vmul.u32 %v2216_v29, %v2192_v30 }
 0x17e   :  { %v858_v19 = vsub.s32 32, %v857_v11  ;;  %v862_v28 = vsub.s32 4294967266, %v857_v11  ;;  %v859_v15 = vshll.u32 %v850_v41, %v857_v11  ;;  %v2220_v37 = vmul.u32 %v2216_v29, %v2193_v62 }
 0x17f   :  { %vm2204_vm8 = vc.u32 %v2196_v21, %v2200_v16  ;;  %v2206_v44 = vadd.s32 %v2200_v16, %v2196_v21  ;;  %vm6418_vm5 = vcmp.le.f32.partialorder %v9505_v55, 0.7853982  ;;  %v2222_v41 = vshll.u32 %v2219_v22, 16 }
 0x180   :  { %v860_v58 = vshrl.u32 %v842_v5, %v858_v19  ;;  %v863_v46 = vadd.s32 127, %v862_v28  ;;  %v2205_v63 = vsel %vm2204_vm8, 1, %v9494_v49  ;;  %v872_v12 = vsub.s32 4, %v6354_v1 }
 0x181   :  { %v2207_v11 = vadd.s32 %v2205_v63, %v2199_v51  ;;  %vm2208_vm9 = vc.u32 %v2206_v44, %v2202_v48  ;;  %v2221_v19 = vmul.u32 %v2217_v18, %v2193_v62  ;;  %vm2226_vm10 = vc.u32 %v2218_v36, %v2222_v41 }
 0x182   :  { %v861_v14 = vor.u32 %v860_v58, %v859_v15  ;;  %v864_v6 = vshll.u32 %v863_v46, 23  ;;  %v2209_v5 = vsel %vm2208_vm9, 1, %v9494_v49  ;;  %v2201_v21 = vshrl.u32 %v2197_v35, 16 }
 0x183   :  { %v2211_v16 = vadd.s32 %v2209_v5, %v2207_v11  ;;  %v2227_v55 = vsel %vm2226_vm10, 1, %v9494_v49  ;;  %v2180_v30 = vsel %vm2178_vm1, %v6367_v56, 2102212464  ;;  %v2224_v29 = vshll.u32 %v2220_v37, 16 }
 0x184   :  { %v865_v28 = vor.u32 4788187, %v864_v6  ;;  %v2228_v15 = vadd.s32 %v2222_v41, %v2218_v36  ;;  %v2229_v58 = vadd.s32 %v2227_v55, %v2221_v19  ;;  %v868_v48 = vcvt.s32.f32 %v861_v14  ;;  %v232_v19 = vpop.permute.xlu1 %231 }
 0x185   :  { %v2212_v46 = vadd.s32 %v2211_v16, %v2201_v21  ;;  %v596_v44 = vand.u32 2139095040, %v6414_v8  ;;  %v873_v62 = vsel %vm750_vm7, %v872_v12, %v6354_v1  ;;  %v2159_v18 = vshrl.u32 %v9488_v26, %v6340_v45 }
 0x186   :  { %v866_v51 = vand.u32 2147483647, %v865_v28  ;;  %vm2230_vm11 = vc.u32 %v2228_v15, %v2224_v29  ;;  %v9474_v35 = vand.u32 2147483647, %v6414_v8  ;;  %v2203_v56 = vshrl.u32 %v2198_v47, 16 }
 0x187   :  { %v2231_v36 = vsel %vm2230_vm11, 1, %v9494_v49  ;;  %v597_v41 = vshrl.u32 %v596_v44, 23  ;;  %v2179_v14 = vsel %vm2175_vm12, %v2159_v18, %v6363_v61  ;;  %v2181_v6 = vsel %vm2177_vm14, %v6365_v52, %v2180_v30 }
 0x188   :  { %v869_v63 = vmul.f32 %v868_v48, %v866_v51  ;;  %v2223_v1 = vshrl.u32 %v2219_v22, 16  ;;  %v2233_v11 = vadd.s32 %v2231_v36, %v2229_v58  ;;  %v875_v45 = vsel %vm6418_vm5, 0, %v873_v62 }
 0x189   :  { %v6445_v5 = vadd.s32 %v2212_v46, %v2203_v56  ;;  %v5440_v47 = vadd.s32 4294967169, %v597_v41  ;;  %v2225_v28 = vshrl.u32 %v2220_v37, 16  ;;  %v600_v16 = vand.u32 8388607, %v9474_v35 }
 0x18a   :  { %v870_v12 = vxor.u32 2147483648, %v869_v63  ;;  %v2234_v21 = vadd.s32 %v2233_v11, %v2223_v1  ;;  %v2182_v52 = vsel %vm2176_vm3, %v2179_v14, %v2181_v6  ;;  %v2232_v22 = vadd.s32 %v2228_v15, %v2224_v29 }
 0x18b   :  { %v603_v55 = vadd.s32 1, %v5440_v47  ;;  %v892_v58 = vadd.s32 3, %v875_v45  ;;  %v346_v37 = vsel %vm42_vm0, %v5692_v34, %v232_v19  ;;  %v2236_v46 = vmul.u32 %v6369_v23, %v2182_v52 }
 0x18c   :  { %v871_v61 = vsel %vm750_vm7, %v870_v12, %v869_v63  ;;  %v2235_v51 = vadd.s32 %v2234_v21, %v2225_v28  ;;  %vm2238_vm13 = vc.u32 %v6445_v5, %v2232_v22  ;;  %v601_v44 = vor.u32 8388608, %v600_v16 }
 0x18d   :  { %v874_v30 = vsel %vm6418_vm5, %v6163_v9, %v871_v61  ;;  %vm604_vm15 = vcmp.gt.s32.totalorder %v603_v55, 0  ;;  %v378_v59 = vmul.f32 %v346_v37, %v5727_v53  ;;  %v6462_v63 = vand.u32 3, %v892_v58 }
 0x18e   :  { %v876_v48 = vmul.f32 %v874_v30, %v874_v30  ;;  %v2239_v7 = vadd.s32 1, %v2235_v51  ;;  %v605_v29 = vsel %vm604_vm15, %v603_v55, 0  ;;  %v6466_v6 = vshll.u32 %v601_v44, 8 }
 0x18f   :  { %v607_v18 = vand.u32 31, %v605_v29  ;;  %v6469_v12 = vadd.f32 %v378_v59, %v5729_v57  ;;  %v6471_v45 = vshrl.u32 %v605_v29, 5  ;;  %vm898_vm12 = vcmp.eq.s32.totalorder %v6462_v63, 2 }
 0x190   :  { %v877_v15 = vmul.f32 -0.001358992, %v876_v48  ;;  %v884_v62 = vmul.f32 -0.00019511016, %v876_v48  ;;  %v2240_v56 = vsel %vm2238_vm13, %v2239_v7, %v2235_v51  ;;  %vm895_vm14 = vcmp.eq.s32.totalorder %v6462_v63, 0 }
 0x191   :  { %v2241_v34 = vadd.s32 %v2240_v56, %v2236_v46  ;;  %v6464_v14 = vsub.s32 32, %v607_v18  ;;  %v610_v52 = vshll.u32 %v9488_v26, %v607_v18  ;;  %v613_v55 = vshll.u32 %v9489_v32, %v607_v18 }
 0x192   :  { %v878_v36 = vadd.f32 0.041655596, %v877_v15  ;;  %v885_v41 = vadd.f32 0.008332121, %v884_v62  ;;  %v616_v58 = vshll.u32 %v9491_v50, %v607_v18  ;;  %v619_v37 = vshll.u32 %v9490_v60, %v607_v18 }
 0x193   :  { %v2242_v11 = vadd.s32 536870912, %v2241_v34  ;;  %v611_v47 = vshrl.u32 %v9489_v32, %v6464_v14  ;;  %v614_v19 = vshrl.u32 %v9491_v50, %v6464_v14  ;;  %v620_v28 = vshrl.u32 %v9492_v27, %v6464_v14 }
 0x194   :  { %v879_v1 = vmul.f32 %v878_v36, %v876_v48  ;;  %v886_v23 = vmul.f32 %v885_v41, %v876_v48  ;;  %v617_v51 = vshrl.u32 %v9490_v60, %v6464_v14  ;;  %vm894_vm1 = vcmp.lt.s32.totalorder %v6462_v63, 2 }
 0x195   :  { %v2243_v61 = vshrl.u32 %v2242_v11, 30  ;;  %v622_v29 = vshll.u32 %v9492_v27, %v607_v18  ;;  %vm891_vm2 = vweird.f32 %v6163_v9  ;;  %vm2145_vm3 = vcmp.lt.s32.totalorder %v6201_v54, 0 }
 0x196   :  { %v880_v21 = vadd.f32 -0.4999988, %v879_v1  ;;  %v887_v16 = vadd.f32 -0.16666654, %v886_v23  ;;  %v612_v15 = vor.u32 %v611_v47, %v610_v52  ;;  %v6491_v62 = vor.u32 %v614_v19, %v613_v55 }
 0x197   :  { %v2244_v44 = vshll.u32 %v2243_v61, 30  ;;  %v621_v59 = vor.u32 %v620_v28, %v619_v37  ;;  %v623_v56 = vshrl.u32 %v9493_v0, %v6464_v14  ;;  %v618_v23 = vor.u32 %v617_v51, %v616_v58 }
 0x198   :  { %v881_v46 = vmul.f32 %v880_v21, %v876_v48  ;;  %v888_v7 = vmul.f32 %v887_v16, %v876_v48  ;;  %v2237_v48 = vadd.s32 %v2232_v22, %v6445_v5  ;;  %vm625_vm4 = vcmp.lt.s32.totalorder %v6471_v45, 1 }
 0x199   :  { %v2245_v1 = vsub.s32 %v2241_v34, %v2244_v44  ;;  %v624_v11 = vor.u32 %v623_v56, %v622_v29  ;;  %vm628_vm7 = vcmp.lt.s32.totalorder %v6471_v45, 4  ;;  %v9508_v47 = vand.u32 2147483647, %v6201_v54 }
 0x19a   :  { %v882_v36 = vadd.f32 1.0, %v881_v46  ;;  %v889_v41 = vadd.f32 1.0, %v888_v7  ;;  %v633_v5 = vsel %vm625_vm4, %v612_v15, %v6491_v62  ;;  %v634_v22 = vsel %vm628_vm7, %v621_v59, 920167782 }
 0x19b   :  { %vm6500_vm8 = vcmp.le.f32.partialorder %v9508_v47, 0.7853982  ;;  %vm2246_vm5 = vcmp.lt.s32.totalorder %v2245_v1, 0  ;;  %v2247_v28 = vsub.s32 0, %v2245_v1  ;;  %v642_v34 = vand.u32 65535, %v6466_v6 }
 0x19c   :  { %v890_v18 = vmul.f32 %v889_v41, %v874_v30  ;;  %v899_v21 = vxor.u32 2147483648, %v882_v36  ;;  %v1061_v30 = vand.u32 2139095040, %v6469_v12  ;;  %v2267_v55 = vsub.s32 4, %v2243_v61 }
 0x19d   :  { %v2248_v52 = vsel %vm2246_vm5, %v2247_v28, %v2245_v1  ;;  %vm627_vm9 = vcmp.lt.s32.totalorder %v6471_v45, 3  ;;  %vm626_vm10 = vcmp.lt.s32.totalorder %v6471_v45, 2  ;;  %v637_v44 = vsel %vm625_vm4, %v6491_v62, %v618_v23 }
 0x19e   :  { %v896_v16 = vxor.u32 2147483648, %v890_v18  ;;  %v900_v58 = vsel %vm898_vm12, %v899_v21, %v890_v18  ;;  %v2249_v51 = vclz %v2248_v52  ;;  %v635_v37 = vsel %vm627_vm9, %v618_v23, %v634_v22 }
 0x19f   :  { %v636_v7 = vsel %vm626_vm10, %v633_v5, %v635_v37  ;;  %v638_v29 = vsel %vm628_vm7, %v624_v11, 1326507024  ;;  %v643_v18 = vshrl.u32 %v6466_v6, 16  ;;  %v2268_v47 = vsel %vm2145_vm3, %v2267_v55, %v2243_v61 }
 0x1a0   :  { %v897_v46 = vsel %vm895_vm14, %v882_v36, %v896_v16  ;;  %v5471_v41 = vadd.s32 4294967294, %v2249_v51  ;;  %v639_v28 = vsel %vm627_vm9, %v621_v59, %v638_v29  ;;  %v1062_v5 = vshrl.u32 %v1061_v30, 23 }
 0x1a1   :  { %v901_v56 = vsel %vm894_vm1, %v897_v46, %v900_v58  ;;  %v640_v63 = vsel %vm626_vm10, %v637_v44, %v639_v28  ;;  %v666_v11 = vand.u32 65535, %v636_v7  ;;  %v667_v22 = vshrl.u32 %v636_v7, 16 }
 0x1a2   :  { %v902_v36 = vsel %vm891_vm2, nan, %v901_v56  ;;  %vm5472_vm11 = vcmp.lt.s32.totalorder %v5471_v41, 0  ;;  %v609_v16 = vshrl.u32 %v9488_v26, %v6464_v14  ;;  %v644_v61 = vand.u32 65535, %v640_v63 }
 0x1a3   :  { %5401 = vst.msk [vmem:[%s9457_s1 + $0x10] sm:$0xff] %vm5398_vm6, %v902_v36  ;;  %v2252_v9 = vsel %vm5472_vm11, 0, %v5471_v41  ;;  %v645_v52 = vshrl.u32 %v640_v63, 16  ;;  %v2270_v30 = vsel %vm6500_vm8, 0, %v2268_v47  ;;  %v669_v58 = vmul.u32 %v667_v22, %v642_v34 }
 0x1a4   :  { %v2253_v55 = vsub.s32 32, %v2252_v9  ;;  %v2257_v59 = vsub.s32 4294967266, %v2252_v9  ;;  %v629_v51 = vsel %vm625_vm4, %v609_v16, %v612_v15  ;;  %v630_v37 = vsel %vm628_vm7, %v618_v23, 2102212464 }
 0x1a5   :  { %v647_v46 = vmul.u32 %v645_v52, %v642_v34  ;;  %v648_v7 = vmul.u32 %v644_v61, %v643_v18  ;;  %v2254_v44 = vshll.u32 %v2245_v1, %v2252_v9  ;;  %v670_v14 = vmul.u32 %v666_v11, %v643_v18 }
 0x1a6   :  { %v2255_v29 = vshrl.u32 %v2237_v48, %v2253_v55  ;;  %v2258_v56 = vadd.s32 127, %v2257_v59  ;;  %v646_v41 = vmul.u32 %v644_v61, %v642_v34  ;;  %v649_v36 = vmul.u32 %v645_v52, %v643_v18 }
 0x1a7   :  { %v650_v28 = vshll.u32 %v647_v46, 16  ;;  %v668_v63 = vmul.u32 %v666_v11, %v642_v34  ;;  %v671_v47 = vmul.u32 %v667_v22, %v643_v18  ;;  %v672_v33 = vshll.u32 %v669_v58, 16 }
 0x1a8   :  { %v2256_v35 = vor.u32 %v2255_v29, %v2254_v44  ;;  %v2259_v21 = vshll.u32 %v2258_v56, 23  ;;  %v652_v17 = vshll.u32 %v648_v7, 16  ;;  %v674_v16 = vshll.u32 %v670_v14, 16 }
 0x1a9   :  { %vm654_vm13 = vc.u32 %v646_v41, %v650_v28  ;;  %v656_v15 = vadd.s32 %v650_v28, %v646_v41  ;;  %vm676_vm15 = vc.u32 %v668_v63, %v672_v33  ;;  %v678_v9 = vadd.s32 %v672_v33, %v668_v63 }
 0x1aa   :  { %v2260_v20 = vor.u32 4788187, %v2259_v21  ;;  %v2263_v23 = vcvt.s32.f32 %v2256_v35  ;;  %v655_v10 = vsel %vm654_vm13, 1, %v9494_v49  ;;  %v677_v1 = vsel %vm676_vm15, 1, %v9494_v49 }
 0x1ab   :  { %v657_v48 = vadd.s32 %v655_v10, %v649_v36  ;;  %vm658_vm12 = vc.u32 %v656_v15, %v652_v17  ;;  %v679_v11 = vadd.s32 %v677_v1, %v671_v47  ;;  %v5449_v18 = vadd.s32 4294967169, %v1062_v5 }
 0x1ac   :  { %v2261_v61 = vand.u32 2147483647, %v2260_v20  ;;  %v659_v34 = vsel %vm658_vm12, 1, %v9494_v49  ;;  %v631_v22 = vsel %vm627_vm9, %v6491_v62, %v630_v37  ;;  %v651_v52 = vshrl.u32 %v647_v46, 16 }
 0x1ad   :  { %v661_v21 = vadd.s32 %v659_v34, %v657_v48  ;;  %vm680_vm14 = vc.u32 %v678_v9, %v674_v16  ;;  %v2287_v55 = vadd.s32 3, %v2270_v30  ;;  %v1068_v17 = vadd.s32 1, %v5449_v18 }
 0x1ae   :  { %v2264_v35 = vmul.f32 %v2263_v23, %v2261_v61  ;;  %v681_v10 = vsel %vm680_vm14, 1, %v9494_v49  ;;  %v653_v59 = vshrl.u32 %v648_v7, 16  ;;  %v673_v33 = vshrl.u32 %v669_v58, 16 }
 0x1af   :  { %v662_v44 = vadd.s32 %v661_v21, %v651_v52  ;;  %v683_v20 = vadd.s32 %v681_v10, %v679_v11  ;;  %v632_v5 = vsel %vm626_vm10, %v629_v51, %v631_v22  ;;  %vm1069_vm1 = vcmp.gt.s32.totalorder %v1068_v17, 0 }
 0x1b0   :  { %v2265_v29 = vxor.u32 2147483648, %v2264_v35  ;;  %v675_v62 = vshrl.u32 %v670_v14, 16  ;;  %v1070_v46 = vsel %vm1069_vm1, %v1068_v17, 0  ;;  %v6563_v41 = vadd.s32 %v678_v9, %v674_v16 }
 0x1b1   :  { %v6559_v56 = vadd.s32 %v662_v44, %v653_v59  ;;  %v684_v37 = vadd.s32 %v683_v20, %v673_v33  ;;  %v1072_v36 = vand.u32 31, %v1070_v46  ;;  %v6570_v7 = vand.u32 3, %v2287_v55 }
 0x1b2   :  { %v2266_v30 = vsel %vm2145_vm3, %v2265_v29, %v2264_v35  ;;  %v9511_v51 = vand.u32 2147483647, %v6469_v12  ;;  %v686_v63 = vmul.u32 %v6466_v6, %v632_v5  ;;  %v6581_v19 = vshrl.u32 %v1070_v46, 5  ;;  %v272_v5 = vpop.permute.xlu2 %271 }
 0x1b3   :  { %v6568_v58 = vsel %vm6500_vm8, %v6201_v54, %v2266_v30  ;;  %v685_v45 = vadd.s32 %v684_v37, %v675_v62  ;;  %vm688_vm2 = vc.u32 %v6559_v56, %v6563_v41  ;;  %v6579_v47 = vsub.s32 32, %v1072_v36 }
 0x1b4   :  { %v1065_v28 = vand.u32 8388607, %v9511_v51  ;;  %v2271_v14 = vmul.f32 %v6568_v58, %v6568_v58  ;;  %v1075_v16 = vshll.u32 %v9488_v26, %v1072_v36  ;;  %v1078_v23 = vshll.u32 %v9489_v32, %v1072_v36 }
 0x1b5   :  { %v689_v15 = vadd.s32 1, %v685_v45  ;;  %v1076_v9 = vshrl.u32 %v9489_v32, %v6579_v47  ;;  %v1084_v61 = vshll.u32 %v9490_v60, %v1072_v36  ;;  %v1079_v34 = vshrl.u32 %v9491_v50, %v6579_v47 }
 0x1b6   :  { %v2272_v48 = vmul.f32 -0.001358992, %v2271_v14  ;;  %v2279_v1 = vmul.f32 -0.00019511016, %v2271_v14  ;;  %v1082_v11 = vshrl.u32 %v9490_v60, %v6579_v47  ;;  %v1085_v18 = vshrl.u32 %v9492_v27, %v6579_v47 }
 0x1b7   :  { %v690_v6 = vsel %vm688_vm2, %v689_v15, %v685_v45  ;;  %v1081_v35 = vshll.u32 %v9491_v50, %v1072_v36  ;;  %v1077_v55 = vor.u32 %v1076_v9, %v1075_v16  ;;  %v1087_v17 = vshll.u32 %v9492_v27, %v1072_v36 }
 0x1b8   :  { %v2273_v22 = vadd.f32 0.041655596, %v2272_v48  ;;  %v2280_v52 = vadd.f32 0.008332121, %v2279_v1  ;;  %v691_v21 = vadd.s32 %v690_v6, %v686_v63  ;;  %v1086_v10 = vor.u32 %v1085_v18, %v1084_v61 }
 0x1b9   :  { %v1088_v59 = vshrl.u32 %v9493_v0, %v6579_v47  ;;  %v1080_v29 = vor.u32 %v1079_v34, %v1078_v23  ;;  %v1066_v62 = vor.u32 8388608, %v1065_v28  ;;  %v1083_v37 = vor.u32 %v1082_v11, %v1081_v35 }
 0x1ba   :  { %v2274_v44 = vmul.f32 %v2273_v22, %v2271_v14  ;;  %v2281_v33 = vmul.f32 %v2280_v52, %v2271_v14  ;;  %v692_v20 = vadd.s32 536870912, %v691_v21  ;;  %vm1093_vm3 = vcmp.lt.s32.totalorder %v6581_v19, 4 }
 0x1bb   :  { %v1089_v46 = vor.u32 %v1088_v59, %v1087_v17  ;;  %vm2290_vm4 = vcmp.eq.s32.totalorder %v6570_v7, 0  ;;  %vm1090_vm7 = vcmp.lt.s32.totalorder %v6581_v19, 1  ;;  %vm1092_vm8 = vcmp.lt.s32.totalorder %v6581_v19, 3 }
 0x1bc   :  { %v2275_v30 = vadd.f32 -0.4999988, %v2274_v44  ;;  %v2282_v45 = vadd.f32 -0.16666654, %v2281_v33  ;;  %v6598_v51 = vshrl.u32 %v692_v20, 30  ;;  %v356_v28 = vsel %vm42_vm0, %v5706_v38, %v272_v5 }
 0x1bd   :  { %v1099_v36 = vsel %vm1093_vm3, %v1086_v10, 920167782  ;;  %vm2289_vm5 = vcmp.lt.s32.totalorder %v6570_v7, 2  ;;  %v1098_v23 = vsel %vm1090_vm7, %v1077_v55, %v1080_v29  ;;  %vm2286_vm9 = vweird.f32 %v6201_v54 }
 0x1be   :  { %v2276_v63 = vmul.f32 %v2275_v30, %v2271_v14  ;;  %v2283_v15 = vmul.f32 %v2282_v45, %v2271_v14  ;;  %v694_v16 = vshll.u32 %v6598_v51, 30  ;;  %vm1091_vm10 = vcmp.lt.s32.totalorder %v6581_v19, 2 }
 0x1bf   :  { %v1100_v48 = vsel %vm1092_vm8, %v1083_v37, %v1099_v36  ;;  %v1103_v1 = vsel %vm1093_vm3, %v1089_v46, 1326507024  ;;  %v6619_v38 = vshll.u32 %v1066_v62, 8  ;;  %v1102_v6 = vsel %vm1090_vm7, %v1080_v29, %v1083_v37 }
 0x1c0   :  { %v2277_v14 = vadd.f32 1.0, %v2276_v63  ;;  %v2284_v9 = vadd.f32 1.0, %v2283_v15  ;;  %v695_v61 = vsub.s32 %v691_v21, %v694_v16  ;;  %vm2293_vm11 = vcmp.eq.s32.totalorder %v6570_v7, 2 }
 0x1c1   :  { %v1101_v34 = vsel %vm1091_vm10, %v1098_v23, %v1100_v48  ;;  %v1104_v11 = vsel %vm1092_vm8, %v1086_v10, %v1103_v1  ;;  %v388_v18 = vmul.f32 %v356_v28, %v5727_v53  ;;  %v1107_v17 = vand.u32 65535, %v6619_v38 }
 0x1c2   :  { %v2285_v22 = vmul.f32 %v2284_v9, %v6568_v58  ;;  %v2294_v52 = vxor.u32 2147483648, %v2277_v14  ;;  %vm696_vm13 = vcmp.lt.s32.totalorder %v695_v61, 0  ;;  %v697_v35 = vsub.s32 0, %v695_v61 }
 0x1c3   :  { %v1105_v21 = vsel %vm1091_vm10, %v1102_v6, %v1104_v11  ;;  %v1108_v59 = vshrl.u32 %v6619_v38, 16  ;;  %v1132_v44 = vshrl.u32 %v1101_v34, 16  ;;  %v1074_v10 = vshrl.u32 %v9488_v26, %v6579_v47 }
 0x1c4   :  { %v2291_v33 = vxor.u32 2147483648, %v2285_v22  ;;  %v698_v20 = vsel %vm696_vm13, %v697_v35, %v695_v61  ;;  %v1109_v5 = vand.u32 65535, %v1105_v21  ;;  %v1095_v58 = vsel %vm1093_vm3, %v1083_v37, 2102212464 }
 0x1c5   :  { %v699_v62 = vclz %v698_v20  ;;  %v1110_v46 = vshrl.u32 %v1105_v21, 16  ;;  %v1131_v30 = vand.u32 65535, %v1101_v34  ;;  %v2295_v36 = vsel %vm2293_vm11, %v2294_v52, %v2285_v22 }
 0x1c6   :  { %v2292_v45 = vsel %vm2290_vm4, %v2277_v14, %v2291_v33  ;;  %v687_v28 = vadd.s32 %v6563_v41, %v6559_v56  ;;  %v6646_v63 = vsel %vm1090_vm7, %v1074_v10, %v1077_v55  ;;  %v1113_v37 = vmul.u32 %v1109_v5, %v1108_v59 }
 0x1c7   :  { %v2296_v47 = vsel %vm2289_vm5, %v2292_v45, %v2295_v36  ;;  %v5441_v15 = vadd.s32 4294967294, %v699_v62  ;;  %v1134_v16 = vmul.u32 %v1132_v44, %v1107_v17  ;;  %vm595_vm15 = vcmp.lt.s32.totalorder %v6414_v8, 0 }
 0x1c8   :  { %v2297_v23 = vsel %vm2286_vm9, nan, %v2296_v47  ;;  %v717_v48 = vsub.s32 4, %v6598_v51  ;;  %v1096_v56 = vsel %vm1092_vm8, %v1080_v29, %v1095_v58  ;;  %v1112_v41 = vmul.u32 %v1110_v46, %v1107_v17 }
 0x1c9   :  { %5410 = vst.msk [vmem:[%s9457_s1 + $0x58] sm:$0xff] %vm5398_vm6, %v2297_v23  ;;  %vm5442_vm12 = vcmp.lt.s32.totalorder %v5441_v15, 0  ;;  %v1133_v7 = vmul.u32 %v1131_v30, %v1107_v17  ;;  %v1135_v55 = vmul.u32 %v1131_v30, %v1108_v59  ;;  %v6661_v1 = vadd.f32 %v388_v18, %v5729_v57 }
 0x1ca   :  { %v702_v54 = vsel %vm5442_vm12, 0, %v5441_v15  ;;  %v1111_v14 = vmul.u32 %v1109_v5, %v1107_v17  ;;  %v1114_v9 = vmul.u32 %v1110_v46, %v1108_v59  ;;  %v1115_v6 = vshll.u32 %v1112_v41, 16 }
 0x1cb   :  { %v703_v34 = vsub.s32 32, %v702_v54  ;;  %v707_v11 = vsub.s32 4294967266, %v702_v54  ;;  %v1117_v22 = vshll.u32 %v1113_v37, 16  ;;  %v1137_v29 = vshll.u32 %v1134_v16, 16 }
 0x1cc   :  { %v704_v52 = vshll.u32 %v695_v61, %v702_v54  ;;  %vm1119_vm14 = vc.u32 %v1111_v14, %v1115_v6  ;;  %v1121_v35 = vadd.s32 %v1115_v6, %v1111_v14  ;;  %v1136_v21 = vmul.u32 %v1132_v44, %v1108_v59  ;;  %v240_v59 = vpop.permute.xlu0 %239 }
 0x1cd   :  { %v705_v33 = vshrl.u32 %v687_v28, %v703_v34  ;;  %v708_v20 = vadd.s32 127, %v707_v11  ;;  %v1120_v10 = vsel %vm1119_vm14, 1, %v9494_v49  ;;  %v1139_v62 = vshll.u32 %v1135_v55, 16 }
 0x1ce   :  { %v1122_v58 = vadd.s32 %v1120_v10, %v1114_v9  ;;  %vm1123_vm1 = vc.u32 %v1121_v35, %v1117_v22  ;;  %vm1141_vm2 = vc.u32 %v1133_v7, %v1137_v29  ;;  %v1143_v18 = vadd.s32 %v1137_v29, %v1133_v7 }
 0x1cf   :  { %v706_v17 = vor.u32 %v705_v33, %v704_v52  ;;  %v709_v5 = vshll.u32 %v708_v20, 23  ;;  %v1124_v46 = vsel %vm1123_vm1, 1, %v9494_v49  ;;  %v1142_v30 = vsel %vm1141_vm2, 1, %v9494_v49 }
 0x1d0   :  { %v1116_v45 = vshrl.u32 %v1112_v41, 16  ;;  %v1126_v61 = vadd.s32 %v1124_v46, %v1122_v58  ;;  %v1144_v36 = vadd.s32 %v1142_v30, %v1136_v21  ;;  %vm1145_vm3 = vc.u32 %v1143_v18, %v1139_v62 }
 0x1d1   :  { %v710_v44 = vor.u32 4788187, %v709_v5  ;;  %v718_v28 = vsel %vm595_vm15, %v717_v48, %v6598_v51  ;;  %v1118_v47 = vshrl.u32 %v1113_v37, 16  ;;  %v1146_v15 = vsel %vm1145_vm3, 1, %v9494_v49 }
 0x1d2   :  { %v1127_v23 = vadd.s32 %v1126_v61, %v1116_v45  ;;  %v1138_v7 = vshrl.u32 %v1134_v16, 16  ;;  %v1148_v54 = vadd.s32 %v1146_v15, %v1144_v36  ;;  %v2608_v14 = vand.u32 2147483647, %v6661_v1 }
 0x1d3   :  { %v711_v9 = vand.u32 2147483647, %v710_v44  ;;  %v713_v6 = vcvt.s32.f32 %v706_v17  ;;  %v2611_v41 = vand.u32 2139095040, %v6661_v1  ;;  %v348_v34 = vsel %vm42_vm0, %v6058_v4, %v240_v59 }
 0x1d4   :  { %v9512_v11 = vand.u32 2147483647, %v6414_v8  ;;  %v1128_v37 = vadd.s32 %v1127_v23, %v1118_v47  ;;  %v1140_v48 = vshrl.u32 %v1135_v55, 16  ;;  %v1149_v16 = vadd.s32 %v1148_v54, %v1138_v7 }
 0x1d5   :  { %v714_v22 = vmul.f32 %v713_v6, %v711_v9  ;;  %v1147_v52 = vadd.s32 %v1143_v18, %v1139_v62  ;;  %v2612_v35 = vshrl.u32 %v2611_v41, 23  ;;  %v1097_v21 = vsel %vm1091_vm10, %v6646_v63, %v1096_v56 }
 0x1d6   :  { %vm6677_vm4 = vcmp.le.f32.partialorder %v9512_v11, 0.7853982  ;;  %v1150_v4 = vadd.s32 %v1149_v16, %v1140_v48  ;;  %v2615_v33 = vand.u32 8388607, %v2608_v14  ;;  %v380_v20 = vmul.f32 %v348_v34, %v5727_v53 }
 0x1d7   :  { %v720_v29 = vsel %vm6677_vm4, 0, %v718_v28  ;;  %v715_v10 = vxor.u32 2147483648, %v714_v22  ;;  %vm1153_vm7 = vc.u32 %v1128_v37, %v1147_v52  ;;  %v5479_v55 = vadd.s32 4294967169, %v2612_v35 }
 0x1d8   :  { %v1154_v58 = vadd.s32 1, %v1150_v4  ;;  %v737_v5 = vadd.s32 3, %v720_v29  ;;  %v1151_v62 = vmul.u32 %v6619_v38, %v1097_v21  ;;  %v2616_v56 = vor.u32 8388608, %v2615_v33 }
 0x1d9   :  { %v716_v17 = vsel %vm595_vm15, %v715_v10, %v714_v22  ;;  %v2618_v18 = vadd.s32 1, %v5479_v55  ;;  %v6696_v46 = vadd.f32 %v380_v20, %v5729_v57  ;;  %vm1060_vm5 = vcmp.lt.s32.totalorder %v6469_v12, 0 }
 0x1da   :  { %v719_v19 = vsel %vm6677_vm4, %v6414_v8, %v716_v17  ;;  %v1155_v63 = vsel %vm1153_vm7, %v1154_v58, %v1150_v4  ;;  %v6698_v28 = vand.u32 3, %v737_v5  ;;  %v6700_v47 = vshll.u32 %v2616_v56, 8 }
 0x1db   :  { %v721_v30 = vmul.f32 %v719_v19, %v719_v19  ;;  %v1156_v45 = vadd.s32 %v1155_v63, %v1151_v62  ;;  %vm2619_vm8 = vcmp.gt.s32.totalorder %v2618_v18, 0  ;;  %v1371_v15 = vand.u32 2139095040, %v6696_v46 }
 0x1dc   :  { %v2620_v61 = vsel %vm2619_vm8, %v2618_v18, 0  ;;  %v6706_v11 = vadd.s32 %v1147_v52, %v1128_v37  ;;  %v6709_v48 = vand.u32 65535, %v6700_v47  ;;  %v6712_v16 = vshrl.u32 %v6700_v47, 16 }
 0x1dd   :  { %v722_v36 = vmul.f32 -0.001358992, %v721_v30  ;;  %v729_v59 = vmul.f32 -0.00019511016, %v721_v30  ;;  %v1157_v44 = vadd.s32 536870912, %v1156_v45  ;;  %v2622_v38 = vand.u32 31, %v2620_v61 }
 0x1de   :  { %v6703_v9 = vshrl.u32 %v2620_v61, 5  ;;  %v1368_v22 = vand.u32 2147483647, %v6696_v46  ;;  %v6715_v29 = vshrl.u32 %v1371_v15, 23  ;;  %vm743_vm9 = vcmp.eq.s32.totalorder %v6698_v28, 2 }
 0x1df   :  { %v723_v23 = vadd.f32 0.041655596, %v722_v36  ;;  %v730_v7 = vadd.f32 0.008332121, %v729_v59  ;;  %v1158_v54 = vshrl.u32 %v1157_v44, 30  ;;  %v2623_v6 = vsub.s32 32, %v2622_v38 }
 0x1e0   :  { %v2625_v37 = vshll.u32 %v9488_v26, %v2622_v38  ;;  %vm2640_vm10 = vcmp.lt.s32.totalorder %v6703_v9, 1  ;;  %vm740_vm11 = vcmp.eq.s32.totalorder %v6698_v28, 0  ;;  %v2628_v33 = vshll.u32 %v9489_v32, %v2622_v38 }
 0x1e1   :  { %v724_v41 = vmul.f32 %v723_v23, %v721_v30  ;;  %v731_v34 = vmul.f32 %v730_v7, %v721_v30  ;;  %v1159_v51 = vshll.u32 %v1158_v54, 30  ;;  %v2626_v52 = vshrl.u32 %v9489_v32, %v2623_v6 }
 0x1e2   :  { %v2629_v20 = vshrl.u32 %v9491_v50, %v2623_v6  ;;  %v2632_v10 = vshrl.u32 %v9490_v60, %v2623_v6  ;;  %vm739_vm13 = vcmp.lt.s32.totalorder %v6698_v28, 2  ;;  %vm736_vm12 = vweird.f32 %v6414_v8 }
 0x1e3   :  { %v725_v35 = vadd.f32 -0.4999988, %v724_v41  ;;  %v732_v21 = vadd.f32 -0.16666654, %v731_v34  ;;  %v6718_v4 = vsub.s32 %v1156_v45, %v1159_v51  ;;  %v1182_v5 = vsub.s32 4, %v1158_v54 }
 0x1e4   :  { %v2631_v62 = vshll.u32 %v9491_v50, %v2622_v38  ;;  %v2634_v18 = vshll.u32 %v9490_v60, %v2622_v38  ;;  %v2635_v63 = vshrl.u32 %v9492_v27, %v2623_v6  ;;  %v2627_v59 = vor.u32 %v2626_v52, %v2625_v37 }
 0x1e5   :  { %v726_v55 = vmul.f32 %v725_v35, %v721_v30  ;;  %v733_v58 = vmul.f32 %v732_v21, %v721_v30  ;;  %vm1161_vm15 = vcmp.lt.s32.totalorder %v6718_v4, 0  ;;  %v1162_v17 = vsub.s32 0, %v6718_v4 }
 0x1e6   :  { %v2638_v30 = vshrl.u32 %v9493_v0, %v2623_v6  ;;  %v2630_v44 = vor.u32 %v2629_v20, %v2628_v33  ;;  %v2636_v15 = vor.u32 %v2635_v63, %v2634_v18  ;;  %v2633_v41 = vor.u32 %v2632_v10, %v2631_v62 }
 0x1e7   :  { %v727_v56 = vadd.f32 1.0, %v726_v55  ;;  %v734_v45 = vadd.f32 1.0, %v733_v58  ;;  %v1163_v61 = vsel %vm1161_vm15, %v1162_v17, %v6718_v4  ;;  %v2637_v34 = vshll.u32 %v9492_v27, %v2622_v38 }
 0x1e8   :  { %v1164_v36 = vclz %v1163_v61  ;;  %v6739_v35 = vsel %vm1060_vm5, %v1182_v5, %v1158_v54  ;;  %v2624_v21 = vshrl.u32 %v9488_v26, %v2623_v6  ;;  %vm2641_vm14 = vcmp.lt.s32.totalorder %v6703_v9, 2 }
 0x1e9   :  { %v735_v23 = vmul.f32 %v734_v45, %v719_v19  ;;  %v744_v7 = vxor.u32 2147483648, %v727_v56  ;;  %v2639_v58 = vor.u32 %v2638_v30, %v2637_v34  ;;  %vm2642_vm1 = vcmp.lt.s32.totalorder %v6703_v9, 3 }
 0x1ea   :  { %v5450_v51 = vadd.s32 4294967294, %v1164_v36  ;;  %vm2643_vm2 = vcmp.lt.s32.totalorder %v6703_v9, 4  ;;  %v2648_v38 = vsel %vm2640_vm10, %v2627_v59, %v2630_v44  ;;  %v2644_v52 = vsel %vm2640_vm10, %v2624_v21, %v2627_v59 }
 0x1eb   :  { %v741_v55 = vxor.u32 2147483648, %v735_v23  ;;  %v745_v19 = vsel %vm743_vm9, %v744_v7, %v735_v23  ;;  %v2649_v54 = vsel %vm2643_vm2, %v2636_v15, 920167782  ;;  %v2645_v5 = vsel %vm2643_vm2, %v2633_v41, 2102212464 }
 0x1ec   :  { %vm5451_vm3 = vcmp.lt.s32.totalorder %v5450_v51, 0  ;;  %v2650_v33 = vsel %vm2642_vm1, %v2633_v41, %v2649_v54  ;;  %v2653_v8 = vsel %vm2643_vm2, %v2639_v58, 1326507024  ;;  %v5455_v59 = vadd.s32 4294967169, %v6715_v29 }
 0x1ed   :  { %v742_v6 = vsel %vm740_vm11, %v727_v56, %v741_v55  ;;  %v1167_v37 = vsel %vm5451_vm3, 0, %v5450_v51  ;;  %v2651_v63 = vsel %vm2641_vm14, %v2648_v38, %v2650_v33  ;;  %v2652_v56 = vsel %vm2640_vm10, %v2630_v44, %v2633_v41 }
 0x1ee   :  { %v746_v20 = vsel %vm739_vm13, %v742_v6, %v745_v19  ;;  %v1168_v10 = vsub.s32 32, %v1167_v37  ;;  %v1172_v17 = vsub.s32 4294967266, %v1167_v37  ;;  %v1169_v18 = vshll.u32 %v6718_v4, %v1167_v37 }
 0x1ef   :  { %v747_v62 = vsel %vm736_vm12, nan, %v746_v20  ;;  %v2681_v61 = vand.u32 65535, %v2651_v63  ;;  %v2646_v4 = vsel %vm2642_vm1, %v2630_v44, %v2645_v5  ;;  %v2654_v30 = vsel %vm2642_vm1, %v2636_v15, %v2653_v8 }
 0x1f0   :  { %5400 = vst.msk [vmem:[%s9457_s1 + $0x8] sm:$0xff] %vm5398_vm6, %v747_v62  ;;  %v1170_v28 = vshrl.u32 %v6706_v11, %v1168_v10  ;;  %v1173_v45 = vadd.s32 127, %v1172_v17  ;;  %v2682_v36 = vshrl.u32 %v2651_v63, 16  ;;  %v9515_v23 = vand.u32 2147483647, %v6469_v12 }
 0x1f1   :  { %v2655_v34 = vsel %vm2641_vm14, %v2652_v56, %v2654_v30  ;;  %v2685_v15 = vmul.u32 %v2681_v61, %v6712_v16  ;;  %v6795_v58 = vsel %vm2641_vm14, %v2644_v52, %v2646_v4  ;;  %v6799_v19 = vand.u32 8388607, %v1368_v22 }
 0x1f2   :  { %vm6782_vm4 = vcmp.le.f32.partialorder %v9515_v23, 0.7853982  ;;  %v1171_v11 = vor.u32 %v1170_v28, %v1169_v18  ;;  %v1174_v41 = vshll.u32 %v1173_v45, 23  ;;  %v2659_v51 = vand.u32 65535, %v2655_v34 }
 0x1f3   :  { %v2660_v21 = vshrl.u32 %v2655_v34, 16  ;;  %v2684_v44 = vmul.u32 %v2682_v36, %v6709_v48  ;;  %v1185_v29 = vsel %vm6782_vm4, 0, %v6739_v35  ;;  %v2683_v6 = vmul.u32 %v2681_v61, %v6709_v48 }
 0x1f4   :  { %v1175_v55 = vor.u32 4788187, %v1174_v41  ;;  %v2663_v54 = vmul.u32 %v2659_v51, %v6712_v16  ;;  %v1378_v37 = vadd.s32 1, %v5455_v59  ;;  %v1178_v20 = vcvt.s32.f32 %v1171_v11 }
 0x1f5   :  { %v2662_v38 = vmul.u32 %v2660_v21, %v6709_v48  ;;  %v2686_v10 = vmul.u32 %v2682_v36, %v6712_v16  ;;  %v2687_v35 = vshll.u32 %v2684_v44, 16  ;;  %v2661_v9 = vmul.u32 %v2659_v51, %v6709_v48 }
 0x1f6   :  { %v1176_v33 = vand.u32 2147483647, %v1175_v55  ;;  %v2664_v52 = vmul.u32 %v2660_v21, %v6712_v16  ;;  %v2689_v5 = vshll.u32 %v2685_v15, 16  ;;  %v2667_v18 = vshll.u32 %v2663_v54, 16 }
 0x1f7   :  { %v2665_v17 = vshll.u32 %v2662_v38, 16  ;;  %vm2691_vm7 = vc.u32 %v2683_v6, %v2687_v35  ;;  %v2693_v63 = vadd.s32 %v2687_v35, %v2683_v6  ;;  %vm1379_vm9 = vcmp.gt.s32.totalorder %v1378_v37, 0 }
 0x1f8   :  { %v1179_v62 = vmul.f32 %v1178_v20, %v1176_v33  ;;  %v2692_v28 = vsel %vm2691_vm7, 1, %v9494_v49  ;;  %v2688_v48 = vshrl.u32 %v2684_v44, 16  ;;  %v1380_v23 = vsel %vm1379_vm9, %v1378_v37, 0 }
 0x1f9   :  { %vm2669_vm8 = vc.u32 %v2661_v9, %v2665_v17  ;;  %v2671_v56 = vadd.s32 %v2665_v17, %v2661_v9  ;;  %v2694_v61 = vadd.s32 %v2692_v28, %v2686_v10  ;;  %vm2695_vm10 = vc.u32 %v2693_v63, %v2689_v5 }
 0x1fa   :  { %v1180_v45 = vxor.u32 2147483648, %v1179_v62  ;;  %v2670_v8 = vsel %vm2669_vm8, 1, %v9494_v49  ;;  %v2696_v16 = vsel %vm2695_vm10, 1, %v9494_v49  ;;  %v2666_v41 = vshrl.u32 %v2662_v38, 16 }
 0x1fb   :  { %v2672_v4 = vadd.s32 %v2670_v8, %v2664_v52  ;;  %vm2673_vm11 = vc.u32 %v2671_v56, %v2667_v18  ;;  %v2698_v59 = vadd.s32 %v2696_v16, %v2694_v61  ;;  %v1382_v51 = vand.u32 31, %v1380_v23 }
 0x1fc   :  { %v1181_v30 = vsel %vm1060_vm5, %v1180_v45, %v1179_v62  ;;  %v2674_v36 = vsel %vm2673_vm11, 1, %v9494_v49  ;;  %v2690_v55 = vshrl.u32 %v2685_v15, 16  ;;  %v1376_v44 = vor.u32 8388608, %v6799_v19 }
 0x1fd   :  { %v1184_v11 = vsel %vm6782_vm4, %v6469_v12, %v1181_v30  ;;  %v2676_v34 = vadd.s32 %v2674_v36, %v2672_v4  ;;  %v2699_v6 = vadd.s32 %v2698_v59, %v2688_v48  ;;  %v1202_v33 = vadd.s32 3, %v1185_v29 }
 0x1fe   :  { %v1186_v21 = vmul.f32 %v1184_v11, %v1184_v11  ;;  %v2668_v20 = vshrl.u32 %v2663_v54, 16  ;;  %v6817_v35 = vsub.s32 32, %v1382_v51  ;;  %v2701_v7 = vmul.u32 %v6700_v47, %v6795_v58 }
 0x1ff   :  { %v2677_v10 = vadd.s32 %v2676_v34, %v2666_v41  ;;  %v2700_v37 = vadd.s32 %v2699_v6, %v2690_v55  ;;  %v6823_v38 = vadd.s32 %v2693_v63, %v2689_v5  ;;  %v6825_v62 = vshrl.u32 %v1380_v23, 5 }
 0x200   :  { %v1187_v9 = vmul.f32 -0.001358992, %v1186_v21  ;;  %v1194_v52 = vmul.f32 -0.00019511016, %v1186_v21  ;;  %v1386_v15 = vshrl.u32 %v9489_v32, %v6817_v35  ;;  %v1389_v18 = vshrl.u32 %v9491_v50, %v6817_v35 }
 0x201   :  { %v6821_v17 = vadd.s32 %v2677_v10, %v2668_v20  ;;  %v2704_v54 = vadd.s32 1, %v2700_v37  ;;  %v1385_v47 = vshll.u32 %v9488_v26, %v1382_v51  ;;  %v1388_v58 = vshll.u32 %v9489_v32, %v1382_v51 }
 0x202   :  { %v1188_v29 = vadd.f32 0.041655596, %v1187_v9  ;;  %v1195_v19 = vadd.f32 0.008332121, %v1194_v52  ;;  %v1392_v5 = vshrl.u32 %v9490_v60, %v6817_v35  ;;  %v1391_v45 = vshll.u32 %v9491_v50, %v1382_v51 }
 0x203   :  { %vm2703_vm5 = vc.u32 %v6821_v17, %v6823_v38  ;;  %v1387_v61 = vor.u32 %v1386_v15, %v1385_v47  ;;  %v1394_v4 = vshll.u32 %v9490_v60, %v1382_v51  ;;  %v1395_v48 = vshrl.u32 %v9492_v27, %v6817_v35 }
 0x204   :  { %v1189_v63 = vmul.f32 %v1188_v29, %v1186_v21  ;;  %v1196_v56 = vmul.f32 %v1195_v19, %v1186_v21  ;;  %v2705_v28 = vsel %vm2703_vm5, %v2704_v54, %v2700_v37  ;;  %v1390_v36 = vor.u32 %v1389_v18, %v1388_v58 }
 0x205   :  { %v2706_v8 = vadd.s32 %v2705_v28, %v2701_v7  ;;  %v1398_v59 = vshrl.u32 %v9493_v0, %v6817_v35  ;;  %v1393_v41 = vor.u32 %v1392_v5, %v1391_v45  ;;  %v1396_v34 = vor.u32 %v1395_v48, %v1394_v4 }
 0x206   :  { %v1190_v16 = vadd.f32 -0.4999988, %v1189_v63  ;;  %v1197_v30 = vadd.f32 -0.16666654, %v1196_v56  ;;  %v1397_v55 = vshll.u32 %v9492_v27, %v1382_v51  ;;  %v1203_v10 = vand.u32 3, %v1202_v33 }
 0x207   :  { %v2707_v23 = vadd.s32 536870912, %v2706_v8  ;;  %vm1201_vm13 = vweird.f32 %v6469_v12  ;;  %vm1400_vm15 = vcmp.lt.s32.totalorder %v6825_v62, 1  ;;  %vm1403_vm12 = vcmp.lt.s32.totalorder %v6825_v62, 4 }
 0x208   :  { %v1191_v6 = vmul.f32 %v1190_v16, %v1186_v21  ;;  %v1198_v20 = vmul.f32 %v1197_v30, %v1186_v21  ;;  %v1399_v52 = vor.u32 %v1398_v59, %v1397_v55  ;;  %vm1402_vm14 = vcmp.lt.s32.totalorder %v6825_v62, 3 }
 0x209   :  { %v6845_v9 = vshrl.u32 %v2707_v23, 30  ;;  %v1409_v15 = vsel %vm1403_vm12, %v1396_v34, 920167782  ;;  %v1408_v21 = vsel %vm1400_vm15, %v1387_v61, %v1390_v36  ;;  %v6857_v29 = vshll.u32 %v1376_v44, 8 }
 0x20a   :  { %v1192_v37 = vadd.f32 1.0, %v1191_v6  ;;  %v1199_v7 = vadd.f32 1.0, %v1198_v20  ;;  %v1410_v33 = vsel %vm1402_vm14, %v1393_v41, %v1409_v15  ;;  %vm1204_vm1 = vcmp.lt.s32.totalorder %v1203_v10, 2 }
 0x20b   :  { %v2709_v51 = vshll.u32 %v6845_v9, 30  ;;  %v1412_v18 = vsel %vm1400_vm15, %v1390_v36, %v1393_v41  ;;  %vm1205_vm2 = vcmp.eq.s32.totalorder %v1203_v10, 0  ;;  %vm1401_vm3 = vcmp.lt.s32.totalorder %v6825_v62, 2 }
 0x20c   :  { %v1200_v19 = vmul.f32 %v1199_v7, %v1184_v11  ;;  %v1209_v54 = vxor.u32 2147483648, %v1192_v37  ;;  %v1413_v58 = vsel %vm1403_vm12, %v1399_v52, 1326507024  ;;  %vm1208_vm4 = vcmp.eq.s32.totalorder %v1203_v10, 2 }
 0x20d   :  { %v2710_v47 = vsub.s32 %v2706_v8, %v2709_v51  ;;  %v1411_v63 = vsel %vm1401_vm3, %v1408_v21, %v1410_v33  ;;  %v1414_v11 = vsel %vm1402_vm14, %v1396_v34, %v1413_v58  ;;  %v1417_v28 = vand.u32 65535, %v6857_v29 }
 0x20e   :  { %v1206_v5 = vxor.u32 2147483648, %v1200_v19  ;;  %v1415_v56 = vsel %vm1401_vm3, %v1412_v18, %v1414_v11  ;;  %v1210_v8 = vsel %vm1208_vm4, %v1209_v54, %v1200_v19  ;;  %v1384_v59 = vshrl.u32 %v9488_v26, %v6817_v35 }
 0x20f   :  { %vm2711_vm7 = vcmp.lt.s32.totalorder %v2710_v47, 0  ;;  %v2712_v44 = vsub.s32 0, %v2710_v47  ;;  %v1419_v4 = vand.u32 65535, %v1415_v56  ;;  %v1420_v48 = vshrl.u32 %v1415_v56, 16 }
 0x210   :  { %v1207_v45 = vsel %vm1205_vm2, %v1192_v37, %v1206_v5  ;;  %v1418_v23 = vshrl.u32 %v6857_v29, 16  ;;  %v1405_v6 = vsel %vm1403_vm12, %v1393_v41, 2102212464  ;;  %v2702_v10 = vadd.s32 %v6823_v38, %v6821_v17 }
 0x211   :  { %v1211_v16 = vsel %vm1204_vm1, %v1207_v45, %v1210_v8  ;;  %v2713_v30 = vsel %vm2711_vm7, %v2712_v44, %v2710_v47  ;;  %v1422_v20 = vmul.u32 %v1420_v48, %v1417_v28  ;;  %v1441_v35 = vand.u32 65535, %v1411_v63 }
 0x212   :  { %v1212_v34 = vsel %vm1201_vm13, nan, %v1211_v16  ;;  %v2714_v55 = vclz %v2713_v30  ;;  %v1423_v52 = vmul.u32 %v1419_v4, %v1418_v23  ;;  %vm2610_vm8 = vcmp.lt.s32.totalorder %v6661_v1, 0 }
 0x213   :  { %5403 = vst.msk [vmem:[%s9457_s1 + $0x20] sm:$0xff] %vm5398_vm6, %v1212_v34  ;;  %v1404_v12 = vsel %vm1400_vm15, %v1384_v59, %v1387_v61  ;;  %v1421_v7 = vmul.u32 %v1419_v4, %v1417_v28  ;;  %v1425_v15 = vshll.u32 %v1422_v20, 16  ;;  %v2732_v41 = vsub.s32 4, %v6845_v9 }
 0x214   :  { %v5480_v37 = vadd.s32 4294967294, %v2714_v55  ;;  %v1406_v51 = vsel %vm1402_vm14, %v1390_v36, %v1405_v6  ;;  %v1424_v21 = vmul.u32 %v1420_v48, %v1418_v23  ;;  %v1442_v33 = vshrl.u32 %v1411_v63, 16  ;;  %v244_v36 = vpop.permute.xlu1 %243 }
 0x215   :  { %v1427_v19 = vshll.u32 %v1423_v52, 16  ;;  %vm1429_vm10 = vc.u32 %v1421_v7, %v1425_v15  ;;  %v1431_v17 = vadd.s32 %v1425_v15, %v1421_v7  ;;  %v1445_v58 = vmul.u32 %v1441_v35, %v1418_v23 }
 0x216   :  { %vm5481_vm9 = vcmp.lt.s32.totalorder %v5480_v37, 0  ;;  %v1430_v54 = vsel %vm1429_vm10, 1, %v9494_v49  ;;  %v1444_v18 = vmul.u32 %v1442_v33, %v1417_v28  ;;  %v1426_v11 = vshrl.u32 %v1422_v20, 16 }
 0x217   :  { %v2717_v38 = vsel %vm5481_vm9, 0, %v5480_v37  ;;  %v1432_v44 = vadd.s32 %v1430_v54, %v1424_v21  ;;  %vm1433_vm11 = vc.u32 %v1431_v17, %v1427_v19  ;;  %v1443_v56 = vmul.u32 %v1441_v35, %v1417_v28 }
 0x218   :  { %v2718_v5 = vsub.s32 32, %v2717_v38  ;;  %v2722_v61 = vsub.s32 4294967266, %v2717_v38  ;;  %v1446_v45 = vmul.u32 %v1442_v33, %v1418_v23  ;;  %v1447_v8 = vshll.u32 %v1444_v18, 16  ;;  %v284_v23 = vpop.permute.xlu2 %283 }
 0x219   :  { %v2719_v4 = vshll.u32 %v2710_v47, %v2717_v38  ;;  %v1434_v16 = vsel %vm1433_vm11, 1, %v9494_v49  ;;  %v1449_v59 = vshll.u32 %v1445_v58, 16  ;;  %v349_v28 = vsel %vm42_vm0, %v5772_v3, %v244_v36 }
 0x21a   :  { %v2720_v63 = vshrl.u32 %v2702_v10, %v2718_v5  ;;  %v2723_v48 = vadd.s32 127, %v2722_v61  ;;  %v1436_v30 = vadd.s32 %v1434_v16, %v1432_v44  ;;  %vm1451_vm5 = vc.u32 %v1443_v56, %v1447_v8 }
 0x21b   :  { %v1453_v34 = vadd.s32 %v1447_v8, %v1443_v56  ;;  %v1452_v37 = vsel %vm1451_vm5, 1, %v9494_v49  ;;  %v2733_v47 = vsel %vm2610_vm8, %v2732_v41, %v6845_v9  ;;  %v1428_v7 = vshrl.u32 %v1423_v52, 16 }
 0x21c   :  { %v2721_v55 = vor.u32 %v2720_v63, %v2719_v4  ;;  %v2724_v6 = vshll.u32 %v2723_v48, 23  ;;  %v1437_v20 = vadd.s32 %v1436_v30, %v1426_v11  ;;  %v1454_v10 = vadd.s32 %v1452_v37, %v1446_v45 }
 0x21d   :  { %vm1455_vm13 = vc.u32 %v1453_v34, %v1449_v59  ;;  %v381_v21 = vmul.f32 %v349_v28, %v5727_v53  ;;  %v1448_v19 = vshrl.u32 %v1444_v18, 16  ;;  %v359_v3 = vsel %vm42_vm0, %v5708_v39, %v284_v23 }
 0x21e   :  { %v2725_v35 = vor.u32 4788187, %v2724_v6  ;;  %v1456_v15 = vsel %vm1455_vm13, 1, %v9494_v49  ;;  %v2728_v33 = vcvt.s32.f32 %v2721_v55  ;;  %v1438_v54 = vadd.s32 %v1437_v20, %v1428_v7 }
 0x21f   :  { %v1458_v17 = vadd.s32 %v1456_v15, %v1454_v10  ;;  %v6906_v9 = vadd.f32 %v381_v21, %v5729_v57  ;;  %v391_v41 = vmul.f32 %v359_v3, %v5727_v53  ;;  %vm6911_vm15 = vcmp.le.f32.partialorder %v2608_v14, 0.7853982 }
 0x220   :  { %v2726_v38 = vand.u32 2147483647, %v2725_v35  ;;  %v1450_v5 = vshrl.u32 %v1445_v58, 16  ;;  %v1457_v11 = vadd.s32 %v1453_v34, %v1449_v59  ;;  %v2735_v56 = vsel %vm6911_vm15, 0, %v2733_v47 }
 0x221   :  { %v1459_v18 = vadd.s32 %v1458_v17, %v1448_v19  ;;  %v1523_v44 = vand.u32 2147483647, %v6906_v9  ;;  %v1526_v39 = vand.u32 2139095040, %v6906_v9  ;;  %v1407_v45 = vsel %vm1401_vm3, %v1404_v12, %v1406_v51 }
 0x222   :  { %v2729_v61 = vmul.f32 %v2728_v33, %v2726_v38  ;;  %vm1463_vm12 = vc.u32 %v1438_v54, %v1457_v11  ;;  %v6922_v4 = vadd.f32 %v391_v41, %v5729_v57  ;;  %v1461_v16 = vmul.u32 %v6857_v29, %v1407_v45 }
 0x223   :  { %v1460_v8 = vadd.s32 %v1459_v18, %v1450_v5  ;;  %v1527_v14 = vshrl.u32 %v1526_v39, 23  ;;  %v1530_v63 = vand.u32 8388607, %v1523_v44  ;;  %v2752_v12 = vadd.s32 3, %v2735_v56 }
 0x224   :  { %v2730_v36 = vxor.u32 2147483648, %v2729_v61  ;;  %v3076_v6 = vand.u32 2139095040, %v6922_v4  ;;  %vm1370_vm1 = vcmp.lt.s32.totalorder %v6696_v46, 0  ;;  %v1462_v38 = vadd.s32 %v1457_v11, %v1438_v54 }
 0x225   :  { %v1464_v58 = vadd.s32 1, %v1460_v8  ;;  %v5458_v30 = vadd.s32 4294967169, %v1527_v14  ;;  %v1531_v37 = vor.u32 8388608, %v1530_v63  ;;  %v6933_v20 = vand.u32 3, %v2752_v12 }
 0x226   :  { %v2731_v48 = vsel %vm2610_vm8, %v2730_v36, %v2729_v61  ;;  %v3077_v15 = vshrl.u32 %v3076_v6, 23  ;;  %v3073_v52 = vand.u32 2147483647, %v6922_v4  ;;  %vm2751_vm8 = vweird.f32 %v6661_v1 }
 0x227   :  { %v2734_v62 = vsel %vm6911_vm15, %v6661_v1, %v2731_v48  ;;  %v1465_v51 = vsel %vm1463_vm12, %v1464_v58, %v1460_v8  ;;  %v1533_v55 = vadd.s32 1, %v5458_v30  ;;  %v6935_v33 = vshll.u32 %v1531_v37, 8 }
 0x228   :  { %v2736_v59 = vmul.f32 %v2734_v62, %v2734_v62  ;;  %v1466_v34 = vadd.s32 %v1465_v51, %v1461_v16  ;;  %vm2758_vm2 = vcmp.eq.s32.totalorder %v6933_v20, 2  ;;  %v6942_v39 = vadd.s32 4294967169, %v3077_v15 }
 0x229   :  { %vm1534_vm14 = vcmp.gt.s32.totalorder %v1533_v55, 0  ;;  %vm2755_vm3 = vcmp.eq.s32.totalorder %v6933_v20, 0  ;;  %v6949_v36 = vand.u32 65535, %v6935_v33  ;;  %vm2754_vm4 = vcmp.lt.s32.totalorder %v6933_v20, 2 }
 0x22a   :  { %v2737_v28 = vmul.f32 -0.001358992, %v2736_v59  ;;  %v2744_v23 = vmul.f32 -0.00019511016, %v2736_v59  ;;  %v1467_v47 = vadd.s32 536870912, %v1466_v34  ;;  %v1535_v29 = vsel %vm1534_vm14, %v1533_v55, 0 }
 0x22b   :  { %v1537_v21 = vand.u32 31, %v1535_v29  ;;  %v6945_v45 = vshrl.u32 %v1535_v29, 5  ;;  %vm6974_vm9 = vcmp.le.f32.partialorder %v1368_v22, 0.7853982 }
 0x22c   :  { %v2738_v10 = vadd.f32 0.041655596, %v2737_v28  ;;  %v2745_v35 = vadd.f32 0.008332121, %v2744_v23  ;;  %v1468_v7 = vshrl.u32 %v1467_v47, 30 }
 0x22d   :  { %v1538_v41 = vsub.s32 32, %v1537_v21  ;;  %v1540_v8 = vshll.u32 %v9488_v26, %v1537_v21  ;;  %v1543_v63 = vshll.u32 %v9489_v32, %v1537_v21  ;;  %v1546_v16 = vshll.u32 %v9491_v50, %v1537_v21 }
 0x22e   :  { %v2739_v19 = vmul.f32 %v2738_v10, %v2736_v59  ;;  %v2746_v17 = vmul.f32 %v2745_v35, %v2736_v59  ;;  %v1469_v3 = vshll.u32 %v1468_v7, 30  ;;  %v1492_v56 = vsub.s32 4, %v1468_v7 }
 0x22f   :  { %v1541_v58 = vshrl.u32 %v9489_v32, %v1538_v41  ;;  %v1544_v48 = vshrl.u32 %v9491_v50, %v1538_v41  ;;  %v1539_v6 = vshrl.u32 %v9488_v26, %v1538_v41  ;;  %v1550_v37 = vshrl.u32 %v9492_v27, %v1538_v41 }
 0x230   :  { %v2740_v5 = vadd.f32 -0.4999988, %v2739_v19  ;;  %v2747_v18 = vadd.f32 -0.16666654, %v2746_v17  ;;  %v6940_v61 = vsub.s32 %v1466_v34, %v1469_v3  ;;  %v6963_v55 = vsel %vm1370_vm1, %v1492_v56, %v1468_v7 }
 0x231   :  { %v1549_v47 = vshll.u32 %v9490_v60, %v1537_v21  ;;  %v1553_v29 = vshrl.u32 %v9493_v0, %v1538_v41  ;;  %v1542_v35 = vor.u32 %v1541_v58, %v1540_v8  ;;  %v1545_v15 = vor.u32 %v1544_v48, %v1543_v63 }
 0x232   :  { %v2741_v54 = vmul.f32 %v2740_v5, %v2736_v59  ;;  %v2748_v11 = vmul.f32 %v2747_v18, %v2736_v59  ;;  %vm1471_vm7 = vcmp.lt.s32.totalorder %v6940_v61, 0  ;;  %v1472_v14 = vsub.s32 0, %v6940_v61 }
 0x233   :  { %v1547_v59 = vshrl.u32 %v9490_v60, %v1538_v41  ;;  %v1552_v19 = vshll.u32 %v9492_v27, %v1537_v21  ;;  %v1551_v5 = vor.u32 %v1550_v37, %v1549_v47  ;;  %vm1555_vm11 = vcmp.lt.s32.totalorder %v6945_v45, 1 }
 0x234   :  { %v2742_v30 = vadd.f32 1.0, %v2741_v54  ;;  %v2749_v12 = vadd.f32 1.0, %v2748_v11  ;;  %v1473_v51 = vsel %vm1471_vm7, %v1472_v14, %v6940_v61  ;;  %vm1556_vm5 = vcmp.lt.s32.totalorder %v6945_v45, 2 }
 0x235   :  { %v1474_v34 = vclz %v1473_v51  ;;  %v1548_v3 = vor.u32 %v1547_v59, %v1546_v16  ;;  %v1554_v18 = vor.u32 %v1553_v29, %v1552_v19  ;;  %vm1557_vm13 = vcmp.lt.s32.totalorder %v6945_v45, 3 }
 0x236   :  { %v2750_v28 = vmul.f32 %v2749_v12, %v2734_v62  ;;  %v2759_v23 = vxor.u32 2147483648, %v2742_v30  ;;  %vm1558_vm15 = vcmp.lt.s32.totalorder %v6945_v45, 4  ;;  %v1559_v54 = vsel %vm1555_vm11, %v1539_v6, %v1542_v35 }
 0x237   :  { %v5456_v10 = vadd.s32 4294967294, %v1474_v34  ;;  %v1560_v14 = vsel %vm1558_vm15, %v1548_v3, 2102212464  ;;  %v1563_v58 = vsel %vm1555_vm11, %v1542_v35, %v1545_v15  ;;  %v1564_v63 = vsel %vm1558_vm15, %v1551_v5, 920167782 }
 0x238   :  { %v2756_v17 = vxor.u32 2147483648, %v2750_v28  ;;  %v2760_v7 = vsel %vm2758_vm2, %v2759_v23, %v2750_v28  ;;  %v1565_v1 = vsel %vm1557_vm13, %v1548_v3, %v1564_v63  ;;  %v1567_v51 = vsel %vm1555_vm11, %v1545_v15, %v1548_v3 }
 0x239   :  { %vm5457_vm10 = vcmp.lt.s32.totalorder %v5456_v10, 0  ;;  %v1566_v12 = vsel %vm1556_vm5, %v1563_v58, %v1565_v1  ;;  %v1568_v59 = vsel %vm1558_vm15, %v1554_v18, 1326507024  ;;  %v1573_v28 = vshrl.u32 %v6935_v33, 16 }
 0x23a   :  { %v2757_v21 = vsel %vm2755_vm3, %v2742_v30, %v2756_v17  ;;  %v1477_v41 = vsel %vm5457_vm10, 0, %v5456_v10  ;;  %v1561_v30 = vsel %vm1557_vm13, %v1545_v15, %v1560_v14  ;;  %v1597_v23 = vshrl.u32 %v1566_v12, 16 }
 0x23b   :  { %v2761_v22 = vsel %vm2754_vm4, %v2757_v21, %v2760_v7  ;;  %v1478_v56 = vsub.s32 32, %v1477_v41  ;;  %v1482_v8 = vsub.s32 4294967266, %v1477_v41  ;;  %v1479_v20 = vshll.u32 %v6940_v61, %v1477_v41 }
 0x23c   :  { %v2762_v11 = vsel %vm2751_vm8, nan, %v2761_v22  ;;  %v1596_v61 = vand.u32 65535, %v1566_v12  ;;  %v3083_v47 = vadd.s32 1, %v6942_v39  ;;  %v7019_v15 = vand.u32 8388607, %v3073_v52 }
 0x23d   :  { %5413 = vst.msk [vmem:[%s9457_s1 + $0x70] sm:$0xff] %vm5398_vm6, %v2762_v11  ;;  %v1480_v48 = vshrl.u32 %v1462_v38, %v1478_v56  ;;  %v1483_v16 = vadd.s32 127, %v1482_v8  ;;  %v1569_v38 = vsel %vm1557_vm13, %v1551_v5, %v1568_v59  ;;  %v1495_v19 = vsel %vm6974_vm9, 0, %v6963_v55 }
 0x23e   :  { %v1570_v37 = vsel %vm1556_vm5, %v1567_v51, %v1569_v38  ;;  %v7026_v17 = vsel %vm1556_vm5, %v1559_v54, %v1561_v30  ;;  %v1599_v7 = vmul.u32 %v1597_v23, %v6949_v36  ;;  %v1600_v3 = vmul.u32 %v1596_v61, %v1573_v28 }
 0x23f   :  { %v1481_v34 = vor.u32 %v1480_v48, %v1479_v20  ;;  %v1484_v6 = vshll.u32 %v1483_v16, 23  ;;  %v1574_v10 = vand.u32 65535, %v1570_v37  ;;  %v1575_v35 = vshrl.u32 %v1570_v37, 16 }
 0x240   :  { %v1598_v41 = vmul.u32 %v1596_v61, %v6949_v36  ;;  %v1601_v22 = vmul.u32 %v1597_v23, %v1573_v28  ;;  %v1602_v56 = vshll.u32 %v1599_v7, 16  ;;  %vm3084_vm12 = vcmp.gt.s32.totalorder %v3083_v47, 0 }
 0x241   :  { %v1485_v29 = vor.u32 4788187, %v1484_v6  ;;  %v1488_v39 = vcvt.s32.f32 %v1481_v34  ;;  %v1577_v18 = vmul.u32 %v1575_v35, %v6949_v36  ;;  %v1578_v21 = vmul.u32 %v1574_v10, %v1573_v28 }
 0x242   :  { %v1576_v55 = vmul.u32 %v1574_v10, %v6949_v36  ;;  %v1579_v11 = vmul.u32 %v1575_v35, %v1573_v28  ;;  %v1604_v14 = vshll.u32 %v1600_v3, 16  ;;  %vm1606_vm14 = vc.u32 %v1598_v41, %v1602_v56 }
 0x243   :  { %v1486_v5 = vand.u32 2147483647, %v1485_v29  ;;  %v1580_v45 = vshll.u32 %v1577_v18, 16  ;;  %v1582_v54 = vshll.u32 %v1578_v21, 16  ;;  %v1608_v58 = vadd.s32 %v1602_v56, %v1598_v41 }
 0x244   :  { %v1607_v48 = vsel %vm1606_vm14, 1, %v9494_v49  ;;  %v1603_v1 = vshrl.u32 %v1599_v7, 16  ;;  %v3085_v38 = vsel %vm3084_vm12, %v3083_v47, 0  ;;  %v1581_v37 = vshrl.u32 %v1577_v18, 16 }
 0x245   :  { %v1489_v8 = vmul.f32 %v1488_v39, %v1486_v5  ;;  %vm1584_vm2 = vc.u32 %v1576_v55, %v1580_v45  ;;  %v1586_v20 = vadd.s32 %v1580_v45, %v1576_v55  ;;  %v1609_v30 = vadd.s32 %v1607_v48, %v1601_v22 }
 0x246   :  { %v1585_v16 = vsel %vm1584_vm2, 1, %v9494_v49  ;;  %vm1610_vm3 = vc.u32 %v1608_v58, %v1604_v14  ;;  %v3087_v23 = vand.u32 31, %v3085_v38  ;;  %v1583_v29 = vshrl.u32 %v1578_v21, 16 }
 0x247   :  { %v1490_v63 = vxor.u32 2147483648, %v1489_v8  ;;  %v1587_v36 = vadd.s32 %v1585_v16, %v1579_v11  ;;  %vm1588_vm4 = vc.u32 %v1586_v20, %v1582_v54  ;;  %v1611_v51 = vsel %vm1610_vm3, 1, %v9494_v49 }
 0x248   :  { %v1589_v34 = vsel %vm1588_vm4, 1, %v9494_v49  ;;  %v1613_v6 = vadd.s32 %v1611_v51, %v1609_v30  ;;  %v1605_v10 = vshrl.u32 %v1600_v3, 16  ;;  %v7042_v41 = vsub.s32 32, %v3087_v23 }
 0x249   :  { %v1491_v12 = vsel %vm1370_vm1, %v1490_v63, %v1489_v8  ;;  %v1591_v28 = vadd.s32 %v1589_v34, %v1587_v36  ;;  %v1512_v22 = vadd.s32 3, %v1495_v19  ;;  %v1616_v56 = vmul.u32 %v6935_v33, %v7026_v17 }
 0x24a   :  { %v1494_v59 = vsel %vm6974_vm9, %v6696_v46, %v1491_v12  ;;  %v1614_v35 = vadd.s32 %v1613_v6, %v1603_v1  ;;  %v3081_v8 = vor.u32 8388608, %v7019_v15  ;;  %v7049_v11 = vadd.s32 %v1608_v58, %v1604_v14 }
 0x24b   :  { %v1496_v61 = vmul.f32 %v1494_v59, %v1494_v59  ;;  %v1592_v39 = vadd.s32 %v1591_v28, %v1581_v37  ;;  %v7051_v21 = vshrl.u32 %v3085_v38, 5  ;;  %v3090_v45 = vshll.u32 %v9488_v26, %v3087_v23 }
 0x24c   :  { %v1615_v62 = vadd.s32 %v1614_v35, %v1605_v10  ;;  %v3091_v19 = vshrl.u32 %v9489_v32, %v7042_v41  ;;  %v3094_v33 = vshrl.u32 %v9491_v50, %v7042_v41  ;;  %v3093_v17 = vshll.u32 %v9489_v32, %v3087_v23 }
 0x24d   :  { %v1497_v7 = vmul.f32 -0.001358992, %v1496_v61  ;;  %v1504_v5 = vmul.f32 -0.00019511016, %v1496_v61  ;;  %v7047_v18 = vadd.s32 %v1592_v39, %v1583_v29  ;;  %v3096_v14 = vshll.u32 %v9491_v50, %v3087_v23 }
 0x24e   :  { %v1619_v3 = vadd.s32 1, %v1615_v62  ;;  %v3097_v58 = vshrl.u32 %v9490_v60, %v7042_v41  ;;  %v3092_v1 = vor.u32 %v3091_v19, %v3090_v45  ;;  %v3099_v30 = vshll.u32 %v9490_v60, %v3087_v23 }
 0x24f   :  { %v1498_v47 = vadd.f32 0.041655596, %v1497_v7  ;;  %v1505_v55 = vadd.f32 0.008332121, %v1504_v5  ;;  %vm1618_vm1 = vc.u32 %v7047_v18, %v7049_v11  ;;  %v3100_v12 = vshrl.u32 %v9492_v27, %v7042_v41 }
 0x250   :  { %v1620_v15 = vsel %vm1618_vm1, %v1619_v3, %v1615_v62  ;;  %v3102_v36 = vshll.u32 %v9492_v27, %v3087_v23  ;;  %v3103_v51 = vshrl.u32 %v9493_v0, %v7042_v41  ;;  %v7070_v37 = vor.u32 %v3094_v33, %v3093_v17 }
 0x251   :  { %v1499_v54 = vmul.f32 %v1498_v47, %v1496_v61  ;;  %v1506_v63 = vmul.f32 %v1505_v55, %v1496_v61  ;;  %v1621_v16 = vadd.s32 %v1620_v15, %v1616_v56  ;;  %v1513_v28 = vand.u32 3, %v1512_v22 }
 0x252   :  { %v3098_v29 = vor.u32 %v3097_v58, %v3096_v14  ;;  %v3101_v10 = vor.u32 %v3100_v12, %v3099_v30  ;;  %v3104_v35 = vor.u32 %v3103_v51, %v3102_v36  ;;  %vm3108_vm7 = vcmp.lt.s32.totalorder %v7051_v21, 4 }
 0x253   :  { %v1500_v20 = vadd.f32 -0.4999988, %v1499_v54  ;;  %v1507_v48 = vadd.f32 -0.16666654, %v1506_v63  ;;  %v1622_v38 = vadd.s32 536870912, %v1621_v16  ;;  %vm1511_vm8 = vweird.f32 %v6696_v46 }
 0x254   :  { %vm3105_vm9 = vcmp.lt.s32.totalorder %v7051_v21, 1  ;;  %vm3107_vm10 = vcmp.lt.s32.totalorder %v7051_v21, 3  ;;  %vm1514_vm11 = vcmp.lt.s32.totalorder %v1513_v28, 2  ;;  %v3118_v55 = vsel %vm3108_vm7, %v3104_v35, 1326507024 }
 0x255   :  { %v1501_v34 = vmul.f32 %v1500_v20, %v1496_v61  ;;  %v1508_v6 = vmul.f32 %v1507_v48, %v1496_v61  ;;  %v7072_v39 = vshrl.u32 %v1622_v38, 30  ;;  %v3114_v61 = vsel %vm3108_vm7, %v3101_v10, 920167782  ;;  %v252_v48 = vpop.permute.xlu0 %251 }
 0x256   :  { %v3113_v56 = vsel %vm3105_vm9, %v3092_v1, %v7070_v37  ;;  %v3115_v47 = vsel %vm3107_vm10, %v3098_v29, %v3114_v61  ;;  %v7088_v3 = vshll.u32 %v3081_v8, 8  ;;  %vm3106_vm5 = vcmp.lt.s32.totalorder %v7051_v21, 2 }
 0x257   :  { %v1502_v7 = vadd.f32 1.0, %v1501_v34  ;;  %v1509_v5 = vadd.f32 1.0, %v1508_v6  ;;  %v1624_v62 = vshll.u32 %v7072_v39, 30  ;;  %vm1515_vm13 = vcmp.eq.s32.totalorder %v1513_v28, 0 }
 0x258   :  { %vm1518_vm15 = vcmp.eq.s32.totalorder %v1513_v28, 2  ;;  %v3116_v54 = vsel %vm3106_vm5, %v3113_v56, %v3115_v47  ;;  %v3119_v63 = vsel %vm3107_vm10, %v3101_v10, %v3118_v55  ;;  %v3089_v14 = vshrl.u32 %v9488_v26, %v7042_v41 }
 0x259   :  { %v1510_v23 = vmul.f32 %v1509_v5, %v1494_v59  ;;  %v1519_v22 = vxor.u32 2147483648, %v1502_v7  ;;  %v1625_v19 = vsub.s32 %v1621_v16, %v1624_v62  ;;  %v3117_v59 = vsel %vm3105_vm9, %v7070_v37, %v3098_v29 }
 0x25a   :  { %v3120_v58 = vsel %vm3106_vm5, %v3117_v59, %v3119_v63  ;;  %v3122_v20 = vand.u32 65535, %v7088_v3  ;;  %v3146_v36 = vand.u32 65535, %v3116_v54  ;;  %v3123_v41 = vshrl.u32 %v7088_v3, 16 }
 0x25b   :  { %v1516_v45 = vxor.u32 2147483648, %v1510_v23  ;;  %v1520_v15 = vsel %vm1518_vm15, %v1519_v22, %v1510_v23  ;;  %vm1626_vm12 = vcmp.lt.s32.totalorder %v1625_v19, 0  ;;  %v1627_v8 = vsub.s32 0, %v1625_v19 }
 0x25c   :  { %v3124_v12 = vand.u32 65535, %v3120_v58  ;;  %v3125_v34 = vshrl.u32 %v3120_v58, 16  ;;  %v3147_v6 = vshrl.u32 %v3116_v54, 16  ;;  %v1617_v38 = vadd.s32 %v7049_v11, %v7047_v18 }
 0x25d   :  { %v1517_v33 = vsel %vm1515_vm13, %v1502_v7, %v1516_v45  ;;  %v1628_v30 = vsel %vm1626_vm12, %v1627_v8, %v1625_v19  ;;  %v351_v46 = vsel %vm42_vm0, %v6102_v31, %v252_v48  ;;  %v3109_v10 = vsel %vm3105_vm9, %v3089_v14, %v3092_v1  ;;  %v256_v48 = vpop.permute.xlu1 %255 }
 0x25e   :  { %v1521_v17 = vsel %vm1514_vm11, %v1517_v33, %v1520_v15  ;;  %v1629_v51 = vclz %v1628_v30  ;;  %v3127_v35 = vmul.u32 %v3125_v34, %v3122_v20  ;;  %v3128_v7 = vmul.u32 %v3124_v12, %v3123_v41 }
 0x25f   :  { %v1522_v16 = vsel %vm1511_vm8, nan, %v1521_v17  ;;  %v1647_v5 = vsub.s32 4, %v7072_v39  ;;  %v3110_v61 = vsel %vm3108_vm7, %v3098_v29, 2102212464  ;;  %v3149_v23 = vmul.u32 %v3147_v6, %v3122_v20 }
 0x260   :  { %5405 = vst.msk [vmem:[%s9457_s1 + $0x30] sm:$0xff] %vm5398_vm6, %v1522_v16  ;;  %v5459_v28 = vadd.s32 4294967294, %v1629_v51  ;;  %v3150_v22 = vmul.u32 %v3146_v36, %v3123_v41  ;;  %v3126_v62 = vmul.u32 %v3124_v12, %v3122_v20  ;;  %v3130_v18 = vshll.u32 %v3127_v35, 16 }
 0x261   :  { %v3148_v11 = vmul.u32 %v3146_v36, %v3122_v20  ;;  %v3129_v47 = vmul.u32 %v3125_v34, %v3123_v41  ;;  %v3151_v31 = vmul.u32 %v3147_v6, %v3123_v41  ;;  %v3152_v55 = vshll.u32 %v3149_v23, 16 }
 0x262   :  { %vm5460_vm14 = vcmp.lt.s32.totalorder %v5459_v28, 0  ;;  %v3132_v1 = vshll.u32 %v3128_v7, 16  ;;  %vm3134_vm2 = vc.u32 %v3126_v62, %v3130_v18  ;;  %v3136_v33 = vadd.s32 %v3130_v18, %v3126_v62 }
 0x263   :  { %v1632_v56 = vsel %vm5460_vm14, 0, %v5459_v28  ;;  %v3135_v63 = vsel %vm3134_vm2, 1, %v9494_v49  ;;  %v3154_v15 = vshll.u32 %v3150_v22, 16  ;;  %vm3156_vm3 = vc.u32 %v3148_v11, %v3152_v55 }
 0x264   :  { %v1633_v45 = vsub.s32 32, %v1632_v56  ;;  %v1637_v59 = vsub.s32 4294967266, %v1632_v56  ;;  %v1634_v54 = vshll.u32 %v1625_v19, %v1632_v56  ;;  %v3137_v17 = vadd.s32 %v3135_v63, %v3129_v47 }
 0x265   :  { %vm3138_vm4 = vc.u32 %v3136_v33, %v3132_v1  ;;  %v3157_v14 = vsel %vm3156_vm3, 1, %v9494_v49  ;;  %v3158_v58 = vadd.s32 %v3152_v55, %v3148_v11  ;;  %v383_v20 = vmul.f32 %v351_v46, %v5727_v53 }
 0x266   :  { %v1635_v29 = vshrl.u32 %v1617_v38, %v1633_v45  ;;  %v1638_v8 = vadd.s32 127, %v1637_v59  ;;  %v3139_v12 = vsel %vm3138_vm4, 1, %v9494_v49  ;;  %v3159_v19 = vadd.s32 %v3157_v14, %v3151_v31 }
 0x267   :  { %v3131_v36 = vshrl.u32 %v3127_v35, 16  ;;  %v3141_v51 = vadd.s32 %v3139_v12, %v3137_v17  ;;  %vm3160_vm1 = vc.u32 %v3158_v58, %v3154_v15  ;;  %v7126_v41 = vadd.f32 %v383_v20, %v5729_v57 }
 0x268   :  { %v1636_v16 = vor.u32 %v1635_v29, %v1634_v54  ;;  %v1639_v30 = vshll.u32 %v1638_v8, 23  ;;  %v3133_v6 = vshrl.u32 %v3128_v7, 16  ;;  %v3161_v38 = vsel %vm3160_vm1, 1, %v9494_v49 }
 0x269   :  { %v352_v46 = vsel %vm42_vm0, %v5789_v2, %v256_v48  ;;  %v3142_v28 = vadd.s32 %v3141_v51, %v3131_v36  ;;  %v3153_v62 = vshrl.u32 %v3149_v23, 16  ;;  %v3163_v18 = vadd.s32 %v3161_v38, %v3159_v19 }
 0x26a   :  { %v1640_v34 = vor.u32 4788187, %v1639_v30  ;;  %v1833_v11 = vand.u32 2147483647, %v7126_v41  ;;  %v1643_v35 = vcvt.s32.f32 %v1636_v16  ;;  %v3111_v47 = vsel %vm3107_vm10, %v7070_v37, %v3110_v61 }
 0x26b   :  { %v1836_v31 = vand.u32 2139095040, %v7126_v41  ;;  %v3143_v7 = vadd.s32 %v3142_v28, %v3133_v6  ;;  %v3155_v55 = vshrl.u32 %v3150_v22, 16  ;;  %v3164_v45 = vadd.s32 %v3163_v18, %v3153_v62 }
 0x26c   :  { %v1641_v56 = vand.u32 2147483647, %v1640_v34  ;;  %v384_v59 = vmul.f32 %v352_v46, %v5727_v53  ;;  %vm1525_vm7 = vcmp.lt.s32.totalorder %v6906_v9, 0  ;;  %v3162_v23 = vadd.s32 %v3158_v58, %v3154_v15 }
 0x26d   :  { %v1837_v1 = vshrl.u32 %v1836_v31, 23  ;;  %v1648_v54 = vsel %vm1525_vm7, %v1647_v5, %v7072_v39  ;;  %v3112_v63 = vsel %vm3106_vm5, %v3109_v10, %v3111_v47  ;;  %v3165_v33 = vadd.s32 %v3164_v45, %v3155_v55 }
 0x26e   :  { %v1644_v2 = vmul.f32 %v1643_v35, %v1641_v56  ;;  %v1840_v37 = vand.u32 8388607, %v1833_v11  ;;  %vm3168_vm8 = vc.u32 %v3143_v7, %v3162_v23  ;;  %vm1524_vm9 = vcmp.le.f32.partialorder %v1523_v44, 0.7853982 }
 0x26f   :  { %v5464_v22 = vadd.s32 4294967169, %v1837_v1  ;;  %v3169_v29 = vadd.s32 1, %v3165_v33  ;;  %v7147_v8 = vadd.f32 %v384_v59, %v5729_v57  ;;  %v1650_v17 = vsel %vm1524_vm9, 0, %v1648_v54 }
 0x270   :  { %v1645_v61 = vxor.u32 2147483648, %v1644_v2  ;;  %v3166_v39 = vmul.u32 %v7088_v3, %v3112_v63  ;;  %v1841_v14 = vor.u32 8388608, %v1840_v37  ;;  %v1667_v48 = vadd.s32 3, %v1650_v17 }
 0x271   :  { %v1843_v21 = vadd.s32 1, %v5464_v22  ;;  %v3170_v5 = vsel %vm3168_vm8, %v3169_v29, %v3165_v33  ;;  %v1988_v44 = vand.u32 2147483647, %v7147_v8  ;;  %v1991_v3 = vand.u32 2139095040, %v7147_v8 }
 0x272   :  { %v1646_v15 = vsel %vm1525_vm7, %v1645_v61, %v1644_v2  ;;  %v3171_v20 = vadd.s32 %v3170_v5, %v3166_v39  ;;  %v7152_v51 = vshll.u32 %v1841_v14, 8  ;;  %v7155_v46 = vand.u32 3, %v1667_v48 }
 0x273   :  { %v1649_v10 = vsel %vm1524_vm9, %v6906_v9, %v1646_v15  ;;  %vm1844_vm10 = vcmp.gt.s32.totalorder %v1843_v21, 0  ;;  %v7157_v28 = vadd.s32 %v3162_v23, %v3143_v7  ;;  %v7161_v47 = vand.u32 8388607, %v1988_v44 }
 0x274   :  { %v1651_v58 = vmul.f32 %v1649_v10, %v1649_v10  ;;  %v1845_v16 = vsel %vm1844_vm10, %v1843_v21, 0  ;;  %v3172_v19 = vadd.s32 536870912, %v3171_v20  ;;  %vm3075_vm11 = vcmp.lt.s32.totalorder %v6922_v4, 0 }
 0x275   :  { %v1847_v36 = vand.u32 31, %v1845_v16  ;;  %v7164_v31 = vshrl.u32 %v1845_v16, 5  ;;  %v7167_v55 = vand.u32 65535, %v7152_v51  ;;  %v7170_v45 = vshrl.u32 %v7152_v51, 16 }
 0x276   :  { %v1652_v30 = vmul.f32 -0.001358992, %v1651_v58  ;;  %v1659_v12 = vmul.f32 -0.00019511016, %v1651_v58  ;;  %v3173_v38 = vshrl.u32 %v3172_v19, 30  ;;  %v1992_v7 = vshrl.u32 %v1991_v3, 23 }
 0x277   :  { %v1848_v62 = vsub.s32 32, %v1847_v36  ;;  %v1850_v1 = vshll.u32 %v9488_v26, %v1847_v36  ;;  %vm1670_vm5 = vcmp.eq.s32.totalorder %v7155_v46, 0  ;;  %vm1673_vm13 = vcmp.eq.s32.totalorder %v7155_v46, 2 }
 0x278   :  { %v1653_v34 = vadd.f32 0.041655596, %v1652_v30  ;;  %v1660_v6 = vadd.f32 0.008332121, %v1659_v12  ;;  %v3174_v35 = vshll.u32 %v3173_v38, 30  ;;  %v1853_v63 = vshll.u32 %v9489_v32, %v1847_v36 }
 0x279   :  { %v1851_v54 = vshrl.u32 %v9489_v32, %v1848_v62  ;;  %v1854_v33 = vshrl.u32 %v9491_v50, %v1848_v62  ;;  %v1857_v37 = vshrl.u32 %v9490_v60, %v1848_v62  ;;  %vm1669_vm15 = vcmp.lt.s32.totalorder %v7155_v46, 2 }
 0x27a   :  { %v1654_v18 = vmul.f32 %v1653_v34, %v1651_v58  ;;  %v1661_v56 = vmul.f32 %v1660_v6, %v1651_v58  ;;  %v7172_v23 = vsub.s32 %v3171_v20, %v3174_v35  ;;  %vm1666_vm14 = vweird.f32 %v6906_v9 }
 0x27b   :  { %v3197_v15 = vsub.s32 4, %v3173_v38  ;;  %v1856_v17 = vshll.u32 %v9491_v50, %v1847_v36  ;;  %v1859_v39 = vshll.u32 %v9490_v60, %v1847_v36  ;;  %v1860_v21 = vshrl.u32 %v9492_v27, %v1848_v62 }
 0x27c   :  { %v1655_v59 = vadd.f32 -0.4999988, %v1654_v18  ;;  %v1662_v2 = vadd.f32 -0.16666654, %v1661_v56  ;;  %vm3176_vm12 = vcmp.lt.s32.totalorder %v7172_v23, 0  ;;  %v3177_v29 = vsub.s32 0, %v7172_v23 }
 0x27d   :  { %vm7192_vm2 = vcmp.le.f32.partialorder %v3073_v52, 0.7853982  ;;  %v1852_v30 = vor.u32 %v1851_v54, %v1850_v1  ;;  %v1855_v12 = vor.u32 %v1854_v33, %v1853_v63  ;;  %v1861_v19 = vor.u32 %v1860_v21, %v1859_v39 }
 0x27e   :  { %v1656_v61 = vmul.f32 %v1655_v59, %v1651_v58  ;;  %v1663_v22 = vmul.f32 %v1662_v2, %v1651_v58  ;;  %v3178_v20 = vsel %vm3176_vm12, %v3177_v29, %v7172_v23  ;;  %v1863_v58 = vshrl.u32 %v9493_v0, %v1848_v62 }
 0x27f   :  { %v3179_v16 = vclz %v3178_v20  ;;  %v1858_v6 = vor.u32 %v1857_v37, %v1856_v17  ;;  %v1862_v18 = vshll.u32 %v9492_v27, %v1847_v36  ;;  %v1849_v35 = vshrl.u32 %v9488_v26, %v1848_v62 }
 0x280   :  { %v1657_v5 = vadd.f32 1.0, %v1656_v61  ;;  %v1664_v14 = vadd.f32 1.0, %v1663_v22  ;;  %vm1865_vm3 = vcmp.lt.s32.totalorder %v7164_v31, 1  ;;  %v5467_v59 = vadd.s32 4294967169, %v1992_v7 }
 0x281   :  { %v5489_v56 = vadd.s32 4294967294, %v3179_v16  ;;  %v3198_v52 = vsel %vm3075_vm11, %v3197_v15, %v3173_v38  ;;  %v1864_v61 = vor.u32 %v1863_v58, %v1862_v18  ;;  %vm1868_vm4 = vcmp.lt.s32.totalorder %v7164_v31, 4 }
 0x282   :  { %v1665_v3 = vmul.f32 %v1664_v14, %v1649_v10  ;;  %v1674_v34 = vxor.u32 2147483648, %v1657_v5  ;;  %vm1867_vm7 = vcmp.lt.s32.totalorder %v7164_v31, 3  ;;  %v1873_v10 = vsel %vm1865_vm3, %v1852_v30, %v1855_v12 }
 0x283   :  { %vm5490_vm1 = vcmp.lt.s32.totalorder %v5489_v56, 0  ;;  %v1874_v36 = vsel %vm1868_vm4, %v1861_v19, 920167782  ;;  %vm1866_vm8 = vcmp.lt.s32.totalorder %v7164_v31, 2  ;;  %v1877_v15 = vsel %vm1865_vm3, %v1855_v12, %v1858_v6 }
 0x284   :  { %v1671_v2 = vxor.u32 2147483648, %v1665_v3  ;;  %v1675_v7 = vsel %vm1673_vm13, %v1674_v34, %v1665_v3  ;;  %v3182_v1 = vsel %vm5490_vm1, 0, %v5489_v56  ;;  %v1875_v38 = vsel %vm1867_vm7, %v1858_v6, %v1874_v36 }
 0x285   :  { %v3183_v63 = vsub.s32 32, %v3182_v1  ;;  %v3187_v33 = vsub.s32 4294967266, %v3182_v1  ;;  %v3184_v22 = vshll.u32 %v7172_v23, %v3182_v1  ;;  %v1876_v29 = vsel %vm1866_vm8, %v1873_v10, %v1875_v38 }
 0x286   :  { %v1672_v62 = vsel %vm1670_vm5, %v1657_v5, %v1671_v2  ;;  %v1878_v9 = vsel %vm1868_vm4, %v1864_v61, 1326507024  ;;  %v1906_v39 = vand.u32 65535, %v1876_v29  ;;  %v3200_v23 = vsel %vm7192_vm2, 0, %v3198_v52 }
 0x287   :  { %v1676_v54 = vsel %vm1669_vm15, %v1672_v62, %v1675_v7  ;;  %v3185_v46 = vshrl.u32 %v7157_v28, %v3183_v63  ;;  %v3188_v17 = vadd.s32 127, %v3187_v33  ;;  %v1870_v21 = vsel %vm1868_vm4, %v1858_v6, 2102212464 }
 0x288   :  { %v1677_v37 = vsel %vm1666_vm14, nan, %v1676_v54  ;;  %v1879_v5 = vsel %vm1867_vm7, %v1861_v19, %v1878_v9  ;;  %v1907_v14 = vshrl.u32 %v1876_v29, 16  ;;  %v1998_v16 = vadd.s32 1, %v5467_v59 }
 0x289   :  { %5406 = vst.msk [vmem:[%s9457_s1 + $0x38] sm:$0xff] %vm5398_vm6, %v1677_v37  ;;  %v3186_v20 = vor.u32 %v3185_v46, %v3184_v22  ;;  %v3189_v58 = vshll.u32 %v3188_v17, 23  ;;  %v1880_v28 = vsel %vm1866_vm8, %v1877_v15, %v1879_v5  ;;  %v1910_v56 = vmul.u32 %v1906_v39, %v7170_v45 }
 0x28a   :  { %v1884_v3 = vand.u32 65535, %v1880_v28  ;;  %v1885_v34 = vshrl.u32 %v1880_v28, 16  ;;  %v1909_v18 = vmul.u32 %v1907_v14, %v7167_v55  ;;  %v3217_v52 = vadd.s32 3, %v3200_v23 }
 0x28b   :  { %v3190_v2 = vor.u32 4788187, %v3189_v58  ;;  %v1869_v6 = vsel %vm1865_vm3, %v1849_v35, %v1852_v30  ;;  %v1871_v19 = vsel %vm1867_vm7, %v1855_v12, %v1870_v21  ;;  %v3193_v61 = vcvt.s32.f32 %v3186_v20 }
 0x28c   :  { %v1887_v10 = vmul.u32 %v1885_v34, %v7167_v55  ;;  %v1888_v36 = vmul.u32 %v1884_v3, %v7170_v45  ;;  %v1908_v59 = vmul.u32 %v1906_v39, %v7167_v55  ;;  %v1911_v7 = vmul.u32 %v1907_v14, %v7170_v45 }
 0x28d   :  { %v3191_v62 = vand.u32 2147483647, %v3190_v2  ;;  %v1912_v1 = vshll.u32 %v1909_v18, 16  ;;  %vm1999_vm9 = vcmp.gt.s32.totalorder %v1998_v16, 0  ;;  %v1886_v38 = vmul.u32 %v1884_v3, %v7167_v55 }
 0x28e   :  { %v1889_v54 = vmul.u32 %v1885_v34, %v7170_v45  ;;  %v1890_v30 = vshll.u32 %v1887_v10, 16  ;;  %v1914_v35 = vshll.u32 %v1910_v56, 16  ;;  %v1892_v12 = vshll.u32 %v1888_v36, 16 }
 0x28f   :  { %v3194_v63 = vmul.f32 %v3193_v61, %v3191_v62  ;;  %vm1916_vm10 = vc.u32 %v1908_v59, %v1912_v1  ;;  %v1918_v33 = vadd.s32 %v1912_v1, %v1908_v59  ;;  %v2000_v29 = vsel %vm1999_vm9, %v1998_v16, 0 }
 0x290   :  { %vm1894_vm5 = vc.u32 %v1886_v38, %v1890_v30  ;;  %v1896_v37 = vadd.s32 %v1890_v30, %v1886_v38  ;;  %v1917_v22 = vsel %vm1916_vm10, 1, %v9494_v49  ;;  %v1872_v55 = vsel %vm1866_vm8, %v1869_v6, %v1871_v19 }
 0x291   :  { %v3195_v15 = vxor.u32 2147483648, %v3194_v63  ;;  %v1895_v46 = vsel %vm1894_vm5, 1, %v9494_v49  ;;  %v1919_v17 = vadd.s32 %v1917_v22, %v1911_v7  ;;  %vm1920_vm13 = vc.u32 %v1918_v33, %v1914_v35 }
 0x292   :  { %v1897_v45 = vadd.s32 %v1895_v46, %v1889_v54  ;;  %vm1898_vm15 = vc.u32 %v1896_v37, %v1892_v12  ;;  %v1921_v9 = vsel %vm1920_vm13, 1, %v9494_v49  ;;  %v1913_v21 = vshrl.u32 %v1909_v18, 16 }
 0x293   :  { %v3196_v39 = vsel %vm3075_vm11, %v3195_v15, %v3194_v63  ;;  %v1899_v23 = vsel %vm1898_vm15, 1, %v9494_v49  ;;  %v1923_v5 = vadd.s32 %v1921_v9, %v1919_v17  ;;  %v1891_v20 = vshrl.u32 %v1887_v10, 16 }
 0x294   :  { %v3199_v14 = vsel %vm7192_vm2, %v6922_v4, %v3196_v39  ;;  %v1901_v58 = vadd.s32 %v1899_v23, %v1897_v45  ;;  %v2002_v28 = vand.u32 31, %v2000_v29  ;;  %v1915_v16 = vshrl.u32 %v1910_v56, 16 }
 0x295   :  { %v3201_v31 = vmul.f32 %v3199_v14, %v3199_v14  ;;  %v1924_v3 = vadd.s32 %v1923_v5, %v1913_v21  ;;  %v1996_v34 = vor.u32 8388608, %v7161_v47  ;;  %v7262_v2 = vand.u32 3, %v3217_v52 }
 0x296   :  { %v1893_v6 = vshrl.u32 %v1888_v36, 16  ;;  %v1902_v19 = vadd.s32 %v1901_v58, %v1891_v20  ;;  %v7264_v61 = vsub.s32 32, %v2002_v28  ;;  %v1926_v48 = vmul.u32 %v7152_v51, %v1872_v55 }
 0x297   :  { %v3202_v18 = vmul.f32 -0.001358992, %v3201_v31  ;;  %v3209_v59 = vmul.f32 -0.00019511016, %v3201_v31  ;;  %v1925_v62 = vadd.s32 %v1924_v3, %v1915_v16  ;;  %v7269_v10 = vadd.s32 %v1918_v33, %v1914_v35 }
 0x298   :  { %v7267_v7 = vadd.s32 %v1902_v19, %v1893_v6  ;;  %v7271_v1 = vshrl.u32 %v2000_v29, 5  ;;  %v2006_v47 = vshrl.u32 %v9489_v32, %v7264_v61  ;;  %v2005_v38 = vshll.u32 %v9488_v26, %v2002_v28 }
 0x299   :  { %v3203_v56 = vadd.f32 0.041655596, %v3202_v18  ;;  %v3210_v52 = vadd.f32 0.008332121, %v3209_v59  ;;  %v1929_v36 = vadd.s32 1, %v1925_v62  ;;  %v2008_v54 = vshll.u32 %v9489_v32, %v2002_v28 }
 0x29a   :  { %vm1928_vm11 = vc.u32 %v7267_v7, %v7269_v10  ;;  %v2009_v51 = vshrl.u32 %v9491_v50, %v7264_v61  ;;  %v2012_v30 = vshrl.u32 %v9490_v60, %v7264_v61  ;;  %v2011_v33 = vshll.u32 %v9491_v50, %v2002_v28 }
 0x29b   :  { %v3204_v35 = vmul.f32 %v3203_v56, %v3201_v31  ;;  %v3211_v63 = vmul.f32 %v3210_v52, %v3201_v31  ;;  %v1930_v12 = vsel %vm1928_vm11, %v1929_v36, %v1925_v62  ;;  %v7284_v22 = vor.u32 %v2006_v47, %v2005_v38 }
 0x29c   :  { %v1931_v37 = vadd.s32 %v1930_v12, %v1926_v48  ;;  %v2014_v29 = vshll.u32 %v9490_v60, %v2002_v28  ;;  %v2015_v15 = vshrl.u32 %v9492_v27, %v7264_v61  ;;  %v2017_v55 = vshll.u32 %v9492_v27, %v2002_v28 }
 0x29d   :  { %v3205_v46 = vadd.f32 -0.4999988, %v3204_v35  ;;  %v3212_v17 = vadd.f32 -0.16666654, %v3211_v63  ;;  %v2018_v45 = vshrl.u32 %v9493_v0, %v7264_v61  ;;  %v7292_v39 = vor.u32 %v2009_v51, %v2008_v54 }
 0x29e   :  { %v1932_v9 = vadd.s32 536870912, %v1931_v37  ;;  %v2013_v23 = vor.u32 %v2012_v30, %v2011_v33  ;;  %v2016_v21 = vor.u32 %v2015_v15, %v2014_v29  ;;  %vm2023_vm12 = vcmp.lt.s32.totalorder %v7271_v1, 4 }
 0x29f   :  { %v3206_v5 = vmul.f32 %v3205_v46, %v3201_v31  ;;  %v3213_v20 = vmul.f32 %v3212_v17, %v3201_v31  ;;  %v2019_v58 = vor.u32 %v2018_v45, %v2017_v55  ;;  %vm3216_vm14 = vweird.f32 %v6922_v4 }
 0x2a0   :  { %v7296_v16 = vshrl.u32 %v1932_v9, 30  ;;  %v2029_v28 = vsel %vm2023_vm12, %v2016_v21, 920167782  ;;  %v7300_v3 = vshll.u32 %v1996_v34, 8  ;;  %vm2020_vm2 = vcmp.lt.s32.totalorder %v7271_v1, 1 }
 0x2a1   :  { %v3207_v6 = vadd.f32 1.0, %v3206_v5  ;;  %v3214_v19 = vadd.f32 1.0, %v3213_v20  ;;  %vm2022_vm3 = vcmp.lt.s32.totalorder %v7271_v1, 3  ;;  %v2028_v18 = vsel %vm2020_vm2, %v7284_v22, %v7292_v39 }
 0x2a2   :  { %v1934_v31 = vshll.u32 %v7296_v16, 30  ;;  %v2030_v59 = vsel %vm2022_vm3, %v2013_v23, %v2029_v28  ;;  %v2032_v34 = vsel %vm2020_vm2, %v7292_v39, %v2013_v23  ;;  %vm3219_vm4 = vcmp.lt.s32.totalorder %v7262_v2, 2 }
 0x2a3   :  { %v3215_v62 = vmul.f32 %v3214_v19, %v3199_v14  ;;  %v3224_v48 = vxor.u32 2147483648, %v3207_v6  ;;  %v2033_v47 = vsel %vm2023_vm12, %v2019_v58, 1326507024  ;;  %vm3220_vm1 = vcmp.eq.s32.totalorder %v7262_v2, 0 }
 0x2a4   :  { %v1935_v56 = vsub.s32 %v1931_v37, %v1934_v31  ;;  %vm2021_vm7 = vcmp.lt.s32.totalorder %v7271_v1, 2  ;;  %v2034_v52 = vsel %vm2022_vm3, %v2016_v21, %v2033_v47  ;;  %vm3223_vm8 = vcmp.eq.s32.totalorder %v7262_v2, 2 }
 0x2a5   :  { %v3221_v36 = vxor.u32 2147483648, %v3215_v62  ;;  %v2031_v14 = vsel %vm2021_vm7, %v2028_v18, %v2030_v59  ;;  %v2035_v38 = vsel %vm2021_vm7, %v2032_v34, %v2034_v52  ;;  %v2037_v51 = vand.u32 65535, %v7300_v3 }
 0x2a6   :  { %vm1936_vm9 = vcmp.lt.s32.totalorder %v1935_v56, 0  ;;  %v1937_v54 = vsub.s32 0, %v1935_v56  ;;  %v2039_v30 = vand.u32 65535, %v2035_v38  ;;  %v3225_v63 = vsel %vm3223_vm8, %v3224_v48, %v3215_v62 }
 0x2a7   :  { %v3222_v35 = vsel %vm3220_vm1, %v3207_v6, %v3221_v36  ;;  %v2038_v12 = vshrl.u32 %v7300_v3, 16  ;;  %v2040_v33 = vshrl.u32 %v2035_v38, 16  ;;  %v2061_v15 = vand.u32 65535, %v2031_v14  ;;  %v296_v36 = vpop.permute.xlu2 %295 }
 0x2a8   :  { %v3226_v37 = vsel %vm3219_vm4, %v3222_v35, %v3225_v63  ;;  %v1938_v29 = vsel %vm1936_vm9, %v1937_v54, %v1935_v56  ;;  %v2062_v46 = vshrl.u32 %v2031_v14, 16  ;;  %v2004_v21 = vshrl.u32 %v9488_v26, %v7264_v61 }
 0x2a9   :  { %v3227_v17 = vsel %vm3216_vm14, nan, %v3226_v37  ;;  %v1939_v55 = vclz %v1938_v29  ;;  %v2042_v45 = vmul.u32 %v2040_v33, %v2037_v51  ;;  %v2043_v9 = vmul.u32 %v2039_v30, %v2038_v12  ;;  %v264_v37 = vpop.permute.xlu0 %263 }
 0x2aa   :  { %5416 = vst.msk [vmem:[%s9457_s1 + $0x88] sm:$0xff] %vm5398_vm6, %v3227_v17  ;;  %v1927_v2 = vadd.s32 %v7269_v10, %v7267_v7  ;;  %v2041_v20 = vmul.u32 %v2039_v30, %v2037_v51  ;;  %v2025_v4 = vsel %vm2023_vm12, %v2013_v23, 2102212464  ;;  %v2044_v28 = vmul.u32 %v2040_v33, %v2038_v12 }
 0x2ab   :  { %v5465_v5 = vadd.s32 4294967294, %v1939_v55  ;;  %v2045_v58 = vshll.u32 %v2042_v45, 16  ;;  %v2047_v6 = vshll.u32 %v2043_v9, 16  ;;  %v2064_v19 = vmul.u32 %v2062_v46, %v2037_v51 }
 0x2ac   :  { %v2063_v18 = vmul.u32 %v2061_v15, %v2037_v51  ;;  %vm1835_vm13 = vcmp.lt.s32.totalorder %v7126_v41, 0  ;;  %v2065_v34 = vmul.u32 %v2061_v15, %v2038_v12  ;;  %v2046_v48 = vshrl.u32 %v2042_v45, 16 }
 0x2ad   :  { %vm5466_vm10 = vcmp.lt.s32.totalorder %v5465_v5, 0  ;;  %vm2049_vm5 = vc.u32 %v2041_v20, %v2045_v58  ;;  %v2051_v31 = vadd.s32 %v2045_v58, %v2041_v20  ;;  %v2067_v7 = vshll.u32 %v2064_v19, 16 }
 0x2ae   :  { %v1942_v59 = vsel %vm5466_vm10, 0, %v5465_v5  ;;  %v2050_v61 = vsel %vm2049_vm5, 1, %v9494_v49  ;;  %v2066_v23 = vmul.u32 %v2062_v46, %v2038_v12  ;;  %v2069_v35 = vshll.u32 %v2065_v34, 16 }
 0x2af   :  { %v1943_v10 = vsub.s32 32, %v1942_v59  ;;  %v1947_v62 = vsub.s32 4294967266, %v1942_v59  ;;  %v2052_v47 = vadd.s32 %v2050_v61, %v2044_v28  ;;  %v1944_v52 = vshll.u32 %v1935_v56, %v1942_v59 }
 0x2b0   :  { %vm2053_vm15 = vc.u32 %v2051_v31, %v2047_v6  ;;  %vm2071_vm11 = vc.u32 %v2063_v18, %v2067_v7  ;;  %v2073_v63 = vadd.s32 %v2067_v7, %v2063_v18  ;;  %v1957_v17 = vsub.s32 4, %v7296_v16 }
 0x2b1   :  { %v1945_v14 = vshrl.u32 %v1927_v2, %v1943_v10  ;;  %v1948_v38 = vadd.s32 127, %v1947_v62  ;;  %v2054_v54 = vsel %vm2053_vm15, 1, %v9494_v49  ;;  %v2072_v51 = vsel %vm2071_vm11, 1, %v9494_v49 }
 0x2b2   :  { %v2056_v30 = vadd.s32 %v2054_v54, %v2052_v47  ;;  %v2074_v33 = vadd.s32 %v2072_v51, %v2066_v23  ;;  %v362_v56 = vsel %vm42_vm0, %v5710_v40, %v296_v36  ;;  %v2024_v12 = vsel %vm2020_vm2, %v2004_v21, %v7284_v22 }
 0x2b3   :  { %v1946_v29 = vor.u32 %v1945_v14, %v1944_v52  ;;  %v1949_v15 = vshll.u32 %v1948_v38, 23  ;;  %vm2075_vm12 = vc.u32 %v2073_v63, %v2069_v35  ;;  %v394_v55 = vmul.f32 %v362_v56, %v5727_v53 }
 0x2b4   :  { %v2057_v46 = vadd.s32 %v2056_v30, %v2046_v48  ;;  %v2048_v2 = vshrl.u32 %v2043_v9, 16  ;;  %v2076_v5 = vsel %vm2075_vm12, 1, %v9494_v49  ;;  %v354_v20 = vsel %vm42_vm0, %v6142_v24, %v264_v37 }
 0x2b5   :  { %v1950_v45 = vor.u32 4788187, %v1949_v15  ;;  %v2026_v40 = vsel %vm2022_vm3, %v7292_v39, %v2025_v4  ;;  %v2068_v58 = vshrl.u32 %v2064_v19, 16  ;;  %v2078_v28 = vadd.s32 %v2076_v5, %v2074_v33 }
 0x2b6   :  { %v7362_v22 = vadd.f32 %v394_v55, %v5729_v57  ;;  %v1953_v6 = vcvt.s32.f32 %v1946_v29  ;;  %v1958_v9 = vsel %vm1835_vm13, %v1957_v17, %v7296_v16  ;;  %v2058_v31 = vadd.s32 %v2057_v46, %v2048_v2 }
 0x2b7   :  { %v1951_v21 = vand.u32 2147483647, %v1950_v45  ;;  %v2070_v18 = vshrl.u32 %v2065_v34, 16  ;;  %v2079_v59 = vadd.s32 %v2078_v28, %v2068_v58  ;;  %v386_v61 = vmul.f32 %v354_v20, %v5727_v53 }
 0x2b8   :  { %v3538_v24 = vand.u32 2147483647, %v7362_v22  ;;  %vm7371_vm14 = vcmp.le.f32.partialorder %v1833_v11, 0.7853982  ;;  %v2077_v19 = vadd.s32 %v2073_v63, %v2069_v35  ;;  %v3541_v7 = vand.u32 2139095040, %v7362_v22 }
 0x2b9   :  { %v1954_v4 = vmul.f32 %v1953_v6, %v1951_v21  ;;  %v1960_v16 = vsel %vm7371_vm14, 0, %v1958_v9  ;;  %v2027_v34 = vsel %vm2021_vm7, %v2024_v12, %v2026_v40  ;;  %v2080_v10 = vadd.s32 %v2079_v59, %v2070_v18 }
 0x2ba   :  { %vm2083_vm2 = vc.u32 %v2058_v31, %v2077_v19  ;;  %v3542_v48 = vshrl.u32 %v3541_v7, 23  ;;  %v3545_v11 = vand.u32 8388607, %v3538_v24  ;;  %v7383_v52 = vadd.f32 %v386_v61, %v5729_v57 }
 0x2bb   :  { %v1955_v62 = vxor.u32 2147483648, %v1954_v4  ;;  %v2084_v47 = vadd.s32 1, %v2080_v10  ;;  %v2081_v36 = vmul.u32 %v7300_v3, %v2027_v34  ;;  %v1977_v38 = vadd.s32 3, %v1960_v16 }
 0x2bc   :  { %v5497_v14 = vadd.s32 4294967169, %v3542_v48  ;;  %v3546_v35 = vor.u32 8388608, %v3545_v11  ;;  %v2301_v33 = vand.u32 2139095040, %v7383_v52  ;;  %vm1990_vm4 = vcmp.lt.s32.totalorder %v7147_v8, 0 }
 0x2bd   :  { %v1956_v23 = vsel %vm1835_vm13, %v1955_v62, %v1954_v4  ;;  %v2085_v54 = vsel %vm2083_vm2, %v2084_v47, %v2080_v10  ;;  %v7392_v17 = vand.u32 3, %v1977_v38  ;;  %v2082_v58 = vadd.s32 %v2077_v19, %v2058_v31 }
 0x2be   :  { %v1959_v1 = vsel %vm7371_vm14, %v7126_v41, %v1956_v23  ;;  %v2086_v30 = vadd.s32 %v2085_v54, %v2081_v36  ;;  %v3548_v63 = vadd.s32 1, %v5497_v14  ;;  %v7394_v55 = vshll.u32 %v3546_v35, 8 }
 0x2bf   :  { %v1961_v51 = vmul.f32 %v1959_v1, %v1959_v1  ;;  %v2302_v2 = vshrl.u32 %v2301_v33, 23  ;;  %vm1983_vm1 = vcmp.eq.s32.totalorder %v7392_v17, 2  ;;  %v2298_v21 = vand.u32 2147483647, %v7383_v52 }
 0x2c0   :  { %v2087_v15 = vadd.s32 536870912, %v2086_v30  ;;  %vm3549_vm3 = vcmp.gt.s32.totalorder %v3548_v63, 0  ;;  %v7402_v59 = vand.u32 65535, %v7394_v55  ;;  %vm1980_vm7 = vcmp.eq.s32.totalorder %v7392_v17, 0 }
 0x2c1   :  { %v1962_v37 = vmul.f32 -0.001358992, %v1961_v51  ;;  %v1969_v29 = vmul.f32 -0.00019511016, %v1961_v51  ;;  %v3550_v3 = vsel %vm3549_vm3, %v3548_v63, 0  ;;  %v7408_v7 = vadd.s32 4294967169, %v2302_v2 }
 0x2c2   :  { %v2088_v46 = vshrl.u32 %v2087_v15, 30  ;;  %v3552_v45 = vand.u32 31, %v3550_v3  ;;  %v7405_v39 = vshrl.u32 %v3550_v3, 5  ;;  %vm1979_vm8 = vcmp.lt.s32.totalorder %v7392_v17, 2 }
 0x2c3   :  { %v1963_v56 = vadd.f32 0.041655596, %v1962_v37  ;;  %v1970_v12 = vadd.f32 0.008332121, %v1969_v29  ;;  %vm1976_vm10 = vweird.f32 %v7126_v41  ;;  %vm7433_vm5 = vcmp.le.f32.partialorder %v1988_v44, 0.7853982 }
 0x2c4   :  { %v2089_v40 = vshll.u32 %v2088_v46, 30  ;;  %v3553_v28 = vsub.s32 32, %v3552_v45  ;;  %v2112_v61 = vsub.s32 4, %v2088_v46  ;;  %v3555_v4 = vshll.u32 %v9488_v26, %v3552_v45 }
 0x2c5   :  { %v1964_v5 = vmul.f32 %v1963_v56, %v1961_v51  ;;  %v1971_v20 = vmul.f32 %v1970_v12, %v1961_v51  ;;  %v3558_v10 = vshll.u32 %v9489_v32, %v3552_v45  ;;  %v3561_v48 = vshll.u32 %v9491_v50, %v3552_v45 }
 0x2c6   :  { %v7399_v18 = vsub.s32 %v2086_v30, %v2089_v40  ;;  %v3556_v34 = vshrl.u32 %v9489_v32, %v3553_v28  ;;  %v3559_v62 = vshrl.u32 %v9491_v50, %v3553_v28  ;;  %v3562_v36 = vshrl.u32 %v9490_v60, %v3553_v28 }
 0x2c7   :  { %v1965_v6 = vadd.f32 -0.4999988, %v1964_v5  ;;  %v1972_v9 = vadd.f32 -0.16666654, %v1971_v20  ;;  %v7422_v38 = vsel %vm1990_vm4, %v2112_v61, %v2088_v46  ;;  %v3554_v54 = vshrl.u32 %v9488_v26, %v3553_v28 }
 0x2c8   :  { %vm2091_vm9 = vcmp.lt.s32.totalorder %v7399_v18, 0  ;;  %v2092_v16 = vsub.s32 0, %v7399_v18  ;;  %v3564_v63 = vshll.u32 %v9490_v60, %v3552_v45  ;;  %v3568_v33 = vshrl.u32 %v9493_v0, %v3553_v28 }
 0x2c9   :  { %v1966_v31 = vmul.f32 %v1965_v6, %v1961_v51  ;;  %v1973_v19 = vmul.f32 %v1972_v9, %v1961_v51  ;;  %v3565_v51 = vshrl.u32 %v9492_v27, %v3553_v28  ;;  %v3557_v29 = vor.u32 %v3556_v34, %v3555_v4 }
 0x2ca   :  { %v2093_v23 = vsel %vm2091_vm9, %v2092_v16, %v7399_v18  ;;  %v3560_v15 = vor.u32 %v3559_v62, %v3558_v10  ;;  %v3567_v3 = vshll.u32 %v9492_v27, %v3552_v45  ;;  %v3563_v46 = vor.u32 %v3562_v36, %v3561_v48 }
 0x2cb   :  { %v1967_v11 = vadd.f32 1.0, %v1966_v31  ;;  %v1974_v47 = vadd.f32 1.0, %v1973_v19  ;;  %v2094_v14 = vclz %v2093_v23  ;;  %v3566_v2 = vor.u32 %v3565_v51, %v3564_v63 }
 0x2cc   :  { %v3569_v5 = vor.u32 %v3568_v33, %v3567_v3  ;;  %vm3570_vm15 = vcmp.lt.s32.totalorder %v7405_v39, 1  ;;  %vm3571_vm11 = vcmp.lt.s32.totalorder %v7405_v39, 2  ;;  %vm3572_vm12 = vcmp.lt.s32.totalorder %v7405_v39, 3 }
 0x2cd   :  { %v1975_v30 = vmul.f32 %v1974_v47, %v1959_v1  ;;  %v1984_v35 = vxor.u32 2147483648, %v1967_v11  ;;  %v5468_v37 = vadd.s32 4294967294, %v2094_v14  ;;  %vm3573_vm14 = vcmp.lt.s32.totalorder %v7405_v39, 4 }
 0x2ce   :  { %v3574_v6 = vsel %vm3570_vm15, %v3554_v54, %v3557_v29  ;;  %v3575_v61 = vsel %vm3573_vm14, %v3563_v46, 2102212464  ;;  %v3578_v4 = vsel %vm3570_vm15, %v3557_v29, %v3560_v15  ;;  %v3579_v31 = vsel %vm3573_vm14, %v3566_v2, 920167782 }
 0x2cf   :  { %v1981_v56 = vxor.u32 2147483648, %v1975_v30  ;;  %v1985_v12 = vsel %vm1983_vm1, %v1984_v35, %v1975_v30  ;;  %vm5469_vm13 = vcmp.lt.s32.totalorder %v5468_v37, 0  ;;  %v3580_v41 = vsel %vm3572_vm12, %v3563_v46, %v3579_v31 }
 0x2d0   :  { %v2097_v20 = vsel %vm5469_vm13, 0, %v5468_v37  ;;  %v3576_v34 = vsel %vm3572_vm12, %v3560_v15, %v3575_v61  ;;  %v3581_v10 = vsel %vm3571_vm11, %v3578_v4, %v3580_v41  ;;  %v3582_v62 = vsel %vm3570_vm15, %v3560_v15, %v3563_v46 }
 0x2d1   :  { %v1982_v45 = vsel %vm1980_vm7, %v1967_v11, %v1981_v56  ;;  %v2098_v40 = vsub.s32 32, %v2097_v20  ;;  %v2102_v28 = vsub.s32 4294967266, %v2097_v20  ;;  %v2099_v17 = vshll.u32 %v7399_v18, %v2097_v20 }
 0x2d2   :  { %v1986_v44 = vsel %vm1979_vm8, %v1982_v45, %v1985_v12  ;;  %v3583_v48 = vsel %vm3573_vm14, %v3569_v5, 1326507024  ;;  %v3611_v18 = vand.u32 65535, %v3581_v10  ;;  %v3588_v36 = vshrl.u32 %v7394_v55, 16 }
 0x2d3   :  { %v1987_v9 = vsel %vm1976_vm10, nan, %v1986_v44  ;;  %v2100_v19 = vshrl.u32 %v2082_v58, %v2098_v40  ;;  %v2103_v16 = vadd.s32 127, %v2102_v28  ;;  %v3584_v58 = vsel %vm3572_vm12, %v3566_v2, %v3583_v48 }
 0x2d4   :  { %5408 = vst.msk [vmem:[%s9457_s1 + $0x48] sm:$0xff] %vm5398_vm6, %v1987_v9  ;;  %v3585_v23 = vsel %vm3571_vm11, %v3582_v62, %v3584_v58  ;;  %v3612_v14 = vshrl.u32 %v3581_v10, 16  ;;  %v2308_v54 = vadd.s32 1, %v7408_v7  ;;  %v7478_v63 = vand.u32 8388607, %v2298_v21 }
 0x2d5   :  { %v2101_v11 = vor.u32 %v2100_v19, %v2099_v17  ;;  %v2104_v47 = vshll.u32 %v2103_v16, 23  ;;  %v3589_v30 = vand.u32 65535, %v3585_v23  ;;  %v3590_v35 = vshrl.u32 %v3585_v23, 16 }
 0x2d6   :  { %v2115_v33 = vsel %vm7433_vm5, 0, %v7422_v38  ;;  %v7485_v37 = vsel %vm3571_vm11, %v3574_v6, %v3576_v34  ;;  %v3614_v29 = vmul.u32 %v3612_v14, %v7402_v59  ;;  %v3615_v15 = vmul.u32 %v3611_v18, %v3588_v36 }
 0x2d7   :  { %v2105_v51 = vor.u32 4788187, %v2104_v47  ;;  %v2108_v7 = vcvt.s32.f32 %v2101_v11  ;;  %v3592_v56 = vmul.u32 %v3590_v35, %v7402_v59  ;;  %v3593_v12 = vmul.u32 %v3589_v30, %v3588_v36 }
 0x2d8   :  { %v3613_v46 = vmul.u32 %v3611_v18, %v7402_v59  ;;  %v3616_v2 = vmul.u32 %v3612_v14, %v3588_v36  ;;  %v3617_v5 = vshll.u32 %v3614_v29, 16  ;;  %vm2309_vm2 = vcmp.gt.s32.totalorder %v2308_v54, 0 }
 0x2d9   :  { %v2106_v3 = vand.u32 2147483647, %v2105_v51  ;;  %v3591_v38 = vmul.u32 %v3589_v30, %v7402_v59  ;;  %v3594_v20 = vmul.u32 %v3590_v35, %v3588_v36  ;;  %v3595_v39 = vshll.u32 %v3592_v56, 16 }
 0x2da   :  { %v3597_v44 = vshll.u32 %v3593_v12, 16  ;;  %v3619_v40 = vshll.u32 %v3615_v15, 16  ;;  %vm3621_vm3 = vc.u32 %v3613_v46, %v3617_v5  ;;  %v3623_v28 = vadd.s32 %v3617_v5, %v3613_v46 }
 0x2db   :  { %v2109_v45 = vmul.f32 %v2108_v7, %v2106_v3  ;;  %vm3599_vm1 = vc.u32 %v3591_v38, %v3595_v39  ;;  %v3601_v9 = vadd.s32 %v3595_v39, %v3591_v38  ;;  %v3622_v61 = vsel %vm3621_vm3, 1, %v9494_v49 }
 0x2dc   :  { %v3600_v4 = vsel %vm3599_vm1, 1, %v9494_v49  ;;  %v3618_v31 = vshrl.u32 %v3614_v29, 16  ;;  %v3624_v17 = vadd.s32 %v3622_v61, %v3616_v2  ;;  %vm3625_vm7 = vc.u32 %v3623_v28, %v3619_v40 }
 0x2dd   :  { %v2110_v6 = vxor.u32 2147483648, %v2109_v45  ;;  %v3602_v59 = vadd.s32 %v3600_v4, %v3594_v20  ;;  %vm3603_vm8 = vc.u32 %v3601_v9, %v3597_v44  ;;  %v3626_v16 = vsel %vm3625_vm7, 1, %v9494_v49 }
 0x2de   :  { %v3604_v34 = vsel %vm3603_vm8, 1, %v9494_v49  ;;  %v3628_v10 = vadd.s32 %v3626_v16, %v3624_v17  ;;  %v2310_v62 = vsel %vm2309_vm2, %v2308_v54, 0  ;;  %v3596_v11 = vshrl.u32 %v3592_v56, 16 }
 0x2df   :  { %v2111_v19 = vsel %vm1990_vm4, %v2110_v6, %v2109_v45  ;;  %v3606_v47 = vadd.s32 %v3604_v34, %v3602_v59  ;;  %v2312_v58 = vand.u32 31, %v2310_v62  ;;  %v3598_v18 = vshrl.u32 %v3593_v12, 16 }
 0x2e0   :  { %v2114_v41 = vsel %vm7433_vm5, %v7147_v8, %v2111_v19  ;;  %v3620_v23 = vshrl.u32 %v3615_v15, 16  ;;  %v3629_v36 = vadd.s32 %v3628_v10, %v3618_v31  ;;  %v2132_v29 = vadd.s32 3, %v2115_v33 }
 0x2e1   :  { %v2116_v48 = vmul.f32 %v2114_v41, %v2114_v41  ;;  %v3607_v30 = vadd.s32 %v3606_v47, %v3596_v11  ;;  %v7501_v35 = vsub.s32 32, %v2312_v58  ;;  %v3631_v3 = vmul.u32 %v7394_v55, %v7485_v37 }
 0x2e2   :  { %v3630_v1 = vadd.s32 %v3629_v36, %v3620_v23  ;;  %v2306_v7 = vor.u32 8388608, %v7478_v63  ;;  %v7508_v2 = vadd.s32 %v3623_v28, %v3619_v40  ;;  %v7510_v12 = vshrl.u32 %v2310_v62, 5 }
 0x2e3   :  { %v2117_v14 = vmul.f32 -0.001358992, %v2116_v48  ;;  %v2124_v51 = vmul.f32 -0.00019511016, %v2116_v48  ;;  %v7506_v56 = vadd.s32 %v3607_v30, %v3598_v18  ;;  %v2315_v5 = vshll.u32 %v9488_v26, %v2312_v58 }
 0x2e4   :  { %v3634_v15 = vadd.s32 1, %v3630_v1  ;;  %v2316_v33 = vshrl.u32 %v9489_v32, %v7501_v35  ;;  %v2319_v55 = vshrl.u32 %v9491_v50, %v7501_v35  ;;  %v2318_v37 = vshll.u32 %v9489_v32, %v2312_v58 }
 0x2e5   :  { %v2118_v54 = vadd.f32 0.041655596, %v2117_v14  ;;  %v2125_v46 = vadd.f32 0.008332121, %v2124_v51  ;;  %vm3633_vm4 = vc.u32 %v7506_v56, %v7508_v2  ;;  %v2321_v20 = vshll.u32 %v9491_v50, %v2312_v58 }
 0x2e6   :  { %v3635_v63 = vsel %vm3633_vm4, %v3634_v15, %v3630_v1  ;;  %v2322_v39 = vshrl.u32 %v9490_v60, %v7501_v35  ;;  %v2317_v6 = vor.u32 %v2316_v33, %v2315_v5  ;;  %v2324_v9 = vshll.u32 %v9490_v60, %v2312_v58 }
 0x2e7   :  { %v2119_v45 = vmul.f32 %v2118_v54, %v2116_v48  ;;  %v2126_v38 = vmul.f32 %v2125_v46, %v2116_v48  ;;  %v3636_v28 = vadd.s32 %v3635_v63, %v3631_v3  ;;  %v2325_v61 = vshrl.u32 %v9492_v27, %v7501_v35 }
 0x2e8   :  { %v2327_v4 = vshll.u32 %v9492_v27, %v2312_v58  ;;  %v2328_v31 = vshrl.u32 %v9493_v0, %v7501_v35  ;;  %v7529_v16 = vor.u32 %v2319_v55, %v2318_v37  ;;  %v2133_v34 = vand.u32 3, %v2132_v29  ;;  %v268_v37 = vpop.permute.xlu1 %267 }
 0x2e9   :  { %v2120_v44 = vadd.f32 -0.4999988, %v2119_v45  ;;  %v2127_v40 = vadd.f32 -0.16666654, %v2126_v38  ;;  %v3637_v59 = vadd.s32 536870912, %v3636_v28  ;;  %v2323_v10 = vor.u32 %v2322_v39, %v2321_v20 }
 0x2ea   :  { %v2326_v62 = vor.u32 %v2325_v61, %v2324_v9  ;;  %v2329_v11 = vor.u32 %v2328_v31, %v2327_v4  ;;  %vm2333_vm9 = vcmp.lt.s32.totalorder %v7510_v12, 4  ;;  %vm2131_vm10 = vweird.f32 %v7147_v8 }
 0x2eb   :  { %v2121_v17 = vmul.f32 %v2120_v44, %v2116_v48  ;;  %v2128_v19 = vmul.f32 %v2127_v40, %v2116_v48  ;;  %v7531_v23 = vshrl.u32 %v3637_v59, 30  ;;  %vm2330_vm5 = vcmp.lt.s32.totalorder %v7510_v12, 1 }
 0x2ec   :  { %vm2332_vm13 = vcmp.lt.s32.totalorder %v7510_v12, 3  ;;  %v2339_v48 = vsel %vm2333_vm9, %v2326_v62, 920167782  ;;  %v2338_v51 = vsel %vm2330_vm5, %v2317_v6, %v7529_v16  ;;  %vm2134_vm15 = vcmp.lt.s32.totalorder %v2133_v34, 2 }
 0x2ed   :  { %v2122_v47 = vadd.f32 1.0, %v2121_v17  ;;  %v2129_v18 = vadd.f32 1.0, %v2128_v19  ;;  %v3639_v14 = vshll.u32 %v7531_v23, 30  ;;  %v2340_v30 = vsel %vm2332_vm13, %v2323_v10, %v2339_v48 }
 0x2ee   :  { %v2343_v29 = vsel %vm2333_vm9, %v2329_v11, 1326507024  ;;  %v7547_v1 = vshll.u32 %v2306_v7, 8  ;;  %vm2331_vm11 = vcmp.lt.s32.totalorder %v7510_v12, 2  ;;  %vm2135_vm12 = vcmp.eq.s32.totalorder %v2133_v34, 0 }
 0x2ef   :  { %v2130_v58 = vmul.f32 %v2129_v18, %v2114_v41  ;;  %v2139_v36 = vxor.u32 2147483648, %v2122_v47  ;;  %v3640_v54 = vsub.s32 %v3636_v28, %v3639_v14  ;;  %v2342_v41 = vsel %vm2330_vm5, %v7529_v16, %v2323_v10 }
 0x2f0   :  { %vm2138_vm14 = vcmp.eq.s32.totalorder %v2133_v34, 2  ;;  %v2341_v46 = vsel %vm2331_vm11, %v2338_v51, %v2340_v30  ;;  %v2344_v15 = vsel %vm2332_vm13, %v2326_v62, %v2343_v29  ;;  %v2314_v38 = vshrl.u32 %v9488_v26, %v7501_v35 }
 0x2f1   :  { %v2136_v3 = vxor.u32 2147483648, %v2130_v58  ;;  %v2140_v33 = vsel %vm2138_vm14, %v2139_v36, %v2130_v58  ;;  %vm3641_vm2 = vcmp.lt.s32.totalorder %v3640_v54, 0  ;;  %v3642_v7 = vsub.s32 0, %v3640_v54 }
 0x2f2   :  { %v2345_v55 = vsel %vm2331_vm11, %v2342_v41, %v2344_v15  ;;  %v2347_v63 = vand.u32 65535, %v7547_v1  ;;  %v2371_v40 = vand.u32 65535, %v2341_v46  ;;  %v2348_v35 = vshrl.u32 %v7547_v1, 16 }
 0x2f3   :  { %v2137_v5 = vsel %vm2135_vm12, %v2122_v47, %v2136_v3  ;;  %v3643_v39 = vsel %vm3641_vm2, %v3642_v7, %v3640_v54  ;;  %v2349_v44 = vand.u32 65535, %v2345_v55  ;;  %v2350_v9 = vshrl.u32 %v2345_v55, 16 }
 0x2f4   :  { %v2141_v45 = vsel %vm2134_vm15, %v2137_v5, %v2140_v33  ;;  %v3644_v28 = vclz %v3643_v39  ;;  %v2372_v61 = vshrl.u32 %v2341_v46, 16  ;;  %v3632_v4 = vadd.s32 %v7508_v2, %v7506_v56 }
 0x2f5   :  { %v2142_v20 = vsel %vm2131_vm10, nan, %v2141_v45  ;;  %v355_v8 = vsel %vm42_vm0, %v5834_v25, %v268_v37  ;;  %v2334_v17 = vsel %vm2330_vm5, %v2314_v38, %v2317_v6  ;;  %v2352_v19 = vmul.u32 %v2350_v9, %v2347_v63  ;;  %v308_v45 = vpop.permute.xlu2 %307 }
 0x2f6   :  { %5409 = vst.msk [vmem:[%s9457_s1 + $0x50] sm:$0xff] %vm5398_vm6, %v2142_v20  ;;  %v5498_v31 = vadd.s32 4294967294, %v3644_v28  ;;  %v2353_v59 = vmul.u32 %v2349_v44, %v2348_v35  ;;  %v3662_v34 = vsub.s32 4, %v7531_v23  ;;  %v2335_v62 = vsel %vm2333_vm9, %v2323_v10, 2102212464 }
 0x2f7   :  { %v2374_v11 = vmul.u32 %v2372_v61, %v2347_v63  ;;  %v2375_v47 = vmul.u32 %v2371_v40, %v2348_v35  ;;  %v2351_v18 = vmul.u32 %v2349_v44, %v2347_v63  ;;  %v2355_v56 = vshll.u32 %v2352_v19, 16 }
 0x2f8   :  { %vm5499_vm3 = vcmp.lt.s32.totalorder %v5498_v31, 0  ;;  %v2373_v2 = vmul.u32 %v2371_v40, %v2347_v63  ;;  %v2354_v58 = vmul.u32 %v2350_v9, %v2348_v35  ;;  %v2376_v25 = vmul.u32 %v2372_v61, %v2348_v35 }
 0x2f9   :  { %v3647_v48 = vsel %vm5499_vm3, 0, %v5498_v31  ;;  %v2377_v36 = vshll.u32 %v2374_v11, 16  ;;  %v2357_v6 = vshll.u32 %v2353_v59, 16  ;;  %vm2359_vm1 = vc.u32 %v2351_v18, %v2355_v56 }
 0x2fa   :  { %v3648_v14 = vsub.s32 32, %v3647_v48  ;;  %v3652_v51 = vsub.s32 4294967266, %v3647_v48  ;;  %v3649_v30 = vshll.u32 %v3640_v54, %v3647_v48  ;;  %v2360_v29 = vsel %vm2359_vm1, 1, %v9494_v49 }
 0x2fb   :  { %v2361_v3 = vadd.s32 %v2355_v56, %v2351_v18  ;;  %v2379_v41 = vshll.u32 %v2375_v47, 16  ;;  %v2362_v15 = vadd.s32 %v2360_v29, %v2354_v58  ;;  %vm2381_vm7 = vc.u32 %v2373_v2, %v2377_v36 }
 0x2fc   :  { %v3650_v10 = vshrl.u32 %v3632_v4, %v3648_v14  ;;  %v3653_v46 = vadd.s32 127, %v3652_v51  ;;  %v2382_v5 = vsel %vm2381_vm7, 1, %v9494_v49  ;;  %v2383_v33 = vadd.s32 %v2377_v36, %v2373_v2 }
 0x2fd   :  { %vm2363_vm8 = vc.u32 %v2361_v3, %v2357_v6  ;;  %v387_v7 = vmul.f32 %v355_v8, %v5727_v53  ;;  %v2384_v54 = vadd.s32 %v2382_v5, %v2376_v25  ;;  %v2356_v37 = vshrl.u32 %v2352_v19, 16 }
 0x2fe   :  { %v3651_v38 = vor.u32 %v3650_v10, %v3649_v30  ;;  %v3654_v55 = vshll.u32 %v3653_v46, 23  ;;  %v2364_v63 = vsel %vm2363_vm8, 1, %v9494_v49  ;;  %vm2385_vm4 = vc.u32 %v2383_v33, %v2379_v41 }
 0x2ff   :  { %v2366_v20 = vadd.s32 %v2364_v63, %v2362_v15  ;;  %v7585_v39 = vadd.f32 %v387_v7, %v5729_v57  ;;  %v2358_v40 = vshrl.u32 %v2353_v59, 16  ;;  %v2386_v28 = vsel %vm2385_vm4, 1, %v9494_v49 }
 0x300   :  { %v3655_v44 = vor.u32 4788187, %v3654_v55  ;;  %v365_v35 = vsel %vm42_vm0, %v5712_v42, %v308_v45  ;;  %v2378_v61 = vshrl.u32 %v2374_v11, 16  ;;  %v2388_v4 = vadd.s32 %v2386_v28, %v2384_v54 }
 0x301   :  { %v2367_v9 = vadd.s32 %v2366_v20, %v2356_v37  ;;  %v2453_v8 = vand.u32 2147483647, %v7585_v39  ;;  %v3658_v19 = vcvt.s32.f32 %v3651_v38  ;;  %v2336_v18 = vsel %vm2332_vm13, %v7529_v16, %v2335_v62 }
 0x302   :  { %v3656_v31 = vand.u32 2147483647, %v3655_v44  ;;  %v2456_v56 = vand.u32 2139095040, %v7585_v39  ;;  %v2380_v2 = vshrl.u32 %v2375_v47, 16  ;;  %v2389_v48 = vadd.s32 %v2388_v4, %v2378_v61 }
 0x303   :  { %v2368_v59 = vadd.s32 %v2367_v9, %v2358_v40  ;;  %v397_v58 = vmul.f32 %v365_v35, %v5727_v53  ;;  %vm3540_vm9 = vcmp.lt.s32.totalorder %v7362_v22, 0  ;;  %v2387_v11 = vadd.s32 %v2383_v33, %v2379_v41 }
 0x304   :  { %v3659_v42 = vmul.f32 %v3658_v19, %v3656_v31  ;;  %v2457_v25 = vshrl.u32 %v2456_v56, 23  ;;  %v3663_v36 = vsel %vm3540_vm9, %v3662_v34, %v7531_v23  ;;  %v2337_v14 = vsel %vm2331_vm11, %v2334_v17, %v2336_v18 }
 0x305   :  { %v2390_v51 = vadd.s32 %v2389_v48, %v2380_v2  ;;  %v2460_v16 = vand.u32 8388607, %v2453_v8  ;;  %vm2393_vm10 = vc.u32 %v2368_v59, %v2387_v11  ;;  %vm3539_vm5 = vcmp.le.f32.partialorder %v3538_v24, 0.7853982 }
 0x306   :  { %v3660_v62 = vxor.u32 2147483648, %v3659_v42  ;;  %v5476_v47 = vadd.s32 4294967169, %v2457_v25  ;;  %v7606_v30 = vadd.f32 %v397_v58, %v5729_v57  ;;  %v3665_v3 = vsel %vm3539_vm5, 0, %v3663_v36 }
 0x307   :  { %v2394_v6 = vadd.s32 1, %v2390_v51  ;;  %v2391_v23 = vmul.u32 %v7547_v1, %v2337_v14  ;;  %v2461_v41 = vor.u32 8388608, %v2460_v16  ;;  %v3682_v15 = vadd.s32 3, %v3665_v3 }
 0x308   :  { %v3661_v29 = vsel %vm3540_vm9, %v3660_v62, %v3659_v42  ;;  %v2463_v12 = vadd.s32 1, %v5476_v47  ;;  %v4003_v24 = vand.u32 2147483647, %v7606_v30  ;;  %v4006_v1 = vand.u32 2139095040, %v7606_v30 }
 0x309   :  { %v3664_v17 = vsel %vm3539_vm5, %v7362_v22, %v3661_v29  ;;  %v2395_v34 = vsel %vm2393_vm10, %v2394_v6, %v2390_v51  ;;  %v7611_v55 = vshll.u32 %v2461_v41, 8  ;;  %v7614_v20 = vand.u32 3, %v3682_v15 }
 0x30a   :  { %v3666_v10 = vmul.f32 %v3664_v17, %v3664_v17  ;;  %v2396_v46 = vadd.s32 %v2395_v34, %v2391_v23  ;;  %vm2464_vm13 = vcmp.gt.s32.totalorder %v2463_v12, 0  ;;  %v7616_v44 = vadd.s32 %v2387_v11, %v2368_v59 }
 0x30b   :  { %v2465_v5 = vsel %vm2464_vm13, %v2463_v12, 0  ;;  %v7620_v61 = vand.u32 8388607, %v4003_v24  ;;  %vm2300_vm15 = vcmp.lt.s32.totalorder %v7383_v52, 0  ;;  %v7626_v31 = vand.u32 65535, %v7611_v55 }
 0x30c   :  { %v3667_v33 = vmul.f32 -0.001358992, %v3666_v10  ;;  %v3674_v7 = vmul.f32 -0.00019511016, %v3666_v10  ;;  %v2397_v45 = vadd.s32 536870912, %v2396_v46  ;;  %v2467_v38 = vand.u32 31, %v2465_v5 }
 0x30d   :  { %v7623_v4 = vshrl.u32 %v2465_v5, 5  ;;  %v7629_v19 = vshrl.u32 %v7611_v55, 16  ;;  %v4007_v18 = vshrl.u32 %v4006_v1, 23  ;;  %vm3685_vm11 = vcmp.eq.s32.totalorder %v7614_v20, 0 }
 0x30e   :  { %v3668_v63 = vadd.f32 0.041655596, %v3667_v33  ;;  %v3675_v54 = vadd.f32 0.008332121, %v3674_v7  ;;  %v2398_v37 = vshrl.u32 %v2397_v45, 30  ;;  %v2468_v40 = vsub.s32 32, %v2467_v38 }
 0x30f   :  { %v2470_v48 = vshll.u32 %v9488_v26, %v2467_v38  ;;  %vm3688_vm12 = vcmp.eq.s32.totalorder %v7614_v20, 2  ;;  %v2473_v42 = vshll.u32 %v9489_v32, %v2467_v38  ;;  %vm3684_vm14 = vcmp.lt.s32.totalorder %v7614_v20, 2 }
 0x310   :  { %v3669_v28 = vmul.f32 %v3668_v63, %v3666_v10  ;;  %v3676_v35 = vmul.f32 %v3675_v54, %v3666_v10  ;;  %v2399_v9 = vshll.u32 %v2398_v37, 30  ;;  %v2471_v58 = vshrl.u32 %v9489_v32, %v2468_v40 }
 0x311   :  { %v2474_v11 = vshrl.u32 %v9491_v50, %v2468_v40  ;;  %v2477_v25 = vshrl.u32 %v9490_v60, %v2468_v40  ;;  %vm3681_vm3 = vweird.f32 %v7362_v22  ;;  %v2422_v16 = vsub.s32 4, %v2398_v37 }
 0x312   :  { %v3670_v56 = vadd.f32 -0.4999988, %v3669_v28  ;;  %v3677_v59 = vadd.f32 -0.16666654, %v3676_v35  ;;  %v7631_v2 = vsub.s32 %v2396_v46, %v2399_v9  ;;  %v2476_v62 = vshll.u32 %v9491_v50, %v2467_v38 }
 0x313   :  { %v2479_v47 = vshll.u32 %v9490_v60, %v2467_v38  ;;  %v2480_v6 = vshrl.u32 %v9492_v27, %v2468_v40  ;;  %v2483_v12 = vshrl.u32 %v9493_v0, %v2468_v40  ;;  %vm7651_vm1 = vcmp.le.f32.partialorder %v2298_v21, 0.7853982 }
 0x314   :  { %v3671_v36 = vmul.f32 %v3670_v56, %v3666_v10  ;;  %v3678_v14 = vmul.f32 %v3677_v59, %v3666_v10  ;;  %vm2401_vm2 = vcmp.lt.s32.totalorder %v7631_v2, 0  ;;  %v2402_v51 = vsub.s32 0, %v7631_v2 }
 0x315   :  { %v2472_v10 = vor.u32 %v2471_v58, %v2470_v48  ;;  %v2475_v46 = vor.u32 %v2474_v11, %v2473_v42  ;;  %v2481_v15 = vor.u32 %v2480_v6, %v2479_v47  ;;  %v2478_v7 = vor.u32 %v2477_v25, %v2476_v62 }
 0x316   :  { %v3672_v29 = vadd.f32 1.0, %v3671_v36  ;;  %v3679_v3 = vadd.f32 1.0, %v3678_v14  ;;  %v2403_v23 = vsel %vm2401_vm2, %v2402_v51, %v7631_v2  ;;  %v2482_v45 = vshll.u32 %v9492_v27, %v2467_v38 }
 0x317   :  { %v2404_v41 = vclz %v2403_v23  ;;  %v2469_v63 = vshrl.u32 %v9488_v26, %v2468_v40  ;;  %vm2485_vm7 = vcmp.lt.s32.totalorder %v7623_v4, 1  ;;  %v5506_v54 = vadd.s32 4294967169, %v4007_v18 }
 0x318   :  { %v3680_v5 = vmul.f32 %v3679_v3, %v3664_v17  ;;  %v3689_v33 = vxor.u32 2147483648, %v3672_v29  ;;  %v2423_v21 = vsel %vm2300_vm15, %v2422_v16, %v2398_v37  ;;  %v2484_v35 = vor.u32 %v2483_v12, %v2482_v45 }
 0x319   :  { %v5474_v1 = vadd.s32 4294967294, %v2404_v41  ;;  %vm2488_vm8 = vcmp.lt.s32.totalorder %v7623_v4, 4  ;;  %vm2487_vm9 = vcmp.lt.s32.totalorder %v7623_v4, 3  ;;  %v2493_v17 = vsel %vm2485_vm7, %v2472_v10, %v2475_v46 }
 0x31a   :  { %v3686_v28 = vxor.u32 2147483648, %v3680_v5  ;;  %v2494_v38 = vsel %vm2488_vm8, %v2481_v15, 920167782  ;;  %v3690_v9 = vsel %vm3688_vm12, %v3689_v33, %v3680_v5  ;;  %vm2486_vm10 = vcmp.lt.s32.totalorder %v7623_v4, 2 }
 0x31b   :  { %vm5475_vm4 = vcmp.lt.s32.totalorder %v5474_v1, 0  ;;  %v2495_v37 = vsel %vm2487_vm9, %v2478_v7, %v2494_v38  ;;  %v2497_v25 = vsel %vm2485_vm7, %v2475_v46, %v2478_v7  ;;  %v2498_v22 = vsel %vm2488_vm8, %v2484_v35, 1326507024 }
 0x31c   :  { %v3687_v40 = vsel %vm3685_vm11, %v3672_v29, %v3686_v28  ;;  %v2407_v18 = vsel %vm5475_vm4, 0, %v5474_v1  ;;  %v2496_v11 = vsel %vm2486_vm10, %v2493_v17, %v2495_v37  ;;  %v2490_v51 = vsel %vm2488_vm8, %v2478_v7, 2102212464 }
 0x31d   :  { %v3691_v56 = vsel %vm3684_vm14, %v3687_v40, %v3690_v9  ;;  %v2408_v59 = vsub.s32 32, %v2407_v18  ;;  %v2412_v48 = vsub.s32 4294967266, %v2407_v18  ;;  %v2409_v42 = vshll.u32 %v7631_v2, %v2407_v18 }
 0x31e   :  { %v3692_v58 = vsel %vm3681_vm3, nan, %v3691_v56  ;;  %v2526_v14 = vand.u32 65535, %v2496_v11  ;;  %v2425_v2 = vsel %vm7651_vm1, 0, %v2423_v21  ;;  %v2499_v16 = vsel %vm2487_vm9, %v2481_v15, %v2498_v22 }
 0x31f   :  { %5419 = vst.msk [vmem:[%s9457_s1 + $0xa0] sm:$0xff] %vm5398_vm6, %v3692_v58  ;;  %v2410_v20 = vshrl.u32 %v7616_v44, %v2408_v59  ;;  %v2413_v36 = vadd.s32 127, %v2412_v48  ;;  %v2527_v62 = vshrl.u32 %v2496_v11, 16  ;;  %v2500_v44 = vsel %vm2486_vm10, %v2497_v25, %v2499_v16 }
 0x320   :  { %v4013_v29 = vadd.s32 1, %v5506_v54  ;;  %v2504_v3 = vand.u32 65535, %v2500_v44  ;;  %v2505_v23 = vshrl.u32 %v2500_v44, 16  ;;  %v2530_v41 = vmul.u32 %v2526_v14, %v7629_v19 }
 0x321   :  { %v2411_v47 = vor.u32 %v2410_v20, %v2409_v42  ;;  %v2414_v6 = vshll.u32 %v2413_v36, 23  ;;  %v2529_v12 = vmul.u32 %v2527_v62, %v7626_v31  ;;  %v2442_v33 = vadd.s32 3, %v2425_v2 }
 0x322   :  { %v2489_v7 = vsel %vm2485_vm7, %v2469_v63, %v2472_v10  ;;  %v2491_v15 = vsel %vm2487_vm9, %v2475_v46, %v2490_v51  ;;  %v2507_v1 = vmul.u32 %v2505_v23, %v7626_v31  ;;  %v2508_v28 = vmul.u32 %v2504_v3, %v7629_v19 }
 0x323   :  { %v2415_v5 = vor.u32 4788187, %v2414_v6  ;;  %v2418_v45 = vcvt.s32.f32 %v2411_v47  ;;  %v2528_v54 = vmul.u32 %v2526_v14, %v7626_v31  ;;  %v2531_v35 = vmul.u32 %v2527_v62, %v7629_v19 }
 0x324   :  { %v2532_v17 = vshll.u32 %v2529_v12, 16  ;;  %vm4014_vm5 = vcmp.gt.s32.totalorder %v4013_v29, 0  ;;  %v2506_v38 = vmul.u32 %v2504_v3, %v7626_v31  ;;  %v2509_v40 = vmul.u32 %v2505_v23, %v7629_v19 }
 0x325   :  { %v2416_v21 = vand.u32 2147483647, %v2415_v5  ;;  %v2510_v10 = vshll.u32 %v2507_v1, 16  ;;  %v2534_v63 = vshll.u32 %v2530_v41, 16  ;;  %v2512_v46 = vshll.u32 %v2508_v28, 16 }
 0x326   :  { %vm2536_vm13 = vc.u32 %v2528_v54, %v2532_v17  ;;  %v2538_v18 = vadd.s32 %v2532_v17, %v2528_v54  ;;  %v4015_v59 = vsel %vm4014_vm5, %v4013_v29, 0  ;;  %v2492_v31 = vsel %vm2486_vm10, %v2489_v7, %v2491_v15 }
 0x327   :  { %v2419_v9 = vmul.f32 %v2418_v45, %v2416_v21  ;;  %vm2514_vm11 = vc.u32 %v2506_v38, %v2510_v10  ;;  %v2516_v37 = vadd.s32 %v2510_v10, %v2506_v38  ;;  %v2537_v56 = vsel %vm2536_vm13, 1, %v9494_v49 }
 0x328   :  { %v2515_v58 = vsel %vm2514_vm11, 1, %v9494_v49  ;;  %v2539_v42 = vadd.s32 %v2537_v56, %v2531_v35  ;;  %vm2540_vm12 = vc.u32 %v2538_v18, %v2534_v63  ;;  %v2533_v36 = vshrl.u32 %v2529_v12, 16 }
 0x329   :  { %v2420_v48 = vxor.u32 2147483648, %v2419_v9  ;;  %v2517_v19 = vadd.s32 %v2515_v58, %v2509_v40  ;;  %vm2518_vm14 = vc.u32 %v2516_v37, %v2512_v46  ;;  %v2541_v11 = vsel %vm2540_vm12, 1, %v9494_v49 }
 0x32a   :  { %v2519_v20 = vsel %vm2518_vm14, 1, %v9494_v49  ;;  %v2543_v22 = vadd.s32 %v2541_v11, %v2539_v42  ;;  %v2511_v2 = vshrl.u32 %v2507_v1, 16  ;;  %v4017_v16 = vand.u32 31, %v4015_v59 }
 0x32b   :  { %v2421_v25 = vsel %vm2300_vm15, %v2420_v48, %v2419_v9  ;;  %v2521_v51 = vadd.s32 %v2519_v20, %v2517_v19  ;;  %v2535_v62 = vshrl.u32 %v2530_v41, 16  ;;  %v4011_v6 = vor.u32 8388608, %v7620_v61 }
 0x32c   :  { %v2424_v14 = vsel %vm7651_vm1, %v7383_v52, %v2421_v25  ;;  %v2544_v47 = vadd.s32 %v2543_v22, %v2533_v36  ;;  %v7721_v44 = vand.u32 3, %v2442_v33  ;;  %v2513_v29 = vshrl.u32 %v2508_v28, 16 }
 0x32d   :  { %v2426_v4 = vmul.f32 %v2424_v14, %v2424_v14  ;;  %v2522_v3 = vadd.s32 %v2521_v51, %v2511_v2  ;;  %v7723_v23 = vsub.s32 32, %v4017_v16  ;;  %v2546_v34 = vmul.u32 %v7611_v55, %v2492_v31 }
 0x32e   :  { %v2545_v7 = vadd.s32 %v2544_v47, %v2535_v62  ;;  %v7728_v45 = vadd.s32 %v2538_v18, %v2534_v63  ;;  %v7730_v1 = vshrl.u32 %v4015_v59, 5  ;;  %v4020_v54 = vshll.u32 %v9488_v26, %v4017_v16 }
 0x32f   :  { %v2427_v12 = vmul.f32 -0.001358992, %v2426_v4  ;;  %v2434_v5 = vmul.f32 -0.00019511016, %v2426_v4  ;;  %v7726_v15 = vadd.s32 %v2522_v3, %v2513_v29  ;;  %v4021_v61 = vshrl.u32 %v9489_v32, %v7723_v23 }
 0x330   :  { %v2549_v28 = vadd.s32 1, %v2545_v7  ;;  %v4023_v21 = vshll.u32 %v9489_v32, %v4017_v16  ;;  %v4024_v55 = vshrl.u32 %v9491_v50, %v7723_v23  ;;  %v4027_v35 = vshrl.u32 %v9490_v60, %v7723_v23 }
 0x331   :  { %v2428_v41 = vadd.f32 0.041655596, %v2427_v12  ;;  %v2435_v33 = vadd.f32 0.008332121, %v2434_v5  ;;  %vm2548_vm15 = vc.u32 %v7726_v15, %v7728_v45  ;;  %v4026_v10 = vshll.u32 %v9491_v50, %v4017_v16 }
 0x332   :  { %v2550_v40 = vsel %vm2548_vm15, %v2549_v28, %v2545_v7  ;;  %v7743_v9 = vor.u32 %v4021_v61, %v4020_v54  ;;  %v4029_v46 = vshll.u32 %v9490_v60, %v4017_v16  ;;  %v4030_v18 = vshrl.u32 %v9492_v27, %v7723_v23 }
 0x333   :  { %v2429_v17 = vmul.f32 %v2428_v41, %v2426_v4  ;;  %v2436_v38 = vmul.f32 %v2435_v33, %v2426_v4  ;;  %v2551_v63 = vadd.s32 %v2550_v40, %v2546_v34  ;;  %v4032_v59 = vshll.u32 %v9492_v27, %v4017_v16 }
 0x334   :  { %v4033_v48 = vshrl.u32 %v9493_v0, %v7723_v23  ;;  %v7751_v42 = vor.u32 %v4024_v55, %v4023_v21  ;;  %v4028_v31 = vor.u32 %v4027_v35, %v4026_v10  ;;  %v4031_v19 = vor.u32 %v4030_v18, %v4029_v46 }
 0x335   :  { %v2430_v37 = vadd.f32 -0.4999988, %v2429_v17  ;;  %v2437_v56 = vadd.f32 -0.16666654, %v2436_v38  ;;  %v2552_v58 = vadd.s32 536870912, %v2551_v63  ;;  %vm4038_vm2 = vcmp.lt.s32.totalorder %v7730_v1, 4 }
 0x336   :  { %v4034_v20 = vor.u32 %v4033_v48, %v4032_v59  ;;  %vm2441_vm3 = vweird.f32 %v7383_v52  ;;  %v4044_v22 = vsel %vm4038_vm2, %v4031_v19, 920167782  ;;  %v7759_v2 = vshll.u32 %v4011_v6, 8 }
 0x337   :  { %v2431_v11 = vmul.f32 %v2430_v37, %v2426_v4  ;;  %v2438_v25 = vmul.f32 %v2437_v56, %v2426_v4  ;;  %v7755_v36 = vshrl.u32 %v2552_v58, 30  ;;  %vm4035_vm1 = vcmp.lt.s32.totalorder %v7730_v1, 1 }
 0x338   :  { %vm4037_vm7 = vcmp.lt.s32.totalorder %v7730_v1, 3  ;;  %v4043_v62 = vsel %vm4035_vm1, %v7743_v9, %v7751_v42  ;;  %v4047_v6 = vsel %vm4035_vm1, %v7751_v42, %v4028_v31  ;;  %vm2444_vm8 = vcmp.lt.s32.totalorder %v7721_v44, 2 }
 0x339   :  { %v2432_v51 = vadd.f32 1.0, %v2431_v11  ;;  %v2439_v16 = vadd.f32 1.0, %v2438_v25  ;;  %v2554_v4 = vshll.u32 %v7755_v36, 30  ;;  %v4045_v47 = vsel %vm4037_vm7, %v4028_v31, %v4044_v22 }
 0x33a   :  { %v4048_v12 = vsel %vm4038_vm2, %v4034_v20, 1326507024  ;;  %vm2445_vm4 = vcmp.eq.s32.totalorder %v7721_v44, 0  ;;  %vm4036_vm9 = vcmp.lt.s32.totalorder %v7730_v1, 2  ;;  %vm2448_vm10 = vcmp.eq.s32.totalorder %v7721_v44, 2 }
 0x33b   :  { %v2440_v29 = vmul.f32 %v2439_v16, %v2424_v14  ;;  %v2449_v3 = vxor.u32 2147483648, %v2432_v51  ;;  %v2555_v5 = vsub.s32 %v2551_v63, %v2554_v4  ;;  %v4049_v7 = vsel %vm4037_vm7, %v4031_v19, %v4048_v12 }
 0x33c   :  { %v4046_v14 = vsel %vm4036_vm9, %v4043_v62, %v4045_v47  ;;  %v4050_v61 = vsel %vm4036_vm9, %v4047_v6, %v4049_v7  ;;  %v4052_v33 = vand.u32 65535, %v7759_v2  ;;  %v4053_v55 = vshrl.u32 %v7759_v2, 16 }
 0x33d   :  { %v2446_v34 = vxor.u32 2147483648, %v2440_v29  ;;  %vm2556_vm5 = vcmp.lt.s32.totalorder %v2555_v5, 0  ;;  %v2557_v41 = vsub.s32 0, %v2555_v5  ;;  %v4054_v28 = vand.u32 65535, %v4050_v61 }
 0x33e   :  { %v2450_v21 = vsel %vm2448_vm10, %v2449_v3, %v2440_v29  ;;  %v4055_v35 = vshrl.u32 %v4050_v61, 16  ;;  %v4076_v40 = vand.u32 65535, %v4046_v14  ;;  %v4077_v10 = vshrl.u32 %v4046_v14, 16  ;;  %v276_v29 = vpop.permute.xlu0 %275 }
 0x33f   :  { %v2447_v54 = vsel %vm2445_vm4, %v2432_v51, %v2446_v34  ;;  %v2558_v38 = vsel %vm2556_vm5, %v2557_v41, %v2555_v5  ;;  %v4058_v37 = vmul.u32 %v4054_v28, %v4053_v55  ;;  %v4019_v56 = vshrl.u32 %v9488_v26, %v7723_v23 }
 0x340   :  { %v2451_v17 = vsel %vm2444_vm8, %v2447_v54, %v2450_v21  ;;  %v2559_v46 = vclz %v2558_v38  ;;  %v4057_v18 = vmul.u32 %v4055_v35, %v4052_v33  ;;  %v2547_v44 = vadd.s32 %v7728_v45, %v7726_v15 }
 0x341   :  { %v2452_v63 = vsel %vm2441_vm3, nan, %v2451_v17  ;;  %v4056_v48 = vmul.u32 %v4054_v28, %v4052_v33  ;;  %v4040_v52 = vsel %vm4038_vm2, %v4028_v31, 2102212464  ;;  %v4059_v19 = vmul.u32 %v4055_v35, %v4053_v55  ;;  %v280_v28 = vpop.permute.xlu1 %279 }
 0x342   :  { %5411 = vst.msk [vmem:[%s9457_s1 + $0x60] sm:$0xff] %vm5398_vm6, %v2452_v63  ;;  %v5477_v59 = vadd.s32 4294967294, %v2559_v46  ;;  %v4060_v58 = vshll.u32 %v4057_v18, 16  ;;  %v4062_v11 = vshll.u32 %v4058_v37, 16  ;;  %v4079_v25 = vmul.u32 %v4077_v10, %v4052_v33  ;;  %v9530_v46 = vld [vmem:[#allocation4_spill] sm:$0xff] }
 0x343   :  { %v4078_v22 = vmul.u32 %v4076_v40, %v4052_v33  ;;  %vm2455_vm12 = vcmp.lt.s32.totalorder %v7585_v39, 0  ;;  %v4080_v16 = vmul.u32 %v4076_v40, %v4053_v55  ;;  %v4061_v62 = vshrl.u32 %v4057_v18, 16 }
 0x344   :  { %vm5478_vm13 = vcmp.lt.s32.totalorder %v5477_v59, 0  ;;  %vm4064_vm11 = vc.u32 %v4056_v48, %v4060_v58  ;;  %v4066_v20 = vadd.s32 %v4060_v58, %v4056_v48  ;;  %v4082_v15 = vshll.u32 %v4079_v25, 16 }
 0x345   :  { %v2562_v51 = vsel %vm5478_vm13, 0, %v5477_v59  ;;  %v4065_v23 = vsel %vm4064_vm11, 1, %v9494_v49  ;;  %v4081_v31 = vmul.u32 %v4077_v10, %v4053_v55  ;;  %v4084_v61 = vshll.u32 %v4080_v16, 16 }
 0x346   :  { %v2563_v45 = vsub.s32 32, %v2562_v51  ;;  %v2567_v4 = vsub.s32 4294967266, %v2562_v51  ;;  %v4067_v47 = vadd.s32 %v4065_v23, %v4059_v19  ;;  %v2564_v6 = vshll.u32 %v2555_v5, %v2562_v51 }
 0x347   :  { %vm4068_vm14 = vc.u32 %v4066_v20, %v4062_v11  ;;  %vm4086_vm15 = vc.u32 %v4078_v22, %v4082_v15  ;;  %v4088_v41 = vadd.s32 %v4082_v15, %v4078_v22  ;;  %v2577_v35 = vsub.s32 4, %v7755_v36 }
 0x348   :  { %v2565_v3 = vshrl.u32 %v2547_v44, %v2563_v45  ;;  %v2568_v12 = vadd.s32 127, %v2567_v4  ;;  %v4069_v7 = vsel %vm4068_vm14, 1, %v9494_v49  ;;  %v4087_v34 = vsel %vm4086_vm15, 1, %v9494_v49 }
 0x349   :  { %v4071_v14 = vadd.s32 %v4069_v7, %v4067_v47  ;;  %v4089_v33 = vadd.s32 %v4087_v34, %v4081_v31  ;;  %v357_v5 = vsel %vm42_vm0, %v6169_v13, %v276_v29  ;;  %v4039_v55 = vsel %vm4035_vm1, %v4019_v56, %v7743_v9 }
 0x34a   :  { %v2566_v54 = vor.u32 %v2565_v3, %v2564_v6  ;;  %v2569_v21 = vshll.u32 %v2568_v12, 23  ;;  %vm4090_vm2 = vc.u32 %v4088_v41, %v4084_v61  ;;  %v389_v38 = vmul.f32 %v357_v5, %v5727_v53 }
 0x34b   :  { %v4072_v17 = vadd.s32 %v4071_v14, %v4061_v62  ;;  %v4063_v10 = vshrl.u32 %v4058_v37, 16  ;;  %v4091_v63 = vsel %vm4090_vm2, 1, %v9494_v49  ;;  %v358_v18 = vsel %vm42_vm0, %v9530_v46, %v280_v28 }
 0x34c   :  { %v2570_v40 = vor.u32 4788187, %v2569_v21  ;;  %v4041_v13 = vsel %vm4037_vm7, %v7751_v42, %v4040_v52  ;;  %v4083_v44 = vshrl.u32 %v4079_v25, 16  ;;  %v4093_v59 = vadd.s32 %v4091_v63, %v4089_v33 }
 0x34d   :  { %v7821_v9 = vadd.f32 %v389_v38, %v5729_v57  ;;  %v2573_v48 = vcvt.s32.f32 %v2566_v54  ;;  %v2578_v37 = vsel %vm2455_vm12, %v2577_v35, %v7755_v36  ;;  %v4073_v58 = vadd.s32 %v4072_v17, %v4063_v10 }
 0x34e   :  { %v2571_v56 = vand.u32 2147483647, %v2570_v40  ;;  %v4085_v19 = vshrl.u32 %v4080_v16, 16  ;;  %v4094_v11 = vadd.s32 %v4093_v59, %v4083_v44  ;;  %v390_v22 = vmul.f32 %v358_v18, %v5727_v53 }
 0x34f   :  { %v2763_v20 = vand.u32 2147483647, %v7821_v9  ;;  %vm7830_vm3 = vcmp.le.f32.partialorder %v2453_v8, 0.7853982  ;;  %v4092_v25 = vadd.s32 %v4088_v41, %v4084_v61  ;;  %v2766_v51 = vand.u32 2139095040, %v7821_v9 }
 0x350   :  { %v2574_v52 = vmul.f32 %v2573_v48, %v2571_v56  ;;  %v2580_v36 = vsel %vm7830_vm3, 0, %v2578_v37  ;;  %v4042_v23 = vsel %vm4036_vm9, %v4039_v55, %v4041_v13  ;;  %v4095_v16 = vadd.s32 %v4094_v11, %v4085_v19 }
 0x351   :  { %vm4098_vm1 = vc.u32 %v4073_v58, %v4092_v25  ;;  %v2767_v45 = vshrl.u32 %v2766_v51, 23  ;;  %v2770_v8 = vand.u32 8388607, %v2763_v20  ;;  %v7842_v62 = vadd.f32 %v390_v22, %v5729_v57 }
 0x352   :  { %v2575_v15 = vxor.u32 2147483648, %v2574_v52  ;;  %v4099_v4 = vadd.s32 1, %v4095_v16  ;;  %v4096_v6 = vmul.u32 %v7759_v2, %v4042_v23  ;;  %v2597_v29 = vadd.s32 3, %v2580_v36 }
 0x353   :  { %v5482_v31 = vadd.s32 4294967169, %v2767_v45  ;;  %v2771_v34 = vor.u32 8388608, %v2770_v8  ;;  %v2921_v61 = vand.u32 2139095040, %v7842_v62  ;;  %vm4005_vm8 = vcmp.lt.s32.totalorder %v7606_v30, 0 }
 0x354   :  { %v2576_v47 = vsel %vm2455_vm12, %v2575_v15, %v2574_v52  ;;  %v4100_v3 = vsel %vm4098_vm1, %v4099_v4, %v4095_v16  ;;  %v7851_v54 = vand.u32 3, %v2597_v29  ;;  %v4097_v46 = vadd.s32 %v4092_v25, %v4073_v58 }
 0x355   :  { %v2579_v1 = vsel %vm7830_vm3, %v7585_v39, %v2576_v47  ;;  %v4101_v7 = vadd.s32 %v4100_v3, %v4096_v6  ;;  %v2773_v14 = vadd.s32 1, %v5482_v31  ;;  %v7853_v55 = vshll.u32 %v2771_v34, 8 }
 0x356   :  { %v2581_v12 = vmul.f32 %v2579_v1, %v2579_v1  ;;  %v2922_v38 = vshrl.u32 %v2921_v61, 23  ;;  %vm2603_vm4 = vcmp.eq.s32.totalorder %v7851_v54, 2  ;;  %v2918_v13 = vand.u32 2147483647, %v7842_v62 }
 0x357   :  { %v4102_v28 = vadd.s32 536870912, %v4101_v7  ;;  %vm2774_vm7 = vcmp.gt.s32.totalorder %v2773_v14, 0  ;;  %v7861_v48 = vand.u32 65535, %v7853_v55  ;;  %vm2600_vm9 = vcmp.eq.s32.totalorder %v7851_v54, 0 }
 0x358   :  { %v2582_v41 = vmul.f32 -0.001358992, %v2581_v12  ;;  %v2589_v33 = vmul.f32 -0.00019511016, %v2581_v12  ;;  %v2775_v2 = vsel %vm2774_vm7, %v2773_v14, 0  ;;  %v7867_v22 = vadd.s32 4294967169, %v2922_v38 }
 0x359   :  { %v4103_v5 = vshrl.u32 %v4102_v28, 30  ;;  %v2777_v17 = vand.u32 31, %v2775_v2  ;;  %v7864_v19 = vshrl.u32 %v2775_v2, 5  ;;  %vm2599_vm10 = vcmp.lt.s32.totalorder %v7851_v54, 2 }
 0x35a   :  { %v2583_v21 = vadd.f32 0.041655596, %v2582_v41  ;;  %v2590_v35 = vadd.f32 0.008332121, %v2589_v33  ;;  %vm2596_vm13 = vweird.f32 %v7585_v39  ;;  %vm7892_vm11 = vcmp.le.f32.partialorder %v4003_v24, 0.7853982 }
 0x35b   :  { %v4104_v63 = vshll.u32 %v4103_v5, 30  ;;  %v2778_v18 = vsub.s32 32, %v2777_v17  ;;  %v4127_v37 = vsub.s32 4, %v4103_v5  ;;  %v2780_v11 = vshll.u32 %v9488_v26, %v2777_v17 }
 0x35c   :  { %v2584_v40 = vmul.f32 %v2583_v21, %v2581_v12  ;;  %v2591_v10 = vmul.f32 %v2590_v35, %v2581_v12  ;;  %v2783_v51 = vshll.u32 %v9489_v32, %v2777_v17  ;;  %v2786_v23 = vshll.u32 %v9491_v50, %v2777_v17 }
 0x35d   :  { %v7858_v56 = vsub.s32 %v4101_v7, %v4104_v63  ;;  %v2781_v25 = vshrl.u32 %v9489_v32, %v2778_v18  ;;  %v2784_v36 = vshrl.u32 %v9491_v50, %v2778_v18  ;;  %v2787_v8 = vshrl.u32 %v9490_v60, %v2778_v18 }
 0x35e   :  { %v2585_v44 = vadd.f32 -0.4999988, %v2584_v40  ;;  %v2592_v59 = vadd.f32 -0.16666654, %v2591_v10  ;;  %v7881_v47 = vsel %vm4005_vm8, %v4127_v37, %v4103_v5  ;;  %v2779_v6 = vshrl.u32 %v9488_v26, %v2778_v18 }
 0x35f   :  { %vm4106_vm5 = vcmp.lt.s32.totalorder %v7858_v56, 0  ;;  %v4107_v52 = vsub.s32 0, %v7858_v56  ;;  %v2790_v31 = vshrl.u32 %v9492_v27, %v2778_v18  ;;  %v2793_v7 = vshrl.u32 %v9493_v0, %v2778_v18 }
 0x360   :  { %v2586_v58 = vmul.f32 %v2585_v44, %v2581_v12  ;;  %v2593_v42 = vmul.f32 %v2592_v59, %v2581_v12  ;;  %v2789_v12 = vshll.u32 %v9490_v60, %v2777_v17  ;;  %v2782_v14 = vor.u32 %v2781_v25, %v2780_v11 }
 0x361   :  { %v4108_v45 = vsel %vm4106_vm5, %v4107_v52, %v7858_v56  ;;  %v2785_v61 = vor.u32 %v2784_v36, %v2783_v51  ;;  %v2792_v41 = vshll.u32 %v9492_v27, %v2777_v17  ;;  %v2788_v2 = vor.u32 %v2787_v8, %v2786_v23 }
 0x362   :  { %v2587_v16 = vadd.f32 1.0, %v2586_v58  ;;  %v2594_v15 = vadd.f32 1.0, %v2593_v42  ;;  %v4109_v4 = vclz %v4108_v45  ;;  %v2791_v21 = vor.u32 %v2790_v31, %v2789_v12 }
 0x363   :  { %v2794_v35 = vor.u32 %v2793_v7, %v2792_v41  ;;  %vm2795_vm14 = vcmp.lt.s32.totalorder %v7864_v19, 1  ;;  %vm2796_vm15 = vcmp.lt.s32.totalorder %v7864_v19, 2  ;;  %vm2797_vm2 = vcmp.lt.s32.totalorder %v7864_v19, 3 }
 0x364   :  { %v2595_v29 = vmul.f32 %v2594_v15, %v2579_v1  ;;  %v2604_v3 = vxor.u32 2147483648, %v2587_v16  ;;  %v5507_v34 = vadd.s32 4294967294, %v4109_v4  ;;  %vm2798_vm3 = vcmp.lt.s32.totalorder %v7864_v19, 4 }
 0x365   :  { %v2799_v10 = vsel %vm2795_vm14, %v2779_v6, %v2782_v14  ;;  %v2800_v18 = vsel %vm2798_vm3, %v2788_v2, 2102212464  ;;  %v2803_v44 = vsel %vm2795_vm14, %v2782_v14, %v2785_v61  ;;  %v2804_v59 = vsel %vm2798_vm3, %v2791_v21, 920167782 }
 0x366   :  { %v2601_v33 = vxor.u32 2147483648, %v2595_v29  ;;  %v2605_v28 = vsel %vm2603_vm4, %v2604_v3, %v2595_v29  ;;  %vm5508_vm12 = vcmp.lt.s32.totalorder %v5507_v34, 0  ;;  %v2805_v39 = vsel %vm2797_vm2, %v2788_v2, %v2804_v59 }
 0x367   :  { %v4112_v17 = vsel %vm5508_vm12, 0, %v5507_v34  ;;  %v2801_v58 = vsel %vm2797_vm2, %v2785_v61, %v2800_v18  ;;  %v2806_v42 = vsel %vm2796_vm15, %v2803_v44, %v2805_v39  ;;  %v2807_v52 = vsel %vm2795_vm14, %v2785_v61, %v2788_v2 }
 0x368   :  { %v2602_v5 = vsel %vm2600_vm9, %v2587_v16, %v2601_v33  ;;  %v4113_v38 = vsub.s32 32, %v4112_v17  ;;  %v4117_v40 = vsub.s32 4294967266, %v4112_v17  ;;  %v4114_v54 = vshll.u32 %v7858_v56, %v4112_v17 }
 0x369   :  { %v2606_v24 = vsel %vm2599_vm10, %v2602_v5, %v2605_v28  ;;  %v2808_v25 = vsel %vm2798_vm3, %v2794_v35, 1326507024  ;;  %v2836_v56 = vand.u32 65535, %v2806_v42  ;;  %v2813_v16 = vshrl.u32 %v7853_v55, 16 }
 0x36a   :  { %v2607_v63 = vsel %vm2596_vm13, nan, %v2606_v24  ;;  %v4115_v37 = vshrl.u32 %v4097_v46, %v4113_v38  ;;  %v4118_v11 = vadd.s32 127, %v4117_v40  ;;  %v2809_v46 = vsel %vm2797_vm2, %v2791_v21, %v2808_v25 }
 0x36b   :  { %5412 = vst.msk [vmem:[%s9457_s1 + $0x68] sm:$0xff] %vm5398_vm6, %v2607_v63  ;;  %v2810_v23 = vsel %vm2796_vm15, %v2807_v52, %v2809_v46  ;;  %v2837_v15 = vshrl.u32 %v2806_v42, 16  ;;  %v2928_v45 = vadd.s32 1, %v7867_v22  ;;  %v7937_v31 = vand.u32 8388607, %v2918_v13 }
 0x36c   :  { %v4116_v51 = vor.u32 %v4115_v37, %v4114_v54  ;;  %v4119_v36 = vshll.u32 %v4118_v11, 23  ;;  %v2814_v4 = vand.u32 65535, %v2810_v23  ;;  %v2815_v6 = vshrl.u32 %v2810_v23, 16 }
 0x36d   :  { %v4130_v29 = vsel %vm7892_vm11, 0, %v7881_v47  ;;  %v7944_v3 = vsel %vm2796_vm15, %v2799_v10, %v2801_v58  ;;  %v2839_v12 = vmul.u32 %v2837_v15, %v7861_v48  ;;  %v2840_v7 = vmul.u32 %v2836_v56, %v2813_v16 }
 0x36e   :  { %v4120_v8 = vor.u32 4788187, %v4119_v36  ;;  %v4123_v22 = vcvt.s32.f32 %v4116_v51  ;;  %v2817_v14 = vmul.u32 %v2815_v6, %v7861_v48  ;;  %v2818_v61 = vmul.u32 %v2814_v4, %v2813_v16 }
 0x36f   :  { %v2838_v41 = vmul.u32 %v2836_v56, %v7861_v48  ;;  %v2841_v33 = vmul.u32 %v2837_v15, %v2813_v16  ;;  %v2842_v28 = vshll.u32 %v2839_v12, 16  ;;  %vm2929_vm1 = vcmp.gt.s32.totalorder %v2928_v45, 0 }
 0x370   :  { %v4121_v34 = vand.u32 2147483647, %v4120_v8  ;;  %v2816_v47 = vmul.u32 %v2814_v4, %v7861_v48  ;;  %v2819_v21 = vmul.u32 %v2815_v6, %v2813_v16  ;;  %v2820_v19 = vshll.u32 %v2817_v14, 16 }
 0x371   :  { %v2822_v35 = vshll.u32 %v2818_v61, 16  ;;  %v2844_v5 = vshll.u32 %v2840_v7, 16  ;;  %vm2846_vm7 = vc.u32 %v2838_v41, %v2842_v28  ;;  %v2848_v17 = vadd.s32 %v2842_v28, %v2838_v41 }
 0x372   :  { %v4124_v2 = vmul.f32 %v4123_v22, %v4121_v34  ;;  %vm2824_vm4 = vc.u32 %v2816_v47, %v2820_v19  ;;  %v2826_v38 = vadd.s32 %v2820_v19, %v2816_v47  ;;  %v2847_v40 = vsel %vm2846_vm7, 1, %v9494_v49 }
 0x373   :  { %v2825_v10 = vsel %vm2824_vm4, 1, %v9494_v49  ;;  %v2843_v63 = vshrl.u32 %v2839_v12, 16  ;;  %v2849_v18 = vadd.s32 %v2847_v40, %v2841_v33  ;;  %vm2850_vm9 = vc.u32 %v2848_v17, %v2844_v5 }
 0x374   :  { %v4125_v24 = vxor.u32 2147483648, %v4124_v2  ;;  %v2827_v48 = vadd.s32 %v2825_v10, %v2819_v21  ;;  %vm2828_vm10 = vc.u32 %v2826_v38, %v2822_v35  ;;  %v2851_v59 = vsel %vm2850_vm9, 1, %v9494_v49 }
 0x375   :  { %v2829_v37 = vsel %vm2828_vm10, 1, %v9494_v49  ;;  %v2853_v11 = vadd.s32 %v2851_v59, %v2849_v18  ;;  %v2930_v39 = vsel %vm2929_vm1, %v2928_v45, 0  ;;  %v2821_v42 = vshrl.u32 %v2817_v14, 16 }
 0x376   :  { %v4126_v44 = vsel %vm4005_vm8, %v4125_v24, %v4124_v2  ;;  %v2831_v52 = vadd.s32 %v2829_v37, %v2827_v48  ;;  %v2932_v25 = vand.u32 31, %v2930_v39  ;;  %v2823_v51 = vshrl.u32 %v2818_v61, 16 }
 0x377   :  { %v4129_v54 = vsel %vm7892_vm11, %v7606_v30, %v4126_v44  ;;  %v2845_v36 = vshrl.u32 %v2840_v7, 16  ;;  %v2854_v46 = vadd.s32 %v2853_v11, %v2843_v63  ;;  %v4147_v8 = vadd.s32 3, %v4130_v29 }
 0x378   :  { %v4131_v58 = vmul.f32 %v4129_v54, %v4129_v54  ;;  %v2832_v16 = vadd.s32 %v2831_v52, %v2821_v42  ;;  %v7960_v15 = vsub.s32 32, %v2932_v25  ;;  %v2856_v4 = vmul.u32 %v7853_v55, %v7944_v3 }
 0x379   :  { %v2855_v1 = vadd.s32 %v2854_v46, %v2845_v36  ;;  %v2926_v6 = vor.u32 8388608, %v7937_v31  ;;  %v7967_v22 = vadd.s32 %v2848_v17, %v2844_v5  ;;  %v7969_v14 = vshrl.u32 %v2930_v39, 5 }
 0x37a   :  { %v4132_v56 = vmul.f32 -0.001358992, %v4131_v58  ;;  %v4139_v23 = vmul.f32 -0.00019511016, %v4131_v58  ;;  %v7965_v34 = vadd.s32 %v2832_v16, %v2823_v51  ;;  %v2935_v61 = vshll.u32 %v9488_v26, %v2932_v25 }
 0x37b   :  { %v2859_v7 = vadd.s32 1, %v2855_v1  ;;  %v2936_v29 = vshrl.u32 %v9489_v32, %v7960_v15  ;;  %v2939_v55 = vshrl.u32 %v9491_v50, %v7960_v15  ;;  %v2938_v3 = vshll.u32 %v9489_v32, %v2932_v25 }
 0x37c   :  { %v4133_v45 = vadd.f32 0.041655596, %v4132_v56  ;;  %v4140_v12 = vadd.f32 0.008332121, %v4139_v23  ;;  %vm2858_vm8 = vc.u32 %v7965_v34, %v7967_v22  ;;  %v2941_v28 = vshll.u32 %v9491_v50, %v2932_v25 }
 0x37d   :  { %v2860_v31 = vsel %vm2858_vm8, %v2859_v7, %v2855_v1  ;;  %v2942_v2 = vshrl.u32 %v9490_v60, %v7960_v15  ;;  %v2937_v35 = vor.u32 %v2936_v29, %v2935_v61  ;;  %v2944_v5 = vshll.u32 %v9490_v60, %v2932_v25 }
 0x37e   :  { %v4134_v41 = vmul.f32 %v4133_v45, %v4131_v58  ;;  %v4141_v33 = vmul.f32 %v4140_v12, %v4131_v58  ;;  %v2861_v19 = vadd.s32 %v2860_v31, %v2856_v4  ;;  %v2945_v17 = vshrl.u32 %v9492_v27, %v7960_v15 }
 0x37f   :  { %v2947_v24 = vshll.u32 %v9492_v27, %v2932_v25  ;;  %v2948_v38 = vshrl.u32 %v9493_v0, %v7960_v15  ;;  %v7988_v18 = vor.u32 %v2939_v55, %v2938_v3  ;;  %v4148_v44 = vand.u32 3, %v4147_v8 }
 0x380   :  { %v4135_v47 = vadd.f32 -0.4999988, %v4134_v41  ;;  %v4142_v21 = vadd.f32 -0.16666654, %v4141_v33  ;;  %v2862_v63 = vadd.s32 536870912, %v2861_v19  ;;  %v2943_v48 = vor.u32 %v2942_v2, %v2941_v28  ;;  %v320_v33 = vpop.permute.xlu2 %319 }
 0x381   :  { %v2946_v59 = vor.u32 %v2945_v17, %v2944_v5  ;;  %v2949_v37 = vor.u32 %v2948_v38, %v2947_v24  ;;  %vm2953_vm5 = vcmp.lt.s32.totalorder %v7969_v14, 4  ;;  %vm4146_vm13 = vweird.f32 %v7606_v30  ;;  %v9535_v5 = vld [vmem:[#allocation2_spill] sm:$0xff] }
 0x382   :  { %v4136_v40 = vmul.f32 %v4135_v47, %v4131_v58  ;;  %v4143_v10 = vmul.f32 %v4142_v21, %v4131_v58  ;;  %v7990_v42 = vshrl.u32 %v2862_v63, 30  ;;  %vm2950_vm11 = vcmp.lt.s32.totalorder %v7969_v14, 1 }
 0x383   :  { %vm2952_vm12 = vcmp.lt.s32.totalorder %v7969_v14, 3  ;;  %v2959_v58 = vsel %vm2953_vm5, %v2946_v59, 920167782  ;;  %v2958_v36 = vsel %vm2950_vm11, %v2937_v35, %v7988_v18  ;;  %vm4149_vm14 = vcmp.lt.s32.totalorder %v4148_v44, 2 }
 0x384   :  { %v4137_v11 = vadd.f32 1.0, %v4136_v40  ;;  %v4144_v39 = vadd.f32 1.0, %v4143_v10  ;;  %v2864_v51 = vshll.u32 %v7990_v42, 30  ;;  %v2960_v46 = vsel %vm2952_vm12, %v2943_v48, %v2959_v58 }
 0x385   :  { %v2963_v56 = vsel %vm2953_vm5, %v2949_v37, 1326507024  ;;  %v8006_v23 = vshll.u32 %v2926_v6, 8  ;;  %vm2951_vm15 = vcmp.lt.s32.totalorder %v7969_v14, 2  ;;  %vm4150_vm2 = vcmp.eq.s32.totalorder %v4148_v44, 0 }
 0x386   :  { %v4145_v52 = vmul.f32 %v4144_v39, %v4129_v54  ;;  %v4154_v25 = vxor.u32 2147483648, %v4137_v11  ;;  %v2865_v8 = vsub.s32 %v2861_v19, %v2864_v51  ;;  %v2962_v54 = vsel %vm2950_vm11, %v7988_v18, %v2943_v48 }
 0x387   :  { %vm4153_vm3 = vcmp.eq.s32.totalorder %v4148_v44, 2  ;;  %v2961_v1 = vsel %vm2951_vm15, %v2958_v36, %v2960_v46  ;;  %v2964_v4 = vsel %vm2952_vm12, %v2946_v59, %v2963_v56  ;;  %v2934_v61 = vshrl.u32 %v9488_v26, %v7960_v15 }
 0x388   :  { %v4151_v16 = vxor.u32 2147483648, %v4145_v52  ;;  %v4155_v12 = vsel %vm4153_vm3, %v4154_v25, %v4145_v52  ;;  %vm2866_vm1 = vcmp.lt.s32.totalorder %v2865_v8, 0  ;;  %v2867_v6 = vsub.s32 0, %v2865_v8 }
 0x389   :  { %v2965_v29 = vsel %vm2951_vm15, %v2962_v54, %v2964_v4  ;;  %v2967_v41 = vand.u32 65535, %v8006_v23  ;;  %v2991_v28 = vand.u32 65535, %v2961_v1  ;;  %v2968_v15 = vshrl.u32 %v8006_v23, 16 }
 0x38a   :  { %v4152_v45 = vsel %vm4150_vm2, %v4137_v11, %v4151_v16  ;;  %v2868_v31 = vsel %vm2866_vm1, %v2867_v6, %v2865_v8  ;;  %v2969_v3 = vand.u32 65535, %v2965_v29  ;;  %v2970_v47 = vshrl.u32 %v2965_v29, 16  ;;  %v288_v6 = vpop.permute.xlu0 %287 }
 0x38b   :  { %v4156_v7 = vsel %vm4149_vm14, %v4152_v45, %v4155_v12  ;;  %v2869_v2 = vclz %v2868_v31  ;;  %v2992_v21 = vshrl.u32 %v2961_v1, 16  ;;  %v2857_v19 = vadd.s32 %v7967_v22, %v7965_v34 }
 0x38c   :  { %v4157_v55 = vsel %vm4146_vm13, nan, %v4156_v7  ;;  %v368_v30 = vsel %vm42_vm0, %v9535_v5, %v320_v33  ;;  %v2954_v24 = vsel %vm2950_vm11, %v2934_v61, %v2937_v35  ;;  %v2972_v38 = vmul.u32 %v2970_v47, %v2967_v41 }
 0x38d   :  { %5422 = vst.msk [vmem:[%s9457_s1 + $0xb8] sm:$0xff] %vm5398_vm6, %v4157_v55  ;;  %v5483_v17 = vadd.s32 4294967294, %v2869_v2  ;;  %v2973_v40 = vmul.u32 %v2969_v3, %v2968_v15  ;;  %v2887_v10 = vsub.s32 4, %v7990_v42  ;;  %v2955_v63 = vsel %vm2953_vm5, %v2943_v48, 2102212464  ;;  %v9536_v2 = vld [vmem:[#allocation10_spill] sm:$0xff] }
 0x38e   :  { %v2994_v44 = vmul.u32 %v2992_v21, %v2967_v41  ;;  %v2995_v59 = vmul.u32 %v2991_v28, %v2968_v15  ;;  %v2971_v37 = vmul.u32 %v2969_v3, %v2967_v41  ;;  %v2975_v34 = vshll.u32 %v2972_v38, 16 }
 0x38f   :  { %vm5484_vm7 = vcmp.lt.s32.totalorder %v5483_v17, 0  ;;  %v2993_v22 = vmul.u32 %v2991_v28, %v2967_v41  ;;  %v2974_v39 = vmul.u32 %v2970_v47, %v2968_v15  ;;  %v2996_v58 = vmul.u32 %v2992_v21, %v2968_v15 }
 0x390   :  { %v2872_v11 = vsel %vm5484_vm7, 0, %v5483_v17  ;;  %v2997_v52 = vshll.u32 %v2994_v44, 16  ;;  %v2977_v35 = vshll.u32 %v2973_v40, 16  ;;  %vm2979_vm4 = vc.u32 %v2971_v37, %v2975_v34 }
 0x391   :  { %v2873_v25 = vsub.s32 32, %v2872_v11  ;;  %v2877_v51 = vsub.s32 4294967266, %v2872_v11  ;;  %v2874_v36 = vshll.u32 %v2865_v8, %v2872_v11  ;;  %v2980_v46 = vsel %vm2979_vm4, 1, %v9494_v49 }
 0x392   :  { %v2981_v56 = vadd.s32 %v2975_v34, %v2971_v37  ;;  %v2999_v16 = vshll.u32 %v2995_v59, 16  ;;  %v2982_v1 = vadd.s32 %v2980_v46, %v2974_v39  ;;  %vm3001_vm9 = vc.u32 %v2993_v22, %v2997_v52 }
 0x393   :  { %v2875_v48 = vshrl.u32 %v2857_v19, %v2873_v25  ;;  %v2878_v54 = vadd.s32 127, %v2877_v51  ;;  %v3002_v4 = vsel %vm3001_vm9, 1, %v9494_v49  ;;  %v3003_v45 = vadd.s32 %v2997_v52, %v2993_v22 }
 0x394   :  { %vm2983_vm10 = vc.u32 %v2981_v56, %v2977_v35  ;;  %v400_v12 = vmul.f32 %v368_v30, %v5727_v53  ;;  %v3004_v8 = vadd.s32 %v3002_v4, %v2996_v58  ;;  %v2976_v41 = vshrl.u32 %v2972_v38, 16 }
 0x395   :  { %v2876_v7 = vor.u32 %v2875_v48, %v2874_v36  ;;  %v2879_v61 = vshll.u32 %v2878_v54, 23  ;;  %v2984_v29 = vsel %vm2983_vm10, 1, %v9494_v49  ;;  %vm3005_vm8 = vc.u32 %v3003_v45, %v2999_v16 }
 0x396   :  { %v2986_v33 = vadd.s32 %v2984_v29, %v2982_v1  ;;  %v8044_v55 = vadd.f32 %v400_v12, %v5729_v57  ;;  %v2978_v3 = vshrl.u32 %v2973_v40, 16  ;;  %v3006_v28 = vsel %vm3005_vm8, 1, %v9494_v49 }
 0x397   :  { %v2880_v31 = vor.u32 4788187, %v2879_v61  ;;  %v360_v15 = vsel %vm42_vm0, %v9536_v2, %v288_v6  ;;  %v2998_v21 = vshrl.u32 %v2994_v44, 16  ;;  %v3008_v19 = vadd.s32 %v3006_v28, %v3004_v8 }
 0x398   :  { %v2987_v47 = vadd.s32 %v2986_v33, %v2976_v41  ;;  %v4468_v5 = vand.u32 2147483647, %v8044_v55  ;;  %v2883_v17 = vcvt.s32.f32 %v2876_v7  ;;  %v2956_v38 = vsel %vm2952_vm12, %v7988_v18, %v2955_v63 }
 0x399   :  { %v2881_v30 = vand.u32 2147483647, %v2880_v31  ;;  %v4471_v37 = vand.u32 2139095040, %v8044_v55  ;;  %v3000_v34 = vshrl.u32 %v2995_v59, 16  ;;  %v3009_v22 = vadd.s32 %v3008_v19, %v2998_v21 }
 0x39a   :  { %v2988_v40 = vadd.s32 %v2987_v47, %v2978_v3  ;;  %v392_v11 = vmul.f32 %v360_v15, %v5727_v53  ;;  %vm2765_vm5 = vcmp.lt.s32.totalorder %v7821_v9, 0  ;;  %v3007_v44 = vadd.s32 %v3003_v45, %v2999_v16 }
 0x39b   :  { %v2884_v39 = vmul.f32 %v2883_v17, %v2881_v30  ;;  %v4472_v58 = vshrl.u32 %v4471_v37, 23  ;;  %v2888_v52 = vsel %vm2765_vm5, %v2887_v10, %v7990_v42  ;;  %v2957_v25 = vsel %vm2951_vm15, %v2954_v24, %v2956_v38 }
 0x39c   :  { %v3010_v51 = vadd.s32 %v3009_v22, %v3000_v34  ;;  %v4475_v18 = vand.u32 8388607, %v4468_v5  ;;  %vm3013_vm13 = vc.u32 %v2988_v40, %v3007_v44  ;;  %vm2764_vm11 = vcmp.le.f32.partialorder %v2763_v20, 0.7853982 }
 0x39d   :  { %v2885_v63 = vxor.u32 2147483648, %v2884_v39  ;;  %v5515_v59 = vadd.s32 4294967169, %v4472_v58  ;;  %v8065_v36 = vadd.f32 %v392_v11, %v5729_v57  ;;  %v2890_v56 = vsel %vm2764_vm11, 0, %v2888_v52 }
 0x39e   :  { %v3014_v35 = vadd.s32 1, %v3010_v51  ;;  %v3011_v42 = vmul.u32 %v8006_v23, %v2957_v25  ;;  %v4476_v16 = vor.u32 8388608, %v4475_v18  ;;  %v2907_v1 = vadd.s32 3, %v2890_v56 }
 0x39f   :  { %v2886_v46 = vsel %vm2765_vm5, %v2885_v63, %v2884_v39  ;;  %v4478_v14 = vadd.s32 1, %v5515_v59  ;;  %v3228_v20 = vand.u32 2147483647, %v8065_v36  ;;  %v3231_v23 = vand.u32 2139095040, %v8065_v36 }
 0x3a0   :  { %v2889_v24 = vsel %vm2764_vm11, %v7821_v9, %v2886_v46  ;;  %v3015_v10 = vsel %vm3013_vm13, %v3014_v35, %v3010_v51  ;;  %v8070_v61 = vshll.u32 %v4476_v16, 8  ;;  %v8073_v33 = vand.u32 3, %v2907_v1 }
 0x3a1   :  { %v2891_v48 = vmul.f32 %v2889_v24, %v2889_v24  ;;  %v3016_v54 = vadd.s32 %v3015_v10, %v3011_v42  ;;  %vm4479_vm12 = vcmp.gt.s32.totalorder %v4478_v14, 0  ;;  %v8075_v31 = vadd.s32 %v3007_v44, %v2988_v40 }
 0x3a2   :  { %v4480_v4 = vsel %vm4479_vm12, %v4478_v14, 0  ;;  %v8079_v47 = vand.u32 8388607, %v3228_v20  ;;  %vm2920_vm14 = vcmp.lt.s32.totalorder %v7842_v62, 0  ;;  %v8085_v19 = vand.u32 65535, %v8070_v61 }
 0x3a3   :  { %v2892_v45 = vmul.f32 -0.001358992, %v2891_v48  ;;  %v2899_v12 = vmul.f32 -0.00019511016, %v2891_v48  ;;  %v3017_v6 = vadd.s32 536870912, %v3016_v54  ;;  %v4482_v7 = vand.u32 31, %v4480_v4 }
 0x3a4   :  { %v8082_v21 = vshrl.u32 %v4480_v4, 5  ;;  %v8088_v30 = vshrl.u32 %v8070_v61, 16  ;;  %v3232_v17 = vshrl.u32 %v3231_v23, 23  ;;  %vm2910_vm15 = vcmp.eq.s32.totalorder %v8073_v33, 0 }
 0x3a5   :  { %v2893_v29 = vadd.f32 0.041655596, %v2892_v45  ;;  %v2900_v8 = vadd.f32 0.008332121, %v2899_v12  ;;  %v3018_v41 = vshrl.u32 %v3017_v6, 30  ;;  %v4483_v3 = vsub.s32 32, %v4482_v7 }
 0x3a6   :  { %v4485_v34 = vshll.u32 %v9488_v26, %v4482_v7  ;;  %vm2913_vm2 = vcmp.eq.s32.totalorder %v8073_v33, 2  ;;  %v4488_v11 = vshll.u32 %v9489_v32, %v4482_v7  ;;  %vm2909_vm3 = vcmp.lt.s32.totalorder %v8073_v33, 2 }
 0x3a7   :  { %v2894_v28 = vmul.f32 %v2893_v29, %v2891_v48  ;;  %v2901_v2 = vmul.f32 %v2900_v8, %v2891_v48  ;;  %v3019_v15 = vshll.u32 %v3018_v41, 30  ;;  %v4486_v22 = vshrl.u32 %v9489_v32, %v4483_v3 }
 0x3a8   :  { %v4489_v39 = vshrl.u32 %v9491_v50, %v4483_v3  ;;  %v4492_v44 = vshrl.u32 %v9490_v60, %v4483_v3  ;;  %vm2906_vm7 = vweird.f32 %v7821_v9  ;;  %v3042_v51 = vsub.s32 4, %v3018_v41 }
 0x3a9   :  { %v2895_v38 = vadd.f32 -0.4999988, %v2894_v28  ;;  %v2902_v37 = vadd.f32 -0.16666654, %v2901_v2  ;;  %v8090_v40 = vsub.s32 %v3016_v54, %v3019_v15  ;;  %v4491_v18 = vshll.u32 %v9491_v50, %v4482_v7 }
 0x3aa   :  { %v4494_v63 = vshll.u32 %v9490_v60, %v4482_v7  ;;  %v4495_v59 = vshrl.u32 %v9492_v27, %v4483_v3  ;;  %v4498_v42 = vshrl.u32 %v9493_v0, %v4483_v3  ;;  %vm8110_vm4 = vcmp.le.f32.partialorder %v2918_v13, 0.7853982 }
 0x3ab   :  { %v2896_v58 = vmul.f32 %v2895_v38, %v2891_v48  ;;  %v2903_v52 = vmul.f32 %v2902_v37, %v2891_v48  ;;  %vm3021_vm1 = vcmp.lt.s32.totalorder %v8090_v40, 0  ;;  %v3022_v25 = vsub.s32 0, %v8090_v40 }
 0x3ac   :  { %v4487_v16 = vor.u32 %v4486_v22, %v4485_v34  ;;  %v4490_v48 = vor.u32 %v4489_v39, %v4488_v11  ;;  %v4496_v54 = vor.u32 %v4495_v59, %v4494_v63  ;;  %v4493_v45 = vor.u32 %v4492_v44, %v4491_v18 }
 0x3ad   :  { %v2897_v35 = vadd.f32 1.0, %v2896_v58  ;;  %v2904_v46 = vadd.f32 1.0, %v2903_v52  ;;  %v3023_v56 = vsel %vm3021_vm1, %v3022_v25, %v8090_v40  ;;  %v4497_v12 = vshll.u32 %v9492_v27, %v4482_v7 }
 0x3ae   :  { %v3024_v10 = vclz %v3023_v56  ;;  %v4484_v23 = vshrl.u32 %v9488_v26, %v4483_v3  ;;  %vm4500_vm9 = vcmp.lt.s32.totalorder %v8082_v21, 1  ;;  %v5491_v29 = vadd.s32 4294967169, %v3232_v17 }
 0x3af   :  { %v2905_v1 = vmul.f32 %v2904_v46, %v2889_v24  ;;  %v2914_v4 = vxor.u32 2147483648, %v2897_v35  ;;  %v3043_v13 = vsel %vm2920_vm14, %v3042_v51, %v3018_v41  ;;  %v4499_v28 = vor.u32 %v4498_v42, %v4497_v12 }
 0x3b0   :  { %v5486_v6 = vadd.s32 4294967294, %v3024_v10  ;;  %vm4503_vm10 = vcmp.lt.s32.totalorder %v8082_v21, 4  ;;  %vm4502_vm5 = vcmp.lt.s32.totalorder %v8082_v21, 3  ;;  %v4508_v24 = vsel %vm4500_vm9, %v4487_v16, %v4490_v48 }
 0x3b1   :  { %v2911_v8 = vxor.u32 2147483648, %v2905_v1  ;;  %v4509_v7 = vsel %vm4503_vm10, %v4496_v54, 920167782  ;;  %v2915_v2 = vsel %vm2913_vm2, %v2914_v4, %v2905_v1  ;;  %vm4501_vm13 = vcmp.lt.s32.totalorder %v8082_v21, 2 }
 0x3b2   :  { %vm5487_vm8 = vcmp.lt.s32.totalorder %v5486_v6, 0  ;;  %v4510_v41 = vsel %vm4502_vm5, %v4493_v45, %v4509_v7  ;;  %v4512_v39 = vsel %vm4500_vm9, %v4490_v48, %v4493_v45  ;;  %v4513_v9 = vsel %vm4503_vm10, %v4499_v28, 1326507024 }
 0x3b3   :  { %v2912_v3 = vsel %vm2910_vm15, %v2897_v35, %v2911_v8  ;;  %v3027_v15 = vsel %vm5487_vm8, 0, %v5486_v6  ;;  %v4511_v11 = vsel %vm4501_vm13, %v4508_v24, %v4510_v41  ;;  %v4505_v52 = vsel %vm4503_vm10, %v4493_v45, 2102212464 }
 0x3b4   :  { %v2916_v17 = vsel %vm2909_vm3, %v2912_v3, %v2915_v2  ;;  %v3028_v38 = vsub.s32 32, %v3027_v15  ;;  %v3032_v37 = vsub.s32 4294967266, %v3027_v15  ;;  %v3029_v22 = vshll.u32 %v8090_v40, %v3027_v15 }
 0x3b5   :  { %v2917_v34 = vsel %vm2906_vm7, nan, %v2916_v17  ;;  %v4541_v58 = vand.u32 65535, %v4511_v11  ;;  %v3045_v40 = vsel %vm8110_vm4, 0, %v3043_v13  ;;  %v4514_v25 = vsel %vm4502_vm5, %v4496_v54, %v4513_v9 }
 0x3b6   :  { %5414 = vst.msk [vmem:[%s9457_s1 + $0x78] sm:$0xff] %vm5398_vm6, %v2917_v34  ;;  %v3030_v33 = vshrl.u32 %v8075_v31, %v3028_v38  ;;  %v3033_v44 = vadd.s32 127, %v3032_v37  ;;  %v4542_v51 = vshrl.u32 %v4511_v11, 16  ;;  %v4515_v31 = vsel %vm4501_vm13, %v4512_v39, %v4514_v25 }
 0x3b7   :  { %v3238_v59 = vadd.s32 1, %v5491_v29  ;;  %v4519_v35 = vand.u32 65535, %v4515_v31  ;;  %v4520_v46 = vshrl.u32 %v4515_v31, 16  ;;  %v4545_v42 = vmul.u32 %v4541_v58, %v8088_v30 }
 0x3b8   :  { %v3031_v18 = vor.u32 %v3030_v33, %v3029_v22  ;;  %v3034_v63 = vshll.u32 %v3033_v44, 23  ;;  %v4544_v56 = vmul.u32 %v4542_v51, %v8085_v19  ;;  %v3062_v1 = vadd.s32 3, %v3045_v40 }
 0x3b9   :  { %v4504_v4 = vsel %vm4500_vm9, %v4484_v23, %v4487_v16  ;;  %v4506_v54 = vsel %vm4502_vm5, %v4490_v48, %v4505_v52  ;;  %v4522_v12 = vmul.u32 %v4520_v46, %v8085_v19  ;;  %v4523_v6 = vmul.u32 %v4519_v35, %v8088_v30 }
 0x3ba   :  { %v3035_v10 = vor.u32 4788187, %v3034_v63  ;;  %v3038_v45 = vcvt.s32.f32 %v3031_v18  ;;  %v4543_v29 = vmul.u32 %v4541_v58, %v8085_v19  ;;  %v4546_v13 = vmul.u32 %v4542_v51, %v8088_v30 }
 0x3bb   :  { %v4547_v28 = vshll.u32 %v4544_v56, 16  ;;  %vm3239_vm11 = vcmp.gt.s32.totalorder %v3238_v59, 0  ;;  %v4521_v24 = vmul.u32 %v4519_v35, %v8085_v19  ;;  %v4524_v7 = vmul.u32 %v4520_v46, %v8088_v30 }
 0x3bc   :  { %v3036_v8 = vand.u32 2147483647, %v3035_v10  ;;  %v4525_v16 = vshll.u32 %v4522_v12, 16  ;;  %v4549_v23 = vshll.u32 %v4545_v42, 16  ;;  %v4527_v48 = vshll.u32 %v4523_v6, 16 }
 0x3bd   :  { %vm4551_vm12 = vc.u32 %v4543_v29, %v4547_v28  ;;  %v4553_v2 = vadd.s32 %v4547_v28, %v4543_v29  ;;  %v3240_v17 = vsel %vm3239_vm11, %v3238_v59, 0  ;;  %v4507_v19 = vsel %vm4501_vm13, %v4504_v4, %v4506_v54 }
 0x3be   :  { %v3039_v3 = vmul.f32 %v3038_v45, %v3036_v8  ;;  %vm4529_vm15 = vc.u32 %v4521_v24, %v4525_v16  ;;  %v4531_v15 = vadd.s32 %v4525_v16, %v4521_v24  ;;  %v4552_v41 = vsel %vm4551_vm12, 1, %v9494_v49 }
 0x3bf   :  { %v4530_v37 = vsel %vm4529_vm15, 1, %v9494_v49  ;;  %v4554_v34 = vadd.s32 %v4552_v41, %v4546_v13  ;;  %vm4555_vm2 = vc.u32 %v4553_v2, %v4549_v23  ;;  %v4548_v33 = vshrl.u32 %v4544_v56, 16 }
 0x3c0   :  { %v3040_v38 = vxor.u32 2147483648, %v3039_v3  ;;  %v4532_v30 = vadd.s32 %v4530_v37, %v4524_v7  ;;  %vm4533_vm3 = vc.u32 %v4531_v15, %v4527_v48  ;;  %v4556_v22 = vsel %vm4555_vm2, 1, %v9494_v49 }
 0x3c1   :  { %v4534_v39 = vsel %vm4533_vm3, 1, %v9494_v49  ;;  %v4558_v44 = vadd.s32 %v4556_v22, %v4554_v34  ;;  %v4526_v58 = vshrl.u32 %v4522_v12, 16  ;;  %v3242_v52 = vand.u32 31, %v3240_v17 }
 0x3c2   :  { %v3041_v11 = vsel %vm2920_vm14, %v3040_v38, %v3039_v3  ;;  %v4536_v40 = vadd.s32 %v4534_v39, %v4532_v30  ;;  %v4550_v25 = vshrl.u32 %v4545_v42, 16  ;;  %v3236_v18 = vor.u32 8388608, %v8079_v47 }
 0x3c3   :  { %v3044_v9 = vsel %vm8110_vm4, %v7842_v62, %v3041_v11  ;;  %v4559_v51 = vadd.s32 %v4558_v44, %v4548_v33  ;;  %v8180_v63 = vand.u32 3, %v3062_v1  ;;  %v4528_v31 = vshrl.u32 %v4523_v6, 16 }
 0x3c4   :  { %v3046_v21 = vmul.f32 %v3044_v9, %v3044_v9  ;;  %v4537_v59 = vadd.s32 %v4536_v40, %v4526_v58  ;;  %v8182_v35 = vsub.s32 32, %v3242_v52  ;;  %v4561_v14 = vmul.u32 %v8070_v61, %v4507_v19 }
 0x3c5   :  { %v4560_v10 = vadd.s32 %v4559_v51, %v4550_v25  ;;  %v8187_v54 = vadd.s32 %v4553_v2, %v4549_v23  ;;  %v8189_v45 = vshrl.u32 %v3240_v17, 5  ;;  %v3245_v6 = vshll.u32 %v9488_v26, %v3242_v52 }
 0x3c6   :  { %v3047_v46 = vmul.f32 -0.001358992, %v3046_v21  ;;  %v3054_v56 = vmul.f32 -0.00019511016, %v3046_v21  ;;  %v8185_v4 = vadd.s32 %v4537_v59, %v4528_v31  ;;  %v3246_v47 = vshrl.u32 %v9489_v32, %v8182_v35 }
 0x3c7   :  { %v4564_v12 = vadd.s32 1, %v4560_v10  ;;  %v3248_v29 = vshll.u32 %v9489_v32, %v3242_v52  ;;  %v3249_v61 = vshrl.u32 %v9491_v50, %v8182_v35  ;;  %v3252_v8 = vshrl.u32 %v9490_v60, %v8182_v35 }
 0x3c8   :  { %v3048_v42 = vadd.f32 0.041655596, %v3047_v46  ;;  %v3055_v1 = vadd.f32 0.008332121, %v3054_v56  ;;  %vm4563_vm14 = vc.u32 %v8185_v4, %v8187_v54  ;;  %v3251_v7 = vshll.u32 %v9491_v50, %v3242_v52 }
 0x3c9   :  { %v4565_v24 = vsel %vm4563_vm14, %v4564_v12, %v4560_v10  ;;  %v8202_v23 = vor.u32 %v3246_v47, %v3245_v6  ;;  %v3254_v3 = vshll.u32 %v9490_v60, %v3242_v52  ;;  %v3255_v48 = vshrl.u32 %v9492_v27, %v8182_v35 }
 0x3ca   :  { %v3049_v13 = vmul.f32 %v3048_v42, %v3046_v21  ;;  %v3056_v28 = vmul.f32 %v3055_v1, %v3046_v21  ;;  %v4566_v16 = vadd.s32 %v4565_v24, %v4561_v14  ;;  %v3257_v41 = vshll.u32 %v9492_v27, %v3242_v52 }
 0x3cb   :  { %v3258_v17 = vshrl.u32 %v9493_v0, %v8182_v35  ;;  %v8210_v37 = vor.u32 %v3249_v61, %v3248_v29  ;;  %v3253_v34 = vor.u32 %v3252_v8, %v3251_v7  ;;  %v3256_v19 = vor.u32 %v3255_v48, %v3254_v3 }
 0x3cc   :  { %v3050_v2 = vadd.f32 -0.4999988, %v3049_v13  ;;  %v3057_v15 = vadd.f32 -0.16666654, %v3056_v28  ;;  %v4567_v38 = vadd.s32 536870912, %v4566_v16  ;;  %vm3263_vm1 = vcmp.lt.s32.totalorder %v8189_v45, 4 }
 0x3cd   :  { %v3259_v11 = vor.u32 %v3258_v17, %v3257_v41  ;;  %vm3061_vm7 = vweird.f32 %v7842_v62  ;;  %v3269_v33 = vsel %vm3263_vm1, %v3256_v19, 920167782  ;;  %v8218_v44 = vshll.u32 %v3236_v18, 8 }
 0x3ce   :  { %v3051_v30 = vmul.f32 %v3050_v2, %v3046_v21  ;;  %v3058_v22 = vmul.f32 %v3057_v15, %v3046_v21  ;;  %v8214_v39 = vshrl.u32 %v4567_v38, 30  ;;  %vm3260_vm4 = vcmp.lt.s32.totalorder %v8189_v45, 1 }
 0x3cf   :  { %vm3262_vm9 = vcmp.lt.s32.totalorder %v8189_v45, 3  ;;  %v3268_v21 = vsel %vm3260_vm4, %v8202_v23, %v8210_v37  ;;  %v3272_v51 = vsel %vm3260_vm4, %v8210_v37, %v3253_v34  ;;  %vm3064_vm10 = vcmp.lt.s32.totalorder %v8180_v63, 2 }
 0x3d0   :  { %v3052_v58 = vadd.f32 1.0, %v3051_v30  ;;  %v3059_v40 = vadd.f32 1.0, %v3058_v22  ;;  %v4569_v52 = vshll.u32 %v8214_v39, 30  ;;  %v3270_v25 = vsel %vm3262_vm9, %v3253_v34, %v3269_v33 }
 0x3d1   :  { %v3273_v59 = vsel %vm3263_vm1, %v3259_v11, 1326507024  ;;  %vm3065_vm8 = vcmp.eq.s32.totalorder %v8180_v63, 0  ;;  %vm3261_vm5 = vcmp.lt.s32.totalorder %v8189_v45, 2  ;;  %vm3068_vm13 = vcmp.eq.s32.totalorder %v8180_v63, 2 }
 0x3d2   :  { %v3060_v18 = vmul.f32 %v3059_v40, %v3044_v9  ;;  %v3069_v31 = vxor.u32 2147483648, %v3052_v58  ;;  %v4570_v46 = vsub.s32 %v4566_v16, %v4569_v52  ;;  %v3274_v56 = vsel %vm3262_vm9, %v3256_v19, %v3273_v59 }
 0x3d3   :  { %v3271_v9 = vsel %vm3261_vm5, %v3268_v21, %v3270_v25  ;;  %v3275_v14 = vsel %vm3261_vm5, %v3272_v51, %v3274_v56  ;;  %v3277_v42 = vand.u32 65535, %v8218_v44  ;;  %v3278_v29 = vshrl.u32 %v8218_v44, 16  ;;  %v292_v51 = vpop.permute.xlu1 %291 }
 0x3d4   :  { %v3066_v10 = vxor.u32 2147483648, %v3060_v18  ;;  %vm4571_vm11 = vcmp.lt.s32.totalorder %v4570_v46, 0  ;;  %v4572_v47 = vsub.s32 0, %v4570_v46  ;;  %v3279_v1 = vand.u32 65535, %v3275_v14 }
 0x3d5   :  { %v3070_v6 = vsel %vm3068_vm13, %v3069_v31, %v3060_v18  ;;  %v3280_v61 = vshrl.u32 %v3275_v14, 16  ;;  %v3301_v28 = vand.u32 65535, %v3271_v9  ;;  %v3302_v24 = vshrl.u32 %v3271_v9, 16 }
 0x3d6   :  { %v3067_v12 = vsel %vm3065_vm8, %v3052_v58, %v3066_v10  ;;  %v4573_v13 = vsel %vm4571_vm11, %v4572_v47, %v4570_v46  ;;  %v3283_v48 = vmul.u32 %v3279_v1, %v3278_v29  ;;  %v3244_v2 = vshrl.u32 %v9488_v26, %v8182_v35 }
 0x3d7   :  { %v3071_v8 = vsel %vm3064_vm10, %v3067_v12, %v3070_v6  ;;  %v4574_v16 = vclz %v4573_v13  ;;  %v3282_v3 = vmul.u32 %v3280_v61, %v3277_v42  ;;  %v4562_v63 = vadd.s32 %v8187_v54, %v8185_v4 }
 0x3d8   :  { %v3072_v7 = vsel %vm3061_vm7, nan, %v3071_v8  ;;  %v3281_v41 = vmul.u32 %v3279_v1, %v3277_v42  ;;  %v3265_v62 = vsel %vm3263_vm1, %v3253_v34, 2102212464  ;;  %v3284_v38 = vmul.u32 %v3280_v61, %v3278_v29 }
 0x3d9   :  { %5415 = vst.msk [vmem:[%s9457_s1 + $0x80] sm:$0xff] %vm5398_vm6, %v3072_v7  ;;  %v5516_v15 = vadd.s32 4294967294, %v4574_v16  ;;  %v3285_v17 = vshll.u32 %v3282_v3, 16  ;;  %v3287_v19 = vshll.u32 %v3283_v48, 16  ;;  %v3304_v30 = vmul.u32 %v3302_v24, %v3277_v42  ;;  %v9540_v16 = vld [vmem:[#allocation3_spill] sm:$0xff] }
 0x3da   :  { %v3303_v11 = vmul.u32 %v3301_v28, %v3277_v42  ;;  %vm4470_vm2 = vcmp.lt.s32.totalorder %v8044_v55, 0  ;;  %v3305_v58 = vmul.u32 %v3301_v28, %v3278_v29  ;;  %v3286_v52 = vshrl.u32 %v3282_v3, 16  ;;  %v332_v42 = vpop.permute.xlu2 %331 }
 0x3db   :  { %vm5517_vm12 = vcmp.lt.s32.totalorder %v5516_v15, 0  ;;  %vm3289_vm15 = vc.u32 %v3281_v41, %v3285_v17  ;;  %v3291_v22 = vadd.s32 %v3285_v17, %v3281_v41  ;;  %v3307_v4 = vshll.u32 %v3304_v30, 16 }
 0x3dc   :  { %v4577_v33 = vsel %vm5517_vm12, 0, %v5516_v15  ;;  %v3290_v35 = vsel %vm3289_vm15, 1, %v9494_v49  ;;  %v3306_v34 = vmul.u32 %v3302_v24, %v3278_v29  ;;  %v3309_v9 = vshll.u32 %v3305_v58, 16 }
 0x3dd   :  { %v4578_v54 = vsub.s32 32, %v4577_v33  ;;  %v4582_v40 = vsub.s32 4294967266, %v4577_v33  ;;  %v3292_v21 = vadd.s32 %v3290_v35, %v3284_v38  ;;  %v4579_v25 = vshll.u32 %v4570_v46, %v4577_v33  ;;  %v9539_v46 = vld [vmem:[#allocation5_spill] sm:$0xff] }
 0x3de   :  { %vm3293_vm3 = vc.u32 %v3291_v22, %v3287_v19  ;;  %vm3311_vm14 = vc.u32 %v3303_v11, %v3307_v4  ;;  %v3313_v14 = vadd.s32 %v3307_v4, %v3303_v11  ;;  %v4592_v6 = vsub.s32 4, %v8214_v39 }
 0x3df   :  { %v4580_v18 = vshrl.u32 %v4562_v63, %v4578_v54  ;;  %v4583_v31 = vadd.s32 127, %v4582_v40  ;;  %v3294_v59 = vsel %vm3293_vm3, 1, %v9494_v49  ;;  %v3312_v56 = vsel %vm3311_vm14, 1, %v9494_v49 }
 0x3e0   :  { %v3296_v10 = vadd.s32 %v3294_v59, %v3292_v21  ;;  %v3314_v47 = vadd.s32 %v3312_v56, %v3306_v34  ;;  %v361_v29 = vsel %vm42_vm0, %v9539_v46, %v292_v51  ;;  %v3264_v61 = vsel %vm3260_vm4, %v3244_v2, %v8202_v23 }
 0x3e1   :  { %v4581_v1 = vor.u32 %v4580_v18, %v4579_v25  ;;  %v4584_v12 = vshll.u32 %v4583_v31, 23  ;;  %vm3315_vm1 = vc.u32 %v3313_v14, %v3309_v9  ;;  %v393_v13 = vmul.f32 %v361_v29, %v5727_v53 }
 0x3e2   :  { %v3297_v8 = vadd.s32 %v3296_v10, %v3286_v52  ;;  %v3288_v24 = vshrl.u32 %v3283_v48, 16  ;;  %v3316_v7 = vsel %vm3315_vm1, 1, %v9494_v49  ;;  %v371_v3 = vsel %vm42_vm0, %v9540_v16, %v332_v42 }
 0x3e3   :  { %v4585_v28 = vor.u32 4788187, %v4584_v12  ;;  %v3266_v63 = vsel %vm3262_vm9, %v8210_v37, %v3265_v62  ;;  %v3308_v15 = vshrl.u32 %v3304_v30, 16  ;;  %v3318_v41 = vadd.s32 %v3316_v7, %v3314_v47 }
 0x3e4   :  { %v8280_v23 = vadd.f32 %v393_v13, %v5729_v57  ;;  %v4588_v17 = vcvt.s32.f32 %v4581_v1  ;;  %v4593_v48 = vsel %vm4470_vm2, %v4592_v6, %v8214_v39  ;;  %v3298_v38 = vadd.s32 %v3297_v8, %v3288_v24 }
 0x3e5   :  { %v4586_v2 = vand.u32 2147483647, %v4585_v28  ;;  %v3310_v19 = vshrl.u32 %v3305_v58, 16  ;;  %v3319_v22 = vadd.s32 %v3318_v41, %v3308_v15  ;;  %v403_v33 = vmul.f32 %v371_v3, %v5727_v53 }
 0x3e6   :  { %v3383_v11 = vand.u32 2147483647, %v8280_v23  ;;  %vm8289_vm7 = vcmp.le.f32.partialorder %v4468_v5, 0.7853982  ;;  %v3317_v30 = vadd.s32 %v3313_v14, %v3309_v9  ;;  %v3386_v35 = vand.u32 2139095040, %v8280_v23 }
 0x3e7   :  { %v4589_v62 = vmul.f32 %v4588_v17, %v4586_v2  ;;  %v4595_v39 = vsel %vm8289_vm7, 0, %v4593_v48  ;;  %v3267_v58 = vsel %vm3261_vm5, %v3264_v61, %v3266_v63  ;;  %v3320_v4 = vadd.s32 %v3319_v22, %v3310_v19 }
 0x3e8   :  { %vm3323_vm4 = vc.u32 %v3298_v38, %v3317_v30  ;;  %v3387_v40 = vshrl.u32 %v3386_v35, 23  ;;  %v3390_v5 = vand.u32 8388607, %v3383_v11  ;;  %v8301_v21 = vadd.f32 %v403_v33, %v5729_v57 }
 0x3e9   :  { %v4590_v54 = vxor.u32 2147483648, %v4589_v62  ;;  %v3324_v52 = vadd.s32 1, %v3320_v4  ;;  %v3321_v34 = vmul.u32 %v8218_v44, %v3267_v58  ;;  %v4612_v18 = vadd.s32 3, %v4595_v39 }
 0x3ea   :  { %v5494_v51 = vadd.s32 4294967169, %v3387_v40  ;;  %v3391_v10 = vor.u32 8388608, %v3390_v5  ;;  %v4936_v14 = vand.u32 2139095040, %v8301_v21  ;;  %vm3230_vm10 = vcmp.lt.s32.totalorder %v8065_v36, 0 }
 0x3eb   :  { %v4591_v25 = vsel %vm4470_vm2, %v4590_v54, %v4589_v62  ;;  %v3325_v31 = vsel %vm3323_vm4, %v3324_v52, %v3320_v4  ;;  %v8310_v12 = vand.u32 3, %v4612_v18  ;;  %v3322_v16 = vadd.s32 %v3317_v30, %v3298_v38 }
 0x3ec   :  { %v4594_v45 = vsel %vm8289_vm7, %v8044_v55, %v4591_v25  ;;  %v3326_v56 = vadd.s32 %v3325_v31, %v3321_v34  ;;  %v3393_v9 = vadd.s32 1, %v5494_v51  ;;  %v8312_v61 = vshll.u32 %v3391_v10, 8 }
 0x3ed   :  { %v4596_v59 = vmul.f32 %v4594_v45, %v4594_v45  ;;  %v4937_v13 = vshrl.u32 %v4936_v14, 23  ;;  %vm4618_vm8 = vcmp.eq.s32.totalorder %v8310_v12, 2  ;;  %v4933_v63 = vand.u32 2147483647, %v8301_v21 }
 0x3ee   :  { %v3327_v1 = vadd.s32 536870912, %v3326_v56  ;;  %vm3394_vm9 = vcmp.gt.s32.totalorder %v3393_v9, 0  ;;  %v8320_v17 = vand.u32 65535, %v8312_v61  ;;  %vm4615_vm5 = vcmp.eq.s32.totalorder %v8310_v12, 0 }
 0x3ef   :  { %v4597_v47 = vmul.f32 -0.001358992, %v4596_v59  ;;  %v4604_v42 = vmul.f32 -0.00019511016, %v4596_v59  ;;  %v3395_v44 = vsel %vm3394_vm9, %v3393_v9, 0  ;;  %v8326_v33 = vadd.s32 4294967169, %v4937_v13 }
 0x3f0   :  { %v3328_v29 = vshrl.u32 %v3327_v1, 30  ;;  %v3397_v8 = vand.u32 31, %v3395_v44  ;;  %v8323_v19 = vshrl.u32 %v3395_v44, 5  ;;  %vm4614_vm13 = vcmp.lt.s32.totalorder %v8310_v12, 2 }
 0x3f1   :  { %v4598_v6 = vadd.f32 0.041655596, %v4597_v47  ;;  %v4605_v46 = vadd.f32 0.008332121, %v4604_v42  ;;  %vm4611_vm12 = vweird.f32 %v8044_v55  ;;  %vm8351_vm15 = vcmp.le.f32.partialorder %v3228_v20, 0.7853982 }
 0x3f2   :  { %v3329_v7 = vshll.u32 %v3328_v29, 30  ;;  %v3398_v3 = vsub.s32 32, %v3397_v8  ;;  %v3352_v48 = vsub.s32 4, %v3328_v29  ;;  %v3400_v22 = vshll.u32 %v9488_v26, %v3397_v8 }
 0x3f3   :  { %v4599_v28 = vmul.f32 %v4598_v6, %v4596_v59  ;;  %v4606_v24 = vmul.f32 %v4605_v46, %v4596_v59  ;;  %v3403_v35 = vshll.u32 %v9489_v32, %v3397_v8  ;;  %v3406_v58 = vshll.u32 %v9491_v50, %v3397_v8 }
 0x3f4   :  { %v8317_v2 = vsub.s32 %v3326_v56, %v3329_v7  ;;  %v3401_v30 = vshrl.u32 %v9489_v32, %v3398_v3  ;;  %v3404_v39 = vshrl.u32 %v9491_v50, %v3398_v3  ;;  %v3407_v5 = vshrl.u32 %v9490_v60, %v3398_v3 }
 0x3f5   :  { %v4600_v15 = vadd.f32 -0.4999988, %v4599_v28  ;;  %v4607_v41 = vadd.f32 -0.16666654, %v4606_v24  ;;  %v8340_v25 = vsel %vm3230_vm10, %v3352_v48, %v3328_v29  ;;  %v3399_v34 = vshrl.u32 %v9488_v26, %v3398_v3 }
 0x3f6   :  { %vm3331_vm11 = vcmp.lt.s32.totalorder %v8317_v2, 0  ;;  %v3332_v62 = vsub.s32 0, %v8317_v2  ;;  %v3410_v51 = vshrl.u32 %v9492_v27, %v3398_v3  ;;  %v3413_v56 = vshrl.u32 %v9493_v0, %v3398_v3 }
 0x3f7   :  { %v4601_v38 = vmul.f32 %v4600_v15, %v4596_v59  ;;  %v4608_v37 = vmul.f32 %v4607_v41, %v4596_v59  ;;  %v3409_v59 = vshll.u32 %v9490_v60, %v3397_v8  ;;  %v3402_v9 = vor.u32 %v3401_v30, %v3400_v22 }
 0x3f8   :  { %v3333_v40 = vsel %vm3331_vm11, %v3332_v62, %v8317_v2  ;;  %v3405_v14 = vor.u32 %v3404_v39, %v3403_v35  ;;  %v3412_v47 = vshll.u32 %v9492_v27, %v3397_v8  ;;  %v3408_v44 = vor.u32 %v3407_v5, %v3406_v58 }
 0x3f9   :  { %v4602_v4 = vadd.f32 1.0, %v4601_v38  ;;  %v4609_v54 = vadd.f32 1.0, %v4608_v37  ;;  %v3334_v52 = vclz %v3333_v40  ;;  %v3411_v6 = vor.u32 %v3410_v51, %v3409_v59 }
 0x3fa   :  { %v3414_v46 = vor.u32 %v3413_v56, %v3412_v47  ;;  %vm3415_vm3 = vcmp.lt.s32.totalorder %v8323_v19, 1  ;;  %vm3416_vm14 = vcmp.lt.s32.totalorder %v8323_v19, 2  ;;  %vm3417_vm1 = vcmp.lt.s32.totalorder %v8323_v19, 3 }
 0x3fb   :  { %v4610_v18 = vmul.f32 %v4609_v54, %v4594_v45  ;;  %v4619_v31 = vxor.u32 2147483648, %v4602_v4  ;;  %v5492_v10 = vadd.s32 4294967294, %v3334_v52  ;;  %vm3418_vm7 = vcmp.lt.s32.totalorder %v8323_v19, 4 }
 0x3fc   :  { %v3419_v24 = vsel %vm3415_vm3, %v3399_v34, %v3402_v9  ;;  %v3420_v3 = vsel %vm3418_vm7, %v3408_v44, 2102212464  ;;  %v3423_v15 = vsel %vm3415_vm3, %v3402_v9, %v3405_v14  ;;  %v3424_v41 = vsel %vm3418_vm7, %v3411_v6, 920167782 }
 0x3fd   :  { %v4616_v42 = vxor.u32 2147483648, %v4610_v18  ;;  %v4620_v1 = vsel %vm4618_vm8, %v4619_v31, %v4610_v18  ;;  %vm5493_vm2 = vcmp.lt.s32.totalorder %v5492_v10, 0  ;;  %v3425_v55 = vsel %vm3417_vm1, %v3408_v44, %v3424_v41 }
 0x3fe   :  { %v3337_v8 = vsel %vm5493_vm2, 0, %v5492_v10  ;;  %v3421_v38 = vsel %vm3417_vm1, %v3405_v14, %v3420_v3  ;;  %v3426_v37 = vsel %vm3416_vm14, %v3423_v15, %v3425_v55  ;;  %v3427_v62 = vsel %vm3415_vm3, %v3405_v14, %v3408_v44 }
 0x3ff   :  { %v4617_v29 = vsel %vm4615_vm5, %v4602_v4, %v4616_v42  ;;  %v3338_v13 = vsub.s32 32, %v3337_v8  ;;  %v3342_v28 = vsub.s32 4294967266, %v3337_v8  ;;  %v3339_v12 = vshll.u32 %v8317_v2, %v3337_v8 }
 0x400   :  { %v4621_v20 = vsel %vm4614_vm13, %v4617_v29, %v4620_v1  ;;  %v3428_v30 = vsel %vm3418_vm7, %v3414_v46, 1326507024  ;;  %v3456_v2 = vand.u32 65535, %v3426_v37  ;;  %v3433_v4 = vshrl.u32 %v8312_v61, 16 }
 0x401   :  { %v4622_v7 = vsel %vm4611_vm12, nan, %v4621_v20  ;;  %v3340_v48 = vshrl.u32 %v3322_v16, %v3338_v13  ;;  %v3343_v22 = vadd.s32 127, %v3342_v28  ;;  %v3429_v16 = vsel %vm3417_vm1, %v3411_v6, %v3428_v30 }
 0x402   :  { %5425 = vst.msk [vmem:[%s9457_s1 + $0xd0] sm:$0xff] %vm5398_vm6, %v4622_v7  ;;  %v3430_v58 = vsel %vm3416_vm14, %v3427_v62, %v3429_v16  ;;  %v3457_v54 = vshrl.u32 %v3426_v37, 16  ;;  %v4943_v40 = vadd.s32 1, %v8326_v33  ;;  %v8396_v51 = vand.u32 8388607, %v4933_v63 }
 0x403   :  { %v3341_v35 = vor.u32 %v3340_v48, %v3339_v12  ;;  %v3344_v39 = vshll.u32 %v3343_v22, 23  ;;  %v3434_v52 = vand.u32 65535, %v3430_v58  ;;  %v3435_v34 = vshrl.u32 %v3430_v58, 16 }
 0x404   :  { %v3355_v18 = vsel %vm8351_vm15, 0, %v8340_v25  ;;  %v8403_v31 = vsel %vm3416_vm14, %v3419_v24, %v3421_v38  ;;  %v3459_v59 = vmul.u32 %v3457_v54, %v8320_v17  ;;  %v3460_v56 = vmul.u32 %v3456_v2, %v3433_v4 }
 0x405   :  { %v3345_v5 = vor.u32 4788187, %v3344_v39  ;;  %v3348_v33 = vcvt.s32.f32 %v3341_v35  ;;  %v3437_v9 = vmul.u32 %v3435_v34, %v8320_v17  ;;  %v3438_v14 = vmul.u32 %v3434_v52, %v3433_v4 }
 0x406   :  { %v3458_v47 = vmul.u32 %v3456_v2, %v8320_v17  ;;  %v3461_v42 = vmul.u32 %v3457_v54, %v3433_v4  ;;  %v3462_v1 = vshll.u32 %v3459_v59, 16  ;;  %vm4944_vm4 = vcmp.gt.s32.totalorder %v4943_v40, 0 }
 0x407   :  { %v3346_v10 = vand.u32 2147483647, %v3345_v5  ;;  %v3436_v25 = vmul.u32 %v3434_v52, %v8320_v17  ;;  %v3439_v6 = vmul.u32 %v3435_v34, %v3433_v4  ;;  %v3440_v19 = vshll.u32 %v3437_v9, 16 }
 0x408   :  { %v3442_v46 = vshll.u32 %v3438_v14, 16  ;;  %v3464_v29 = vshll.u32 %v3460_v56, 16  ;;  %vm3466_vm9 = vc.u32 %v3458_v47, %v3462_v1  ;;  %v3468_v8 = vadd.s32 %v3462_v1, %v3458_v47 }
 0x409   :  { %v3349_v44 = vmul.f32 %v3348_v33, %v3346_v10  ;;  %vm3444_vm8 = vc.u32 %v3436_v25, %v3440_v19  ;;  %v3446_v13 = vadd.s32 %v3440_v19, %v3436_v25  ;;  %v3467_v28 = vsel %vm3466_vm9, 1, %v9494_v49 }
 0x40a   :  { %v3445_v24 = vsel %vm3444_vm8, 1, %v9494_v49  ;;  %v3463_v7 = vshrl.u32 %v3459_v59, 16  ;;  %v3469_v3 = vadd.s32 %v3467_v28, %v3461_v42  ;;  %vm3470_vm5 = vc.u32 %v3468_v8, %v3464_v29 }
 0x40b   :  { %v3350_v20 = vxor.u32 2147483648, %v3349_v44  ;;  %v3447_v17 = vadd.s32 %v3445_v24, %v3439_v6  ;;  %vm3448_vm13 = vc.u32 %v3446_v13, %v3442_v46  ;;  %v3471_v41 = vsel %vm3470_vm5, 1, %v9494_v49 }
 0x40c   :  { %v3449_v48 = vsel %vm3448_vm13, 1, %v9494_v49  ;;  %v3473_v22 = vadd.s32 %v3471_v41, %v3469_v3  ;;  %v4945_v55 = vsel %vm4944_vm4, %v4943_v40, 0  ;;  %v3441_v37 = vshrl.u32 %v3437_v9, 16 }
 0x40d   :  { %v3351_v15 = vsel %vm3230_vm10, %v3350_v20, %v3349_v44  ;;  %v3451_v62 = vadd.s32 %v3449_v48, %v3447_v17  ;;  %v4947_v30 = vand.u32 31, %v4945_v55  ;;  %v3443_v35 = vshrl.u32 %v3438_v14, 16 }
 0x40e   :  { %v3354_v12 = vsel %vm8351_vm15, %v8065_v36, %v3351_v15  ;;  %v3465_v39 = vshrl.u32 %v3460_v56, 16  ;;  %v3474_v16 = vadd.s32 %v3473_v22, %v3463_v7  ;;  %v3372_v5 = vadd.s32 3, %v3355_v18 }
 0x40f   :  { %v3356_v38 = vmul.f32 %v3354_v12, %v3354_v12  ;;  %v3452_v4 = vadd.s32 %v3451_v62, %v3441_v37  ;;  %v8419_v54 = vsub.s32 32, %v4947_v30  ;;  %v3476_v52 = vmul.u32 %v8312_v61, %v8403_v31 }
 0x410   :  { %v3475_v45 = vadd.s32 %v3474_v16, %v3465_v39  ;;  %v4941_v34 = vor.u32 8388608, %v8396_v51  ;;  %v8426_v33 = vadd.s32 %v3468_v8, %v3464_v29  ;;  %v8428_v9 = vshrl.u32 %v4945_v55, 5 }
 0x411   :  { %v3357_v2 = vmul.f32 -0.001358992, %v3356_v38  ;;  %v3364_v58 = vmul.f32 -0.00019511016, %v3356_v38  ;;  %v8424_v10 = vadd.s32 %v3452_v4, %v3443_v35  ;;  %v4950_v14 = vshll.u32 %v9488_v26, %v4947_v30 }
 0x412   :  { %v3479_v56 = vadd.s32 1, %v3475_v45  ;;  %v4951_v18 = vshrl.u32 %v9489_v32, %v8419_v54  ;;  %v4954_v61 = vshrl.u32 %v9491_v50, %v8419_v54  ;;  %v4953_v31 = vshll.u32 %v9489_v32, %v4947_v30 }
 0x413   :  { %v3358_v40 = vadd.f32 0.041655596, %v3357_v2  ;;  %v3365_v59 = vadd.f32 0.008332121, %v3364_v58  ;;  %vm3478_vm10 = vc.u32 %v8424_v10, %v8426_v33  ;;  %v4956_v1 = vshll.u32 %v9491_v50, %v4947_v30 }
 0x414   :  { %v3480_v51 = vsel %vm3478_vm10, %v3479_v56, %v3475_v45  ;;  %v4957_v44 = vshrl.u32 %v9490_v60, %v8419_v54  ;;  %v4952_v46 = vor.u32 %v4951_v18, %v4950_v14  ;;  %v4959_v29 = vshll.u32 %v9490_v60, %v4947_v30 }
 0x415   :  { %v3359_v47 = vmul.f32 %v3358_v40, %v3356_v38  ;;  %v3366_v42 = vmul.f32 %v3365_v59, %v3356_v38  ;;  %v3481_v19 = vadd.s32 %v3480_v51, %v3476_v52  ;;  %v4960_v8 = vshrl.u32 %v9492_v27, %v8419_v54 }
 0x416   :  { %v4962_v20 = vshll.u32 %v9492_v27, %v4947_v30  ;;  %v4963_v13 = vshrl.u32 %v9493_v0, %v8419_v54  ;;  %v8447_v3 = vor.u32 %v4954_v61, %v4953_v31  ;;  %v3373_v15 = vand.u32 3, %v3372_v5 }
 0x417   :  { %v3360_v25 = vadd.f32 -0.4999988, %v3359_v47  ;;  %v3367_v6 = vadd.f32 -0.16666654, %v3366_v42  ;;  %v3482_v7 = vadd.s32 536870912, %v3481_v19  ;;  %v4958_v17 = vor.u32 %v4957_v44, %v4956_v1  ;;  %v300_v42 = vpop.permute.xlu0 %299 }
 0x418   :  { %v4961_v41 = vor.u32 %v4960_v8, %v4959_v29  ;;  %v4964_v48 = vor.u32 %v4963_v13, %v4962_v20  ;;  %vm4968_vm11 = vcmp.lt.s32.totalorder %v8428_v9, 4  ;;  %vm3371_vm12 = vweird.f32 %v8065_v36  ;;  %v9545_v29 = vld [vmem:[#allocation11_spill] sm:$0xff] }
 0x419   :  { %v3361_v28 = vmul.f32 %v3360_v25, %v3356_v38  ;;  %v3368_v24 = vmul.f32 %v3367_v6, %v3356_v38  ;;  %v8449_v37 = vshrl.u32 %v3482_v7, 30  ;;  %vm4965_vm15 = vcmp.lt.s32.totalorder %v8428_v9, 1 }
 0x41a   :  { %vm4967_vm2 = vcmp.lt.s32.totalorder %v8428_v9, 3  ;;  %v4974_v38 = vsel %vm4968_vm11, %v4961_v41, 920167782  ;;  %v4973_v39 = vsel %vm4965_vm15, %v4952_v46, %v8447_v3  ;;  %vm3374_vm3 = vcmp.lt.s32.totalorder %v3373_v15, 2 }
 0x41b   :  { %v3362_v22 = vadd.f32 1.0, %v3361_v28  ;;  %v3369_v55 = vadd.f32 1.0, %v3368_v24  ;;  %v3484_v35 = vshll.u32 %v8449_v37, 30  ;;  %v4975_v16 = vsel %vm4967_vm2, %v4958_v17, %v4974_v38 }
 0x41c   :  { %v4978_v2 = vsel %vm4968_vm11, %v4964_v48, 1326507024  ;;  %v8465_v58 = vshll.u32 %v4941_v34, 8  ;;  %vm4966_vm14 = vcmp.lt.s32.totalorder %v8428_v9, 2  ;;  %vm3375_vm1 = vcmp.eq.s32.totalorder %v3373_v15, 0 }
 0x41d   :  { %v3370_v62 = vmul.f32 %v3369_v55, %v3354_v12  ;;  %v3379_v30 = vxor.u32 2147483648, %v3362_v22  ;;  %v3485_v5 = vsub.s32 %v3481_v19, %v3484_v35  ;;  %v4977_v12 = vsel %vm4965_vm15, %v8447_v3, %v4958_v17 }
 0x41e   :  { %vm3378_vm7 = vcmp.eq.s32.totalorder %v3373_v15, 2  ;;  %v4976_v45 = vsel %vm4966_vm14, %v4973_v39, %v4975_v16  ;;  %v4979_v52 = vsel %vm4967_vm2, %v4961_v41, %v4978_v2  ;;  %v4949_v14 = vshrl.u32 %v9488_v26, %v8419_v54 }
 0x41f   :  { %v3376_v4 = vxor.u32 2147483648, %v3370_v62  ;;  %v3380_v59 = vsel %vm3378_vm7, %v3379_v30, %v3370_v62  ;;  %vm3486_vm4 = vcmp.lt.s32.totalorder %v3485_v5, 0  ;;  %v3487_v34 = vsub.s32 0, %v3485_v5 }
 0x420   :  { %v4980_v18 = vsel %vm4966_vm14, %v4977_v12, %v4979_v52  ;;  %v4982_v47 = vand.u32 65535, %v8465_v58  ;;  %v5006_v1 = vand.u32 65535, %v4976_v45  ;;  %v4983_v54 = vshrl.u32 %v8465_v58, 16 }
 0x421   :  { %v3377_v40 = vsel %vm3375_vm1, %v3362_v22, %v3376_v4  ;;  %v3488_v51 = vsel %vm3486_vm4, %v3487_v34, %v3485_v5  ;;  %v4984_v31 = vand.u32 65535, %v4980_v18  ;;  %v4985_v25 = vshrl.u32 %v4980_v18, 16  ;;  %v304_v34 = vpop.permute.xlu1 %303 }
 0x422   :  { %v3381_v56 = vsel %vm3374_vm3, %v3377_v40, %v3380_v59  ;;  %v3489_v44 = vclz %v3488_v51  ;;  %v5007_v6 = vshrl.u32 %v4976_v45, 16  ;;  %v3477_v19 = vadd.s32 %v8426_v33, %v8424_v10 }
 0x423   :  { %v3382_v61 = vsel %vm3371_vm12, nan, %v3381_v56  ;;  %v363_v36 = vsel %vm42_vm0, %v9545_v29, %v300_v42  ;;  %v4969_v20 = vsel %vm4965_vm15, %v4949_v14, %v4952_v46  ;;  %v4987_v13 = vmul.u32 %v4985_v25, %v4982_v47 }
 0x424   :  { %5417 = vst.msk [vmem:[%s9457_s1 + $0x90] sm:$0xff] %vm5398_vm6, %v3382_v61  ;;  %v5495_v8 = vadd.s32 4294967294, %v3489_v44  ;;  %v4988_v28 = vmul.u32 %v4984_v31, %v4983_v54  ;;  %v3507_v24 = vsub.s32 4, %v8449_v37  ;;  %v4970_v7 = vsel %vm4968_vm11, %v4958_v17, 2102212464  ;;  %v9546_v44 = vld [vmem:[#allocation6_spill] sm:$0xff] }
 0x425   :  { %v5009_v15 = vmul.u32 %v5007_v6, %v4982_v47  ;;  %v5010_v41 = vmul.u32 %v5006_v1, %v4983_v54  ;;  %v4986_v48 = vmul.u32 %v4984_v31, %v4982_v47  ;;  %v4990_v10 = vshll.u32 %v4987_v13, 16 }
 0x426   :  { %vm5496_vm9 = vcmp.lt.s32.totalorder %v5495_v8, 0  ;;  %v5008_v33 = vmul.u32 %v5006_v1, %v4982_v47  ;;  %v4989_v55 = vmul.u32 %v4985_v25, %v4983_v54  ;;  %v5011_v38 = vmul.u32 %v5007_v6, %v4983_v54 }
 0x427   :  { %v3492_v22 = vsel %vm5496_vm9, 0, %v5495_v8  ;;  %v5012_v62 = vshll.u32 %v5009_v15, 16  ;;  %v4992_v46 = vshll.u32 %v4988_v28, 16  ;;  %vm4994_vm8 = vc.u32 %v4986_v48, %v4990_v10 }
 0x428   :  { %v3493_v30 = vsub.s32 32, %v3492_v22  ;;  %v3497_v35 = vsub.s32 4294967266, %v3492_v22  ;;  %v3494_v39 = vshll.u32 %v3485_v5, %v3492_v22  ;;  %v4995_v16 = vsel %vm4994_vm8, 1, %v9494_v49 }
 0x429   :  { %v4996_v2 = vadd.s32 %v4990_v10, %v4986_v48  ;;  %v5014_v4 = vshll.u32 %v5010_v41, 16  ;;  %v4997_v45 = vadd.s32 %v4995_v16, %v4989_v55  ;;  %vm5016_vm5 = vc.u32 %v5008_v33, %v5012_v62 }
 0x42a   :  { %v3495_v17 = vshrl.u32 %v3477_v19, %v3493_v30  ;;  %v3498_v12 = vadd.s32 127, %v3497_v35  ;;  %v5017_v52 = vsel %vm5016_vm5, 1, %v9494_v49  ;;  %v5018_v40 = vadd.s32 %v5012_v62, %v5008_v33 }
 0x42b   :  { %vm4998_vm13 = vc.u32 %v4996_v2, %v4992_v46  ;;  %v395_v59 = vmul.f32 %v363_v36, %v5727_v53  ;;  %v5019_v5 = vadd.s32 %v5017_v52, %v5011_v38  ;;  %v4991_v47 = vshrl.u32 %v4987_v13, 16 }
 0x42c   :  { %v3496_v56 = vor.u32 %v3495_v17, %v3494_v39  ;;  %v3499_v14 = vshll.u32 %v3498_v12, 23  ;;  %v4999_v18 = vsel %vm4998_vm13, 1, %v9494_v49  ;;  %vm5020_vm10 = vc.u32 %v5018_v40, %v5014_v4 }
 0x42d   :  { %v5001_v42 = vadd.s32 %v4999_v18, %v4997_v45  ;;  %v8503_v61 = vadd.f32 %v395_v59, %v5729_v57  ;;  %v4993_v31 = vshrl.u32 %v4988_v28, 16  ;;  %v5021_v1 = vsel %vm5020_vm10, 1, %v9494_v49 }
 0x42e   :  { %v3500_v51 = vor.u32 4788187, %v3499_v14  ;;  %v364_v54 = vsel %vm42_vm0, %v9546_v44, %v304_v34  ;;  %v5013_v6 = vshrl.u32 %v5009_v15, 16  ;;  %v5023_v19 = vadd.s32 %v5021_v1, %v5019_v5 }
 0x42f   :  { %v5002_v25 = vadd.s32 %v5001_v42, %v4991_v47  ;;  %v3693_v29 = vand.u32 2147483647, %v8503_v61  ;;  %v3503_v8 = vcvt.s32.f32 %v3496_v56  ;;  %v4971_v13 = vsel %vm4967_vm2, %v8447_v3, %v4970_v7 }
 0x430   :  { %v3501_v36 = vand.u32 2147483647, %v3500_v51  ;;  %v3696_v48 = vand.u32 2139095040, %v8503_v61  ;;  %v5015_v10 = vshrl.u32 %v5010_v41, 16  ;;  %v5024_v33 = vadd.s32 %v5023_v19, %v5013_v6 }
 0x431   :  { %v5003_v28 = vadd.s32 %v5002_v25, %v4993_v31  ;;  %v396_v22 = vmul.f32 %v364_v54, %v5727_v53  ;;  %vm3385_vm11 = vcmp.lt.s32.totalorder %v8280_v23, 0  ;;  %v5022_v15 = vadd.s32 %v5018_v40, %v5014_v4 }
 0x432   :  { %v3504_v55 = vmul.f32 %v3503_v8, %v3501_v36  ;;  %v3697_v38 = vshrl.u32 %v3696_v48, 23  ;;  %v3508_v62 = vsel %vm3385_vm11, %v3507_v24, %v8449_v37  ;;  %v4972_v30 = vsel %vm4966_vm14, %v4969_v20, %v4971_v13 }
 0x433   :  { %v5025_v35 = vadd.s32 %v5024_v33, %v5015_v10  ;;  %v3700_v3 = vand.u32 8388607, %v3693_v29  ;;  %vm5028_vm12 = vc.u32 %v5003_v28, %v5022_v15  ;;  %vm3384_vm15 = vcmp.le.f32.partialorder %v3383_v11, 0.7853982 }
 0x434   :  { %v3505_v7 = vxor.u32 2147483648, %v3504_v55  ;;  %v5500_v41 = vadd.s32 4294967169, %v3697_v38  ;;  %v8524_v39 = vadd.f32 %v396_v22, %v5729_v57  ;;  %v3510_v2 = vsel %vm3384_vm15, 0, %v3508_v62 }
 0x435   :  { %v5029_v46 = vadd.s32 1, %v5025_v35  ;;  %v5026_v37 = vmul.u32 %v8465_v58, %v4972_v30  ;;  %v3701_v4 = vor.u32 8388608, %v3700_v3  ;;  %v3527_v45 = vadd.s32 3, %v3510_v2 }
 0x436   :  { %v3506_v16 = vsel %vm3385_vm11, %v3505_v7, %v3504_v55  ;;  %v3703_v9 = vadd.s32 1, %v5500_v41  ;;  %v3848_v11 = vand.u32 2147483647, %v8524_v39  ;;  %v3851_v58 = vand.u32 2139095040, %v8524_v39 }
 0x437   :  { %v3509_v20 = vsel %vm3384_vm15, %v8280_v23, %v3506_v16  ;;  %v5030_v24 = vsel %vm5028_vm12, %v5029_v46, %v5025_v35  ;;  %v8529_v14 = vshll.u32 %v3701_v4, 8  ;;  %v8532_v42 = vand.u32 3, %v3527_v45 }
 0x438   :  { %v3511_v17 = vmul.f32 %v3509_v20, %v3509_v20  ;;  %v5031_v12 = vadd.s32 %v5030_v24, %v5026_v37  ;;  %vm3704_vm2 = vcmp.gt.s32.totalorder %v3703_v9, 0  ;;  %v8534_v51 = vadd.s32 %v5022_v15, %v5003_v28 }
 0x439   :  { %v3705_v52 = vsel %vm3704_vm2, %v3703_v9, 0  ;;  %v8538_v25 = vand.u32 8388607, %v3848_v11  ;;  %vm4935_vm3 = vcmp.lt.s32.totalorder %v8301_v21, 0  ;;  %v8544_v19 = vand.u32 65535, %v8529_v14 }
 0x43a   :  { %v3512_v40 = vmul.f32 -0.001358992, %v3511_v17  ;;  %v3519_v59 = vmul.f32 -0.00019511016, %v3511_v17  ;;  %v5032_v34 = vadd.s32 536870912, %v5031_v12  ;;  %v3707_v56 = vand.u32 31, %v3705_v52 }
 0x43b   :  { %v8541_v6 = vshrl.u32 %v3705_v52, 5  ;;  %v8547_v36 = vshrl.u32 %v8529_v14, 16  ;;  %v3852_v8 = vshrl.u32 %v3851_v58, 23  ;;  %vm3530_vm14 = vcmp.eq.s32.totalorder %v8532_v42, 0 }
 0x43c   :  { %v3513_v18 = vadd.f32 0.041655596, %v3512_v40  ;;  %v3520_v5 = vadd.f32 0.008332121, %v3519_v59  ;;  %v5033_v47 = vshrl.u32 %v5032_v34, 30  ;;  %v3708_v31 = vsub.s32 32, %v3707_v56 }
 0x43d   :  { %v3710_v10 = vshll.u32 %v9488_v26, %v3707_v56  ;;  %vm3533_vm1 = vcmp.eq.s32.totalorder %v8532_v42, 2  ;;  %v3713_v22 = vshll.u32 %v9489_v32, %v3707_v56  ;;  %vm3529_vm7 = vcmp.lt.s32.totalorder %v8532_v42, 2 }
 0x43e   :  { %v3514_v1 = vmul.f32 %v3513_v18, %v3511_v17  ;;  %v3521_v44 = vmul.f32 %v3520_v5, %v3511_v17  ;;  %v5034_v54 = vshll.u32 %v5033_v47, 30  ;;  %v3711_v33 = vshrl.u32 %v9489_v32, %v3708_v31 }
 0x43f   :  { %v3714_v55 = vshrl.u32 %v9491_v50, %v3708_v31  ;;  %v3717_v15 = vshrl.u32 %v9490_v60, %v3708_v31  ;;  %vm3526_vm9 = vweird.f32 %v8280_v23  ;;  %v5057_v35 = vsub.s32 4, %v5033_v47 }
 0x440   :  { %v3515_v13 = vadd.f32 -0.4999988, %v3514_v1  ;;  %v3522_v48 = vadd.f32 -0.16666654, %v3521_v44  ;;  %v8549_v28 = vsub.s32 %v5031_v12, %v5034_v54  ;;  %v3716_v3 = vshll.u32 %v9491_v50, %v3707_v56 }
 0x441   :  { %v3719_v7 = vshll.u32 %v9490_v60, %v3707_v56  ;;  %v3720_v41 = vshrl.u32 %v9492_v27, %v3708_v31  ;;  %v3723_v37 = vshrl.u32 %v9493_v0, %v3708_v31  ;;  %vm8569_vm8 = vcmp.le.f32.partialorder %v4933_v63, 0.7853982 }
 0x442   :  { %v3516_v38 = vmul.f32 %v3515_v13, %v3511_v17  ;;  %v3523_v62 = vmul.f32 %v3522_v48, %v3511_v17  ;;  %vm5036_vm4 = vcmp.lt.s32.totalorder %v8549_v28, 0  ;;  %v5037_v30 = vsub.s32 0, %v8549_v28 }
 0x443   :  { %v3712_v4 = vor.u32 %v3711_v33, %v3710_v10  ;;  %v3715_v17 = vor.u32 %v3714_v55, %v3713_v22  ;;  %v3721_v12 = vor.u32 %v3720_v41, %v3719_v7  ;;  %v3718_v40 = vor.u32 %v3717_v15, %v3716_v3 }
 0x444   :  { %v3517_v46 = vadd.f32 1.0, %v3516_v38  ;;  %v3524_v16 = vadd.f32 1.0, %v3523_v62  ;;  %v5038_v2 = vsel %vm5036_vm4, %v5037_v30, %v8549_v28  ;;  %v3722_v59 = vshll.u32 %v9492_v27, %v3707_v56 }
 0x445   :  { %v5039_v24 = vclz %v5038_v2  ;;  %v3709_v58 = vshrl.u32 %v9488_v26, %v3708_v31  ;;  %vm3725_vm5 = vcmp.lt.s32.totalorder %v8541_v6, 1  ;;  %v5503_v18 = vadd.s32 4294967169, %v3852_v8 }
 0x446   :  { %v3525_v45 = vmul.f32 %v3524_v16, %v3509_v20  ;;  %v3534_v52 = vxor.u32 2147483648, %v3517_v46  ;;  %v5058_v63 = vsel %vm4935_vm3, %v5057_v35, %v5033_v47  ;;  %v3724_v1 = vor.u32 %v3723_v37, %v3722_v59 }
 0x447   :  { %v5525_v34 = vadd.s32 4294967294, %v5039_v24  ;;  %vm3728_vm13 = vcmp.lt.s32.totalorder %v8541_v6, 4  ;;  %vm3727_vm11 = vcmp.lt.s32.totalorder %v8541_v6, 3  ;;  %v3733_v20 = vsel %vm3725_vm5, %v3712_v4, %v3715_v17 }
 0x448   :  { %v3531_v5 = vxor.u32 2147483648, %v3525_v45  ;;  %v3734_v56 = vsel %vm3728_vm13, %v3721_v12, 920167782  ;;  %v3535_v44 = vsel %vm3533_vm1, %v3534_v52, %v3525_v45  ;;  %vm3726_vm12 = vcmp.lt.s32.totalorder %v8541_v6, 2 }
 0x449   :  { %vm5526_vm10 = vcmp.lt.s32.totalorder %v5525_v34, 0  ;;  %v3735_v47 = vsel %vm3727_vm11, %v3718_v40, %v3734_v56  ;;  %v3737_v55 = vsel %vm3725_vm5, %v3715_v17, %v3718_v40  ;;  %v3738_v23 = vsel %vm3728_vm13, %v3724_v1, 1326507024 }
 0x44a   :  { %v3532_v31 = vsel %vm3530_vm14, %v3517_v46, %v3531_v5  ;;  %v5042_v54 = vsel %vm5526_vm10, 0, %v5525_v34  ;;  %v3736_v22 = vsel %vm3726_vm12, %v3733_v20, %v3735_v47  ;;  %v3730_v62 = vsel %vm3728_vm13, %v3718_v40, 2102212464 }
 0x44b   :  { %v3536_v8 = vsel %vm3529_vm7, %v3532_v31, %v3535_v44  ;;  %v5043_v13 = vsub.s32 32, %v5042_v54  ;;  %v5047_v48 = vsub.s32 4294967266, %v5042_v54  ;;  %v5044_v33 = vshll.u32 %v8549_v28, %v5042_v54 }
 0x44c   :  { %v3537_v10 = vsel %vm3526_vm9, nan, %v3536_v8  ;;  %v3766_v38 = vand.u32 65535, %v3736_v22  ;;  %v5060_v28 = vsel %vm8569_vm8, 0, %v5058_v63  ;;  %v3739_v30 = vsel %vm3727_vm11, %v3721_v12, %v3738_v23 }
 0x44d   :  { %5418 = vst.msk [vmem:[%s9457_s1 + $0x98] sm:$0xff] %vm5398_vm6, %v3537_v10  ;;  %v5045_v42 = vshrl.u32 %v8534_v51, %v5043_v13  ;;  %v5048_v15 = vadd.s32 127, %v5047_v48  ;;  %v3767_v35 = vshrl.u32 %v3736_v22, 16  ;;  %v3740_v51 = vsel %vm3726_vm12, %v3737_v55, %v3739_v30 }
 0x44e   :  { %v3858_v41 = vadd.s32 1, %v5503_v18  ;;  %v3744_v46 = vand.u32 65535, %v3740_v51  ;;  %v3745_v16 = vshrl.u32 %v3740_v51, 16  ;;  %v3770_v37 = vmul.u32 %v3766_v38, %v8547_v36 }
 0x44f   :  { %v5046_v3 = vor.u32 %v5045_v42, %v5044_v33  ;;  %v5049_v7 = vshll.u32 %v5048_v15, 23  ;;  %v3769_v2 = vmul.u32 %v3767_v35, %v8544_v19  ;;  %v5077_v45 = vadd.s32 3, %v5060_v28 }
 0x450   :  { %v3729_v52 = vsel %vm3725_vm5, %v3709_v58, %v3712_v4  ;;  %v3731_v12 = vsel %vm3727_vm11, %v3715_v17, %v3730_v62  ;;  %v3747_v59 = vmul.u32 %v3745_v16, %v8544_v19  ;;  %v3748_v34 = vmul.u32 %v3744_v46, %v8547_v36 }
 0x451   :  { %v5050_v24 = vor.u32 4788187, %v5049_v7  ;;  %v5053_v40 = vcvt.s32.f32 %v5046_v3  ;;  %v3768_v18 = vmul.u32 %v3766_v38, %v8544_v19  ;;  %v3771_v63 = vmul.u32 %v3767_v35, %v8547_v36 }
 0x452   :  { %v3772_v1 = vshll.u32 %v3769_v2, 16  ;;  %vm3859_vm15 = vcmp.gt.s32.totalorder %v3858_v41, 0  ;;  %v3746_v20 = vmul.u32 %v3744_v46, %v8544_v19  ;;  %v3749_v56 = vmul.u32 %v3745_v16, %v8547_v36 }
 0x453   :  { %v5051_v5 = vand.u32 2147483647, %v5050_v24  ;;  %v3750_v4 = vshll.u32 %v3747_v59, 16  ;;  %v3774_v58 = vshll.u32 %v3770_v37, 16  ;;  %v3752_v17 = vshll.u32 %v3748_v34, 16 }
 0x454   :  { %vm3776_vm2 = vc.u32 %v3768_v18, %v3772_v1  ;;  %v3778_v44 = vadd.s32 %v3772_v1, %v3768_v18  ;;  %v3860_v8 = vsel %vm3859_vm15, %v3858_v41, 0  ;;  %v3732_v19 = vsel %vm3726_vm12, %v3729_v52, %v3731_v12 }
 0x455   :  { %v5054_v31 = vmul.f32 %v5053_v40, %v5051_v5  ;;  %vm3754_vm14 = vc.u32 %v3746_v20, %v3750_v4  ;;  %v3756_v54 = vadd.s32 %v3750_v4, %v3746_v20  ;;  %v3777_v47 = vsel %vm3776_vm2, 1, %v9494_v49 }
 0x456   :  { %v3755_v48 = vsel %vm3754_vm14, 1, %v9494_v49  ;;  %v3779_v10 = vadd.s32 %v3777_v47, %v3771_v63  ;;  %vm3780_vm1 = vc.u32 %v3778_v44, %v3774_v58  ;;  %v3773_v42 = vshrl.u32 %v3769_v2, 16 }
 0x457   :  { %v5055_v13 = vxor.u32 2147483648, %v5054_v31  ;;  %v3757_v36 = vadd.s32 %v3755_v48, %v3749_v56  ;;  %vm3758_vm7 = vc.u32 %v3756_v54, %v3752_v17  ;;  %v3781_v33 = vsel %vm3780_vm1, 1, %v9494_v49 }
 0x458   :  { %v3759_v55 = vsel %vm3758_vm7, 1, %v9494_v49  ;;  %v3783_v15 = vadd.s32 %v3781_v33, %v3779_v10  ;;  %v3751_v38 = vshrl.u32 %v3747_v59, 16  ;;  %v3862_v62 = vand.u32 31, %v3860_v8 }
 0x459   :  { %v5056_v22 = vsel %vm4935_vm3, %v5055_v13, %v5054_v31  ;;  %v3761_v28 = vadd.s32 %v3759_v55, %v3757_v36  ;;  %v3775_v30 = vshrl.u32 %v3770_v37, 16  ;;  %v3856_v3 = vor.u32 8388608, %v8538_v25 }
 0x45a   :  { %v5059_v23 = vsel %vm8569_vm8, %v8301_v21, %v5056_v22  ;;  %v3784_v35 = vadd.s32 %v3783_v15, %v3773_v42  ;;  %v8639_v7 = vand.u32 3, %v5077_v45  ;;  %v3753_v51 = vshrl.u32 %v3748_v34, 16 }
 0x45b   :  { %v5061_v6 = vmul.f32 %v5059_v23, %v5059_v23  ;;  %v3762_v41 = vadd.s32 %v3761_v28, %v3751_v38  ;;  %v8641_v46 = vsub.s32 32, %v3862_v62  ;;  %v3786_v9 = vmul.u32 %v8529_v14, %v3732_v19 }
 0x45c   :  { %v3785_v24 = vadd.s32 %v3784_v35, %v3775_v30  ;;  %v8646_v12 = vadd.s32 %v3778_v44, %v3774_v58  ;;  %v8648_v40 = vshrl.u32 %v3860_v8, 5  ;;  %v3865_v34 = vshll.u32 %v9488_v26, %v3862_v62 }
 0x45d   :  { %v5062_v16 = vmul.f32 -0.001358992, %v5061_v6  ;;  %v5069_v2 = vmul.f32 -0.00019511016, %v5061_v6  ;;  %v8644_v52 = vadd.s32 %v3762_v41, %v3753_v51  ;;  %v3866_v25 = vshrl.u32 %v9489_v32, %v8641_v46 }
 0x45e   :  { %v3789_v59 = vadd.s32 1, %v3785_v24  ;;  %v3868_v18 = vshll.u32 %v9489_v32, %v3862_v62  ;;  %v3869_v14 = vshrl.u32 %v9491_v50, %v8641_v46  ;;  %v3872_v5 = vshrl.u32 %v9490_v60, %v8641_v46 }
 0x45f   :  { %v5063_v37 = vadd.f32 0.041655596, %v5062_v16  ;;  %v5070_v45 = vadd.f32 0.008332121, %v5069_v2  ;;  %vm3788_vm3 = vc.u32 %v8644_v52, %v8646_v12  ;;  %v3871_v56 = vshll.u32 %v9491_v50, %v3862_v62 }
 0x460   :  { %v3790_v20 = vsel %vm3788_vm3, %v3789_v59, %v3785_v24  ;;  %v8661_v58 = vor.u32 %v3866_v25, %v3865_v34  ;;  %v3874_v31 = vshll.u32 %v9490_v60, %v3862_v62  ;;  %v3875_v17 = vshrl.u32 %v9492_v27, %v8641_v46 }
 0x461   :  { %v5064_v63 = vmul.f32 %v5063_v37, %v5061_v6  ;;  %v5071_v1 = vmul.f32 %v5070_v45, %v5061_v6  ;;  %v3791_v4 = vadd.s32 %v3790_v20, %v3786_v9  ;;  %v3877_v47 = vshll.u32 %v9492_v27, %v3862_v62 }
 0x462   :  { %v3878_v8 = vshrl.u32 %v9493_v0, %v8641_v46  ;;  %v8669_v48 = vor.u32 %v3869_v14, %v3868_v18  ;;  %v3873_v10 = vor.u32 %v3872_v5, %v3871_v56  ;;  %v3876_v19 = vor.u32 %v3875_v17, %v3874_v31 }
 0x463   :  { %v5065_v44 = vadd.f32 -0.4999988, %v5064_v63  ;;  %v5072_v54 = vadd.f32 -0.16666654, %v5071_v1  ;;  %v3792_v13 = vadd.s32 536870912, %v3791_v4  ;;  %vm3883_vm4 = vcmp.lt.s32.totalorder %v8648_v40, 4 }
 0x464   :  { %v3879_v22 = vor.u32 %v3878_v8, %v3877_v47  ;;  %vm5076_vm9 = vweird.f32 %v8301_v21  ;;  %v3889_v42 = vsel %vm3883_vm4, %v3876_v19, 920167782  ;;  %v8677_v15 = vshll.u32 %v3856_v3, 8 }
 0x465   :  { %v5066_v36 = vmul.f32 %v5065_v44, %v5061_v6  ;;  %v5073_v33 = vmul.f32 %v5072_v54, %v5061_v6  ;;  %v8673_v55 = vshrl.u32 %v3792_v13, 30  ;;  %vm3880_vm8 = vcmp.lt.s32.totalorder %v8648_v40, 1 }
 0x466   :  { %vm3882_vm5 = vcmp.lt.s32.totalorder %v8648_v40, 3  ;;  %v3888_v6 = vsel %vm3880_vm8, %v8661_v58, %v8669_v48  ;;  %v3892_v35 = vsel %vm3880_vm8, %v8669_v48, %v3873_v10  ;;  %vm5079_vm13 = vcmp.lt.s32.totalorder %v8639_v7, 2 }
 0x467   :  { %v5067_v38 = vadd.f32 1.0, %v5066_v36  ;;  %v5074_v28 = vadd.f32 1.0, %v5073_v33  ;;  %v3794_v62 = vshll.u32 %v8673_v55, 30  ;;  %v3890_v30 = vsel %vm3882_vm5, %v3873_v10, %v3889_v42 }
 0x468   :  { %v3893_v41 = vsel %vm3883_vm4, %v3879_v22, 1326507024  ;;  %vm5080_vm10 = vcmp.eq.s32.totalorder %v8639_v7, 0  ;;  %vm3881_vm11 = vcmp.lt.s32.totalorder %v8648_v40, 2  ;;  %vm5083_vm12 = vcmp.eq.s32.totalorder %v8639_v7, 2 }
 0x469   :  { %v5075_v3 = vmul.f32 %v5074_v28, %v5059_v23  ;;  %v5084_v51 = vxor.u32 2147483648, %v5067_v38  ;;  %v3795_v16 = vsub.s32 %v3791_v4, %v3794_v62  ;;  %v3894_v2 = vsel %vm3882_vm5, %v3876_v19, %v3893_v41 }
 0x46a   :  { %v3891_v23 = vsel %vm3881_vm11, %v3888_v6, %v3890_v30  ;;  %v3895_v9 = vsel %vm3881_vm11, %v3892_v35, %v3894_v2  ;;  %v3897_v37 = vand.u32 65535, %v8677_v15  ;;  %v3898_v18 = vshrl.u32 %v8677_v15, 16  ;;  %v312_v35 = vpop.permute.xlu0 %311 }
 0x46b   :  { %v5081_v24 = vxor.u32 2147483648, %v5075_v3  ;;  %vm3796_vm15 = vcmp.lt.s32.totalorder %v3795_v16, 0  ;;  %v3797_v25 = vsub.s32 0, %v3795_v16  ;;  %v3899_v45 = vand.u32 65535, %v3895_v9 }
 0x46c   :  { %v5085_v34 = vsel %vm5083_vm12, %v5084_v51, %v5075_v3  ;;  %v3900_v14 = vshrl.u32 %v3895_v9, 16  ;;  %v3921_v1 = vand.u32 65535, %v3891_v23  ;;  %v3922_v20 = vshrl.u32 %v3891_v23, 16 }
 0x46d   :  { %v5082_v59 = vsel %vm5080_vm10, %v5067_v38, %v5081_v24  ;;  %v3798_v63 = vsel %vm3796_vm15, %v3797_v25, %v3795_v16  ;;  %v3903_v17 = vmul.u32 %v3899_v45, %v3898_v18  ;;  %v3864_v44 = vshrl.u32 %v9488_v26, %v8641_v46 }
 0x46e   :  { %v5086_v5 = vsel %vm5079_vm13, %v5082_v59, %v5085_v34  ;;  %v3799_v4 = vclz %v3798_v63  ;;  %v3902_v31 = vmul.u32 %v3900_v14, %v3897_v37  ;;  %v3787_v7 = vadd.s32 %v8646_v12, %v8644_v52 }
 0x46f   :  { %v5087_v56 = vsel %vm5076_vm9, nan, %v5086_v5  ;;  %v3901_v47 = vmul.u32 %v3899_v45, %v3897_v37  ;;  %v3885_v21 = vsel %vm3883_vm4, %v3873_v10, 2102212464  ;;  %v3904_v13 = vmul.u32 %v3900_v14, %v3898_v18 }
 0x470   :  { %5428 = vst.msk [vmem:[%s9457_s1 + $0xe8] sm:$0xff] %vm5398_vm6, %v5087_v56  ;;  %v5501_v54 = vadd.s32 4294967294, %v3799_v4  ;;  %v3905_v8 = vshll.u32 %v3902_v31, 16  ;;  %v3907_v19 = vshll.u32 %v3903_v17, 16  ;;  %v3924_v36 = vmul.u32 %v3922_v20, %v3897_v37  ;;  %v9550_v4 = vld [vmem:[#allocation7_spill] sm:$0xff] }
 0x471   :  { %v3923_v22 = vmul.u32 %v3921_v1, %v3897_v37  ;;  %vm3695_vm1 = vcmp.lt.s32.totalorder %v8503_v61, 0  ;;  %v3925_v38 = vmul.u32 %v3921_v1, %v3898_v18  ;;  %v3906_v62 = vshrl.u32 %v3902_v31, 16  ;;  %v316_v37 = vpop.permute.xlu1 %315 }
 0x472   :  { %vm5502_vm2 = vcmp.lt.s32.totalorder %v5501_v54, 0  ;;  %vm3909_vm14 = vc.u32 %v3901_v47, %v3905_v8  ;;  %v3911_v33 = vadd.s32 %v3905_v8, %v3901_v47  ;;  %v3927_v52 = vshll.u32 %v3924_v36, 16 }
 0x473   :  { %v3802_v42 = vsel %vm5502_vm2, 0, %v5501_v54  ;;  %v3910_v46 = vsel %vm3909_vm14, 1, %v9494_v49  ;;  %v3926_v10 = vmul.u32 %v3922_v20, %v3898_v18  ;;  %v3929_v23 = vshll.u32 %v3925_v38, 16 }
 0x474   :  { %v3803_v12 = vsub.s32 32, %v3802_v42  ;;  %v3807_v28 = vsub.s32 4294967266, %v3802_v42  ;;  %v3912_v6 = vadd.s32 %v3910_v46, %v3904_v13  ;;  %v3804_v30 = vshll.u32 %v3795_v16, %v3802_v42  ;;  %v9549_v16 = vld [vmem:[#allocation12_spill] sm:$0xff] }
 0x475   :  { %vm3913_vm7 = vc.u32 %v3911_v33, %v3907_v19  ;;  %vm3931_vm3 = vc.u32 %v3923_v22, %v3927_v52  ;;  %v3933_v9 = vadd.s32 %v3927_v52, %v3923_v22  ;;  %v3817_v34 = vsub.s32 4, %v8673_v55 }
 0x476   :  { %v3805_v3 = vshrl.u32 %v3787_v7, %v3803_v12  ;;  %v3808_v51 = vadd.s32 127, %v3807_v28  ;;  %v3914_v41 = vsel %vm3913_vm7, 1, %v9494_v49  ;;  %v3932_v2 = vsel %vm3931_vm3, 1, %v9494_v49 }
 0x477   :  { %v3916_v24 = vadd.s32 %v3914_v41, %v3912_v6  ;;  %v3934_v25 = vadd.s32 %v3932_v2, %v3926_v10  ;;  %v366_v18 = vsel %vm42_vm0, %v9549_v16, %v312_v35  ;;  %v3884_v14 = vsel %vm3880_vm8, %v3864_v44, %v8661_v58 }
 0x478   :  { %v3806_v45 = vor.u32 %v3805_v3, %v3804_v30  ;;  %v3809_v59 = vshll.u32 %v3808_v51, 23  ;;  %vm3935_vm4 = vc.u32 %v3933_v9, %v3929_v23  ;;  %v398_v63 = vmul.f32 %v366_v18, %v5727_v53 }
 0x479   :  { %v3917_v5 = vadd.s32 %v3916_v24, %v3906_v62  ;;  %v3908_v20 = vshrl.u32 %v3903_v17, 16  ;;  %v3936_v56 = vsel %vm3935_vm4, 1, %v9494_v49  ;;  %v367_v31 = vsel %vm42_vm0, %v9550_v4, %v316_v37 }
 0x47a   :  { %v3810_v1 = vor.u32 4788187, %v3809_v59  ;;  %v3886_v7 = vsel %vm3882_vm5, %v8669_v48, %v3885_v21  ;;  %v3928_v54 = vshrl.u32 %v3924_v36, 16  ;;  %v3938_v47 = vadd.s32 %v3936_v56, %v3934_v25 }
 0x47b   :  { %v8739_v58 = vadd.f32 %v398_v63, %v5729_v57  ;;  %v3813_v8 = vcvt.s32.f32 %v3806_v45  ;;  %v3818_v17 = vsel %vm3695_vm1, %v3817_v34, %v8673_v55  ;;  %v3918_v13 = vadd.s32 %v3917_v5, %v3908_v20 }
 0x47c   :  { %v3811_v44 = vand.u32 2147483647, %v3810_v1  ;;  %v3930_v19 = vshrl.u32 %v3925_v38, 16  ;;  %v3939_v33 = vadd.s32 %v3938_v47, %v3928_v54  ;;  %v399_v42 = vmul.f32 %v367_v31, %v5727_v53 }
 0x47d   :  { %v4158_v22 = vand.u32 2147483647, %v8739_v58  ;;  %vm8748_vm9 = vcmp.le.f32.partialorder %v3693_v29, 0.7853982  ;;  %v3937_v36 = vadd.s32 %v3933_v9, %v3929_v23  ;;  %v4161_v46 = vand.u32 2139095040, %v8739_v58 }
 0x47e   :  { %v3814_v21 = vmul.f32 %v3813_v8, %v3811_v44  ;;  %v3820_v55 = vsel %vm8748_vm9, 0, %v3818_v17  ;;  %v3887_v38 = vsel %vm3881_vm11, %v3884_v14, %v3886_v7  ;;  %v3940_v52 = vadd.s32 %v3939_v33, %v3930_v19 }
 0x47f   :  { %vm3943_vm8 = vc.u32 %v3918_v13, %v3937_v36  ;;  %v4162_v28 = vshrl.u32 %v4161_v46, 23  ;;  %v4165_v29 = vand.u32 8388607, %v4158_v22  ;;  %v8760_v6 = vadd.f32 %v399_v42, %v5729_v57 }
 0x480   :  { %v3815_v12 = vxor.u32 2147483648, %v3814_v21  ;;  %v3944_v62 = vadd.s32 1, %v3940_v52  ;;  %v3941_v10 = vmul.u32 %v8677_v15, %v3887_v38  ;;  %v3837_v3 = vadd.s32 3, %v3820_v55 }
 0x481   :  { %v5509_v35 = vadd.s32 4294967169, %v4162_v28  ;;  %v4166_v24 = vor.u32 8388608, %v4165_v29  ;;  %v4316_v9 = vand.u32 2139095040, %v8760_v6  ;;  %vm3850_vm13 = vcmp.lt.s32.totalorder %v8524_v39, 0 }
 0x482   :  { %v3816_v30 = vsel %vm3695_vm1, %v3815_v12, %v3814_v21  ;;  %v3945_v51 = vsel %vm3943_vm8, %v3944_v62, %v3940_v52  ;;  %v8769_v59 = vand.u32 3, %v3837_v3  ;;  %v3942_v4 = vadd.s32 %v3937_v36, %v3918_v13 }
 0x483   :  { %v3819_v40 = vsel %vm8748_vm9, %v8503_v61, %v3816_v30  ;;  %v3946_v2 = vadd.s32 %v3945_v51, %v3941_v10  ;;  %v4168_v23 = vadd.s32 1, %v5509_v35  ;;  %v8771_v14 = vshll.u32 %v4166_v24, 8 }
 0x484   :  { %v3821_v41 = vmul.f32 %v3819_v40, %v3819_v40  ;;  %v4317_v63 = vshrl.u32 %v4316_v9, 23  ;;  %vm3843_vm10 = vcmp.eq.s32.totalorder %v8769_v59, 2  ;;  %v4313_v7 = vand.u32 2147483647, %v8760_v6 }
 0x485   :  { %v3947_v45 = vadd.s32 536870912, %v3946_v2  ;;  %vm4169_vm5 = vcmp.gt.s32.totalorder %v4168_v23, 0  ;;  %v8779_v8 = vand.u32 65535, %v8771_v14  ;;  %vm3840_vm11 = vcmp.eq.s32.totalorder %v8769_v59, 0 }
 0x486   :  { %v3822_v25 = vmul.f32 -0.001358992, %v3821_v41  ;;  %v3829_v37 = vmul.f32 -0.00019511016, %v3821_v41  ;;  %v4170_v15 = vsel %vm4169_vm5, %v4168_v23, 0  ;;  %v8785_v42 = vadd.s32 4294967169, %v4317_v63 }
 0x487   :  { %v3948_v18 = vshrl.u32 %v3947_v45, 30  ;;  %v4172_v5 = vand.u32 31, %v4170_v15  ;;  %v8782_v19 = vshrl.u32 %v4170_v15, 5  ;;  %vm3839_vm12 = vcmp.lt.s32.totalorder %v8769_v59, 2 }
 0x488   :  { %v3823_v34 = vadd.f32 0.041655596, %v3822_v25  ;;  %v3830_v16 = vadd.f32 0.008332121, %v3829_v37  ;;  %vm3836_vm2 = vweird.f32 %v8503_v61  ;;  %vm8810_vm14 = vcmp.le.f32.partialorder %v3848_v11, 0.7853982 }
 0x489   :  { %v3949_v56 = vshll.u32 %v3948_v18, 30  ;;  %v4173_v31 = vsub.s32 32, %v4172_v5  ;;  %v3972_v17 = vsub.s32 4, %v3948_v18  ;;  %v4175_v33 = vshll.u32 %v9488_v26, %v4172_v5 }
 0x48a   :  { %v3824_v1 = vmul.f32 %v3823_v34, %v3821_v41  ;;  %v3831_v20 = vmul.f32 %v3830_v16, %v3821_v41  ;;  %v4178_v46 = vshll.u32 %v9489_v32, %v4172_v5  ;;  %v4181_v38 = vshll.u32 %v9491_v50, %v4172_v5 }
 0x48b   :  { %v8776_v44 = vsub.s32 %v3946_v2, %v3949_v56  ;;  %v4176_v36 = vshrl.u32 %v9489_v32, %v4173_v31  ;;  %v4179_v55 = vshrl.u32 %v9491_v50, %v4173_v31  ;;  %v4182_v29 = vshrl.u32 %v9490_v60, %v4173_v31 }
 0x48c   :  { %v3825_v54 = vadd.f32 -0.4999988, %v3824_v1  ;;  %v3832_v47 = vadd.f32 -0.16666654, %v3831_v20  ;;  %v8799_v30 = vsel %vm3850_vm13, %v3972_v17, %v3948_v18  ;;  %v4174_v10 = vshrl.u32 %v9488_v26, %v4173_v31 }
 0x48d   :  { %vm3951_vm15 = vcmp.lt.s32.totalorder %v8776_v44, 0  ;;  %v3952_v21 = vsub.s32 0, %v8776_v44  ;;  %v4185_v35 = vshrl.u32 %v9492_v27, %v4173_v31  ;;  %v4188_v2 = vshrl.u32 %v9493_v0, %v4173_v31 }
 0x48e   :  { %v3826_v13 = vmul.f32 %v3825_v54, %v3821_v41  ;;  %v3833_v48 = vmul.f32 %v3832_v47, %v3821_v41  ;;  %v4184_v41 = vshll.u32 %v9490_v60, %v4172_v5  ;;  %v4177_v23 = vor.u32 %v4176_v36, %v4175_v33 }
 0x48f   :  { %v3953_v28 = vsel %vm3951_vm15, %v3952_v21, %v8776_v44  ;;  %v4180_v9 = vor.u32 %v4179_v55, %v4178_v46  ;;  %v4187_v25 = vshll.u32 %v9492_v27, %v4172_v5  ;;  %v4183_v15 = vor.u32 %v4182_v29, %v4181_v38 }
 0x490   :  { %v3827_v52 = vadd.f32 1.0, %v3826_v13  ;;  %v3834_v12 = vadd.f32 1.0, %v3833_v48  ;;  %v3954_v62 = vclz %v3953_v28  ;;  %v4186_v34 = vor.u32 %v4185_v35, %v4184_v41 }
 0x491   :  { %v4189_v16 = vor.u32 %v4188_v2, %v4187_v25  ;;  %vm4190_vm7 = vcmp.lt.s32.totalorder %v8782_v19, 1  ;;  %vm4191_vm3 = vcmp.lt.s32.totalorder %v8782_v19, 2  ;;  %vm4192_vm4 = vcmp.lt.s32.totalorder %v8782_v19, 3 }
 0x492   :  { %v3835_v3 = vmul.f32 %v3834_v12, %v3819_v40  ;;  %v3844_v51 = vxor.u32 2147483648, %v3827_v52  ;;  %v5504_v24 = vadd.s32 4294967294, %v3954_v62  ;;  %vm4193_vm9 = vcmp.lt.s32.totalorder %v8782_v19, 4 }
 0x493   :  { %v4194_v20 = vsel %vm4190_vm7, %v4174_v10, %v4177_v23  ;;  %v4195_v31 = vsel %vm4193_vm9, %v4183_v15, 2102212464  ;;  %v4198_v54 = vsel %vm4190_vm7, %v4177_v23, %v4180_v9  ;;  %v4199_v47 = vsel %vm4193_vm9, %v4186_v34, 920167782 }
 0x494   :  { %v3841_v37 = vxor.u32 2147483648, %v3835_v3  ;;  %v3845_v45 = vsel %vm3843_vm10, %v3844_v51, %v3835_v3  ;;  %vm5505_vm1 = vcmp.lt.s32.totalorder %v5504_v24, 0  ;;  %v4200_v61 = vsel %vm4192_vm4, %v4183_v15, %v4199_v47 }
 0x495   :  { %v3957_v5 = vsel %vm5505_vm1, 0, %v5504_v24  ;;  %v4196_v13 = vsel %vm4192_vm4, %v4180_v9, %v4195_v31  ;;  %v4201_v48 = vsel %vm4191_vm3, %v4198_v54, %v4200_v61  ;;  %v4202_v21 = vsel %vm4190_vm7, %v4180_v9, %v4183_v15 }
 0x496   :  { %v3842_v18 = vsel %vm3840_vm11, %v3827_v52, %v3841_v37  ;;  %v3958_v63 = vsub.s32 32, %v3957_v5  ;;  %v3962_v1 = vsub.s32 4294967266, %v3957_v5  ;;  %v3959_v59 = vshll.u32 %v8776_v44, %v3957_v5 }
 0x497   :  { %v3846_v11 = vsel %vm3839_vm12, %v3842_v18, %v3845_v45  ;;  %v4203_v36 = vsel %vm4193_vm9, %v4189_v16, 1326507024  ;;  %v4231_v44 = vand.u32 65535, %v4201_v48  ;;  %v4208_v52 = vshrl.u32 %v8771_v14, 16 }
 0x498   :  { %v3847_v56 = vsel %vm3836_vm2, nan, %v3846_v11  ;;  %v3960_v17 = vshrl.u32 %v3942_v4, %v3958_v63  ;;  %v3963_v33 = vadd.s32 127, %v3962_v1  ;;  %v4204_v4 = vsel %vm4192_vm4, %v4186_v34, %v4203_v36 }
 0x499   :  { %5420 = vst.msk [vmem:[%s9457_s1 + $0xa8] sm:$0xff] %vm5398_vm6, %v3847_v56  ;;  %v4205_v38 = vsel %vm4191_vm3, %v4202_v21, %v4204_v4  ;;  %v4232_v12 = vshrl.u32 %v4201_v48, 16  ;;  %v4323_v28 = vadd.s32 1, %v8785_v42  ;;  %v8855_v35 = vand.u32 8388607, %v4313_v7 }
 0x49a   :  { %v3961_v46 = vor.u32 %v3960_v17, %v3959_v59  ;;  %v3964_v55 = vshll.u32 %v3963_v33, 23  ;;  %v4209_v62 = vand.u32 65535, %v4205_v38  ;;  %v4210_v10 = vshrl.u32 %v4205_v38, 16 }
 0x49b   :  { %v3975_v3 = vsel %vm8810_vm14, 0, %v8799_v30  ;;  %v8862_v51 = vsel %vm4191_vm3, %v4194_v20, %v4196_v13  ;;  %v4234_v41 = vmul.u32 %v4232_v12, %v8779_v8  ;;  %v4235_v2 = vmul.u32 %v4231_v44, %v4208_v52 }
 0x49c   :  { %v3965_v29 = vor.u32 4788187, %v3964_v55  ;;  %v3968_v42 = vcvt.s32.f32 %v3961_v46  ;;  %v4212_v23 = vmul.u32 %v4210_v10, %v8779_v8  ;;  %v4213_v9 = vmul.u32 %v4209_v62, %v4208_v52 }
 0x49d   :  { %v4233_v25 = vmul.u32 %v4231_v44, %v8779_v8  ;;  %v4236_v37 = vmul.u32 %v4232_v12, %v4208_v52  ;;  %v4237_v45 = vshll.u32 %v4234_v41, 16  ;;  %vm4324_vm8 = vcmp.gt.s32.totalorder %v4323_v28, 0 }
 0x49e   :  { %v3966_v24 = vand.u32 2147483647, %v3965_v29  ;;  %v4211_v30 = vmul.u32 %v4209_v62, %v8779_v8  ;;  %v4214_v34 = vmul.u32 %v4210_v10, %v4208_v52  ;;  %v4215_v19 = vshll.u32 %v4212_v23, 16 }
 0x49f   :  { %v4217_v16 = vshll.u32 %v4213_v9, 16  ;;  %v4239_v18 = vshll.u32 %v4235_v2, 16  ;;  %vm4241_vm5 = vc.u32 %v4233_v25, %v4237_v45  ;;  %v4243_v5 = vadd.s32 %v4237_v45, %v4233_v25 }
 0x4a0   :  { %v3969_v15 = vmul.f32 %v3968_v42, %v3966_v24  ;;  %vm4219_vm10 = vc.u32 %v4211_v30, %v4215_v19  ;;  %v4221_v63 = vadd.s32 %v4215_v19, %v4211_v30  ;;  %v4242_v1 = vsel %vm4241_vm5, 1, %v9494_v49 }
 0x4a1   :  { %v4220_v20 = vsel %vm4219_vm10, 1, %v9494_v49  ;;  %v4238_v56 = vshrl.u32 %v4234_v41, 16  ;;  %v4244_v31 = vadd.s32 %v4242_v1, %v4236_v37  ;;  %vm4245_vm11 = vc.u32 %v4243_v5, %v4239_v18 }
 0x4a2   :  { %v3970_v11 = vxor.u32 2147483648, %v3969_v15  ;;  %v4222_v8 = vadd.s32 %v4220_v20, %v4214_v34  ;;  %vm4223_vm12 = vc.u32 %v4221_v63, %v4217_v16  ;;  %v4246_v47 = vsel %vm4245_vm11, 1, %v9494_v49 }
 0x4a3   :  { %v4224_v17 = vsel %vm4223_vm12, 1, %v9494_v49  ;;  %v4248_v33 = vadd.s32 %v4246_v47, %v4244_v31  ;;  %v4325_v61 = vsel %vm4324_vm8, %v4323_v28, 0  ;;  %v4216_v48 = vshrl.u32 %v4212_v23, 16 }
 0x4a4   :  { %v3971_v54 = vsel %vm3850_vm13, %v3970_v11, %v3969_v15  ;;  %v4226_v21 = vadd.s32 %v4224_v17, %v4222_v8  ;;  %v4327_v36 = vand.u32 31, %v4325_v61  ;;  %v4218_v46 = vshrl.u32 %v4213_v9, 16 }
 0x4a5   :  { %v3974_v59 = vsel %vm8810_vm14, %v8524_v39, %v3971_v54  ;;  %v4240_v55 = vshrl.u32 %v4235_v2, 16  ;;  %v4249_v4 = vadd.s32 %v4248_v33, %v4238_v56  ;;  %v3992_v29 = vadd.s32 3, %v3975_v3 }
 0x4a6   :  { %v3976_v13 = vmul.f32 %v3974_v59, %v3974_v59  ;;  %v4227_v52 = vadd.s32 %v4226_v21, %v4216_v48  ;;  %v8878_v12 = vsub.s32 32, %v4327_v36  ;;  %v4251_v62 = vmul.u32 %v8771_v14, %v8862_v51 }
 0x4a7   :  { %v4250_v40 = vadd.s32 %v4249_v4, %v4240_v55  ;;  %v4321_v10 = vor.u32 8388608, %v8855_v35  ;;  %v8885_v42 = vadd.s32 %v4243_v5, %v4239_v18  ;;  %v8887_v23 = vshrl.u32 %v4325_v61, 5 }
 0x4a8   :  { %v3977_v44 = vmul.f32 -0.001358992, %v3976_v13  ;;  %v3984_v38 = vmul.f32 -0.00019511016, %v3976_v13  ;;  %v8883_v24 = vadd.s32 %v4227_v52, %v4218_v46  ;;  %v4330_v9 = vshll.u32 %v9488_v26, %v4327_v36 }
 0x4a9   :  { %v4254_v2 = vadd.s32 1, %v4250_v40  ;;  %v4331_v3 = vshrl.u32 %v9489_v32, %v8878_v12  ;;  %v4334_v14 = vshrl.u32 %v9491_v50, %v8878_v12  ;;  %v4333_v51 = vshll.u32 %v9489_v32, %v4327_v36 }
 0x4aa   :  { %v3978_v28 = vadd.f32 0.041655596, %v3977_v44  ;;  %v3985_v41 = vadd.f32 0.008332121, %v3984_v38  ;;  %vm4253_vm13 = vc.u32 %v8883_v24, %v8885_v42  ;;  %v4336_v45 = vshll.u32 %v9491_v50, %v4327_v36 }
 0x4ab   :  { %v4255_v35 = vsel %vm4253_vm13, %v4254_v2, %v4250_v40  ;;  %v4337_v15 = vshrl.u32 %v9490_v60, %v8878_v12  ;;  %v4332_v16 = vor.u32 %v4331_v3, %v4330_v9  ;;  %v4339_v18 = vshll.u32 %v9490_v60, %v4327_v36 }
 0x4ac   :  { %v3979_v25 = vmul.f32 %v3978_v28, %v3976_v13  ;;  %v3986_v37 = vmul.f32 %v3985_v41, %v3976_v13  ;;  %v4256_v19 = vadd.s32 %v4255_v35, %v4251_v62  ;;  %v4340_v5 = vshrl.u32 %v9492_v27, %v8878_v12 }
 0x4ad   :  { %v4342_v11 = vshll.u32 %v9492_v27, %v4327_v36  ;;  %v4343_v63 = vshrl.u32 %v9493_v0, %v8878_v12  ;;  %v8906_v31 = vor.u32 %v4334_v14, %v4333_v51  ;;  %v3993_v54 = vand.u32 3, %v3992_v29 }
 0x4ae   :  { %v3980_v30 = vadd.f32 -0.4999988, %v3979_v25  ;;  %v3987_v34 = vadd.f32 -0.16666654, %v3986_v37  ;;  %v4257_v56 = vadd.s32 536870912, %v4256_v19  ;;  %v4338_v8 = vor.u32 %v4337_v15, %v4336_v45  ;;  %v324_v37 = vpop.permute.xlu0 %323 }
 0x4af   :  { %v4341_v47 = vor.u32 %v4340_v5, %v4339_v18  ;;  %v4344_v17 = vor.u32 %v4343_v63, %v4342_v11  ;;  %vm4348_vm15 = vcmp.lt.s32.totalorder %v8887_v23, 4  ;;  %vm3991_vm2 = vweird.f32 %v8524_v39  ;;  %v9555_v18 = vld [vmem:[#allocation13_spill] sm:$0xff] }
 0x4b0   :  { %v3981_v1 = vmul.f32 %v3980_v30, %v3976_v13  ;;  %v3988_v20 = vmul.f32 %v3987_v34, %v3976_v13  ;;  %v8908_v48 = vshrl.u32 %v4257_v56, 30  ;;  %vm4345_vm14 = vcmp.lt.s32.totalorder %v8887_v23, 1 }
 0x4b1   :  { %vm4347_vm1 = vcmp.lt.s32.totalorder %v8887_v23, 3  ;;  %v4354_v13 = vsel %vm4348_vm15, %v4341_v47, 920167782  ;;  %v4353_v55 = vsel %vm4345_vm14, %v4332_v16, %v8906_v31  ;;  %vm3994_vm7 = vcmp.lt.s32.totalorder %v3993_v54, 2 }
 0x4b2   :  { %v3982_v33 = vadd.f32 1.0, %v3981_v1  ;;  %v3989_v61 = vadd.f32 1.0, %v3988_v20  ;;  %v4259_v46 = vshll.u32 %v8908_v48, 30  ;;  %v4355_v4 = vsel %vm4347_vm1, %v4338_v8, %v4354_v13 }
 0x4b3   :  { %v4358_v44 = vsel %vm4348_vm15, %v4344_v17, 1326507024  ;;  %v8924_v38 = vshll.u32 %v4321_v10, 8  ;;  %vm4346_vm3 = vcmp.lt.s32.totalorder %v8887_v23, 2  ;;  %vm3995_vm4 = vcmp.eq.s32.totalorder %v3993_v54, 0 }
 0x4b4   :  { %v3990_v21 = vmul.f32 %v3989_v61, %v3974_v59  ;;  %v3999_v36 = vxor.u32 2147483648, %v3982_v33  ;;  %v4260_v29 = vsub.s32 %v4256_v19, %v4259_v46  ;;  %v4357_v59 = vsel %vm4345_vm14, %v8906_v31, %v4338_v8 }
 0x4b5   :  { %vm3998_vm9 = vcmp.eq.s32.totalorder %v3993_v54, 2  ;;  %v4356_v40 = vsel %vm4346_vm3, %v4353_v55, %v4355_v4  ;;  %v4359_v62 = vsel %vm4347_vm1, %v4341_v47, %v4358_v44  ;;  %v4329_v9 = vshrl.u32 %v9488_v26, %v8878_v12 }
 0x4b6   :  { %v3996_v52 = vxor.u32 2147483648, %v3990_v21  ;;  %v4000_v41 = vsel %vm3998_vm9, %v3999_v36, %v3990_v21  ;;  %vm4261_vm8 = vcmp.lt.s32.totalorder %v4260_v29, 0  ;;  %v4262_v10 = vsub.s32 0, %v4260_v29 }
 0x4b7   :  { %v4360_v3 = vsel %vm4346_vm3, %v4357_v59, %v4359_v62  ;;  %v4362_v25 = vand.u32 65535, %v8924_v38  ;;  %v4386_v45 = vand.u32 65535, %v4356_v40  ;;  %v4363_v12 = vshrl.u32 %v8924_v38, 16 }
 0x4b8   :  { %v3997_v28 = vsel %vm3995_vm4, %v3982_v33, %v3996_v52  ;;  %v4263_v35 = vsel %vm4261_vm8, %v4262_v10, %v4260_v29  ;;  %v4364_v51 = vand.u32 65535, %v4360_v3  ;;  %v4365_v30 = vshrl.u32 %v4360_v3, 16  ;;  %v328_v10 = vpop.permute.xlu1 %327 }
 0x4b9   :  { %v4001_v2 = vsel %vm3994_vm7, %v3997_v28, %v4000_v41  ;;  %v4264_v15 = vclz %v4263_v35  ;;  %v4387_v34 = vshrl.u32 %v4356_v40, 16  ;;  %v4252_v19 = vadd.s32 %v8885_v42, %v8883_v24 }
 0x4ba   :  { %v4002_v14 = vsel %vm3991_vm2, nan, %v4001_v2  ;;  %v369_v39 = vsel %vm42_vm0, %v9555_v18, %v324_v37  ;;  %v4349_v11 = vsel %vm4345_vm14, %v4329_v9, %v4332_v16  ;;  %v4367_v63 = vmul.u32 %v4365_v30, %v4362_v25 }
 0x4bb   :  { %5421 = vst.msk [vmem:[%s9457_s1 + $0xb0] sm:$0xff] %vm5398_vm6, %v4002_v14  ;;  %v5510_v5 = vadd.s32 4294967294, %v4264_v15  ;;  %v4368_v1 = vmul.u32 %v4364_v51, %v4363_v12  ;;  %v4282_v20 = vsub.s32 4, %v8908_v48  ;;  %v4350_v56 = vsel %vm4348_vm15, %v4338_v8, 2102212464  ;;  %v9556_v15 = vld [vmem:[#allocation8_spill] sm:$0xff] }
 0x4bc   :  { %v4389_v54 = vmul.u32 %v4387_v34, %v4362_v25  ;;  %v4390_v47 = vmul.u32 %v4386_v45, %v4363_v12  ;;  %v4366_v17 = vmul.u32 %v4364_v51, %v4362_v25  ;;  %v4370_v24 = vshll.u32 %v4367_v63, 16 }
 0x4bd   :  { %vm5511_vm5 = vcmp.lt.s32.totalorder %v5510_v5, 0  ;;  %v4388_v42 = vmul.u32 %v4386_v45, %v4362_v25  ;;  %v4369_v61 = vmul.u32 %v4365_v30, %v4363_v12  ;;  %v4391_v13 = vmul.u32 %v4387_v34, %v4363_v12 }
 0x4be   :  { %v4267_v33 = vsel %vm5511_vm5, 0, %v5510_v5  ;;  %v4392_v21 = vshll.u32 %v4389_v54, 16  ;;  %v4372_v16 = vshll.u32 %v4368_v1, 16  ;;  %vm4374_vm10 = vc.u32 %v4366_v17, %v4370_v24 }
 0x4bf   :  { %v4268_v36 = vsub.s32 32, %v4267_v33  ;;  %v4272_v46 = vsub.s32 4294967266, %v4267_v33  ;;  %v4269_v55 = vshll.u32 %v4260_v29, %v4267_v33  ;;  %v4375_v4 = vsel %vm4374_vm10, 1, %v9494_v49 }
 0x4c0   :  { %v4376_v44 = vadd.s32 %v4370_v24, %v4366_v17  ;;  %v4394_v52 = vshll.u32 %v4390_v47, 16  ;;  %v4377_v40 = vadd.s32 %v4375_v4, %v4369_v61  ;;  %vm4396_vm11 = vc.u32 %v4388_v42, %v4392_v21 }
 0x4c1   :  { %v4270_v8 = vshrl.u32 %v4252_v19, %v4268_v36  ;;  %v4273_v59 = vadd.s32 127, %v4272_v46  ;;  %v4397_v62 = vsel %vm4396_vm11, 1, %v9494_v49  ;;  %v4398_v28 = vadd.s32 %v4392_v21, %v4388_v42 }
 0x4c2   :  { %vm4378_vm12 = vc.u32 %v4376_v44, %v4372_v16  ;;  %v401_v41 = vmul.f32 %v369_v39, %v5727_v53  ;;  %v4399_v29 = vadd.s32 %v4397_v62, %v4391_v13  ;;  %v4371_v25 = vshrl.u32 %v4367_v63, 16 }
 0x4c3   :  { %v4271_v2 = vor.u32 %v4270_v8, %v4269_v55  ;;  %v4274_v9 = vshll.u32 %v4273_v59, 23  ;;  %v4379_v3 = vsel %vm4378_vm12, 1, %v9494_v49  ;;  %vm4400_vm13 = vc.u32 %v4398_v28, %v4394_v52 }
 0x4c4   :  { %v4381_v37 = vadd.s32 %v4379_v3, %v4377_v40  ;;  %v8962_v14 = vadd.f32 %v401_v41, %v5729_v57  ;;  %v4373_v51 = vshrl.u32 %v4368_v1, 16  ;;  %v4401_v45 = vsel %vm4400_vm13, 1, %v9494_v49 }
 0x4c5   :  { %v4275_v35 = vor.u32 4788187, %v4274_v9  ;;  %v370_v12 = vsel %vm42_vm0, %v9556_v15, %v328_v10  ;;  %v4393_v34 = vshrl.u32 %v4389_v54, 16  ;;  %v4403_v19 = vadd.s32 %v4401_v45, %v4399_v29 }
 0x4c6   :  { %v4382_v30 = vadd.s32 %v4381_v37, %v4371_v25  ;;  %v4623_v18 = vand.u32 2147483647, %v8962_v14  ;;  %v4278_v5 = vcvt.s32.f32 %v4271_v2  ;;  %v4351_v63 = vsel %vm4347_vm1, %v8906_v31, %v4350_v56 }
 0x4c7   :  { %v4276_v39 = vand.u32 2147483647, %v4275_v35  ;;  %v4626_v17 = vand.u32 2139095040, %v8962_v14  ;;  %v4395_v24 = vshrl.u32 %v4390_v47, 16  ;;  %v4404_v42 = vadd.s32 %v4403_v19, %v4393_v34 }
 0x4c8   :  { %v4383_v1 = vadd.s32 %v4382_v30, %v4373_v51  ;;  %v402_v33 = vmul.f32 %v370_v12, %v5727_v53  ;;  %vm4160_vm15 = vcmp.lt.s32.totalorder %v8739_v58, 0  ;;  %v4402_v54 = vadd.s32 %v4398_v28, %v4394_v52 }
 0x4c9   :  { %v4279_v61 = vmul.f32 %v4278_v5, %v4276_v39  ;;  %v4627_v13 = vshrl.u32 %v4626_v17, 23  ;;  %v4283_v21 = vsel %vm4160_vm15, %v4282_v20, %v8908_v48  ;;  %v4352_v36 = vsel %vm4346_vm3, %v4349_v11, %v4351_v63 }
 0x4ca   :  { %v4405_v46 = vadd.s32 %v4404_v42, %v4395_v24  ;;  %v4630_v31 = vand.u32 8388607, %v4623_v18  ;;  %vm4408_vm2 = vc.u32 %v4383_v1, %v4402_v54  ;;  %vm4159_vm14 = vcmp.le.f32.partialorder %v4158_v22, 0.7853982 }
 0x4cb   :  { %v4280_v56 = vxor.u32 2147483648, %v4279_v61  ;;  %v5518_v47 = vadd.s32 4294967169, %v4627_v13  ;;  %v8983_v55 = vadd.f32 %v402_v33, %v5729_v57  ;;  %v4285_v44 = vsel %vm4159_vm14, 0, %v4283_v21 }
 0x4cc   :  { %v4409_v16 = vadd.s32 1, %v4405_v46  ;;  %v4406_v48 = vmul.u32 %v8924_v38, %v4352_v36  ;;  %v4631_v52 = vor.u32 8388608, %v4630_v31  ;;  %v4302_v40 = vadd.s32 3, %v4285_v44 }
 0x4cd   :  { %v4281_v4 = vsel %vm4160_vm15, %v4280_v56, %v4279_v61  ;;  %v4633_v23 = vadd.s32 1, %v5518_v47  ;;  %v4778_v22 = vand.u32 2147483647, %v8983_v55  ;;  %v4781_v38 = vand.u32 2139095040, %v8983_v55 }
 0x4ce   :  { %v4284_v11 = vsel %vm4159_vm14, %v8739_v58, %v4281_v4  ;;  %v4410_v20 = vsel %vm4408_vm2, %v4409_v16, %v4405_v46  ;;  %v8988_v9 = vshll.u32 %v4631_v52, 8  ;;  %v8991_v37 = vand.u32 3, %v4302_v40 }
 0x4cf   :  { %v4286_v8 = vmul.f32 %v4284_v11, %v4284_v11  ;;  %v4411_v59 = vadd.s32 %v4410_v20, %v4406_v48  ;;  %vm4634_vm1 = vcmp.gt.s32.totalorder %v4633_v23, 0  ;;  %v8993_v35 = vadd.s32 %v4402_v54, %v4383_v1 }
 0x4d0   :  { %v4635_v62 = vsel %vm4634_vm1, %v4633_v23, 0  ;;  %v8997_v30 = vand.u32 8388607, %v4778_v22  ;;  %vm4315_vm7 = vcmp.lt.s32.totalorder %v8760_v6, 0  ;;  %v9003_v19 = vand.u32 65535, %v8988_v9 }
 0x4d1   :  { %v4287_v28 = vmul.f32 -0.001358992, %v4286_v8  ;;  %v4294_v41 = vmul.f32 -0.00019511016, %v4286_v8  ;;  %v4412_v10 = vadd.s32 536870912, %v4411_v59  ;;  %v4637_v2 = vand.u32 31, %v4635_v62 }
 0x4d2   :  { %v9000_v34 = vshrl.u32 %v4635_v62, 5  ;;  %v9006_v39 = vshrl.u32 %v8988_v9, 16  ;;  %v4782_v5 = vshrl.u32 %v4781_v38, 23  ;;  %vm4305_vm3 = vcmp.eq.s32.totalorder %v8991_v37, 0 }
 0x4d3   :  { %v4288_v3 = vadd.f32 0.041655596, %v4287_v28  ;;  %v4295_v29 = vadd.f32 0.008332121, %v4294_v41  ;;  %v4413_v25 = vshrl.u32 %v4412_v10, 30  ;;  %v4638_v51 = vsub.s32 32, %v4637_v2 }
 0x4d4   :  { %v4640_v24 = vshll.u32 %v9488_v26, %v4637_v2  ;;  %vm4308_vm4 = vcmp.eq.s32.totalorder %v8991_v37, 2  ;;  %v4643_v33 = vshll.u32 %v9489_v32, %v4637_v2  ;;  %vm4304_vm9 = vcmp.lt.s32.totalorder %v8991_v37, 2 }
 0x4d5   :  { %v4289_v45 = vmul.f32 %v4288_v3, %v4286_v8  ;;  %v4296_v15 = vmul.f32 %v4295_v29, %v4286_v8  ;;  %v4414_v12 = vshll.u32 %v4413_v25, 30  ;;  %v4641_v42 = vshrl.u32 %v9489_v32, %v4638_v51 }
 0x4d6   :  { %v4644_v61 = vshrl.u32 %v9491_v50, %v4638_v51  ;;  %v4647_v54 = vshrl.u32 %v9490_v60, %v4638_v51  ;;  %vm4301_vm5 = vweird.f32 %v8739_v58  ;;  %v4437_v46 = vsub.s32 4, %v4413_v25 }
 0x4d7   :  { %v4290_v63 = vadd.f32 -0.4999988, %v4289_v45  ;;  %v4297_v17 = vadd.f32 -0.16666654, %v4296_v15  ;;  %v9008_v1 = vsub.s32 %v4411_v59, %v4414_v12  ;;  %v4646_v31 = vshll.u32 %v9491_v50, %v4637_v2 }
 0x4d8   :  { %v4649_v56 = vshll.u32 %v9490_v60, %v4637_v2  ;;  %v4650_v47 = vshrl.u32 %v9492_v27, %v4638_v51  ;;  %v4653_v48 = vshrl.u32 %v9493_v0, %v4638_v51  ;;  %vm9028_vm10 = vcmp.le.f32.partialorder %v4313_v7, 0.7853982 }
 0x4d9   :  { %v4291_v13 = vmul.f32 %v4290_v63, %v4286_v8  ;;  %v4298_v21 = vmul.f32 %v4297_v17, %v4286_v8  ;;  %vm4416_vm8 = vcmp.lt.s32.totalorder %v9008_v1, 0  ;;  %v4417_v36 = vsub.s32 0, %v9008_v1 }
 0x4da   :  { %v4642_v52 = vor.u32 %v4641_v42, %v4640_v24  ;;  %v4645_v8 = vor.u32 %v4644_v61, %v4643_v33  ;;  %v4651_v59 = vor.u32 %v4650_v47, %v4649_v56  ;;  %v4648_v28 = vor.u32 %v4647_v54, %v4646_v31 }
 0x4db   :  { %v4292_v16 = vadd.f32 1.0, %v4291_v13  ;;  %v4299_v4 = vadd.f32 1.0, %v4298_v21  ;;  %v4418_v44 = vsel %vm4416_vm8, %v4417_v36, %v9008_v1  ;;  %v4652_v41 = vshll.u32 %v9492_v27, %v4637_v2 }
 0x4dc   :  { %v4419_v20 = vclz %v4418_v44  ;;  %v4639_v38 = vshrl.u32 %v9488_v26, %v4638_v51  ;;  %vm4655_vm11 = vcmp.lt.s32.totalorder %v9000_v34, 1  ;;  %v5521_v3 = vadd.s32 4294967169, %v4782_v5 }
 0x4dd   :  { %v4300_v40 = vmul.f32 %v4299_v4, %v4284_v11  ;;  %v4309_v62 = vxor.u32 2147483648, %v4292_v16  ;;  %v4438_v7 = vsel %vm4315_vm7, %v4437_v46, %v4413_v25  ;;  %v4654_v45 = vor.u32 %v4653_v48, %v4652_v41 }
 0x4de   :  { %v5513_v10 = vadd.s32 4294967294, %v4419_v20  ;;  %vm4658_vm12 = vcmp.lt.s32.totalorder %v9000_v34, 4  ;;  %vm4657_vm15 = vcmp.lt.s32.totalorder %v9000_v34, 3  ;;  %v4663_v11 = vsel %vm4655_vm11, %v4642_v52, %v4645_v8 }
 0x4df   :  { %v4306_v29 = vxor.u32 2147483648, %v4300_v40  ;;  %v4664_v2 = vsel %vm4658_vm12, %v4651_v59, 920167782  ;;  %v4310_v15 = vsel %vm4308_vm4, %v4309_v62, %v4300_v40  ;;  %vm4656_vm2 = vcmp.lt.s32.totalorder %v9000_v34, 2 }
 0x4e0   :  { %vm5514_vm13 = vcmp.lt.s32.totalorder %v5513_v10, 0  ;;  %v4665_v25 = vsel %vm4657_vm15, %v4648_v28, %v4664_v2  ;;  %v4667_v61 = vsel %vm4655_vm11, %v4645_v8, %v4648_v28  ;;  %v4668_v58 = vsel %vm4658_vm12, %v4654_v45, 1326507024 }
 0x4e1   :  { %v4307_v51 = vsel %vm4305_vm3, %v4292_v16, %v4306_v29  ;;  %v4422_v12 = vsel %vm5514_vm13, 0, %v5513_v10  ;;  %v4666_v33 = vsel %vm4656_vm2, %v4663_v11, %v4665_v25  ;;  %v4660_v21 = vsel %vm4658_vm12, %v4648_v28, 2102212464 }
 0x4e2   :  { %v4311_v5 = vsel %vm4304_vm9, %v4307_v51, %v4310_v15  ;;  %v4423_v63 = vsub.s32 32, %v4422_v12  ;;  %v4427_v17 = vsub.s32 4294967266, %v4422_v12  ;;  %v4424_v42 = vshll.u32 %v9008_v1, %v4422_v12 }
 0x4e3   :  { %v4312_v24 = vsel %vm4301_vm5, nan, %v4311_v5  ;;  %v4696_v13 = vand.u32 65535, %v4666_v33  ;;  %v4440_v1 = vsel %vm9028_vm10, 0, %v4438_v7  ;;  %v4669_v36 = vsel %vm4657_vm15, %v4651_v59, %v4668_v58 }
 0x4e4   :  { %5423 = vst.msk [vmem:[%s9457_s1 + $0xc0] sm:$0xff] %vm5398_vm6, %v4312_v24  ;;  %v4425_v37 = vshrl.u32 %v8993_v35, %v4423_v63  ;;  %v4428_v54 = vadd.s32 127, %v4427_v17  ;;  %v4697_v46 = vshrl.u32 %v4666_v33, 16  ;;  %v4670_v35 = vsel %vm4656_vm2, %v4667_v61, %v4669_v36 }
 0x4e5   :  { %v4788_v47 = vadd.s32 1, %v5521_v3  ;;  %v4674_v16 = vand.u32 65535, %v4670_v35  ;;  %v4675_v4 = vshrl.u32 %v4670_v35, 16  ;;  %v4700_v48 = vmul.u32 %v4696_v13, %v9006_v39 }
 0x4e6   :  { %v4426_v31 = vor.u32 %v4425_v37, %v4424_v42  ;;  %v4429_v56 = vshll.u32 %v4428_v54, 23  ;;  %v4699_v44 = vmul.u32 %v4697_v46, %v9003_v19  ;;  %v4457_v40 = vadd.s32 3, %v4440_v1 }
 0x4e7   :  { %v4659_v62 = vsel %vm4655_vm11, %v4639_v38, %v4642_v52  ;;  %v4661_v59 = vsel %vm4657_vm15, %v4645_v8, %v4660_v21  ;;  %v4677_v41 = vmul.u32 %v4675_v4, %v9003_v19  ;;  %v4678_v10 = vmul.u32 %v4674_v16, %v9006_v39 }
 0x4e8   :  { %v4430_v20 = vor.u32 4788187, %v4429_v56  ;;  %v4433_v28 = vcvt.s32.f32 %v4426_v31  ;;  %v4698_v3 = vmul.u32 %v4696_v13, %v9003_v19  ;;  %v4701_v7 = vmul.u32 %v4697_v46, %v9006_v39 }
 0x4e9   :  { %v4702_v45 = vshll.u32 %v4699_v44, 16  ;;  %vm4789_vm14 = vcmp.gt.s32.totalorder %v4788_v47, 0  ;;  %v4676_v11 = vmul.u32 %v4674_v16, %v9003_v19  ;;  %v4679_v2 = vmul.u32 %v4675_v4, %v9006_v39 }
 0x4ea   :  { %v4431_v29 = vand.u32 2147483647, %v4430_v20  ;;  %v4680_v52 = vshll.u32 %v4677_v41, 16  ;;  %v4704_v38 = vshll.u32 %v4700_v48, 16  ;;  %v4682_v8 = vshll.u32 %v4678_v10, 16 }
 0x4eb   :  { %vm4706_vm1 = vc.u32 %v4698_v3, %v4702_v45  ;;  %v4708_v15 = vadd.s32 %v4702_v45, %v4698_v3  ;;  %v4790_v5 = vsel %vm4789_vm14, %v4788_v47, 0  ;;  %v4662_v19 = vsel %vm4656_vm2, %v4659_v62, %v4661_v59 }
 0x4ec   :  { %v4434_v51 = vmul.f32 %v4433_v28, %v4431_v29  ;;  %vm4684_vm3 = vc.u32 %v4676_v11, %v4680_v52  ;;  %v4686_v12 = vadd.s32 %v4680_v52, %v4676_v11  ;;  %v4707_v25 = vsel %vm4706_vm1, 1, %v9494_v49 }
 0x4ed   :  { %v4685_v17 = vsel %vm4684_vm3, 1, %v9494_v49  ;;  %v4709_v24 = vadd.s32 %v4707_v25, %v4701_v7  ;;  %vm4710_vm4 = vc.u32 %v4708_v15, %v4704_v38  ;;  %v4703_v37 = vshrl.u32 %v4699_v44, 16 }
 0x4ee   :  { %v4435_v63 = vxor.u32 2147483648, %v4434_v51  ;;  %v4687_v39 = vadd.s32 %v4685_v17, %v4679_v2  ;;  %vm4688_vm9 = vc.u32 %v4686_v12, %v4682_v8  ;;  %v4711_v42 = vsel %vm4710_vm4, 1, %v9494_v49 }
 0x4ef   :  { %v4689_v61 = vsel %vm4688_vm9, 1, %v9494_v49  ;;  %v4713_v54 = vadd.s32 %v4711_v42, %v4709_v24  ;;  %v4681_v13 = vshrl.u32 %v4677_v41, 16  ;;  %v4792_v21 = vand.u32 31, %v4790_v5 }
 0x4f0   :  { %v4436_v33 = vsel %vm4315_vm7, %v4435_v63, %v4434_v51  ;;  %v4691_v1 = vadd.s32 %v4689_v61, %v4687_v39  ;;  %v4705_v36 = vshrl.u32 %v4700_v48, 16  ;;  %v4786_v31 = vor.u32 8388608, %v8997_v30 }
 0x4f1   :  { %v4439_v58 = vsel %vm9028_vm10, %v8760_v6, %v4436_v33  ;;  %v4714_v46 = vadd.s32 %v4713_v54, %v4703_v37  ;;  %v9098_v56 = vand.u32 3, %v4457_v40  ;;  %v4683_v35 = vshrl.u32 %v4678_v10, 16 }
 0x4f2   :  { %v4441_v34 = vmul.f32 %v4439_v58, %v4439_v58  ;;  %v4692_v47 = vadd.s32 %v4691_v1, %v4681_v13  ;;  %v9100_v16 = vsub.s32 32, %v4792_v21  ;;  %v4716_v23 = vmul.u32 %v8988_v9, %v4662_v19 }
 0x4f3   :  { %v4715_v20 = vadd.s32 %v4714_v46, %v4705_v36  ;;  %v9105_v59 = vadd.s32 %v4708_v15, %v4704_v38  ;;  %v9107_v28 = vshrl.u32 %v4790_v5, 5  ;;  %v4795_v10 = vshll.u32 %v9488_v26, %v4792_v21 }
 0x4f4   :  { %v4442_v4 = vmul.f32 -0.001358992, %v4441_v34  ;;  %v4449_v44 = vmul.f32 -0.00019511016, %v4441_v34  ;;  %v9103_v62 = vadd.s32 %v4692_v47, %v4683_v35  ;;  %v4796_v30 = vshrl.u32 %v9489_v32, %v9100_v16 }
 0x4f5   :  { %v4719_v41 = vadd.s32 1, %v4715_v20  ;;  %v4798_v3 = vshll.u32 %v9489_v32, %v4792_v21  ;;  %v4799_v9 = vshrl.u32 %v9491_v50, %v9100_v16  ;;  %v4802_v29 = vshrl.u32 %v9490_v60, %v9100_v16 }
 0x4f6   :  { %v4443_v48 = vadd.f32 0.041655596, %v4442_v4  ;;  %v4450_v40 = vadd.f32 0.008332121, %v4449_v44  ;;  %vm4718_vm7 = vc.u32 %v9103_v62, %v9105_v59  ;;  %v4801_v2 = vshll.u32 %v9491_v50, %v4792_v21 }
 0x4f7   :  { %v4720_v11 = vsel %vm4718_vm7, %v4719_v41, %v4715_v20  ;;  %v9120_v38 = vor.u32 %v4796_v30, %v4795_v10  ;;  %v4804_v51 = vshll.u32 %v9490_v60, %v4792_v21  ;;  %v4805_v8 = vshrl.u32 %v9492_v27, %v9100_v16 }
 0x4f8   :  { %v4444_v7 = vmul.f32 %v4443_v48, %v4441_v34  ;;  %v4451_v45 = vmul.f32 %v4450_v40, %v4441_v34  ;;  %v4721_v52 = vadd.s32 %v4720_v11, %v4716_v23  ;;  %v4807_v25 = vshll.u32 %v9492_v27, %v4792_v21 }
 0x4f9   :  { %v4808_v5 = vshrl.u32 %v9493_v0, %v9100_v16  ;;  %v9128_v17 = vor.u32 %v4799_v9, %v4798_v3  ;;  %v9130_v24 = vor.u32 %v4802_v29, %v4801_v2  ;;  %v4806_v19 = vor.u32 %v4805_v8, %v4804_v51 }
 0x4fa   :  { %v4445_v15 = vadd.f32 -0.4999988, %v4444_v7  ;;  %v4452_v12 = vadd.f32 -0.16666654, %v4451_v45  ;;  %v4722_v63 = vadd.s32 536870912, %v4721_v52  ;;  %vm4813_vm8 = vcmp.lt.s32.totalorder %v9107_v28, 4 }
 0x4fb   :  { %v4809_v33 = vor.u32 %v4808_v5, %v4807_v25  ;;  %vm4456_vm5 = vweird.f32 %v8760_v6  ;;  %v4819_v37 = vsel %vm4813_vm8, %v4806_v19, 920167782  ;;  %v9138_v54 = vshll.u32 %v4786_v31, 8 }
 0x4fc   :  { %v4446_v39 = vmul.f32 %v4445_v15, %v4441_v34  ;;  %v4453_v42 = vmul.f32 %v4452_v12, %v4441_v34  ;;  %v9134_v61 = vshrl.u32 %v4722_v63, 30  ;;  %vm4810_vm10 = vcmp.lt.s32.totalorder %v9107_v28, 1 }
 0x4fd   :  { %vm4812_vm11 = vcmp.lt.s32.totalorder %v9107_v28, 3  ;;  %v4818_v34 = vsel %vm4810_vm10, %v9120_v38, %v9128_v17  ;;  %v4822_v46 = vsel %vm4810_vm10, %v9128_v17, %v9130_v24  ;;  %vm4459_vm12 = vcmp.lt.s32.totalorder %v9098_v56, 2 }
 0x4fe   :  { %v4447_v13 = vadd.f32 1.0, %v4446_v39  ;;  %v4454_v1 = vadd.f32 1.0, %v4453_v42  ;;  %v4724_v21 = vshll.u32 %v9134_v61, 30  ;;  %v4820_v36 = vsel %vm4812_vm11, %v9130_v24, %v4819_v37 }
 0x4ff   :  { %v4823_v47 = vsel %vm4813_vm8, %v4809_v33, 1326507024  ;;  %vm4460_vm13 = vcmp.eq.s32.totalorder %v9098_v56, 0  ;;  %vm4811_vm15 = vcmp.lt.s32.totalorder %v9107_v28, 2  ;;  %vm4463_vm2 = vcmp.eq.s32.totalorder %v9098_v56, 2 }
 0x500   :  { %v4455_v31 = vmul.f32 %v4454_v1, %v4439_v58  ;;  %v4464_v35 = vxor.u32 2147483648, %v4447_v13  ;;  %v4725_v4 = vsub.s32 %v4721_v52, %v4724_v21  ;;  %v4824_v44 = vsel %vm4812_vm11, %v4806_v19, %v4823_v47 }
 0x501   :  { %v4821_v58 = vsel %vm4811_vm15, %v4818_v34, %v4820_v36  ;;  %v4825_v23 = vsel %vm4811_vm15, %v4822_v46, %v4824_v44  ;;  %v4827_v48 = vand.u32 65535, %v9138_v54  ;;  %v4828_v3 = vshrl.u32 %v9138_v54, 16 }
 0x502   :  { %v4461_v20 = vxor.u32 2147483648, %v4455_v31  ;;  %vm4726_vm14 = vcmp.lt.s32.totalorder %v4725_v4, 0  ;;  %v4727_v30 = vsub.s32 0, %v4725_v4  ;;  %v4829_v40 = vand.u32 65535, %v4825_v23 }
 0x503   :  { %v4465_v10 = vsel %vm4463_vm2, %v4464_v35, %v4455_v31  ;;  %v4830_v9 = vshrl.u32 %v4825_v23, 16  ;;  %v4851_v45 = vand.u32 65535, %v4821_v58  ;;  %v4852_v11 = vshrl.u32 %v4821_v58, 16 }
 0x504   :  { %v4462_v41 = vsel %vm4460_vm13, %v4447_v13, %v4461_v20  ;;  %v4728_v7 = vsel %vm4726_vm14, %v4727_v30, %v4725_v4  ;;  %v4833_v8 = vmul.u32 %v4829_v40, %v4828_v3  ;;  %v4794_v12 = vshrl.u32 %v9488_v26, %v9100_v16 }
 0x505   :  { %v4466_v29 = vsel %vm4459_vm12, %v4462_v41, %v4465_v10  ;;  %v4729_v52 = vclz %v4728_v7  ;;  %v4832_v51 = vmul.u32 %v4830_v9, %v4827_v48  ;;  %v4831_v56 = vmul.u32 %v4829_v40, %v4827_v48  ;;  %v9559_v10 = vld [vmem:[#allocation14_spill] sm:$0xff] }
 0x506   :  { %v4467_v2 = vsel %vm4456_vm5, nan, %v4466_v29  ;;  %v4717_v5 = vadd.s32 %v9105_v59, %v9103_v62  ;;  %v4834_v63 = vmul.u32 %v4830_v9, %v4828_v3  ;;  %v4837_v6 = vshll.u32 %v4833_v8, 16  ;;  %v336_v59 = vpop.permute.xlu0 %335 }
 0x507   :  { %5424 = vst.msk [vmem:[%s9457_s1 + $0xc8] sm:$0xff] %vm5398_vm6, %v4467_v2  ;;  %v5519_v15 = vadd.s32 4294967294, %v4729_v52  ;;  %v4835_v25 = vshll.u32 %v4832_v51, 16  ;;  %v4854_v19 = vmul.u32 %v4852_v11, %v4827_v48  ;;  %v4853_v42 = vmul.u32 %v4851_v45, %v4827_v48  ;;  %v340_v48 = vpop.permute.xlu1 %339  ;;  %v9560_v52 = vld [vmem:[#allocation9_spill] sm:$0xff] }
 0x508   :  { %v4855_v13 = vmul.u32 %v4851_v45, %v4828_v3  ;;  %v4836_v16 = vshrl.u32 %v4832_v51, 16  ;;  %vm4625_vm4 = vcmp.lt.s32.totalorder %v8962_v14, 0  ;;  %v4856_v62 = vmul.u32 %v4852_v11, %v4828_v3 }
 0x509   :  { %vm5520_vm1 = vcmp.lt.s32.totalorder %v5519_v15, 0  ;;  %vm4839_vm3 = vc.u32 %v4831_v56, %v4835_v25  ;;  %v4841_v39 = vadd.s32 %v4835_v25, %v4831_v56  ;;  %v4857_v1 = vshll.u32 %v4854_v19, 16 }
 0x50a   :  { %v4732_v33 = vsel %vm5520_vm1, 0, %v5519_v15  ;;  %v4840_v37 = vsel %vm4839_vm3, 1, %v9494_v49  ;;  %v4859_v58 = vshll.u32 %v4855_v13, 16  ;;  %v372_v3 = vsel %vm42_vm0, %v9559_v10, %v336_v59 }
 0x50b   :  { %v4733_v21 = vsub.s32 32, %v4732_v33  ;;  %v4737_v34 = vsub.s32 4294967266, %v4732_v33  ;;  %v4842_v36 = vadd.s32 %v4840_v37, %v4834_v63  ;;  %v4734_v46 = vshll.u32 %v4725_v4, %v4732_v33 }
 0x50c   :  { %vm4843_vm9 = vc.u32 %v4841_v39, %v4837_v6  ;;  %vm4861_vm7 = vc.u32 %v4853_v42, %v4857_v1  ;;  %v4863_v23 = vadd.s32 %v4857_v1, %v4853_v42  ;;  %v4815_v4 = vsel %vm4813_vm8, %v9130_v24, 2102212464 }
 0x50d   :  { %v4735_v31 = vshrl.u32 %v4717_v5, %v4733_v21  ;;  %v4738_v35 = vadd.s32 127, %v4737_v34  ;;  %v4844_v47 = vsel %vm4843_vm9, 1, %v9494_v49  ;;  %v4862_v44 = vsel %vm4861_vm7, 1, %v9494_v49 }
 0x50e   :  { %v4846_v20 = vadd.s32 %v4844_v47, %v4842_v36  ;;  %v4864_v30 = vadd.s32 %v4862_v44, %v4856_v62  ;;  %v4747_v9 = vsub.s32 4, %v9134_v61  ;;  %vm4865_vm5 = vc.u32 %v4863_v23, %v4859_v58 }
 0x50f   :  { %v4736_v40 = vor.u32 %v4735_v31, %v4734_v46  ;;  %v4739_v41 = vshll.u32 %v4738_v35, 23  ;;  %v404_v7 = vmul.f32 %v372_v3, %v5727_v53  ;;  %v4838_v11 = vshrl.u32 %v4833_v8, 16 }
 0x510   :  { %v4847_v29 = vadd.s32 %v4846_v20, %v4836_v16  ;;  %v4866_v2 = vsel %vm4865_vm5, 1, %v9494_v49  ;;  %v373_v51 = vsel %vm42_vm0, %v9560_v52, %v340_v48  ;;  %v4814_v24 = vsel %vm4810_vm10, %v4794_v12, %v9120_v38 }
 0x511   :  { %v4740_v45 = vor.u32 4788187, %v4739_v41  ;;  %v4858_v15 = vshrl.u32 %v4854_v19, 16  ;;  %v4868_v56 = vadd.s32 %v4866_v2, %v4864_v30  ;;  %v9200_v25 = vadd.f32 %v404_v7, %v5729_v57 }
 0x512   :  { %v4743_v63 = vcvt.s32.f32 %v4736_v40  ;;  %v4816_v8 = vsel %vm4812_vm11, %v9128_v17, %v4815_v4  ;;  %v4848_v6 = vadd.s32 %v4847_v29, %v4838_v11  ;;  %v4860_v39 = vshrl.u32 %v4855_v13, 16 }
 0x513   :  { %v4741_v5 = vand.u32 2147483647, %v4740_v45  ;;  %v4869_v42 = vadd.s32 %v4868_v56, %v4858_v15  ;;  %v5088_v43 = vand.u32 2147483647, %v9200_v25  ;;  %v405_v33 = vmul.f32 %v373_v51, %v5727_v53 }
 0x514   :  { %v4748_v38 = vsel %vm4625_vm4, %v4747_v9, %v9134_v61  ;;  %v4867_v12 = vadd.s32 %v4863_v23, %v4859_v58  ;;  %v5091_v19 = vand.u32 2139095040, %v9200_v25  ;;  %v4817_v1 = vsel %vm4811_vm15, %v4814_v24, %v4816_v8 }
 0x515   :  { %v4744_v37 = vmul.f32 %v4743_v63, %v4741_v5  ;;  %v4870_v21 = vadd.s32 %v4869_v42, %v4860_v39  ;;  %vm4624_vm0 = vcmp.le.f32.partialorder %v4623_v18, 0.7853982  ;;  %v5095_v16 = vand.u32 8388607, %v5088_v43 }
 0x516   :  { %vm4873_vm8 = vc.u32 %v4848_v6, %v4867_v12  ;;  %v5092_v13 = vshrl.u32 %v5091_v19, 23  ;;  %v4750_v34 = vsel %vm4624_vm0, 0, %v4748_v38  ;;  %v9218_v61 = vadd.f32 %v405_v33, %v5729_v57 }
 0x517   :  { %v4745_v17 = vxor.u32 2147483648, %v4744_v37  ;;  %v4874_v53 = vadd.s32 1, %v4870_v21  ;;  %v4871_v28 = vmul.u32 %v9138_v54, %v4817_v1  ;;  %v4767_v31 = vadd.s32 3, %v4750_v34 }
 0x518   :  { %v5527_v46 = vadd.s32 4294967169, %v5092_v13  ;;  %v5096_v44 = vor.u32 8388608, %v5095_v16  ;;  %v5246_v20 = vand.u32 2139095040, %v9218_v61  ;;  %v5243_v3 = vand.u32 2147483647, %v9218_v61 }
 0x519   :  { %v4746_v36 = vsel %vm4625_vm4, %v4745_v17, %v4744_v37  ;;  %v4875_v18 = vsel %vm4873_vm8, %v4874_v53, %v4870_v21  ;;  %v9225_v41 = vand.u32 3, %v4767_v31  ;;  %vm9232_vm11 = vcmp.le.f32.partialorder %v4778_v22, 0.7853982 }
 0x51a   :  { %v4749_v62 = vsel %vm4624_vm0, %v8962_v14, %v4746_v36  ;;  %v4876_v35 = vadd.s32 %v4875_v18, %v4871_v28  ;;  %v5098_v47 = vadd.s32 1, %v5527_v46  ;;  %v9227_v10 = vshll.u32 %v5096_v44, 8 }
 0x51b   :  { %v4751_v59 = vmul.f32 %v4749_v62, %v4749_v62  ;;  %v5247_v9 = vshrl.u32 %v5246_v20, 23  ;;  %vm4780_vm12 = vcmp.lt.s32.totalorder %v8983_v55, 0  ;;  %vm4773_vm13 = vcmp.eq.s32.totalorder %v9225_v41, 2 }
 0x51c   :  { %v4877_v57 = vadd.s32 536870912, %v4876_v35  ;;  %vm5099_vm10 = vcmp.gt.s32.totalorder %v5098_v47, 0  ;;  %v4872_v15 = vadd.s32 %v4867_v12, %v4848_v6  ;;  %vm4770_vm15 = vcmp.eq.s32.totalorder %v9225_v41, 0 }
 0x51d   :  { %v4752_v58 = vmul.f32 -0.001358992, %v4751_v59  ;;  %v4759_v23 = vmul.f32 -0.00019511016, %v4751_v59  ;;  %v5100_v30 = vsel %vm5099_vm10, %v5098_v47, 0  ;;  %v9242_v5 = vand.u32 65535, %v9227_v10 }
 0x51e   :  { %v4878_v54 = vshrl.u32 %v4877_v57, 30  ;;  %v5102_v4 = vand.u32 31, %v5100_v30  ;;  %v9245_v22 = vshrl.u32 %v9227_v10, 16  ;;  %v9247_v63 = vadd.s32 4294967169, %v5247_v9 }
 0x51f   :  { %v4753_v48 = vadd.f32 0.041655596, %v4752_v58  ;;  %v4760_v40 = vadd.f32 0.008332121, %v4759_v23  ;;  %v9251_v8 = vand.u32 8388607, %v5243_v3  ;;  %vm4766_vm1 = vweird.f32 %v8962_v14 }
 0x520   :  { %v4879_v45 = vshll.u32 %v4878_v54, 30  ;;  %v4902_v2 = vsub.s32 4, %v4878_v54  ;;  %v9237_v52 = vsub.s32 32, %v5102_v4  ;;  %vm4769_vm2 = vcmp.lt.s32.totalorder %v9225_v41, 2 }
 0x521   :  { %v4754_v29 = vmul.f32 %v4753_v48, %v4751_v59  ;;  %v4761_v7 = vmul.f32 %v4760_v40, %v4751_v59  ;;  %v9257_v37 = vshrl.u32 %v5100_v30, 5  ;;  %v5105_v38 = vshll.u32 %v9488_v26, %v5102_v4 }
 0x522   :  { %v4880_v56 = vsub.s32 %v4876_v35, %v4879_v45  ;;  %v4903_v33 = vsel %vm4780_vm12, %v4902_v2, %v4878_v54  ;;  %v5106_v12 = vshrl.u32 %v9489_v32, %v9237_v52  ;;  %v5109_v17 = vshrl.u32 %v9491_v50, %v9237_v52 }
 0x523   :  { %v4755_v51 = vadd.f32 -0.4999988, %v4754_v29  ;;  %v4762_v24 = vadd.f32 -0.16666654, %v4761_v7  ;;  %v5108_v34 = vshll.u32 %v9489_v32, %v5102_v4  ;;  %v5112_v53 = vshrl.u32 %v9490_v60, %v9237_v52 }
 0x524   :  { %vm4881_vm14 = vcmp.lt.s32.totalorder %v4880_v56, 0  ;;  %v4882_v6 = vsub.s32 0, %v4880_v56  ;;  %v5115_v16 = vshrl.u32 %v9492_v27, %v9237_v52  ;;  %v5114_v46 = vshll.u32 %v9490_v60, %v5102_v4 }
 0x525   :  { %v4756_v39 = vmul.f32 %v4755_v51, %v4751_v59  ;;  %v4763_v42 = vmul.f32 %v4762_v24, %v4751_v59  ;;  %v5118_v18 = vshrl.u32 %v9493_v0, %v9237_v52  ;;  %v4905_v31 = vsel %vm9232_vm11, 0, %v4903_v33 }
 0x526   :  { %v4883_v21 = vsel %vm4881_vm14, %v4882_v6, %v4880_v56  ;;  %v5111_v35 = vshll.u32 %v9491_v50, %v5102_v4  ;;  %v5117_v47 = vshll.u32 %v9492_v27, %v5102_v4  ;;  %v5107_v20 = vor.u32 %v5106_v12, %v5105_v38 }
 0x527   :  { %v4757_v19 = vadd.f32 1.0, %v4756_v39  ;;  %v4764_v1 = vadd.f32 1.0, %v4763_v42  ;;  %v4884_v13 = vclz %v4883_v21  ;;  %v5110_v58 = vor.u32 %v5109_v17, %v5108_v34 }
 0x528   :  { %v5116_v23 = vor.u32 %v5115_v16, %v5114_v46  ;;  %v5113_v57 = vor.u32 %v5112_v53, %v5111_v35  ;;  %v5119_v30 = vor.u32 %v5118_v18, %v5117_v47  ;;  %vm5120_vm4 = vcmp.lt.s32.totalorder %v9257_v37, 1 }
 0x529   :  { %v4765_v36 = vmul.f32 %v4764_v1, %v4749_v62  ;;  %v4774_v28 = vxor.u32 2147483648, %v4757_v19  ;;  %v5522_v59 = vadd.s32 4294967294, %v4884_v13  ;;  %vm5121_vm9 = vcmp.lt.s32.totalorder %v9257_v37, 2 }
 0x52a   :  { %vm5123_vm7 = vcmp.lt.s32.totalorder %v9257_v37, 4  ;;  %vm5122_vm5 = vcmp.lt.s32.totalorder %v9257_v37, 3  ;;  %v5128_v7 = vsel %vm5120_vm4, %v5107_v20, %v5110_v58  ;;  %v5132_v42 = vsel %vm5120_vm4, %v5110_v58, %v5113_v57 }
 0x52b   :  { %v4771_v44 = vxor.u32 2147483648, %v4765_v36  ;;  %v4775_v62 = vsel %vm4773_vm13, %v4774_v28, %v4765_v36  ;;  %vm5523_vm3 = vcmp.lt.s32.totalorder %v5522_v59, 0  ;;  %v5129_v45 = vsel %vm5123_vm7, %v5116_v23, 920167782 }
 0x52c   :  { %v4887_v40 = vsel %vm5523_vm3, 0, %v5522_v59  ;;  %v5130_v24 = vsel %vm5122_vm5, %v5113_v57, %v5129_v45  ;;  %v5125_v39 = vsel %vm5123_vm7, %v5113_v57, 2102212464  ;;  %v5133_v6 = vsel %vm5123_vm7, %v5119_v30, 1326507024 }
 0x52d   :  { %v4772_v48 = vsel %vm4770_vm15, %v4757_v19, %v4771_v44  ;;  %v4888_v4 = vsub.s32 32, %v4887_v40  ;;  %v4892_v9 = vsub.s32 4294967266, %v4887_v40  ;;  %v4889_v41 = vshll.u32 %v4880_v56, %v4887_v40 }
 0x52e   :  { %v4776_v54 = vsel %vm4769_vm2, %v4772_v48, %v4775_v62  ;;  %v5131_v14 = vsel %vm5121_vm9, %v5128_v7, %v5130_v24  ;;  %v5134_v12 = vsel %vm5122_vm5, %v5116_v23, %v5133_v6  ;;  %v5253_v21 = vadd.s32 1, %v9247_v63 }
 0x52f   :  { %v4777_v29 = vsel %vm4766_vm1, nan, %v4776_v54  ;;  %v4890_v2 = vshrl.u32 %v4872_v15, %v4888_v4  ;;  %v4893_v51 = vadd.s32 127, %v4892_v9  ;;  %v5161_v19 = vand.u32 65535, %v5131_v14 }
 0x530   :  { %5426 = vst.msk [vmem:[%s9457_s1 + $0xd8] sm:$0xff] %vm5398_vm6, %v4777_v29  ;;  %v5104_v15 = vshrl.u32 %v9488_v26, %v9237_v52  ;;  %v5135_v56 = vsel %vm5121_vm9, %v5132_v42, %v5134_v12  ;;  %v5162_v1 = vshrl.u32 %v5131_v14, 16  ;;  %v4922_v13 = vadd.s32 3, %v4905_v31 }
 0x531   :  { %v4891_v33 = vor.u32 %v4890_v2, %v4889_v41  ;;  %v4894_v38 = vshll.u32 %v4893_v51, 23  ;;  %v5139_v34 = vand.u32 65535, %v5135_v56  ;;  %v5140_v53 = vshrl.u32 %v5135_v56, 16 }
 0x532   :  { %v5124_v16 = vsel %vm5120_vm4, %v5104_v15, %v5107_v20  ;;  %v5126_v36 = vsel %vm5122_vm5, %v5110_v58, %v5125_v39  ;;  %v5164_v28 = vmul.u32 %v5162_v1, %v9242_v5  ;;  %v5165_v52 = vmul.u32 %v5161_v19, %v9245_v22 }
 0x533   :  { %v4895_v17 = vor.u32 4788187, %v4894_v38  ;;  %v4898_v18 = vcvt.s32.f32 %v4891_v33  ;;  %v5142_v59 = vmul.u32 %v5140_v53, %v9242_v5  ;;  %v5143_v63 = vmul.u32 %v5139_v34, %v9245_v22 }
 0x534   :  { %v5163_v31 = vmul.u32 %v5161_v19, %v9242_v5  ;;  %v5166_v35 = vmul.u32 %v5162_v1, %v9245_v22  ;;  %v5167_v47 = vshll.u32 %v5164_v28, 16  ;;  %vm5254_vm0 = vcmp.gt.s32.totalorder %v5253_v21, 0 }
 0x535   :  { %v4896_v46 = vand.u32 2147483647, %v4895_v17  ;;  %v5141_v20 = vmul.u32 %v5139_v34, %v9242_v5  ;;  %v5144_v58 = vmul.u32 %v5140_v53, %v9245_v22  ;;  %v5145_v23 = vshll.u32 %v5142_v59, 16 }
 0x536   :  { %v5147_v62 = vshll.u32 %v5143_v63, 16  ;;  %v5169_v57 = vshll.u32 %v5165_v52, 16  ;;  %vm5171_vm8 = vc.u32 %v5163_v31, %v5167_v47  ;;  %v5173_v30 = vadd.s32 %v5167_v47, %v5163_v31 }
 0x537   :  { %v4899_v44 = vmul.f32 %v4898_v18, %v4896_v46  ;;  %vm5149_vm10 = vc.u32 %v5141_v20, %v5145_v23  ;;  %v5151_v40 = vadd.s32 %v5145_v23, %v5141_v20  ;;  %v5172_v54 = vsel %vm5171_vm8, 1, %v9494_v49 }
 0x538   :  { %v5150_v4 = vsel %vm5149_vm10, 1, %v9494_v49  ;;  %v5168_v9 = vshrl.u32 %v5164_v28, 16  ;;  %v5174_v29 = vadd.s32 %v5172_v54, %v5166_v35  ;;  %vm5175_vm13 = vc.u32 %v5173_v30, %v5169_v57 }
 0x539   :  { %v4900_v48 = vxor.u32 2147483648, %v4899_v44  ;;  %v5152_v7 = vadd.s32 %v5150_v4, %v5144_v58  ;;  %vm5153_vm15 = vc.u32 %v5151_v40, %v5147_v62  ;;  %v5176_v22 = vsel %vm5175_vm13, 1, %v9494_v49 }
 0x53a   :  { %v5154_v41 = vsel %vm5153_vm15, 1, %v9494_v49  ;;  %v5178_v2 = vadd.s32 %v5176_v22, %v5174_v29  ;;  %v5255_v51 = vsel %vm5254_vm0, %v5253_v21, 0  ;;  %v5146_v39 = vshrl.u32 %v5142_v59, 16 }
 0x53b   :  { %v4901_v5 = vsel %vm4780_vm12, %v4900_v48, %v4899_v44  ;;  %v5156_v14 = vadd.s32 %v5154_v41, %v5152_v7  ;;  %v5257_v42 = vand.u32 31, %v5255_v51  ;;  %v5127_v6 = vsel %vm5121_vm9, %v5124_v16, %v5126_v36 }
 0x53c   :  { %v4904_v45 = vsel %vm9232_vm11, %v8983_v55, %v4901_v5  ;;  %v5148_v33 = vshrl.u32 %v5143_v63, 16  ;;  %v5170_v38 = vshrl.u32 %v5165_v52, 16  ;;  %v5179_v12 = vadd.s32 %v5178_v2, %v5168_v9 }
 0x53d   :  { %v4906_v24 = vmul.f32 %v4904_v45, %v4904_v45  ;;  %v5157_v56 = vadd.s32 %v5156_v14, %v5146_v39  ;;  %v9331_v11 = vsub.s32 32, %v5257_v42  ;;  %v9333_v1 = vand.u32 3, %v4922_v13 }
 0x53e   :  { %v5180_v17 = vadd.s32 %v5179_v12, %v5170_v38  ;;  %v5251_v21 = vor.u32 8388608, %v9251_v8  ;;  %v9338_v46 = vadd.s32 %v5173_v30, %v5169_v57  ;;  %v5181_v37 = vmul.u32 %v9227_v10, %v5127_v6 }
 0x53f   :  { %v4907_v19 = vmul.f32 -0.001358992, %v4906_v24  ;;  %v4914_v15 = vmul.f32 -0.00019511016, %v4906_v24  ;;  %v9336_v28 = vadd.s32 %v5157_v56, %v5148_v33  ;;  %v9341_v36 = vshrl.u32 %v5255_v51, 5 }
 0x540   :  { %v5184_v16 = vadd.s32 1, %v5180_v17  ;;  %v5260_v52 = vshll.u32 %v9488_v26, %v5257_v42  ;;  %v5261_v8 = vshrl.u32 %v9489_v32, %v9331_v11  ;;  %v5263_v63 = vshll.u32 %v9489_v32, %v5257_v42 }
 0x541   :  { %v4908_v34 = vadd.f32 0.041655596, %v4907_v19  ;;  %v4915_v53 = vadd.f32 0.008332121, %v4914_v15  ;;  %vm5183_vm11 = vc.u32 %v9336_v28, %v9338_v46  ;;  %v5264_v31 = vshrl.u32 %v9491_v50, %v9331_v11 }
 0x542   :  { %v5185_v13 = vsel %vm5183_vm11, %v5184_v16, %v5180_v17  ;;  %v5267_v10 = vshrl.u32 %v9490_v60, %v9331_v11  ;;  %v5266_v20 = vshll.u32 %v9491_v50, %v5257_v42  ;;  %v5269_v58 = vshll.u32 %v9490_v60, %v5257_v42 }
 0x543   :  { %v4909_v18 = vmul.f32 %v4908_v34, %v4906_v24  ;;  %v4916_v59 = vmul.f32 %v4915_v53, %v4906_v24  ;;  %v5186_v44 = vadd.s32 %v5185_v13, %v5181_v37  ;;  %v5270_v23 = vshrl.u32 %v9492_v27, %v9331_v11 }
 0x544   :  { %v5272_v62 = vshll.u32 %v9492_v27, %v5257_v42  ;;  %v5273_v32 = vshrl.u32 %v9493_v0, %v9331_v11  ;;  %v9360_v40 = vor.u32 %v5261_v8, %v5260_v52  ;;  %v9362_v54 = vor.u32 %v5264_v31, %v5263_v63 }
 0x545   :  { %v4910_v35 = vadd.f32 -0.4999988, %v4909_v18  ;;  %v4917_v47 = vadd.f32 -0.16666654, %v4916_v59  ;;  %v5187_v48 = vadd.s32 536870912, %v5186_v44  ;;  %v9364_v4 = vor.u32 %v5267_v10, %v5266_v20 }
 0x546   :  { %v5271_v50 = vor.u32 %v5270_v23, %v5269_v58  ;;  %v5274_v9 = vor.u32 %v5273_v32, %v5272_v62  ;;  %vm5278_vm12 = vcmp.lt.s32.totalorder %v9341_v36, 4  ;;  %vm4924_vm2 = vcmp.lt.s32.totalorder %v9333_v1, 2 }
 0x547   :  { %v4911_v57 = vmul.f32 %v4910_v35, %v4906_v24  ;;  %v4918_v30 = vmul.f32 %v4917_v47, %v4906_v24  ;;  %v9366_v5 = vshrl.u32 %v5187_v48, 30  ;;  %vm5275_vm14 = vcmp.lt.s32.totalorder %v9341_v36, 1 }
 0x548   :  { %v5284_v0 = vsel %vm5278_vm12, %v5271_v50, 920167782  ;;  %vm5277_vm1 = vcmp.lt.s32.totalorder %v9341_v36, 3  ;;  %vm4928_vm3 = vcmp.eq.s32.totalorder %v9333_v1, 2  ;;  %v5283_v41 = vsel %vm5275_vm14, %v9360_v40, %v9362_v54 }
 0x549   :  { %v4912_v60 = vadd.f32 1.0, %v4911_v57  ;;  %v4919_v29 = vadd.f32 1.0, %v4918_v30  ;;  %v5189_v22 = vshll.u32 %v9366_v5, 30  ;;  %v5285_v2 = vsel %vm5277_vm1, %v9364_v4, %v5284_v0 }
 0x54a   :  { %v5288_v51 = vsel %vm5278_vm12, %v5274_v9, 1326507024  ;;  %v5287_v39 = vsel %vm5275_vm14, %v9362_v54, %v9364_v4  ;;  %v9389_v14 = vshll.u32 %v5251_v21, 8  ;;  %vm4925_vm4 = vcmp.eq.s32.totalorder %v9333_v1, 0 }
 0x54b   :  { %v4920_v27 = vmul.f32 %v4919_v29, %v4904_v45  ;;  %v4929_v7 = vxor.u32 2147483648, %v4912_v60  ;;  %v5190_v24 = vsub.s32 %v5186_v44, %v5189_v22  ;;  %vm5276_vm9 = vcmp.lt.s32.totalorder %v9341_v36, 2 }
 0x54c   :  { %v5289_v6 = vsel %vm5277_vm1, %v5271_v50, %v5288_v51  ;;  %v5286_v12 = vsel %vm5276_vm9, %v5283_v41, %v5285_v2  ;;  %vm4921_vm5 = vweird.f32 %v8983_v55  ;;  %v5292_v21 = vand.u32 65535, %v9389_v14 }
 0x54d   :  { %v4926_v45 = vxor.u32 2147483648, %v4920_v27  ;;  %v4930_v42 = vsel %vm4928_vm3, %v4929_v7, %v4920_v27  ;;  %vm5191_vm7 = vcmp.lt.s32.totalorder %v5190_v24, 0  ;;  %v5192_v38 = vsub.s32 0, %v5190_v24 }
 0x54e   :  { %v5290_v15 = vsel %vm5276_vm9, %v5287_v39, %v5289_v6  ;;  %v5316_v16 = vand.u32 65535, %v5286_v12  ;;  %v5317_v55 = vshrl.u32 %v5286_v12, 16  ;;  %v5293_v1 = vshrl.u32 %v9389_v14, 16 }
 0x54f   :  { %v4927_v33 = vsel %vm4925_vm4, %v4912_v60, %v4926_v45  ;;  %v5193_v17 = vsel %vm5191_vm7, %v5192_v38, %v5190_v24  ;;  %v5294_v34 = vand.u32 65535, %v5290_v15  ;;  %v5295_v37 = vshrl.u32 %v5290_v15, 16 }
 0x550   :  { %v4931_v19 = vsel %vm4924_vm2, %v4927_v33, %v4930_v42  ;;  %v5194_v53 = vclz %v5193_v17  ;;  %v5182_v59 = vadd.s32 %v9338_v46, %v9336_v28  ;;  %v5319_v13 = vmul.u32 %v5317_v55, %v5292_v21 }
 0x551   :  { %v4932_v56 = vsel %vm4921_vm5, nan, %v4931_v19  ;;  %v5297_v18 = vmul.u32 %v5295_v37, %v5292_v21  ;;  %v5298_v8 = vmul.u32 %v5294_v34, %v5293_v1  ;;  %v5296_v63 = vmul.u32 %v5294_v34, %v5292_v21 }
 0x552   :  { %5427 = vst.msk [vmem:[%s9457_s1 + $0xe0] sm:$0xff] %vm5398_vm6, %v4932_v56  ;;  %v5528_v52 = vadd.s32 4294967294, %v5194_v53  ;;  %v5318_v10 = vmul.u32 %v5316_v16, %v5292_v21  ;;  %v5299_v47 = vmul.u32 %v5295_v37, %v5293_v1  ;;  %v5320_v44 = vmul.u32 %v5316_v16, %v5293_v1 }
 0x553   :  { %v5300_v31 = vshll.u32 %v5297_v18, 16  ;;  %v5322_v20 = vshll.u32 %v5319_v13, 16  ;;  %v5321_v62 = vmul.u32 %v5317_v55, %v5293_v1  ;;  %v5302_v57 = vshll.u32 %v5298_v8, 16 }
 0x554   :  { %vm5529_vm0 = vcmp.lt.s32.totalorder %v5528_v52, 0  ;;  %v5324_v9 = vshll.u32 %v5320_v44, 16  ;;  %v5280_v41 = vsel %vm5278_vm12, %v9364_v4, 2102212464  ;;  %v5301_v2 = vshrl.u32 %v5297_v18, 16 }
 0x555   :  { %v5197_v35 = vsel %vm5529_vm0, 0, %v5528_v52  ;;  %vm5304_vm8 = vc.u32 %v5296_v63, %v5300_v31  ;;  %v5306_v48 = vadd.s32 %v5300_v31, %v5296_v63  ;;  %vm5326_vm10 = vc.u32 %v5318_v10, %v5322_v20 }
 0x556   :  { %v5198_v58 = vsub.s32 32, %v5197_v35  ;;  %v5202_v23 = vsub.s32 4294967266, %v5197_v35  ;;  %v5199_v32 = vshll.u32 %v5190_v24, %v5197_v35  ;;  %v5305_v30 = vsel %vm5304_vm8, 1, %v9494_v49 }
 0x557   :  { %v5307_v50 = vadd.s32 %v5305_v30, %v5299_v47  ;;  %vm5308_vm13 = vc.u32 %v5306_v48, %v5302_v57  ;;  %v5327_v60 = vsel %vm5326_vm10, 1, %v9494_v49  ;;  %v5328_v29 = vadd.s32 %v5322_v20, %v5318_v10 }
 0x558   :  { %v5200_v28 = vshrl.u32 %v5182_v59, %v5198_v58  ;;  %v5203_v46 = vadd.s32 127, %v5202_v23  ;;  %v5309_v7 = vsel %vm5308_vm13, 1, %v9494_v49  ;;  %v5329_v22 = vadd.s32 %v5327_v60, %v5321_v62 }
 0x559   :  { %v5311_v51 = vadd.s32 %v5309_v7, %v5307_v50  ;;  %vm5330_vm15 = vc.u32 %v5328_v29, %v5324_v9  ;;  %v5259_v24 = vshrl.u32 %v9488_v26, %v9331_v11  ;;  %v5303_v42 = vshrl.u32 %v5298_v8, 16 }
 0x55a   :  { %v5201_v0 = vor.u32 %v5200_v28, %v5199_v32  ;;  %v5204_v27 = vshll.u32 %v5203_v46, 23  ;;  %v5331_v39 = vsel %vm5330_vm15, 1, %v9494_v49  ;;  %v5323_v33 = vshrl.u32 %v5319_v13, 16 }
 0x55b   :  { %v5312_v6 = vadd.s32 %v5311_v51, %v5301_v2  ;;  %v5333_v38 = vadd.s32 %v5331_v39, %v5329_v22  ;;  %v5279_v15 = vsel %vm5275_vm14, %v5259_v24, %v9360_v40  ;;  %v5281_v4 = vsel %vm5277_vm1, %v9362_v54, %v5280_v41 }
 0x55c   :  { %v5205_v45 = vor.u32 4788187, %v5204_v27  ;;  %v5208_v19 = vcvt.s32.f32 %v5201_v0  ;;  %v5325_v17 = vshrl.u32 %v5320_v44, 16  ;;  %v5332_v11 = vadd.s32 %v5328_v29, %v5324_v9 }
 0x55d   :  { %v5313_v56 = vadd.s32 %v5312_v6, %v5303_v42  ;;  %v5334_v21 = vadd.s32 %v5333_v38, %v5323_v33  ;;  %v5282_v49 = vsel %vm5276_vm9, %v5279_v15, %v5281_v4  ;;  %vm5090_vm12 = vcmp.lt.s32.totalorder %v9200_v25, 0 }
 0x55e   :  { %v5206_v12 = vand.u32 2147483647, %v5205_v45  ;;  %vm9430_vm2 = vcmp.le.f32.partialorder %v5088_v43, 0.7853982  ;;  %v5336_v16 = vmul.u32 %v9389_v14, %v5282_v49  ;;  %v5212_v55 = vsub.s32 4, %v9366_v5 }
 0x55f   :  { %v5335_v34 = vadd.s32 %v5334_v21, %v5325_v17  ;;  %vm5338_vm11 = vc.u32 %v5313_v56, %v5332_v11  ;;  %vm5231_vm1 = vweird.f32 %v9200_v25  ;;  %v5337_v2 = vadd.s32 %v5332_v11, %v5313_v56 }
 0x560   :  { %v5209_v26 = vmul.f32 %v5208_v19, %v5206_v12  ;;  %v5213_v43 = vsel %vm5090_vm12, %v5212_v55, %v9366_v5  ;;  %vm5245_vm5 = vcmp.lt.s32.totalorder %v9218_v61, 0  ;;  %vm5244_vm0 = vcmp.le.f32.partialorder %v5243_v3, 0.7853982 }
 0x561   :  { %v5339_v37 = vadd.s32 1, %v5335_v34  ;;  %v5215_v14 = vsel %vm9430_vm2, 0, %v5213_v43  ;;  %vm5386_vm15 = vweird.f32 %v9218_v61 }
 0x562   :  { %v5210_v53 = vxor.u32 2147483648, %v5209_v26  ;;  %v5232_v62 = vadd.s32 3, %v5215_v14 }
 0x563   :  { %v5340_v1 = vsel %vm5338_vm11, %v5339_v37, %v5335_v34 }
 0x564   :  { %v5211_v54 = vsel %vm5090_vm12, %v5210_v53, %v5209_v26  ;;  %v5341_v18 = vadd.s32 %v5340_v1, %v5336_v16  ;;  %v5233_v46 = vand.u32 3, %v5232_v62 }
 0x565   :  { %v5214_v36 = vsel %vm9430_vm2, %v9200_v25, %v5211_v54 }
 0x566   :  { %v5216_v52 = vmul.f32 %v5214_v36, %v5214_v36  ;;  %v5342_v13 = vadd.s32 536870912, %v5341_v18  ;;  %vm5235_vm3 = vcmp.eq.s32.totalorder %v5233_v46, 0  ;;  %vm5238_vm4 = vcmp.eq.s32.totalorder %v5233_v46, 2 }
 0x567   :  { %vm5234_vm7 = vcmp.lt.s32.totalorder %v5233_v46, 2 }
 0x568   :  { %v5217_v59 = vmul.f32 -0.001358992, %v5216_v52  ;;  %v5224_v8 = vmul.f32 -0.00019511016, %v5216_v52  ;;  %v5343_v10 = vshrl.u32 %v5342_v13, 30 }
 0x56a   :  { %v5218_v63 = vadd.f32 0.041655596, %v5217_v59  ;;  %v5225_v31 = vadd.f32 0.008332121, %v5224_v8  ;;  %v5344_v44 = vshll.u32 %v5343_v10, 30  ;;  %v5367_v17 = vsub.s32 4, %v5343_v10 }
 0x56c   :  { %v5219_v35 = vmul.f32 %v5218_v63, %v5216_v52  ;;  %v5226_v47 = vmul.f32 %v5225_v31, %v5216_v52  ;;  %v5345_v23 = vsub.s32 %v5341_v18, %v5344_v44  ;;  %v5368_v34 = vsel %vm5245_vm5, %v5367_v17, %v5343_v10 }
 0x56d   :  { %v5370_v40 = vsel %vm5244_vm0, 0, %v5368_v34 }
 0x56e   :  { %v5220_v20 = vadd.f32 -0.4999988, %v5219_v35  ;;  %v5227_v58 = vadd.f32 -0.16666654, %v5226_v47  ;;  %vm5346_vm14 = vcmp.lt.s32.totalorder %v5345_v23, 0  ;;  %v5347_v30 = vsub.s32 0, %v5345_v23 }
 0x56f   :  { %v5387_v1 = vadd.s32 3, %v5370_v40 }
 0x570   :  { %v5221_v32 = vmul.f32 %v5220_v20, %v5216_v52  ;;  %v5228_v57 = vmul.f32 %v5227_v58, %v5216_v52  ;;  %v5348_v5 = vsel %vm5346_vm14, %v5347_v30, %v5345_v23 }
 0x571   :  { %v5349_v50 = vclz %v5348_v5  ;;  %v5388_v8 = vand.u32 3, %v5387_v1 }
 0x572   :  { %v5222_v48 = vadd.f32 1.0, %v5221_v32  ;;  %v5229_v28 = vadd.f32 1.0, %v5228_v57 }
 0x573   :  { %v5531_v29 = vadd.s32 4294967294, %v5349_v50  ;;  %vm5390_vm8 = vcmp.eq.s32.totalorder %v5388_v8, 0  ;;  %vm5393_vm10 = vcmp.eq.s32.totalorder %v5388_v8, 2  ;;  %vm5389_vm13 = vcmp.lt.s32.totalorder %v5388_v8, 2 }
 0x574   :  { %v5230_v9 = vmul.f32 %v5229_v28, %v5214_v36  ;;  %v5239_v60 = vxor.u32 2147483648, %v5222_v48 }
 0x575   :  { %vm5532_vm9 = vcmp.lt.s32.totalorder %v5531_v29, 0 }
 0x576   :  { %v5236_v0 = vxor.u32 2147483648, %v5230_v9  ;;  %v5240_v7 = vsel %vm5238_vm4, %v5239_v60, %v5230_v9  ;;  %v5352_v22 = vsel %vm5532_vm9, 0, %v5531_v29 }
 0x577   :  { %v5353_v51 = vsub.s32 32, %v5352_v22  ;;  %v5357_v45 = vsub.s32 4294967266, %v5352_v22  ;;  %v5354_v39 = vshll.u32 %v5345_v23, %v5352_v22 }
 0x578   :  { %v5237_v27 = vsel %vm5235_vm3, %v5222_v48, %v5236_v0 }
 0x579   :  { %v5241_v41 = vsel %vm5234_vm7, %v5237_v27, %v5240_v7  ;;  %v5355_v42 = vshrl.u32 %v5337_v2, %v5353_v51  ;;  %v5358_v25 = vadd.s32 127, %v5357_v45 }
 0x57a   :  { %v5242_v24 = vsel %vm5231_vm1, nan, %v5241_v41 }
 0x57b   :  { %5429 = vst.msk [vmem:[%s9457_s1 + $0xf0] sm:$0xff] %vm5398_vm6, %v5242_v24  ;;  %v5356_v6 = vor.u32 %v5355_v42, %v5354_v39  ;;  %v5359_v33 = vshll.u32 %v5358_v25, 23 }
 0x57d   :  { %v5360_v38 = vor.u32 4788187, %v5359_v33  ;;  %v5363_v19 = vcvt.s32.f32 %v5356_v6 }
 0x57f   :  { %v5361_v12 = vand.u32 2147483647, %v5360_v38 }
 0x581   :  { %v5364_v15 = vmul.f32 %v5363_v19, %v5361_v12 }
 0x583   :  { %v5365_v4 = vxor.u32 2147483648, %v5364_v15 }
 0x585   :  { %v5366_v56 = vsel %vm5245_vm5, %v5365_v4, %v5364_v15 }
 0x586   :  { %v5369_v21 = vsel %vm5244_vm0, %v9218_v61, %v5366_v56 }
 0x587   :  { %v5371_v26 = vmul.f32 %v5369_v21, %v5369_v21 }
 0x589   :  { %v5372_v11 = vmul.f32 -0.001358992, %v5371_v26  ;;  %v5379_v49 = vmul.f32 -0.00019511016, %v5371_v26 }
 0x58b   :  { %v5373_v53 = vadd.f32 0.041655596, %v5372_v11  ;;  %v5380_v37 = vadd.f32 0.008332121, %v5379_v49 }
 0x58d   :  { %v5374_v54 = vmul.f32 %v5373_v53, %v5371_v26  ;;  %v5381_v16 = vmul.f32 %v5380_v37, %v5371_v26 }
 0x58f   :  { %v5375_v55 = vadd.f32 -0.4999988, %v5374_v54  ;;  %v5382_v36 = vadd.f32 -0.16666654, %v5381_v16 }
 0x591   :  { %v5376_v52 = vmul.f32 %v5375_v55, %v5371_v26  ;;  %v5383_v18 = vmul.f32 %v5382_v36, %v5371_v26 }
 0x593   :  { %v5377_v59 = vadd.f32 1.0, %v5376_v52  ;;  %v5384_v3 = vadd.f32 1.0, %v5383_v18 }
 0x595   :  { %v5385_v13 = vmul.f32 %v5384_v3, %v5369_v21  ;;  %v5394_v43 = vxor.u32 2147483648, %v5377_v59 }
 0x597   :  { %v5391_v63 = vxor.u32 2147483648, %v5385_v13  ;;  %v5395_v10 = vsel %vm5393_vm10, %v5394_v43, %v5385_v13 }
 0x599   :  { %v5392_v31 = vsel %vm5390_vm8, %v5377_v59, %v5391_v63 }
 0x59a   :  { %v5396_v14 = vsel %vm5389_vm13, %v5392_v31, %v5395_v10 }
 0x59b   :  { %v5397_v35 = vsel %vm5386_vm15, nan, %v5396_v14 }
 0x59c   :  { %5430 = vst.msk [vmem:[%s9457_s1 + $0xf8] sm:$0xff] %vm5398_vm6, %v5397_v35 }

</bundles_post_ra>
